<compile_context>
chip_gen: v7x
topology: tpu7x:2x2x1
jax: 0.10.0
libtpu: 0.0.40
codegen_flags: <defaults>
</compile_context>

<pallas_src>
import functools

import jax
import jax.numpy as jnp
from jax.experimental import pallas as pl
from jax.experimental.pallas import tpu as pltpu


# ------------------------------- fused kernel ------------------------------ #

def _kp_fused_kernel(fc_ref, ffph_ref,
                     wc0_ref, bc0_ref, wc1_ref, bc1_ref,
                     wf0_ref, bf0_ref, wf1_ref, bf1_ref,
                     wh0_ref, bh0_ref, wh1_ref, bh1_ref,
                     kps_ref, score_ref,
                     *, hc, wc, cross_ratio):
    """Whole KeypointDetector forward for one batch element, fully in VMEM.

    fc_ref  : (1, hc+2, wc+2, Cc)          bf16  zero-padded coarse features
    ffph_ref: (1, 16*(hc+1), wc+1, Cf)     bf16  fine features, phase-decomposed
                                                 by 4 (16 planes stacked along H)
    w*_ref  : (K*K, Cin, Cout)             bf16  BN scale folded in
    b*_ref  : (1, Cout)                    f32
    kps_ref : (1, hc, wc, 2)               f32
    score_ref:(1, hc, wc, 1)               f32
    """
    m = hc * wc
    bf16 = jnp.bfloat16

    def conv_acc(get_tap, w_ref):
        ksz = {9: 3, 25: 5}[w_ref.shape[0]]
        acc = None
        for kh in range(ksz):
            for kw in range(ksz):
                part = jnp.dot(get_tap(kh, kw), w_ref[kh * ksz + kw],
                               preferred_element_type=jnp.float32)
                acc = part if acc is None else acc + part
        return acc

    def bias_relu(acc, b_ref):
        return jnp.maximum(acc + b_ref[...], 0.0)

    def pad1(v):
        # (hc, wc, C) -> (hc+2, wc+2, C) with a zero border, built from value
        # concatenates (no unaligned VMEM stores, no HBM traffic).
        c = v.shape[-1]
        zr = jnp.zeros((1, wc, c), v.dtype)
        v = jnp.concatenate([zr, v, zr], axis=0)
        zc = jnp.zeros((hc + 2, 1, c), v.dtype)
        return jnp.concatenate([zc, v, zc], axis=1)

    # ---------------- coarse branch: conv_c0 -> conv_c1 (3x3, s1) -----------
    cc = wc0_ref.shape[1]
    c0 = bias_relu(conv_acc(
        lambda kh, kw: fc_ref[0, kh:kh + hc, kw:kw + wc, :].reshape(m, cc),
        wc0_ref), bc0_ref)
    c0p = pad1(c0.reshape(hc, wc, -1).astype(bf16))
    c1cin = wc1_ref.shape[1]
    c1 = bias_relu(conv_acc(
        lambda kh, kw: c0p[kh:kh + hc, kw:kw + wc, :].reshape(m, c1cin),
        wc1_ref), bc1_ref)

    # -------------- fine branch: conv_f0 (5x5 s2) -> conv_f1 (3x3 s2) --------
    # feat_f is phase-decomposed by 4, so each stride-2 tap is an unstrided
    # static slice.  The four output phases of f0 are concatenated along M so
    # every one of the 25 taps feeds a single MXU matmul with M = 4*hc*wc.
    cf = wf0_ref.shape[1]
    hq = hc + 1                                   # per-phase plane height

    def f0_tap(kh, kw):
        taps = []
        for a in (0, 1):
            for b in (0, 1):
                tr, tc = 2 * a + kh, 2 * b + kw
                pln = (tr % 4) * 4 + (tc % 4)
                r0 = pln * hq + tr // 4
                taps.append(
                    ffph_ref[0, r0:r0 + hc, tc // 4:tc // 4 + wc, :]
                    .reshape(m, cf))
        return jnp.concatenate(taps, axis=0)      # (4*m, cf)

    f0 = bias_relu(conv_acc(f0_tap, wf0_ref), bf0_ref).astype(bf16)

    # Re-assemble f0 as four zero-padded phase planes so conv_f1 (pad=1, s=2)
    # also only needs unstrided static slices:
    #   plane q = (qr, qc) holds  f0_pad[2r + qr, 2c + qc]  (pad = 1).
    f1cin = wf1_ref.shape[1]
    zr = jnp.zeros((1, wc, f1cin), bf16)
    zc = jnp.zeros((hc + 1, 1, f1cin), bf16)
    planes = [None] * 4
    for idx, (a, b) in enumerate([(0, 0), (0, 1), (1, 0), (1, 1)]):
        blk = f0[idx * m:(idx + 1) * m].reshape(hc, wc, f1cin)
        blk = (jnp.concatenate([zr, blk], axis=0) if a == 1
               else jnp.concatenate([blk, zr], axis=0))
        blk = (jnp.concatenate([zc, blk], axis=1) if b == 1
               else jnp.concatenate([blk, zc], axis=1))
        planes[(1 - a) * 2 + (1 - b)] = blk

    f1 = bias_relu(conv_acc(
        lambda kh, kw: planes[(kh % 2) * 2 + (kw % 2)]
        [kh // 2:kh // 2 + hc, kw // 2:kw // 2 + wc, :].reshape(m, f1cin),
        wf1_ref), bf1_ref)

    # --------------- heads: x = cat([c1, f1]); (k0||s0) -> (k1||s1) ----------
    x = jnp.concatenate([c1, f1], axis=-1).astype(bf16)
    xp = pad1(x.reshape(hc, wc, -1))
    h_cin = wh0_ref.shape[1]
    h0 = bias_relu(conv_acc(
        lambda kh, kw: xp[kh:kh + hc, kw:kw + wc, :].reshape(m, h_cin),
        wh0_ref), bh0_ref)

    hp = pad1(h0.reshape(hc, wc, -1).astype(bf16))
    h1cin = wh1_ref.shape[1]
    y = conv_acc(
        lambda kh, kw: hp[kh:kh + hc, kw:kw + wc, :].reshape(m, h1cin),
        wh1_ref) + bh1_ref[...]                          # (m, 3) f32

    kps = jnp.tanh(y[:, 0:2]) * cross_ratio
    score = jax.nn.sigmoid(y[:, 2:3])
    kps_ref[...] = kps.reshape(1, hc, wc, 2).astype(kps_ref.dtype)
    score_ref[...] = score.reshape(1, hc, wc, 1).astype(score_ref.dtype)


# ------------------------------ wrapper glue -------------------------------- #

def _prep_conv_bn(p, ksize):
    """Torch (Cout,Cin,KH,KW) weights -> (K*K, Cin, Cout) bf16 with BN folded."""
    w = p["w"].astype(jnp.float32)
    cout, cin = w.shape[0], w.shape[1]
    w = jnp.transpose(w, (2, 3, 1, 0)) * p["scale"][None, None, None, :]
    w = w.reshape(ksize * ksize, cin, cout).astype(jnp.bfloat16)
    b = p["bias"].astype(jnp.float32).reshape(1, cout)
    return w, b


def _full_spec(a):
    nd = a.ndim
    return pl.BlockSpec(a.shape, lambda i, _nd=nd: (0,) * _nd)


def keypoint_detector_forward(params, feat_c_nchw, feat_f_nchw, cross_ratio):
    """Whole KeypointDetector forward as a single fused pallas_call."""
    fc = jnp.transpose(feat_c_nchw, (0, 2, 3, 1)).astype(jnp.bfloat16)   # NHWC
    ff = jnp.transpose(feat_f_nchw, (0, 2, 3, 1)).astype(jnp.bfloat16)
    n, hc, wc, cc = fc.shape
    _, hf, wf, cfch = ff.shape
    assert hf == 4 * hc and wf == 4 * wc, "fine map must be 4x the coarse map"

    # Pad once; phase-decompose the fine map by 4 (planes stacked along H) so
    # both stride-2 convs reduce to unstrided, lane-aligned slices in-kernel.
    fc_pad = jnp.pad(fc, ((0, 0), (1, 1), (1, 1), (0, 0)))
    ffp = jnp.pad(ff, ((0, 0), (2, 2), (2, 2), (0, 0)))
    ff_ph = jnp.concatenate([ffp[:, r::4, c::4, :]
                             for r in range(4) for c in range(4)], axis=1)

    wc0, bc0 = _prep_conv_bn(params["conv_c0"], 3)
    wc1, bc1 = _prep_conv_bn(params["conv_c1"], 3)
    wf0, bf0 = _prep_conv_bn(params["conv_f0"], 5)
    wf1, bf1 = _prep_conv_bn(params["conv_f1"], 3)
    wk0, bk0 = _prep_conv_bn(params["k0"], 3)
    ws0, bs0 = _prep_conv_bn(params["s0"], 3)
    wk1, bk1 = _prep_conv_bn(params["k1"], 3)
    ws1, bs1 = _prep_conv_bn(params["s1"], 3)

    # Fuse k0||s0 (Cout concat) and k1||s1 (block-diagonal) into single convs.
    wh0 = jnp.concatenate([wk0, ws0], axis=-1)
    bh0 = jnp.concatenate([bk0, bs0], axis=-1)
    k1c, s1c = wk1.shape[1], ws1.shape[1]
    wh1 = jnp.zeros((9, k1c + s1c, 3), jnp.bfloat16)
    wh1 = wh1.at[:, :k1c, 0:2].set(wk1).at[:, k1c:, 2:3].set(ws1)
    bh1 = jnp.concatenate([bk1, bs1], axis=-1)

    c1ch, c2ch = wc0.shape[2], wc1.shape[2]
    f1ch, f2ch = wf0.shape[2], wf1.shape[2]
    h1ch = wh0.shape[2]
    m = hc * wc
    flops = 2 * n * m * (9 * cc * c1ch + 9 * c1ch * c2ch
                         + 4 * 25 * cfch * f1ch + 9 * f1ch * f2ch
                         + 9 * (c2ch + f2ch) * h1ch + 9 * h1ch * 3)
    transc = n * m * 3
    bytes_acc = (int(fc_pad.size) * 2 + int(ff_ph.size) * 2
                 + sum(int(a.size) * 2 for a in (wc0, wc1, wf0, wf1, wh0, wh1))
                 + sum(int(a.size) * 4 for a in (bc0, bc1, bf0, bf1, bh0, bh1))
                 + n * m * 3 * 4)

    kps, score = pl.pallas_call(
        functools.partial(_kp_fused_kernel, hc=hc, wc=wc,
                          cross_ratio=float(cross_ratio)),
        out_shape=(jax.ShapeDtypeStruct((n, hc, wc, 2), jnp.float32),
                   jax.ShapeDtypeStruct((n, hc, wc, 1), jnp.float32)),
        grid_spec=pltpu.PrefetchScalarGridSpec(
            num_scalar_prefetch=0,
            grid=(n,),                                    # batch, parallel
            in_specs=[
                pl.BlockSpec((1, hc + 2, wc + 2, cc), lambda i: (i, 0, 0, 0)),
                pl.BlockSpec((1, 16 * (hc + 1), wc + 1, cfch),
                             lambda i: (i, 0, 0, 0)),
                _full_spec(wc0), _full_spec(bc0), _full_spec(wc1), _full_spec(bc1),
                _full_spec(wf0), _full_spec(bf0), _full_spec(wf1), _full_spec(bf1),
                _full_spec(wh0), _full_spec(bh0), _full_spec(wh1), _full_spec(bh1),
            ],
            out_specs=[
                pl.BlockSpec((1, hc, wc, 2), lambda i: (i, 0, 0, 0)),
                pl.BlockSpec((1, hc, wc, 1), lambda i: (i, 0, 0, 0)),
            ]),
        compiler_params=pltpu.CompilerParams(
            dimension_semantics=("parallel",),
            vmem_limit_bytes=48 * 1024 * 1024),
        cost_estimate=pl.CostEstimate(flops=int(flops),
                                      transcendentals=int(transc),
                                      bytes_accessed=int(bytes_acc)),
    )(fc_pad, ff_ph, wc0, bc0, wc1, bc1, wf0, bf0, wf1, bf1, wh0, bh0, wh1, bh1)

    # NHWC -> NCHW to match the PyTorch output convention (tiny outputs).
    return (jnp.transpose(kps, (0, 3, 1, 2)),
            jnp.transpose(score, (0, 3, 1, 2)))


# --------------------------- parameter creation ----------------------------- #

def make_conv_bn_params(key, cin, cout, kernel, bn=True):
    kw_, kg, kb, km, kv = jax.random.split(key, 5)
    w = 0.05 * jax.random.normal(kw_, (cout, cin, kernel, kernel), jnp.float32)
    if bn:
        gamma = 1.0 + 0.1 * jax.random.normal(kg, (cout,), jnp.float32)
        beta = 0.1 * jax.random.normal(kb, (cout,), jnp.float32)
        mean = 0.1 * jax.random.normal(km, (cout,), jnp.float32)
        var = jnp.abs(jax.random.normal(kv, (cout,), jnp.float32)) + 1.0
        scale = gamma / jnp.sqrt(var + 1e-5)
        bias = beta - mean * scale
    else:
        scale = jnp.ones((cout,), jnp.float32)
        bias = jnp.zeros((cout,), jnp.float32)
    return {"w": w, "scale": scale, "bias": bias}


DEFAULT_CONFIG = {
    "c_model": 256, "f_model": 128, "score_dims": [256, 1],
    "keypoint_dims": [256, 2], "coarse_dims": [256, 256],
    "fine_dims": [256, 256], "resolution": 8, "cross_ratio": 1.2,
}


def init_keypoint_detector(config, key):
    cfg = {**DEFAULT_CONFIG, **config}
    c_ch = [cfg["c_model"]] + cfg["coarse_dims"]
    f_ch = [cfg["f_model"]] + cfg["fine_dims"]
    k_ch = [f_ch[-1] + c_ch[-1]] + cfg["keypoint_dims"]
    s_ch = [f_ch[-1] + c_ch[-1]] + cfg["score_dims"]
    keys = jax.random.split(key, 8)
    params = {
        "conv_c0": make_conv_bn_params(keys[0], c_ch[0], c_ch[1], 3, bn=True),
        "conv_c1": make_conv_bn_params(keys[1], c_ch[1], c_ch[2], 3, bn=True),
        "conv_f0": make_conv_bn_params(keys[2], f_ch[0], f_ch[1], 5, bn=True),
        "conv_f1": make_conv_bn_params(keys[3], f_ch[1], f_ch[2], 3, bn=True),
        "k0": make_conv_bn_params(keys[4], k_ch[0], k_ch[1], 3, bn=True),
        "k1": make_conv_bn_params(keys[5], k_ch[1], k_ch[2], 3, bn=False),
        "s0": make_conv_bn_params(keys[6], s_ch[0], s_ch[1], 3, bn=True),
        "s1": make_conv_bn_params(keys[7], s_ch[1], s_ch[2], 3, bn=False),
    }
    return params, cfg


# --------------------------- pure-JAX f32 reference ------------------------- #

def _ref_conv_bn(x, p, ksize, stride, act):
    pad = (ksize - 1) // 2
    w = jnp.transpose(p["w"].astype(jnp.float32), (2, 3, 1, 0))      # HWIO
    y = jax.lax.conv_general_dilated(
        x, w, window_strides=(stride, stride),
        padding=[(pad, pad), (pad, pad)],
        dimension_numbers=("NHWC", "HWIO", "NHWC"),
        precision=jax.lax.Precision.HIGHEST,
        preferred_element_type=jnp.float32)
    y = y * p["scale"] + p["bias"]
    if act == "relu":
        return jnp.maximum(y, 0.0)
    if act == "tanh":
        return jnp.tanh(y)
    if act == "sigmoid":
        return jax.nn.sigmoid(y)
    return y


def keypoint_detector_reference(params, feat_c_nchw, feat_f_nchw, cross_ratio):
    fc = jnp.transpose(feat_c_nchw, (0, 2, 3, 1)).astype(jnp.float32)
    ff = jnp.transpose(feat_f_nchw, (0, 2, 3, 1)).astype(jnp.float32)
    c0 = _ref_conv_bn(fc, params["conv_c0"], 3, 1, "relu")
    c1 = _ref_conv_bn(c0, params["conv_c1"], 3, 1, "relu")
    f0 = _ref_conv_bn(ff, params["conv_f0"], 5, 2, "relu")
    f1 = _ref_conv_bn(f0, params["conv_f1"], 3, 2, "relu")
    x = jnp.concatenate([c1, f1], axis=-1)
    k0 = _ref_conv_bn(x, params["k0"], 3, 1, "relu")
    kps = _ref_conv_bn(k0, params["k1"], 3, 1, "tanh") * cross_ratio
    s0 = _ref_conv_bn(x, params["s0"], 3, 1, "relu")
    score = _ref_conv_bn(s0, params["s1"], 3, 1, "sigmoid")
    return (jnp.transpose(kps, (0, 3, 1, 2)),
            jnp.transpose(score, (0, 3, 1, 2)))


# ----------------------------------- main ------------------------------------ #

if __name__ == "__main__":
    # Small, shape-consistent config: coarse map 8x8, fine map 32x32
    # (two stride-2 convs bring it down to 8x8 for the concat).
    small_config = {
        "c_model": 32, "f_model": 16,
        "coarse_dims": [32, 32], "fine_dims": [32, 32],
        "keypoint_dims": [32, 2], "score_dims": [32, 1],
    }
    key = jax.random.PRNGKey(0)
    kparam, kc, kf = jax.random.split(key, 3)
    params, cfg = init_keypoint_detector(small_config, kparam)

    feat_c = jax.random.normal(kc, (2, 32, 8, 8), jnp.float32)     # NCHW
    feat_f = jax.random.normal(kf, (2, 16, 32, 32), jnp.float32)   # NCHW

    fwd = jax.jit(functools.partial(keypoint_detector_forward,
                                    cross_ratio=cfg["cross_ratio"]))
    kps, score = fwd(params, feat_c, feat_f)
    jax.block_until_ready((kps, score))

    assert kps.shape == (2, 2, 8, 8), kps.shape
    assert score.shape == (2, 1, 8, 8), score.shape
    assert bool(jnp.all(jnp.isfinite(kps))) and bool(jnp.all(jnp.isfinite(score)))
    assert bool(jnp.all((score >= 0.0) & (score <= 1.0)))

    # Validate the fused kernel (phase-decomposed stride-2 indexing, head
    # fusion, folded BN) against an f32 XLA reference of the PyTorch graph.
    ref_kps, ref_score = keypoint_detector_reference(
        params, feat_c, feat_f, cfg["cross_ratio"])
    err_k = float(jnp.max(jnp.abs(kps - ref_kps)))
    err_s = float(jnp.max(jnp.abs(score - ref_score)))
    assert err_k < 5e-2 and err_s < 5e-2, (err_k, err_s)

    print("KERNEL_OK")
</pallas_src>

<mosaic_0001>
module attributes {stable_mosaic.version = 11 : i64} {
  func.func @_kp_fused_kernel(%arg0: i32, %arg1: memref<1x10x10x32xbf16, #tpu.memory_space<vmem>>, %arg2: memref<1x144x9x16xbf16, #tpu.memory_space<vmem>>, %arg3: memref<9x32x32xbf16, #tpu.memory_space<vmem>>, %arg4: memref<1x32xf32, #tpu.memory_space<vmem>>, %arg5: memref<9x32x32xbf16, #tpu.memory_space<vmem>>, %arg6: memref<1x32xf32, #tpu.memory_space<vmem>>, %arg7: memref<25x16x32xbf16, #tpu.memory_space<vmem>>, %arg8: memref<1x32xf32, #tpu.memory_space<vmem>>, %arg9: memref<9x32x32xbf16, #tpu.memory_space<vmem>>, %arg10: memref<1x32xf32, #tpu.memory_space<vmem>>, %arg11: memref<9x64x64xbf16, #tpu.memory_space<vmem>>, %arg12: memref<1x64xf32, #tpu.memory_space<vmem>>, %arg13: memref<9x64x3xbf16, #tpu.memory_space<vmem>>, %arg14: memref<1x3xf32, #tpu.memory_space<vmem>>, %arg15: memref<1x8x8x2xf32, #tpu.memory_space<vmem>>, %arg16: memref<1x8x8x1xf32, #tpu.memory_space<vmem>>) attributes {dimension_semantics = [#tpu.dimension_semantics<parallel>], iteration_bounds = array<i64: 2>, scalar_prefetch = 0 : i64, scratch_operands = 0 : i64, tpu.core_type = #tpu.core_type<tc>, window_params = [{transform_indices = @transform_0, window_bounds = array<i64: 1, 10, 10, 32>}, {transform_indices = @transform_1, window_bounds = array<i64: 1, 144, 9, 16>}, {pipeline_mode = #tpu.pipeline_mode<synchronous>, transform_indices = @transform_2, window_bounds = array<i64: 9, 32, 32>}, {pipeline_mode = #tpu.pipeline_mode<synchronous>, transform_indices = @transform_3, window_bounds = array<i64: 1, 32>}, {pipeline_mode = #tpu.pipeline_mode<synchronous>, transform_indices = @transform_4, window_bounds = array<i64: 9, 32, 32>}, {pipeline_mode = #tpu.pipeline_mode<synchronous>, transform_indices = @transform_5, window_bounds = array<i64: 1, 32>}, {pipeline_mode = #tpu.pipeline_mode<synchronous>, transform_indices = @transform_6, window_bounds = array<i64: 25, 16, 32>}, {pipeline_mode = #tpu.pipeline_mode<synchronous>, transform_indices = @transform_7, window_bounds = array<i64: 1, 32>}, {pipeline_mode = #tpu.pipeline_mode<synchronous>, transform_indices = @transform_8, window_bounds = array<i64: 9, 32, 32>}, {pipeline_mode = #tpu.pipeline_mode<synchronous>, transform_indices = @transform_9, window_bounds = array<i64: 1, 32>}, {pipeline_mode = #tpu.pipeline_mode<synchronous>, transform_indices = @transform_10, window_bounds = array<i64: 9, 64, 64>}, {pipeline_mode = #tpu.pipeline_mode<synchronous>, transform_indices = @transform_11, window_bounds = array<i64: 1, 64>}, {pipeline_mode = #tpu.pipeline_mode<synchronous>, transform_indices = @transform_12, window_bounds = array<i64: 9, 64, 3>}, {pipeline_mode = #tpu.pipeline_mode<synchronous>, transform_indices = @transform_13, window_bounds = array<i64: 1, 3>}, {transform_indices = @transform_14, window_bounds = array<i64: 1, 8, 8, 2>}, {transform_indices = @transform_15, window_bounds = array<i64: 1, 8, 8, 1>}]} {
    %c0 = arith.constant 0 : index
    %c0_0 = arith.constant 0 : index
    %c0_1 = arith.constant 0 : index
    %c0_2 = arith.constant 0 : index
    %0 = vector.load %arg1[%c0, %c0_0, %c0_1, %c0_2] : memref<1x10x10x32xbf16, #tpu.memory_space<vmem>>, vector<1x8x8x32xbf16>
    %1 = vector.shape_cast %0 : vector<1x8x8x32xbf16> to vector<8x8x32xbf16>
    %2 = vector.shape_cast %1 : vector<8x8x32xbf16> to vector<64x32xbf16>
    %c0_3 = arith.constant 0 : index
    %c0_4 = arith.constant 0 : index
    %c0_5 = arith.constant 0 : index
    %3 = vector.load %arg3[%c0_3, %c0_4, %c0_5] : memref<9x32x32xbf16, #tpu.memory_space<vmem>>, vector<1x32x32xbf16>
    %4 = vector.shape_cast %3 : vector<1x32x32xbf16> to vector<32x32xbf16>
    %cst = arith.constant dense<0.000000e+00> : vector<64x32xf32>
    %5 = tpu.matmul %2, %4, %cst {dimension_numbers = #tpu.dot_dimension_numbers<[1], [0], [0], [1], [0, 0, 1, 1], [], []>} : vector<64x32xbf16>, vector<32x32xbf16>, vector<64x32xf32> -> vector<64x32xf32>
    %c0_6 = arith.constant 0 : index
    %c0_7 = arith.constant 0 : index
    %c1 = arith.constant 1 : index
    %c0_8 = arith.constant 0 : index
    %6 = vector.load %arg1[%c0_6, %c0_7, %c1, %c0_8] : memref<1x10x10x32xbf16, #tpu.memory_space<vmem>>, vector<1x8x8x32xbf16>
    %7 = vector.shape_cast %6 : vector<1x8x8x32xbf16> to vector<8x8x32xbf16>
    %8 = vector.shape_cast %7 : vector<8x8x32xbf16> to vector<64x32xbf16>
    %c1_9 = arith.constant 1 : index
    %c0_10 = arith.constant 0 : index
    %c0_11 = arith.constant 0 : index
    %9 = vector.load %arg3[%c1_9, %c0_10, %c0_11] : memref<9x32x32xbf16, #tpu.memory_space<vmem>>, vector<1x32x32xbf16>
    %10 = vector.shape_cast %9 : vector<1x32x32xbf16> to vector<32x32xbf16>
    %cst_12 = arith.constant dense<0.000000e+00> : vector<64x32xf32>
    %11 = tpu.matmul %8, %10, %cst_12 {dimension_numbers = #tpu.dot_dimension_numbers<[1], [0], [0], [1], [0, 0, 1, 1], [], []>} : vector<64x32xbf16>, vector<32x32xbf16>, vector<64x32xf32> -> vector<64x32xf32>
    %12 = arith.addf %5, %11 : vector<64x32xf32>
    %c0_13 = arith.constant 0 : index
    %c0_14 = arith.constant 0 : index
    %c2 = arith.constant 2 : index
    %c0_15 = arith.constant 0 : index
    %13 = vector.load %arg1[%c0_13, %c0_14, %c2, %c0_15] : memref<1x10x10x32xbf16, #tpu.memory_space<vmem>>, vector<1x8x8x32xbf16>
    %14 = vector.shape_cast %13 : vector<1x8x8x32xbf16> to vector<8x8x32xbf16>
    %15 = vector.shape_cast %14 : vector<8x8x32xbf16> to vector<64x32xbf16>
    %c2_16 = arith.constant 2 : index
    %c0_17 = arith.constant 0 : index
    %c0_18 = arith.constant 0 : index
    %16 = vector.load %arg3[%c2_16, %c0_17, %c0_18] : memref<9x32x32xbf16, #tpu.memory_space<vmem>>, vector<1x32x32xbf16>
    %17 = vector.shape_cast %16 : vector<1x32x32xbf16> to vector<32x32xbf16>
    %cst_19 = arith.constant dense<0.000000e+00> : vector<64x32xf32>
    %18 = tpu.matmul %15, %17, %cst_19 {dimension_numbers = #tpu.dot_dimension_numbers<[1], [0], [0], [1], [0, 0, 1, 1], [], []>} : vector<64x32xbf16>, vector<32x32xbf16>, vector<64x32xf32> -> vector<64x32xf32>
    %19 = arith.addf %12, %18 : vector<64x32xf32>
    %c0_20 = arith.constant 0 : index
    %c1_21 = arith.constant 1 : index
    %c0_22 = arith.constant 0 : index
    %c0_23 = arith.constant 0 : index
    %20 = vector.load %arg1[%c0_20, %c1_21, %c0_22, %c0_23] : memref<1x10x10x32xbf16, #tpu.memory_space<vmem>>, vector<1x8x8x32xbf16>
    %21 = vector.shape_cast %20 : vector<1x8x8x32xbf16> to vector<8x8x32xbf16>
    %22 = vector.shape_cast %21 : vector<8x8x32xbf16> to vector<64x32xbf16>
    %c3 = arith.constant 3 : index
    %c0_24 = arith.constant 0 : index
    %c0_25 = arith.constant 0 : index
    %23 = vector.load %arg3[%c3, %c0_24, %c0_25] : memref<9x32x32xbf16, #tpu.memory_space<vmem>>, vector<1x32x32xbf16>
    %24 = vector.shape_cast %23 : vector<1x32x32xbf16> to vector<32x32xbf16>
    %cst_26 = arith.constant dense<0.000000e+00> : vector<64x32xf32>
    %25 = tpu.matmul %22, %24, %cst_26 {dimension_numbers = #tpu.dot_dimension_numbers<[1], [0], [0], [1], [0, 0, 1, 1], [], []>} : vector<64x32xbf16>, vector<32x32xbf16>, vector<64x32xf32> -> vector<64x32xf32>
    %26 = arith.addf %19, %25 : vector<64x32xf32>
    %c0_27 = arith.constant 0 : index
    %c1_28 = arith.constant 1 : index
    %c1_29 = arith.constant 1 : index
    %c0_30 = arith.constant 0 : index
    %27 = vector.load %arg1[%c0_27, %c1_28, %c1_29, %c0_30] : memref<1x10x10x32xbf16, #tpu.memory_space<vmem>>, vector<1x8x8x32xbf16>
    %28 = vector.shape_cast %27 : vector<1x8x8x32xbf16> to vector<8x8x32xbf16>
    %29 = vector.shape_cast %28 : vector<8x8x32xbf16> to vector<64x32xbf16>
    %c4 = arith.constant 4 : index
    %c0_31 = arith.constant 0 : index
    %c0_32 = arith.constant 0 : index
    %30 = vector.load %arg3[%c4, %c0_31, %c0_32] : memref<9x32x32xbf16, #tpu.memory_space<vmem>>, vector<1x32x32xbf16>
    %31 = vector.shape_cast %30 : vector<1x32x32xbf16> to vector<32x32xbf16>
    %cst_33 = arith.constant dense<0.000000e+00> : vector<64x32xf32>
    %32 = tpu.matmul %29, %31, %cst_33 {dimension_numbers = #tpu.dot_dimension_numbers<[1], [0], [0], [1], [0, 0, 1, 1], [], []>} : vector<64x32xbf16>, vector<32x32xbf16>, vector<64x32xf32> -> vector<64x32xf32>
    %33 = arith.addf %26, %32 : vector<64x32xf32>
    %c0_34 = arith.constant 0 : index
    %c1_35 = arith.constant 1 : index
    %c2_36 = arith.constant 2 : index
    %c0_37 = arith.constant 0 : index
    %34 = vector.load %arg1[%c0_34, %c1_35, %c2_36, %c0_37] : memref<1x10x10x32xbf16, #tpu.memory_space<vmem>>, vector<1x8x8x32xbf16>
    %35 = vector.shape_cast %34 : vector<1x8x8x32xbf16> to vector<8x8x32xbf16>
    %36 = vector.shape_cast %35 : vector<8x8x32xbf16> to vector<64x32xbf16>
    %c5 = arith.constant 5 : index
    %c0_38 = arith.constant 0 : index
    %c0_39 = arith.constant 0 : index
    %37 = vector.load %arg3[%c5, %c0_38, %c0_39] : memref<9x32x32xbf16, #tpu.memory_space<vmem>>, vector<1x32x32xbf16>
    %38 = vector.shape_cast %37 : vector<1x32x32xbf16> to vector<32x32xbf16>
    %cst_40 = arith.constant dense<0.000000e+00> : vector<64x32xf32>
    %39 = tpu.matmul %36, %38, %cst_40 {dimension_numbers = #tpu.dot_dimension_numbers<[1], [0], [0], [1], [0, 0, 1, 1], [], []>} : vector<64x32xbf16>, vector<32x32xbf16>, vector<64x32xf32> -> vector<64x32xf32>
    %40 = arith.addf %33, %39 : vector<64x32xf32>
    %c0_41 = arith.constant 0 : index
    %c2_42 = arith.constant 2 : index
    %c0_43 = arith.constant 0 : index
    %c0_44 = arith.constant 0 : index
    %41 = vector.load %arg1[%c0_41, %c2_42, %c0_43, %c0_44] : memref<1x10x10x32xbf16, #tpu.memory_space<vmem>>, vector<1x8x8x32xbf16>
    %42 = vector.shape_cast %41 : vector<1x8x8x32xbf16> to vector<8x8x32xbf16>
    %43 = vector.shape_cast %42 : vector<8x8x32xbf16> to vector<64x32xbf16>
    %c6 = arith.constant 6 : index
    %c0_45 = arith.constant 0 : index
    %c0_46 = arith.constant 0 : index
    %44 = vector.load %arg3[%c6, %c0_45, %c0_46] : memref<9x32x32xbf16, #tpu.memory_space<vmem>>, vector<1x32x32xbf16>
    %45 = vector.shape_cast %44 : vector<1x32x32xbf16> to vector<32x32xbf16>
    %cst_47 = arith.constant dense<0.000000e+00> : vector<64x32xf32>
    %46 = tpu.matmul %43, %45, %cst_47 {dimension_numbers = #tpu.dot_dimension_numbers<[1], [0], [0], [1], [0, 0, 1, 1], [], []>} : vector<64x32xbf16>, vector<32x32xbf16>, vector<64x32xf32> -> vector<64x32xf32>
    %47 = arith.addf %40, %46 : vector<64x32xf32>
    %c0_48 = arith.constant 0 : index
    %c2_49 = arith.constant 2 : index
    %c1_50 = arith.constant 1 : index
    %c0_51 = arith.constant 0 : index
    %48 = vector.load %arg1[%c0_48, %c2_49, %c1_50, %c0_51] : memref<1x10x10x32xbf16, #tpu.memory_space<vmem>>, vector<1x8x8x32xbf16>
    %49 = vector.shape_cast %48 : vector<1x8x8x32xbf16> to vector<8x8x32xbf16>
    %50 = vector.shape_cast %49 : vector<8x8x32xbf16> to vector<64x32xbf16>
    %c7 = arith.constant 7 : index
    %c0_52 = arith.constant 0 : index
    %c0_53 = arith.constant 0 : index
    %51 = vector.load %arg3[%c7, %c0_52, %c0_53] : memref<9x32x32xbf16, #tpu.memory_space<vmem>>, vector<1x32x32xbf16>
    %52 = vector.shape_cast %51 : vector<1x32x32xbf16> to vector<32x32xbf16>
    %cst_54 = arith.constant dense<0.000000e+00> : vector<64x32xf32>
    %53 = tpu.matmul %50, %52, %cst_54 {dimension_numbers = #tpu.dot_dimension_numbers<[1], [0], [0], [1], [0, 0, 1, 1], [], []>} : vector<64x32xbf16>, vector<32x32xbf16>, vector<64x32xf32> -> vector<64x32xf32>
    %54 = arith.addf %47, %53 : vector<64x32xf32>
    %c0_55 = arith.constant 0 : index
    %c2_56 = arith.constant 2 : index
    %c2_57 = arith.constant 2 : index
    %c0_58 = arith.constant 0 : index
    %55 = vector.load %arg1[%c0_55, %c2_56, %c2_57, %c0_58] : memref<1x10x10x32xbf16, #tpu.memory_space<vmem>>, vector<1x8x8x32xbf16>
    %56 = vector.shape_cast %55 : vector<1x8x8x32xbf16> to vector<8x8x32xbf16>
    %57 = vector.shape_cast %56 : vector<8x8x32xbf16> to vector<64x32xbf16>
    %c8 = arith.constant 8 : index
    %c0_59 = arith.constant 0 : index
    %c0_60 = arith.constant 0 : index
    %58 = vector.load %arg3[%c8, %c0_59, %c0_60] : memref<9x32x32xbf16, #tpu.memory_space<vmem>>, vector<1x32x32xbf16>
    %59 = vector.shape_cast %58 : vector<1x32x32xbf16> to vector<32x32xbf16>
    %cst_61 = arith.constant dense<0.000000e+00> : vector<64x32xf32>
    %60 = tpu.matmul %57, %59, %cst_61 {dimension_numbers = #tpu.dot_dimension_numbers<[1], [0], [0], [1], [0, 0, 1, 1], [], []>} : vector<64x32xbf16>, vector<32x32xbf16>, vector<64x32xf32> -> vector<64x32xf32>
    %61 = arith.addf %54, %60 : vector<64x32xf32>
    %c0_62 = arith.constant 0 : index
    %c0_63 = arith.constant 0 : index
    %62 = vector.load %arg4[%c0_62, %c0_63] : memref<1x32xf32, #tpu.memory_space<vmem>>, vector<1x32xf32>
    %63 = vector.broadcast %62 : vector<1x32xf32> to vector<64x32xf32>
    %64 = arith.addf %61, %63 : vector<64x32xf32>
    %cst_64 = arith.constant 0.000000e+00 : f32
    %65 = vector.broadcast %cst_64 : f32 to vector<64x32xf32>
    %66 = arith.maximumf %64, %65 : vector<64x32xf32>
    %67 = vector.shape_cast %66 : vector<64x32xf32> to vector<8x8x32xf32>
    %68 = arith.truncf %67 : vector<8x8x32xf32> to vector<8x8x32xbf16>
    %cst_65 = arith.constant 0.000000e+00 : bf16
    %69 = vector.broadcast %cst_65 : bf16 to vector<1x8x32xbf16>
    %70 = tpu.concatenate %69, %68, %69 in 0 : vector<1x8x32xbf16>, vector<8x8x32xbf16>, vector<1x8x32xbf16> -> vector<10x8x32xbf16>
    %cst_66 = arith.constant 0.000000e+00 : bf16
    %71 = vector.broadcast %cst_66 : bf16 to vector<10x1x32xbf16>
    %72 = tpu.concatenate %71, %70, %71 in 1 : vector<10x1x32xbf16>, vector<10x8x32xbf16>, vector<10x1x32xbf16> -> vector<10x10x32xbf16>
    %73 = vector.extract_strided_slice %72 {offsets = [0, 0, 0], sizes = [8, 8, 32], strides = [1, 1, 1]} : vector<10x10x32xbf16> to vector<8x8x32xbf16>
    %74 = vector.shape_cast %73 : vector<8x8x32xbf16> to vector<64x32xbf16>
    %c0_67 = arith.constant 0 : index
    %c0_68 = arith.constant 0 : index
    %c0_69 = arith.constant 0 : index
    %75 = vector.load %arg5[%c0_67, %c0_68, %c0_69] : memref<9x32x32xbf16, #tpu.memory_space<vmem>>, vector<1x32x32xbf16>
    %76 = vector.shape_cast %75 : vector<1x32x32xbf16> to vector<32x32xbf16>
    %cst_70 = arith.constant dense<0.000000e+00> : vector<64x32xf32>
    %77 = tpu.matmul %74, %76, %cst_70 {dimension_numbers = #tpu.dot_dimension_numbers<[1], [0], [0], [1], [0, 0, 1, 1], [], []>} : vector<64x32xbf16>, vector<32x32xbf16>, vector<64x32xf32> -> vector<64x32xf32>
    %78 = vector.extract_strided_slice %72 {offsets = [0, 1, 0], sizes = [8, 8, 32], strides = [1, 1, 1]} : vector<10x10x32xbf16> to vector<8x8x32xbf16>
    %79 = vector.shape_cast %78 : vector<8x8x32xbf16> to vector<64x32xbf16>
    %c1_71 = arith.constant 1 : index
    %c0_72 = arith.constant 0 : index
    %c0_73 = arith.constant 0 : index
    %80 = vector.load %arg5[%c1_71, %c0_72, %c0_73] : memref<9x32x32xbf16, #tpu.memory_space<vmem>>, vector<1x32x32xbf16>
    %81 = vector.shape_cast %80 : vector<1x32x32xbf16> to vector<32x32xbf16>
    %cst_74 = arith.constant dense<0.000000e+00> : vector<64x32xf32>
    %82 = tpu.matmul %79, %81, %cst_74 {dimension_numbers = #tpu.dot_dimension_numbers<[1], [0], [0], [1], [0, 0, 1, 1], [], []>} : vector<64x32xbf16>, vector<32x32xbf16>, vector<64x32xf32> -> vector<64x32xf32>
    %83 = arith.addf %77, %82 : vector<64x32xf32>
    %84 = vector.extract_strided_slice %72 {offsets = [0, 2, 0], sizes = [8, 8, 32], strides = [1, 1, 1]} : vector<10x10x32xbf16> to vector<8x8x32xbf16>
    %85 = vector.shape_cast %84 : vector<8x8x32xbf16> to vector<64x32xbf16>
    %c2_75 = arith.constant 2 : index
    %c0_76 = arith.constant 0 : index
    %c0_77 = arith.constant 0 : index
    %86 = vector.load %arg5[%c2_75, %c0_76, %c0_77] : memref<9x32x32xbf16, #tpu.memory_space<vmem>>, vector<1x32x32xbf16>
    %87 = vector.shape_cast %86 : vector<1x32x32xbf16> to vector<32x32xbf16>
    %cst_78 = arith.constant dense<0.000000e+00> : vector<64x32xf32>
    %88 = tpu.matmul %85, %87, %cst_78 {dimension_numbers = #tpu.dot_dimension_numbers<[1], [0], [0], [1], [0, 0, 1, 1], [], []>} : vector<64x32xbf16>, vector<32x32xbf16>, vector<64x32xf32> -> vector<64x32xf32>
    %89 = arith.addf %83, %88 : vector<64x32xf32>
    %90 = vector.extract_strided_slice %72 {offsets = [1, 0, 0], sizes = [8, 8, 32], strides = [1, 1, 1]} : vector<10x10x32xbf16> to vector<8x8x32xbf16>
    %91 = vector.shape_cast %90 : vector<8x8x32xbf16> to vector<64x32xbf16>
    %c3_79 = arith.constant 3 : index
    %c0_80 = arith.constant 0 : index
    %c0_81 = arith.constant 0 : index
    %92 = vector.load %arg5[%c3_79, %c0_80, %c0_81] : memref<9x32x32xbf16, #tpu.memory_space<vmem>>, vector<1x32x32xbf16>
    %93 = vector.shape_cast %92 : vector<1x32x32xbf16> to vector<32x32xbf16>
    %cst_82 = arith.constant dense<0.000000e+00> : vector<64x32xf32>
    %94 = tpu.matmul %91, %93, %cst_82 {dimension_numbers = #tpu.dot_dimension_numbers<[1], [0], [0], [1], [0, 0, 1, 1], [], []>} : vector<64x32xbf16>, vector<32x32xbf16>, vector<64x32xf32> -> vector<64x32xf32>
    %95 = arith.addf %89, %94 : vector<64x32xf32>
    %96 = vector.extract_strided_slice %72 {offsets = [1, 1, 0], sizes = [8, 8, 32], strides = [1, 1, 1]} : vector<10x10x32xbf16> to vector<8x8x32xbf16>
    %97 = vector.shape_cast %96 : vector<8x8x32xbf16> to vector<64x32xbf16>
    %c4_83 = arith.constant 4 : index
    %c0_84 = arith.constant 0 : index
    %c0_85 = arith.constant 0 : index
    %98 = vector.load %arg5[%c4_83, %c0_84, %c0_85] : memref<9x32x32xbf16, #tpu.memory_space<vmem>>, vector<1x32x32xbf16>
    %99 = vector.shape_cast %98 : vector<1x32x32xbf16> to vector<32x32xbf16>
    %cst_86 = arith.constant dense<0.000000e+00> : vector<64x32xf32>
    %100 = tpu.matmul %97, %99, %cst_86 {dimension_numbers = #tpu.dot_dimension_numbers<[1], [0], [0], [1], [0, 0, 1, 1], [], []>} : vector<64x32xbf16>, vector<32x32xbf16>, vector<64x32xf32> -> vector<64x32xf32>
    %101 = arith.addf %95, %100 : vector<64x32xf32>
    %102 = vector.extract_strided_slice %72 {offsets = [1, 2, 0], sizes = [8, 8, 32], strides = [1, 1, 1]} : vector<10x10x32xbf16> to vector<8x8x32xbf16>
    %103 = vector.shape_cast %102 : vector<8x8x32xbf16> to vector<64x32xbf16>
    %c5_87 = arith.constant 5 : index
    %c0_88 = arith.constant 0 : index
    %c0_89 = arith.constant 0 : index
    %104 = vector.load %arg5[%c5_87, %c0_88, %c0_89] : memref<9x32x32xbf16, #tpu.memory_space<vmem>>, vector<1x32x32xbf16>
    %105 = vector.shape_cast %104 : vector<1x32x32xbf16> to vector<32x32xbf16>
    %cst_90 = arith.constant dense<0.000000e+00> : vector<64x32xf32>
    %106 = tpu.matmul %103, %105, %cst_90 {dimension_numbers = #tpu.dot_dimension_numbers<[1], [0], [0], [1], [0, 0, 1, 1], [], []>} : vector<64x32xbf16>, vector<32x32xbf16>, vector<64x32xf32> -> vector<64x32xf32>
    %107 = arith.addf %101, %106 : vector<64x32xf32>
    %108 = vector.extract_strided_slice %72 {offsets = [2, 0, 0], sizes = [8, 8, 32], strides = [1, 1, 1]} : vector<10x10x32xbf16> to vector<8x8x32xbf16>
    %109 = vector.shape_cast %108 : vector<8x8x32xbf16> to vector<64x32xbf16>
    %c6_91 = arith.constant 6 : index
    %c0_92 = arith.constant 0 : index
    %c0_93 = arith.constant 0 : index
    %110 = vector.load %arg5[%c6_91, %c0_92, %c0_93] : memref<9x32x32xbf16, #tpu.memory_space<vmem>>, vector<1x32x32xbf16>
    %111 = vector.shape_cast %110 : vector<1x32x32xbf16> to vector<32x32xbf16>
    %cst_94 = arith.constant dense<0.000000e+00> : vector<64x32xf32>
    %112 = tpu.matmul %109, %111, %cst_94 {dimension_numbers = #tpu.dot_dimension_numbers<[1], [0], [0], [1], [0, 0, 1, 1], [], []>} : vector<64x32xbf16>, vector<32x32xbf16>, vector<64x32xf32> -> vector<64x32xf32>
    %113 = arith.addf %107, %112 : vector<64x32xf32>
    %114 = vector.extract_strided_slice %72 {offsets = [2, 1, 0], sizes = [8, 8, 32], strides = [1, 1, 1]} : vector<10x10x32xbf16> to vector<8x8x32xbf16>
    %115 = vector.shape_cast %114 : vector<8x8x32xbf16> to vector<64x32xbf16>
    %c7_95 = arith.constant 7 : index
    %c0_96 = arith.constant 0 : index
    %c0_97 = arith.constant 0 : index
    %116 = vector.load %arg5[%c7_95, %c0_96, %c0_97] : memref<9x32x32xbf16, #tpu.memory_space<vmem>>, vector<1x32x32xbf16>
    %117 = vector.shape_cast %116 : vector<1x32x32xbf16> to vector<32x32xbf16>
    %cst_98 = arith.constant dense<0.000000e+00> : vector<64x32xf32>
    %118 = tpu.matmul %115, %117, %cst_98 {dimension_numbers = #tpu.dot_dimension_numbers<[1], [0], [0], [1], [0, 0, 1, 1], [], []>} : vector<64x32xbf16>, vector<32x32xbf16>, vector<64x32xf32> -> vector<64x32xf32>
    %119 = arith.addf %113, %118 : vector<64x32xf32>
    %120 = vector.extract_strided_slice %72 {offsets = [2, 2, 0], sizes = [8, 8, 32], strides = [1, 1, 1]} : vector<10x10x32xbf16> to vector<8x8x32xbf16>
    %121 = vector.shape_cast %120 : vector<8x8x32xbf16> to vector<64x32xbf16>
    %c8_99 = arith.constant 8 : index
    %c0_100 = arith.constant 0 : index
    %c0_101 = arith.constant 0 : index
    %122 = vector.load %arg5[%c8_99, %c0_100, %c0_101] : memref<9x32x32xbf16, #tpu.memory_space<vmem>>, vector<1x32x32xbf16>
    %123 = vector.shape_cast %122 : vector<1x32x32xbf16> to vector<32x32xbf16>
    %cst_102 = arith.constant dense<0.000000e+00> : vector<64x32xf32>
    %124 = tpu.matmul %121, %123, %cst_102 {dimension_numbers = #tpu.dot_dimension_numbers<[1], [0], [0], [1], [0, 0, 1, 1], [], []>} : vector<64x32xbf16>, vector<32x32xbf16>, vector<64x32xf32> -> vector<64x32xf32>
    %125 = arith.addf %119, %124 : vector<64x32xf32>
    %c0_103 = arith.constant 0 : index
    %c0_104 = arith.constant 0 : index
    %126 = vector.load %arg6[%c0_103, %c0_104] : memref<1x32xf32, #tpu.memory_space<vmem>>, vector<1x32xf32>
    %127 = vector.broadcast %126 : vector<1x32xf32> to vector<64x32xf32>
    %128 = arith.addf %125, %127 : vector<64x32xf32>
    %cst_105 = arith.constant 0.000000e+00 : f32
    %129 = vector.broadcast %cst_105 : f32 to vector<64x32xf32>
    %130 = arith.maximumf %128, %129 : vector<64x32xf32>
    %c0_106 = arith.constant 0 : index
    %c0_107 = arith.constant 0 : index
    %c0_108 = arith.constant 0 : index
    %c0_109 = arith.constant 0 : index
    %131 = vector.load %arg2[%c0_106, %c0_107, %c0_108, %c0_109] : memref<1x144x9x16xbf16, #tpu.memory_space<vmem>>, vector<1x8x8x16xbf16>
    %132 = vector.shape_cast %131 : vector<1x8x8x16xbf16> to vector<8x8x16xbf16>
    %133 = vector.shape_cast %132 : vector<8x8x16xbf16> to vector<64x16xbf16>
    %c0_110 = arith.constant 0 : index
    %c18 = arith.constant 18 : index
    %c0_111 = arith.constant 0 : index
    %c0_112 = arith.constant 0 : index
    %134 = vector.load %arg2[%c0_110, %c18, %c0_111, %c0_112] : memref<1x144x9x16xbf16, #tpu.memory_space<vmem>>, vector<1x8x8x16xbf16>
    %135 = vector.shape_cast %134 : vector<1x8x8x16xbf16> to vector<8x8x16xbf16>
    %136 = vector.shape_cast %135 : vector<8x8x16xbf16> to vector<64x16xbf16>
    %c0_113 = arith.constant 0 : index
    %c72 = arith.constant 72 : index
    %c0_114 = arith.constant 0 : index
    %c0_115 = arith.constant 0 : index
    %137 = vector.load %arg2[%c0_113, %c72, %c0_114, %c0_115] : memref<1x144x9x16xbf16, #tpu.memory_space<vmem>>, vector<1x8x8x16xbf16>
    %138 = vector.shape_cast %137 : vector<1x8x8x16xbf16> to vector<8x8x16xbf16>
    %139 = vector.shape_cast %138 : vector<8x8x16xbf16> to vector<64x16xbf16>
    %c0_116 = arith.constant 0 : index
    %c90 = arith.constant 90 : index
    %c0_117 = arith.constant 0 : index
    %c0_118 = arith.constant 0 : index
    %140 = vector.load %arg2[%c0_116, %c90, %c0_117, %c0_118] : memref<1x144x9x16xbf16, #tpu.memory_space<vmem>>, vector<1x8x8x16xbf16>
    %141 = vector.shape_cast %140 : vector<1x8x8x16xbf16> to vector<8x8x16xbf16>
    %142 = vector.shape_cast %141 : vector<8x8x16xbf16> to vector<64x16xbf16>
    %143 = tpu.concatenate %133, %136, %139, %142 in 0 : vector<64x16xbf16>, vector<64x16xbf16>, vector<64x16xbf16>, vector<64x16xbf16> -> vector<256x16xbf16>
    %c0_119 = arith.constant 0 : index
    %c0_120 = arith.constant 0 : index
    %c0_121 = arith.constant 0 : index
    %144 = vector.load %arg7[%c0_119, %c0_120, %c0_121] : memref<25x16x32xbf16, #tpu.memory_space<vmem>>, vector<1x16x32xbf16>
    %145 = vector.shape_cast %144 : vector<1x16x32xbf16> to vector<16x32xbf16>
    %cst_122 = arith.constant dense<0.000000e+00> : vector<256x32xf32>
    %146 = tpu.matmul %143, %145, %cst_122 {dimension_numbers = #tpu.dot_dimension_numbers<[1], [0], [0], [1], [0, 0, 1, 1], [], []>} : vector<256x16xbf16>, vector<16x32xbf16>, vector<256x32xf32> -> vector<256x32xf32>
    %c0_123 = arith.constant 0 : index
    %c9 = arith.constant 9 : index
    %c0_124 = arith.constant 0 : index
    %c0_125 = arith.constant 0 : index
    %147 = vector.load %arg2[%c0_123, %c9, %c0_124, %c0_125] : memref<1x144x9x16xbf16, #tpu.memory_space<vmem>>, vector<1x8x8x16xbf16>
    %148 = vector.shape_cast %147 : vector<1x8x8x16xbf16> to vector<8x8x16xbf16>
    %149 = vector.shape_cast %148 : vector<8x8x16xbf16> to vector<64x16xbf16>
    %c0_126 = arith.constant 0 : index
    %c27 = arith.constant 27 : index
    %c0_127 = arith.constant 0 : index
    %c0_128 = arith.constant 0 : index
    %150 = vector.load %arg2[%c0_126, %c27, %c0_127, %c0_128] : memref<1x144x9x16xbf16, #tpu.memory_space<vmem>>, vector<1x8x8x16xbf16>
    %151 = vector.shape_cast %150 : vector<1x8x8x16xbf16> to vector<8x8x16xbf16>
    %152 = vector.shape_cast %151 : vector<8x8x16xbf16> to vector<64x16xbf16>
    %c0_129 = arith.constant 0 : index
    %c81 = arith.constant 81 : index
    %c0_130 = arith.constant 0 : index
    %c0_131 = arith.constant 0 : index
    %153 = vector.load %arg2[%c0_129, %c81, %c0_130, %c0_131] : memref<1x144x9x16xbf16, #tpu.memory_space<vmem>>, vector<1x8x8x16xbf16>
    %154 = vector.shape_cast %153 : vector<1x8x8x16xbf16> to vector<8x8x16xbf16>
    %155 = vector.shape_cast %154 : vector<8x8x16xbf16> to vector<64x16xbf16>
    %c0_132 = arith.constant 0 : index
    %c99 = arith.constant 99 : index
    %c0_133 = arith.constant 0 : index
    %c0_134 = arith.constant 0 : index
    %156 = vector.load %arg2[%c0_132, %c99, %c0_133, %c0_134] : memref<1x144x9x16xbf16, #tpu.memory_space<vmem>>, vector<1x8x8x16xbf16>
    %157 = vector.shape_cast %156 : vector<1x8x8x16xbf16> to vector<8x8x16xbf16>
    %158 = vector.shape_cast %157 : vector<8x8x16xbf16> to vector<64x16xbf16>
    %159 = tpu.concatenate %149, %152, %155, %158 in 0 : vector<64x16xbf16>, vector<64x16xbf16>, vector<64x16xbf16>, vector<64x16xbf16> -> vector<256x16xbf16>
    %c1_135 = arith.constant 1 : index
    %c0_136 = arith.constant 0 : index
    %c0_137 = arith.constant 0 : index
    %160 = vector.load %arg7[%c1_135, %c0_136, %c0_137] : memref<25x16x32xbf16, #tpu.memory_space<vmem>>, vector<1x16x32xbf16>
    %161 = vector.shape_cast %160 : vector<1x16x32xbf16> to vector<16x32xbf16>
    %cst_138 = arith.constant dense<0.000000e+00> : vector<256x32xf32>
    %162 = tpu.matmul %159, %161, %cst_138 {dimension_numbers = #tpu.dot_dimension_numbers<[1], [0], [0], [1], [0, 0, 1, 1], [], []>} : vector<256x16xbf16>, vector<16x32xbf16>, vector<256x32xf32> -> vector<256x32xf32>
    %163 = arith.addf %146, %162 : vector<256x32xf32>
    %c0_139 = arith.constant 0 : index
    %c18_140 = arith.constant 18 : index
    %c0_141 = arith.constant 0 : index
    %c0_142 = arith.constant 0 : index
    %164 = vector.load %arg2[%c0_139, %c18_140, %c0_141, %c0_142] : memref<1x144x9x16xbf16, #tpu.memory_space<vmem>>, vector<1x8x8x16xbf16>
    %165 = vector.shape_cast %164 : vector<1x8x8x16xbf16> to vector<8x8x16xbf16>
    %166 = vector.shape_cast %165 : vector<8x8x16xbf16> to vector<64x16xbf16>
    %c0_143 = arith.constant 0 : index
    %c0_144 = arith.constant 0 : index
    %c1_145 = arith.constant 1 : index
    %c0_146 = arith.constant 0 : index
    %167 = vector.load %arg2[%c0_143, %c0_144, %c1_145, %c0_146] : memref<1x144x9x16xbf16, #tpu.memory_space<vmem>>, vector<1x8x8x16xbf16>
    %168 = vector.shape_cast %167 : vector<1x8x8x16xbf16> to vector<8x8x16xbf16>
    %169 = vector.shape_cast %168 : vector<8x8x16xbf16> to vector<64x16xbf16>
    %c0_147 = arith.constant 0 : index
    %c90_148 = arith.constant 90 : index
    %c0_149 = arith.constant 0 : index
    %c0_150 = arith.constant 0 : index
    %170 = vector.load %arg2[%c0_147, %c90_148, %c0_149, %c0_150] : memref<1x144x9x16xbf16, #tpu.memory_space<vmem>>, vector<1x8x8x16xbf16>
    %171 = vector.shape_cast %170 : vector<1x8x8x16xbf16> to vector<8x8x16xbf16>
    %172 = vector.shape_cast %171 : vector<8x8x16xbf16> to vector<64x16xbf16>
    %c0_151 = arith.constant 0 : index
    %c72_152 = arith.constant 72 : index
    %c1_153 = arith.constant 1 : index
    %c0_154 = arith.constant 0 : index
    %173 = vector.load %arg2[%c0_151, %c72_152, %c1_153, %c0_154] : memref<1x144x9x16xbf16, #tpu.memory_space<vmem>>, vector<1x8x8x16xbf16>
    %174 = vector.shape_cast %173 : vector<1x8x8x16xbf16> to vector<8x8x16xbf16>
    %175 = vector.shape_cast %174 : vector<8x8x16xbf16> to vector<64x16xbf16>
    %176 = tpu.concatenate %166, %169, %172, %175 in 0 : vector<64x16xbf16>, vector<64x16xbf16>, vector<64x16xbf16>, vector<64x16xbf16> -> vector<256x16xbf16>
    %c2_155 = arith.constant 2 : index
    %c0_156 = arith.constant 0 : index
    %c0_157 = arith.constant 0 : index
    %177 = vector.load %arg7[%c2_155, %c0_156, %c0_157] : memref<25x16x32xbf16, #tpu.memory_space<vmem>>, vector<1x16x32xbf16>
    %178 = vector.shape_cast %177 : vector<1x16x32xbf16> to vector<16x32xbf16>
    %cst_158 = arith.constant dense<0.000000e+00> : vector<256x32xf32>
    %179 = tpu.matmul %176, %178, %cst_158 {dimension_numbers = #tpu.dot_dimension_numbers<[1], [0], [0], [1], [0, 0, 1, 1], [], []>} : vector<256x16xbf16>, vector<16x32xbf16>, vector<256x32xf32> -> vector<256x32xf32>
    %180 = arith.addf %163, %179 : vector<256x32xf32>
    %c0_159 = arith.constant 0 : index
    %c27_160 = arith.constant 27 : index
    %c0_161 = arith.constant 0 : index
    %c0_162 = arith.constant 0 : index
    %181 = vector.load %arg2[%c0_159, %c27_160, %c0_161, %c0_162] : memref<1x144x9x16xbf16, #tpu.memory_space<vmem>>, vector<1x8x8x16xbf16>
    %182 = vector.shape_cast %181 : vector<1x8x8x16xbf16> to vector<8x8x16xbf16>
    %183 = vector.shape_cast %182 : vector<8x8x16xbf16> to vector<64x16xbf16>
    %c0_163 = arith.constant 0 : index
    %c9_164 = arith.constant 9 : index
    %c1_165 = arith.constant 1 : index
    %c0_166 = arith.constant 0 : index
    %184 = vector.load %arg2[%c0_163, %c9_164, %c1_165, %c0_166] : memref<1x144x9x16xbf16, #tpu.memory_space<vmem>>, vector<1x8x8x16xbf16>
    %185 = vector.shape_cast %184 : vector<1x8x8x16xbf16> to vector<8x8x16xbf16>
    %186 = vector.shape_cast %185 : vector<8x8x16xbf16> to vector<64x16xbf16>
    %c0_167 = arith.constant 0 : index
    %c99_168 = arith.constant 99 : index
    %c0_169 = arith.constant 0 : index
    %c0_170 = arith.constant 0 : index
    %187 = vector.load %arg2[%c0_167, %c99_168, %c0_169, %c0_170] : memref<1x144x9x16xbf16, #tpu.memory_space<vmem>>, vector<1x8x8x16xbf16>
    %188 = vector.shape_cast %187 : vector<1x8x8x16xbf16> to vector<8x8x16xbf16>
    %189 = vector.shape_cast %188 : vector<8x8x16xbf16> to vector<64x16xbf16>
    %c0_171 = arith.constant 0 : index
    %c81_172 = arith.constant 81 : index
    %c1_173 = arith.constant 1 : index
    %c0_174 = arith.constant 0 : index
    %190 = vector.load %arg2[%c0_171, %c81_172, %c1_173, %c0_174] : memref<1x144x9x16xbf16, #tpu.memory_space<vmem>>, vector<1x8x8x16xbf16>
    %191 = vector.shape_cast %190 : vector<1x8x8x16xbf16> to vector<8x8x16xbf16>
    %192 = vector.shape_cast %191 : vector<8x8x16xbf16> to vector<64x16xbf16>
    %193 = tpu.concatenate %183, %186, %189, %192 in 0 : vector<64x16xbf16>, vector<64x16xbf16>, vector<64x16xbf16>, vector<64x16xbf16> -> vector<256x16xbf16>
    %c3_175 = arith.constant 3 : index
    %c0_176 = arith.constant 0 : index
    %c0_177 = arith.constant 0 : index
    %194 = vector.load %arg7[%c3_175, %c0_176, %c0_177] : memref<25x16x32xbf16, #tpu.memory_space<vmem>>, vector<1x16x32xbf16>
    %195 = vector.shape_cast %194 : vector<1x16x32xbf16> to vector<16x32xbf16>
    %cst_178 = arith.constant dense<0.000000e+00> : vector<256x32xf32>
    %196 = tpu.matmul %193, %195, %cst_178 {dimension_numbers = #tpu.dot_dimension_numbers<[1], [0], [0], [1], [0, 0, 1, 1], [], []>} : vector<256x16xbf16>, vector<16x32xbf16>, vector<256x32xf32> -> vector<256x32xf32>
    %197 = arith.addf %180, %196 : vector<256x32xf32>
    %c0_179 = arith.constant 0 : index
    %c0_180 = arith.constant 0 : index
    %c1_181 = arith.constant 1 : index
    %c0_182 = arith.constant 0 : index
    %198 = vector.load %arg2[%c0_179, %c0_180, %c1_181, %c0_182] : memref<1x144x9x16xbf16, #tpu.memory_space<vmem>>, vector<1x8x8x16xbf16>
    %199 = vector.shape_cast %198 : vector<1x8x8x16xbf16> to vector<8x8x16xbf16>
    %200 = vector.shape_cast %199 : vector<8x8x16xbf16> to vector<64x16xbf16>
    %c0_183 = arith.constant 0 : index
    %c18_184 = arith.constant 18 : index
    %c1_185 = arith.constant 1 : index
    %c0_186 = arith.constant 0 : index
    %201 = vector.load %arg2[%c0_183, %c18_184, %c1_185, %c0_186] : memref<1x144x9x16xbf16, #tpu.memory_space<vmem>>, vector<1x8x8x16xbf16>
    %202 = vector.shape_cast %201 : vector<1x8x8x16xbf16> to vector<8x8x16xbf16>
    %203 = vector.shape_cast %202 : vector<8x8x16xbf16> to vector<64x16xbf16>
    %c0_187 = arith.constant 0 : index
    %c72_188 = arith.constant 72 : index
    %c1_189 = arith.constant 1 : index
    %c0_190 = arith.constant 0 : index
    %204 = vector.load %arg2[%c0_187, %c72_188, %c1_189, %c0_190] : memref<1x144x9x16xbf16, #tpu.memory_space<vmem>>, vector<1x8x8x16xbf16>
    %205 = vector.shape_cast %204 : vector<1x8x8x16xbf16> to vector<8x8x16xbf16>
    %206 = vector.shape_cast %205 : vector<8x8x16xbf16> to vector<64x16xbf16>
    %c0_191 = arith.constant 0 : index
    %c90_192 = arith.constant 90 : index
    %c1_193 = arith.constant 1 : index
    %c0_194 = arith.constant 0 : index
    %207 = vector.load %arg2[%c0_191, %c90_192, %c1_193, %c0_194] : memref<1x144x9x16xbf16, #tpu.memory_space<vmem>>, vector<1x8x8x16xbf16>
    %208 = vector.shape_cast %207 : vector<1x8x8x16xbf16> to vector<8x8x16xbf16>
    %209 = vector.shape_cast %208 : vector<8x8x16xbf16> to vector<64x16xbf16>
    %210 = tpu.concatenate %200, %203, %206, %209 in 0 : vector<64x16xbf16>, vector<64x16xbf16>, vector<64x16xbf16>, vector<64x16xbf16> -> vector<256x16xbf16>
    %c4_195 = arith.constant 4 : index
    %c0_196 = arith.constant 0 : index
    %c0_197 = arith.constant 0 : index
    %211 = vector.load %arg7[%c4_195, %c0_196, %c0_197] : memref<25x16x32xbf16, #tpu.memory_space<vmem>>, vector<1x16x32xbf16>
    %212 = vector.shape_cast %211 : vector<1x16x32xbf16> to vector<16x32xbf16>
    %cst_198 = arith.constant dense<0.000000e+00> : vector<256x32xf32>
    %213 = tpu.matmul %210, %212, %cst_198 {dimension_numbers = #tpu.dot_dimension_numbers<[1], [0], [0], [1], [0, 0, 1, 1], [], []>} : vector<256x16xbf16>, vector<16x32xbf16>, vector<256x32xf32> -> vector<256x32xf32>
    %214 = arith.addf %197, %213 : vector<256x32xf32>
    %c0_199 = arith.constant 0 : index
    %c36 = arith.constant 36 : index
    %c0_200 = arith.constant 0 : index
    %c0_201 = arith.constant 0 : index
    %215 = vector.load %arg2[%c0_199, %c36, %c0_200, %c0_201] : memref<1x144x9x16xbf16, #tpu.memory_space<vmem>>, vector<1x8x8x16xbf16>
    %216 = vector.shape_cast %215 : vector<1x8x8x16xbf16> to vector<8x8x16xbf16>
    %217 = vector.shape_cast %216 : vector<8x8x16xbf16> to vector<64x16xbf16>
    %c0_202 = arith.constant 0 : index
    %c54 = arith.constant 54 : index
    %c0_203 = arith.constant 0 : index
    %c0_204 = arith.constant 0 : index
    %218 = vector.load %arg2[%c0_202, %c54, %c0_203, %c0_204] : memref<1x144x9x16xbf16, #tpu.memory_space<vmem>>, vector<1x8x8x16xbf16>
    %219 = vector.shape_cast %218 : vector<1x8x8x16xbf16> to vector<8x8x16xbf16>
    %220 = vector.shape_cast %219 : vector<8x8x16xbf16> to vector<64x16xbf16>
    %c0_205 = arith.constant 0 : index
    %c108 = arith.constant 108 : index
    %c0_206 = arith.constant 0 : index
    %c0_207 = arith.constant 0 : index
    %221 = vector.load %arg2[%c0_205, %c108, %c0_206, %c0_207] : memref<1x144x9x16xbf16, #tpu.memory_space<vmem>>, vector<1x8x8x16xbf16>
    %222 = vector.shape_cast %221 : vector<1x8x8x16xbf16> to vector<8x8x16xbf16>
    %223 = vector.shape_cast %222 : vector<8x8x16xbf16> to vector<64x16xbf16>
    %c0_208 = arith.constant 0 : index
    %c126 = arith.constant 126 : index
    %c0_209 = arith.constant 0 : index
    %c0_210 = arith.constant 0 : index
    %224 = vector.load %arg2[%c0_208, %c126, %c0_209, %c0_210] : memref<1x144x9x16xbf16, #tpu.memory_space<vmem>>, vector<1x8x8x16xbf16>
    %225 = vector.shape_cast %224 : vector<1x8x8x16xbf16> to vector<8x8x16xbf16>
    %226 = vector.shape_cast %225 : vector<8x8x16xbf16> to vector<64x16xbf16>
    %227 = tpu.concatenate %217, %220, %223, %226 in 0 : vector<64x16xbf16>, vector<64x16xbf16>, vector<64x16xbf16>, vector<64x16xbf16> -> vector<256x16xbf16>
    %c5_211 = arith.constant 5 : index
    %c0_212 = arith.constant 0 : index
    %c0_213 = arith.constant 0 : index
    %228 = vector.load %arg7[%c5_211, %c0_212, %c0_213] : memref<25x16x32xbf16, #tpu.memory_space<vmem>>, vector<1x16x32xbf16>
    %229 = vector.shape_cast %228 : vector<1x16x32xbf16> to vector<16x32xbf16>
    %cst_214 = arith.constant dense<0.000000e+00> : vector<256x32xf32>
    %230 = tpu.matmul %227, %229, %cst_214 {dimension_numbers = #tpu.dot_dimension_numbers<[1], [0], [0], [1], [0, 0, 1, 1], [], []>} : vector<256x16xbf16>, vector<16x32xbf16>, vector<256x32xf32> -> vector<256x32xf32>
    %231 = arith.addf %214, %230 : vector<256x32xf32>
    %c0_215 = arith.constant 0 : index
    %c45 = arith.constant 45 : index
    %c0_216 = arith.constant 0 : index
    %c0_217 = arith.constant 0 : index
    %232 = vector.load %arg2[%c0_215, %c45, %c0_216, %c0_217] : memref<1x144x9x16xbf16, #tpu.memory_space<vmem>>, vector<1x8x8x16xbf16>
    %233 = vector.shape_cast %232 : vector<1x8x8x16xbf16> to vector<8x8x16xbf16>
    %234 = vector.shape_cast %233 : vector<8x8x16xbf16> to vector<64x16xbf16>
    %c0_218 = arith.constant 0 : index
    %c63 = arith.constant 63 : index
    %c0_219 = arith.constant 0 : index
    %c0_220 = arith.constant 0 : index
    %235 = vector.load %arg2[%c0_218, %c63, %c0_219, %c0_220] : memref<1x144x9x16xbf16, #tpu.memory_space<vmem>>, vector<1x8x8x16xbf16>
    %236 = vector.shape_cast %235 : vector<1x8x8x16xbf16> to vector<8x8x16xbf16>
    %237 = vector.shape_cast %236 : vector<8x8x16xbf16> to vector<64x16xbf16>
    %c0_221 = arith.constant 0 : index
    %c117 = arith.constant 117 : index
    %c0_222 = arith.constant 0 : index
    %c0_223 = arith.constant 0 : index
    %238 = vector.load %arg2[%c0_221, %c117, %c0_222, %c0_223] : memref<1x144x9x16xbf16, #tpu.memory_space<vmem>>, vector<1x8x8x16xbf16>
    %239 = vector.shape_cast %238 : vector<1x8x8x16xbf16> to vector<8x8x16xbf16>
    %240 = vector.shape_cast %239 : vector<8x8x16xbf16> to vector<64x16xbf16>
    %c0_224 = arith.constant 0 : index
    %c135 = arith.constant 135 : index
    %c0_225 = arith.constant 0 : index
    %c0_226 = arith.constant 0 : index
    %241 = vector.load %arg2[%c0_224, %c135, %c0_225, %c0_226] : memref<1x144x9x16xbf16, #tpu.memory_space<vmem>>, vector<1x8x8x16xbf16>
    %242 = vector.shape_cast %241 : vector<1x8x8x16xbf16> to vector<8x8x16xbf16>
    %243 = vector.shape_cast %242 : vector<8x8x16xbf16> to vector<64x16xbf16>
    %244 = tpu.concatenate %234, %237, %240, %243 in 0 : vector<64x16xbf16>, vector<64x16xbf16>, vector<64x16xbf16>, vector<64x16xbf16> -> vector<256x16xbf16>
    %c6_227 = arith.constant 6 : index
    %c0_228 = arith.constant 0 : index
    %c0_229 = arith.constant 0 : index
    %245 = vector.load %arg7[%c6_227, %c0_228, %c0_229] : memref<25x16x32xbf16, #tpu.memory_space<vmem>>, vector<1x16x32xbf16>
    %246 = vector.shape_cast %245 : vector<1x16x32xbf16> to vector<16x32xbf16>
    %cst_230 = arith.constant dense<0.000000e+00> : vector<256x32xf32>
    %247 = tpu.matmul %244, %246, %cst_230 {dimension_numbers = #tpu.dot_dimension_numbers<[1], [0], [0], [1], [0, 0, 1, 1], [], []>} : vector<256x16xbf16>, vector<16x32xbf16>, vector<256x32xf32> -> vector<256x32xf32>
    %248 = arith.addf %231, %247 : vector<256x32xf32>
    %c0_231 = arith.constant 0 : index
    %c54_232 = arith.constant 54 : index
    %c0_233 = arith.constant 0 : index
    %c0_234 = arith.constant 0 : index
    %249 = vector.load %arg2[%c0_231, %c54_232, %c0_233, %c0_234] : memref<1x144x9x16xbf16, #tpu.memory_space<vmem>>, vector<1x8x8x16xbf16>
    %250 = vector.shape_cast %249 : vector<1x8x8x16xbf16> to vector<8x8x16xbf16>
    %251 = vector.shape_cast %250 : vector<8x8x16xbf16> to vector<64x16xbf16>
    %c0_235 = arith.constant 0 : index
    %c36_236 = arith.constant 36 : index
    %c1_237 = arith.constant 1 : index
    %c0_238 = arith.constant 0 : index
    %252 = vector.load %arg2[%c0_235, %c36_236, %c1_237, %c0_238] : memref<1x144x9x16xbf16, #tpu.memory_space<vmem>>, vector<1x8x8x16xbf16>
    %253 = vector.shape_cast %252 : vector<1x8x8x16xbf16> to vector<8x8x16xbf16>
    %254 = vector.shape_cast %253 : vector<8x8x16xbf16> to vector<64x16xbf16>
    %c0_239 = arith.constant 0 : index
    %c126_240 = arith.constant 126 : index
    %c0_241 = arith.constant 0 : index
    %c0_242 = arith.constant 0 : index
    %255 = vector.load %arg2[%c0_239, %c126_240, %c0_241, %c0_242] : memref<1x144x9x16xbf16, #tpu.memory_space<vmem>>, vector<1x8x8x16xbf16>
    %256 = vector.shape_cast %255 : vector<1x8x8x16xbf16> to vector<8x8x16xbf16>
    %257 = vector.shape_cast %256 : vector<8x8x16xbf16> to vector<64x16xbf16>
    %c0_243 = arith.constant 0 : index
    %c108_244 = arith.constant 108 : index
    %c1_245 = arith.constant 1 : index
    %c0_246 = arith.constant 0 : index
    %258 = vector.load %arg2[%c0_243, %c108_244, %c1_245, %c0_246] : memref<1x144x9x16xbf16, #tpu.memory_space<vmem>>, vector<1x8x8x16xbf16>
    %259 = vector.shape_cast %258 : vector<1x8x8x16xbf16> to vector<8x8x16xbf16>
    %260 = vector.shape_cast %259 : vector<8x8x16xbf16> to vector<64x16xbf16>
    %261 = tpu.concatenate %251, %254, %257, %260 in 0 : vector<64x16xbf16>, vector<64x16xbf16>, vector<64x16xbf16>, vector<64x16xbf16> -> vector<256x16xbf16>
    %c7_247 = arith.constant 7 : index
    %c0_248 = arith.constant 0 : index
    %c0_249 = arith.constant 0 : index
    %262 = vector.load %arg7[%c7_247, %c0_248, %c0_249] : memref<25x16x32xbf16, #tpu.memory_space<vmem>>, vector<1x16x32xbf16>
    %263 = vector.shape_cast %262 : vector<1x16x32xbf16> to vector<16x32xbf16>
    %cst_250 = arith.constant dense<0.000000e+00> : vector<256x32xf32>
    %264 = tpu.matmul %261, %263, %cst_250 {dimension_numbers = #tpu.dot_dimension_numbers<[1], [0], [0], [1], [0, 0, 1, 1], [], []>} : vector<256x16xbf16>, vector<16x32xbf16>, vector<256x32xf32> -> vector<256x32xf32>
    %265 = arith.addf %248, %264 : vector<256x32xf32>
    %c0_251 = arith.constant 0 : index
    %c63_252 = arith.constant 63 : index
    %c0_253 = arith.constant 0 : index
    %c0_254 = arith.constant 0 : index
    %266 = vector.load %arg2[%c0_251, %c63_252, %c0_253, %c0_254] : memref<1x144x9x16xbf16, #tpu.memory_space<vmem>>, vector<1x8x8x16xbf16>
    %267 = vector.shape_cast %266 : vector<1x8x8x16xbf16> to vector<8x8x16xbf16>
    %268 = vector.shape_cast %267 : vector<8x8x16xbf16> to vector<64x16xbf16>
    %c0_255 = arith.constant 0 : index
    %c45_256 = arith.constant 45 : index
    %c1_257 = arith.constant 1 : index
    %c0_258 = arith.constant 0 : index
    %269 = vector.load %arg2[%c0_255, %c45_256, %c1_257, %c0_258] : memref<1x144x9x16xbf16, #tpu.memory_space<vmem>>, vector<1x8x8x16xbf16>
    %270 = vector.shape_cast %269 : vector<1x8x8x16xbf16> to vector<8x8x16xbf16>
    %271 = vector.shape_cast %270 : vector<8x8x16xbf16> to vector<64x16xbf16>
    %c0_259 = arith.constant 0 : index
    %c135_260 = arith.constant 135 : index
    %c0_261 = arith.constant 0 : index
    %c0_262 = arith.constant 0 : index
    %272 = vector.load %arg2[%c0_259, %c135_260, %c0_261, %c0_262] : memref<1x144x9x16xbf16, #tpu.memory_space<vmem>>, vector<1x8x8x16xbf16>
    %273 = vector.shape_cast %272 : vector<1x8x8x16xbf16> to vector<8x8x16xbf16>
    %274 = vector.shape_cast %273 : vector<8x8x16xbf16> to vector<64x16xbf16>
    %c0_263 = arith.constant 0 : index
    %c117_264 = arith.constant 117 : index
    %c1_265 = arith.constant 1 : index
    %c0_266 = arith.constant 0 : index
    %275 = vector.load %arg2[%c0_263, %c117_264, %c1_265, %c0_266] : memref<1x144x9x16xbf16, #tpu.memory_space<vmem>>, vector<1x8x8x16xbf16>
    %276 = vector.shape_cast %275 : vector<1x8x8x16xbf16> to vector<8x8x16xbf16>
    %277 = vector.shape_cast %276 : vector<8x8x16xbf16> to vector<64x16xbf16>
    %278 = tpu.concatenate %268, %271, %274, %277 in 0 : vector<64x16xbf16>, vector<64x16xbf16>, vector<64x16xbf16>, vector<64x16xbf16> -> vector<256x16xbf16>
    %c8_267 = arith.constant 8 : index
    %c0_268 = arith.constant 0 : index
    %c0_269 = arith.constant 0 : index
    %279 = vector.load %arg7[%c8_267, %c0_268, %c0_269] : memref<25x16x32xbf16, #tpu.memory_space<vmem>>, vector<1x16x32xbf16>
    %280 = vector.shape_cast %279 : vector<1x16x32xbf16> to vector<16x32xbf16>
    %cst_270 = arith.constant dense<0.000000e+00> : vector<256x32xf32>
    %281 = tpu.matmul %278, %280, %cst_270 {dimension_numbers = #tpu.dot_dimension_numbers<[1], [0], [0], [1], [0, 0, 1, 1], [], []>} : vector<256x16xbf16>, vector<16x32xbf16>, vector<256x32xf32> -> vector<256x32xf32>
    %282 = arith.addf %265, %281 : vector<256x32xf32>
    %c0_271 = arith.constant 0 : index
    %c36_272 = arith.constant 36 : index
    %c1_273 = arith.constant 1 : index
    %c0_274 = arith.constant 0 : index
    %283 = vector.load %arg2[%c0_271, %c36_272, %c1_273, %c0_274] : memref<1x144x9x16xbf16, #tpu.memory_space<vmem>>, vector<1x8x8x16xbf16>
    %284 = vector.shape_cast %283 : vector<1x8x8x16xbf16> to vector<8x8x16xbf16>
    %285 = vector.shape_cast %284 : vector<8x8x16xbf16> to vector<64x16xbf16>
    %c0_275 = arith.constant 0 : index
    %c54_276 = arith.constant 54 : index
    %c1_277 = arith.constant 1 : index
    %c0_278 = arith.constant 0 : index
    %286 = vector.load %arg2[%c0_275, %c54_276, %c1_277, %c0_278] : memref<1x144x9x16xbf16, #tpu.memory_space<vmem>>, vector<1x8x8x16xbf16>
    %287 = vector.shape_cast %286 : vector<1x8x8x16xbf16> to vector<8x8x16xbf16>
    %288 = vector.shape_cast %287 : vector<8x8x16xbf16> to vector<64x16xbf16>
    %c0_279 = arith.constant 0 : index
    %c108_280 = arith.constant 108 : index
    %c1_281 = arith.constant 1 : index
    %c0_282 = arith.constant 0 : index
    %289 = vector.load %arg2[%c0_279, %c108_280, %c1_281, %c0_282] : memref<1x144x9x16xbf16, #tpu.memory_space<vmem>>, vector<1x8x8x16xbf16>
    %290 = vector.shape_cast %289 : vector<1x8x8x16xbf16> to vector<8x8x16xbf16>
    %291 = vector.shape_cast %290 : vector<8x8x16xbf16> to vector<64x16xbf16>
    %c0_283 = arith.constant 0 : index
    %c126_284 = arith.constant 126 : index
    %c1_285 = arith.constant 1 : index
    %c0_286 = arith.constant 0 : index
    %292 = vector.load %arg2[%c0_283, %c126_284, %c1_285, %c0_286] : memref<1x144x9x16xbf16, #tpu.memory_space<vmem>>, vector<1x8x8x16xbf16>
    %293 = vector.shape_cast %292 : vector<1x8x8x16xbf16> to vector<8x8x16xbf16>
    %294 = vector.shape_cast %293 : vector<8x8x16xbf16> to vector<64x16xbf16>
    %295 = tpu.concatenate %285, %288, %291, %294 in 0 : vector<64x16xbf16>, vector<64x16xbf16>, vector<64x16xbf16>, vector<64x16xbf16> -> vector<256x16xbf16>
    %c9_287 = arith.constant 9 : index
    %c0_288 = arith.constant 0 : index
    %c0_289 = arith.constant 0 : index
    %296 = vector.load %arg7[%c9_287, %c0_288, %c0_289] : memref<25x16x32xbf16, #tpu.memory_space<vmem>>, vector<1x16x32xbf16>
    %297 = vector.shape_cast %296 : vector<1x16x32xbf16> to vector<16x32xbf16>
    %cst_290 = arith.constant dense<0.000000e+00> : vector<256x32xf32>
    %298 = tpu.matmul %295, %297, %cst_290 {dimension_numbers = #tpu.dot_dimension_numbers<[1], [0], [0], [1], [0, 0, 1, 1], [], []>} : vector<256x16xbf16>, vector<16x32xbf16>, vector<256x32xf32> -> vector<256x32xf32>
    %299 = arith.addf %282, %298 : vector<256x32xf32>
    %c0_291 = arith.constant 0 : index
    %c72_292 = arith.constant 72 : index
    %c0_293 = arith.constant 0 : index
    %c0_294 = arith.constant 0 : index
    %300 = vector.load %arg2[%c0_291, %c72_292, %c0_293, %c0_294] : memref<1x144x9x16xbf16, #tpu.memory_space<vmem>>, vector<1x8x8x16xbf16>
    %301 = vector.shape_cast %300 : vector<1x8x8x16xbf16> to vector<8x8x16xbf16>
    %302 = vector.shape_cast %301 : vector<8x8x16xbf16> to vector<64x16xbf16>
    %c0_295 = arith.constant 0 : index
    %c90_296 = arith.constant 90 : index
    %c0_297 = arith.constant 0 : index
    %c0_298 = arith.constant 0 : index
    %303 = vector.load %arg2[%c0_295, %c90_296, %c0_297, %c0_298] : memref<1x144x9x16xbf16, #tpu.memory_space<vmem>>, vector<1x8x8x16xbf16>
    %304 = vector.shape_cast %303 : vector<1x8x8x16xbf16> to vector<8x8x16xbf16>
    %305 = vector.shape_cast %304 : vector<8x8x16xbf16> to vector<64x16xbf16>
    %c0_299 = arith.constant 0 : index
    %c1_300 = arith.constant 1 : index
    %c0_301 = arith.constant 0 : index
    %c0_302 = arith.constant 0 : index
    %306 = vector.load %arg2[%c0_299, %c1_300, %c0_301, %c0_302] : memref<1x144x9x16xbf16, #tpu.memory_space<vmem>>, vector<1x8x8x16xbf16>
    %307 = vector.shape_cast %306 : vector<1x8x8x16xbf16> to vector<8x8x16xbf16>
    %308 = vector.shape_cast %307 : vector<8x8x16xbf16> to vector<64x16xbf16>
    %c0_303 = arith.constant 0 : index
    %c19 = arith.constant 19 : index
    %c0_304 = arith.constant 0 : index
    %c0_305 = arith.constant 0 : index
    %309 = vector.load %arg2[%c0_303, %c19, %c0_304, %c0_305] : memref<1x144x9x16xbf16, #tpu.memory_space<vmem>>, vector<1x8x8x16xbf16>
    %310 = vector.shape_cast %309 : vector<1x8x8x16xbf16> to vector<8x8x16xbf16>
    %311 = vector.shape_cast %310 : vector<8x8x16xbf16> to vector<64x16xbf16>
    %312 = tpu.concatenate %302, %305, %308, %311 in 0 : vector<64x16xbf16>, vector<64x16xbf16>, vector<64x16xbf16>, vector<64x16xbf16> -> vector<256x16xbf16>
    %c10 = arith.constant 10 : index
    %c0_306 = arith.constant 0 : index
    %c0_307 = arith.constant 0 : index
    %313 = vector.load %arg7[%c10, %c0_306, %c0_307] : memref<25x16x32xbf16, #tpu.memory_space<vmem>>, vector<1x16x32xbf16>
    %314 = vector.shape_cast %313 : vector<1x16x32xbf16> to vector<16x32xbf16>
    %cst_308 = arith.constant dense<0.000000e+00> : vector<256x32xf32>
    %315 = tpu.matmul %312, %314, %cst_308 {dimension_numbers = #tpu.dot_dimension_numbers<[1], [0], [0], [1], [0, 0, 1, 1], [], []>} : vector<256x16xbf16>, vector<16x32xbf16>, vector<256x32xf32> -> vector<256x32xf32>
    %316 = arith.addf %299, %315 : vector<256x32xf32>
    %c0_309 = arith.constant 0 : index
    %c81_310 = arith.constant 81 : index
    %c0_311 = arith.constant 0 : index
    %c0_312 = arith.constant 0 : index
    %317 = vector.load %arg2[%c0_309, %c81_310, %c0_311, %c0_312] : memref<1x144x9x16xbf16, #tpu.memory_space<vmem>>, vector<1x8x8x16xbf16>
    %318 = vector.shape_cast %317 : vector<1x8x8x16xbf16> to vector<8x8x16xbf16>
    %319 = vector.shape_cast %318 : vector<8x8x16xbf16> to vector<64x16xbf16>
    %c0_313 = arith.constant 0 : index
    %c99_314 = arith.constant 99 : index
    %c0_315 = arith.constant 0 : index
    %c0_316 = arith.constant 0 : index
    %320 = vector.load %arg2[%c0_313, %c99_314, %c0_315, %c0_316] : memref<1x144x9x16xbf16, #tpu.memory_space<vmem>>, vector<1x8x8x16xbf16>
    %321 = vector.shape_cast %320 : vector<1x8x8x16xbf16> to vector<8x8x16xbf16>
    %322 = vector.shape_cast %321 : vector<8x8x16xbf16> to vector<64x16xbf16>
    %c0_317 = arith.constant 0 : index
    %c10_318 = arith.constant 10 : index
    %c0_319 = arith.constant 0 : index
    %c0_320 = arith.constant 0 : index
    %323 = vector.load %arg2[%c0_317, %c10_318, %c0_319, %c0_320] : memref<1x144x9x16xbf16, #tpu.memory_space<vmem>>, vector<1x8x8x16xbf16>
    %324 = vector.shape_cast %323 : vector<1x8x8x16xbf16> to vector<8x8x16xbf16>
    %325 = vector.shape_cast %324 : vector<8x8x16xbf16> to vector<64x16xbf16>
    %c0_321 = arith.constant 0 : index
    %c28 = arith.constant 28 : index
    %c0_322 = arith.constant 0 : index
    %c0_323 = arith.constant 0 : index
    %326 = vector.load %arg2[%c0_321, %c28, %c0_322, %c0_323] : memref<1x144x9x16xbf16, #tpu.memory_space<vmem>>, vector<1x8x8x16xbf16>
    %327 = vector.shape_cast %326 : vector<1x8x8x16xbf16> to vector<8x8x16xbf16>
    %328 = vector.shape_cast %327 : vector<8x8x16xbf16> to vector<64x16xbf16>
    %329 = tpu.concatenate %319, %322, %325, %328 in 0 : vector<64x16xbf16>, vector<64x16xbf16>, vector<64x16xbf16>, vector<64x16xbf16> -> vector<256x16xbf16>
    %c11 = arith.constant 11 : index
    %c0_324 = arith.constant 0 : index
    %c0_325 = arith.constant 0 : index
    %330 = vector.load %arg7[%c11, %c0_324, %c0_325] : memref<25x16x32xbf16, #tpu.memory_space<vmem>>, vector<1x16x32xbf16>
    %331 = vector.shape_cast %330 : vector<1x16x32xbf16> to vector<16x32xbf16>
    %cst_326 = arith.constant dense<0.000000e+00> : vector<256x32xf32>
    %332 = tpu.matmul %329, %331, %cst_326 {dimension_numbers = #tpu.dot_dimension_numbers<[1], [0], [0], [1], [0, 0, 1, 1], [], []>} : vector<256x16xbf16>, vector<16x32xbf16>, vector<256x32xf32> -> vector<256x32xf32>
    %333 = arith.addf %316, %332 : vector<256x32xf32>
    %c0_327 = arith.constant 0 : index
    %c90_328 = arith.constant 90 : index
    %c0_329 = arith.constant 0 : index
    %c0_330 = arith.constant 0 : index
    %334 = vector.load %arg2[%c0_327, %c90_328, %c0_329, %c0_330] : memref<1x144x9x16xbf16, #tpu.memory_space<vmem>>, vector<1x8x8x16xbf16>
    %335 = vector.shape_cast %334 : vector<1x8x8x16xbf16> to vector<8x8x16xbf16>
    %336 = vector.shape_cast %335 : vector<8x8x16xbf16> to vector<64x16xbf16>
    %c0_331 = arith.constant 0 : index
    %c72_332 = arith.constant 72 : index
    %c1_333 = arith.constant 1 : index
    %c0_334 = arith.constant 0 : index
    %337 = vector.load %arg2[%c0_331, %c72_332, %c1_333, %c0_334] : memref<1x144x9x16xbf16, #tpu.memory_space<vmem>>, vector<1x8x8x16xbf16>
    %338 = vector.shape_cast %337 : vector<1x8x8x16xbf16> to vector<8x8x16xbf16>
    %339 = vector.shape_cast %338 : vector<8x8x16xbf16> to vector<64x16xbf16>
    %c0_335 = arith.constant 0 : index
    %c19_336 = arith.constant 19 : index
    %c0_337 = arith.constant 0 : index
    %c0_338 = arith.constant 0 : index
    %340 = vector.load %arg2[%c0_335, %c19_336, %c0_337, %c0_338] : memref<1x144x9x16xbf16, #tpu.memory_space<vmem>>, vector<1x8x8x16xbf16>
    %341 = vector.shape_cast %340 : vector<1x8x8x16xbf16> to vector<8x8x16xbf16>
    %342 = vector.shape_cast %341 : vector<8x8x16xbf16> to vector<64x16xbf16>
    %c0_339 = arith.constant 0 : index
    %c1_340 = arith.constant 1 : index
    %c1_341 = arith.constant 1 : index
    %c0_342 = arith.constant 0 : index
    %343 = vector.load %arg2[%c0_339, %c1_340, %c1_341, %c0_342] : memref<1x144x9x16xbf16, #tpu.memory_space<vmem>>, vector<1x8x8x16xbf16>
    %344 = vector.shape_cast %343 : vector<1x8x8x16xbf16> to vector<8x8x16xbf16>
    %345 = vector.shape_cast %344 : vector<8x8x16xbf16> to vector<64x16xbf16>
    %346 = tpu.concatenate %336, %339, %342, %345 in 0 : vector<64x16xbf16>, vector<64x16xbf16>, vector<64x16xbf16>, vector<64x16xbf16> -> vector<256x16xbf16>
    %c12 = arith.constant 12 : index
    %c0_343 = arith.constant 0 : index
    %c0_344 = arith.constant 0 : index
    %347 = vector.load %arg7[%c12, %c0_343, %c0_344] : memref<25x16x32xbf16, #tpu.memory_space<vmem>>, vector<1x16x32xbf16>
    %348 = vector.shape_cast %347 : vector<1x16x32xbf16> to vector<16x32xbf16>
    %cst_345 = arith.constant dense<0.000000e+00> : vector<256x32xf32>
    %349 = tpu.matmul %346, %348, %cst_345 {dimension_numbers = #tpu.dot_dimension_numbers<[1], [0], [0], [1], [0, 0, 1, 1], [], []>} : vector<256x16xbf16>, vector<16x32xbf16>, vector<256x32xf32> -> vector<256x32xf32>
    %350 = arith.addf %333, %349 : vector<256x32xf32>
    %c0_346 = arith.constant 0 : index
    %c99_347 = arith.constant 99 : index
    %c0_348 = arith.constant 0 : index
    %c0_349 = arith.constant 0 : index
    %351 = vector.load %arg2[%c0_346, %c99_347, %c0_348, %c0_349] : memref<1x144x9x16xbf16, #tpu.memory_space<vmem>>, vector<1x8x8x16xbf16>
    %352 = vector.shape_cast %351 : vector<1x8x8x16xbf16> to vector<8x8x16xbf16>
    %353 = vector.shape_cast %352 : vector<8x8x16xbf16> to vector<64x16xbf16>
    %c0_350 = arith.constant 0 : index
    %c81_351 = arith.constant 81 : index
    %c1_352 = arith.constant 1 : index
    %c0_353 = arith.constant 0 : index
    %354 = vector.load %arg2[%c0_350, %c81_351, %c1_352, %c0_353] : memref<1x144x9x16xbf16, #tpu.memory_space<vmem>>, vector<1x8x8x16xbf16>
    %355 = vector.shape_cast %354 : vector<1x8x8x16xbf16> to vector<8x8x16xbf16>
    %356 = vector.shape_cast %355 : vector<8x8x16xbf16> to vector<64x16xbf16>
    %c0_354 = arith.constant 0 : index
    %c28_355 = arith.constant 28 : index
    %c0_356 = arith.constant 0 : index
    %c0_357 = arith.constant 0 : index
    %357 = vector.load %arg2[%c0_354, %c28_355, %c0_356, %c0_357] : memref<1x144x9x16xbf16, #tpu.memory_space<vmem>>, vector<1x8x8x16xbf16>
    %358 = vector.shape_cast %357 : vector<1x8x8x16xbf16> to vector<8x8x16xbf16>
    %359 = vector.shape_cast %358 : vector<8x8x16xbf16> to vector<64x16xbf16>
    %c0_358 = arith.constant 0 : index
    %c10_359 = arith.constant 10 : index
    %c1_360 = arith.constant 1 : index
    %c0_361 = arith.constant 0 : index
    %360 = vector.load %arg2[%c0_358, %c10_359, %c1_360, %c0_361] : memref<1x144x9x16xbf16, #tpu.memory_space<vmem>>, vector<1x8x8x16xbf16>
    %361 = vector.shape_cast %360 : vector<1x8x8x16xbf16> to vector<8x8x16xbf16>
    %362 = vector.shape_cast %361 : vector<8x8x16xbf16> to vector<64x16xbf16>
    %363 = tpu.concatenate %353, %356, %359, %362 in 0 : vector<64x16xbf16>, vector<64x16xbf16>, vector<64x16xbf16>, vector<64x16xbf16> -> vector<256x16xbf16>
    %c13 = arith.constant 13 : index
    %c0_362 = arith.constant 0 : index
    %c0_363 = arith.constant 0 : index
    %364 = vector.load %arg7[%c13, %c0_362, %c0_363] : memref<25x16x32xbf16, #tpu.memory_space<vmem>>, vector<1x16x32xbf16>
    %365 = vector.shape_cast %364 : vector<1x16x32xbf16> to vector<16x32xbf16>
    %cst_364 = arith.constant dense<0.000000e+00> : vector<256x32xf32>
    %366 = tpu.matmul %363, %365, %cst_364 {dimension_numbers = #tpu.dot_dimension_numbers<[1], [0], [0], [1], [0, 0, 1, 1], [], []>} : vector<256x16xbf16>, vector<16x32xbf16>, vector<256x32xf32> -> vector<256x32xf32>
    %367 = arith.addf %350, %366 : vector<256x32xf32>
    %c0_365 = arith.constant 0 : index
    %c72_366 = arith.constant 72 : index
    %c1_367 = arith.constant 1 : index
    %c0_368 = arith.constant 0 : index
    %368 = vector.load %arg2[%c0_365, %c72_366, %c1_367, %c0_368] : memref<1x144x9x16xbf16, #tpu.memory_space<vmem>>, vector<1x8x8x16xbf16>
    %369 = vector.shape_cast %368 : vector<1x8x8x16xbf16> to vector<8x8x16xbf16>
    %370 = vector.shape_cast %369 : vector<8x8x16xbf16> to vector<64x16xbf16>
    %c0_369 = arith.constant 0 : index
    %c90_370 = arith.constant 90 : index
    %c1_371 = arith.constant 1 : index
    %c0_372 = arith.constant 0 : index
    %371 = vector.load %arg2[%c0_369, %c90_370, %c1_371, %c0_372] : memref<1x144x9x16xbf16, #tpu.memory_space<vmem>>, vector<1x8x8x16xbf16>
    %372 = vector.shape_cast %371 : vector<1x8x8x16xbf16> to vector<8x8x16xbf16>
    %373 = vector.shape_cast %372 : vector<8x8x16xbf16> to vector<64x16xbf16>
    %c0_373 = arith.constant 0 : index
    %c1_374 = arith.constant 1 : index
    %c1_375 = arith.constant 1 : index
    %c0_376 = arith.constant 0 : index
    %374 = vector.load %arg2[%c0_373, %c1_374, %c1_375, %c0_376] : memref<1x144x9x16xbf16, #tpu.memory_space<vmem>>, vector<1x8x8x16xbf16>
    %375 = vector.shape_cast %374 : vector<1x8x8x16xbf16> to vector<8x8x16xbf16>
    %376 = vector.shape_cast %375 : vector<8x8x16xbf16> to vector<64x16xbf16>
    %c0_377 = arith.constant 0 : index
    %c19_378 = arith.constant 19 : index
    %c1_379 = arith.constant 1 : index
    %c0_380 = arith.constant 0 : index
    %377 = vector.load %arg2[%c0_377, %c19_378, %c1_379, %c0_380] : memref<1x144x9x16xbf16, #tpu.memory_space<vmem>>, vector<1x8x8x16xbf16>
    %378 = vector.shape_cast %377 : vector<1x8x8x16xbf16> to vector<8x8x16xbf16>
    %379 = vector.shape_cast %378 : vector<8x8x16xbf16> to vector<64x16xbf16>
    %380 = tpu.concatenate %370, %373, %376, %379 in 0 : vector<64x16xbf16>, vector<64x16xbf16>, vector<64x16xbf16>, vector<64x16xbf16> -> vector<256x16xbf16>
    %c14 = arith.constant 14 : index
    %c0_381 = arith.constant 0 : index
    %c0_382 = arith.constant 0 : index
    %381 = vector.load %arg7[%c14, %c0_381, %c0_382] : memref<25x16x32xbf16, #tpu.memory_space<vmem>>, vector<1x16x32xbf16>
    %382 = vector.shape_cast %381 : vector<1x16x32xbf16> to vector<16x32xbf16>
    %cst_383 = arith.constant dense<0.000000e+00> : vector<256x32xf32>
    %383 = tpu.matmul %380, %382, %cst_383 {dimension_numbers = #tpu.dot_dimension_numbers<[1], [0], [0], [1], [0, 0, 1, 1], [], []>} : vector<256x16xbf16>, vector<16x32xbf16>, vector<256x32xf32> -> vector<256x32xf32>
    %384 = arith.addf %367, %383 : vector<256x32xf32>
    %c0_384 = arith.constant 0 : index
    %c108_385 = arith.constant 108 : index
    %c0_386 = arith.constant 0 : index
    %c0_387 = arith.constant 0 : index
    %385 = vector.load %arg2[%c0_384, %c108_385, %c0_386, %c0_387] : memref<1x144x9x16xbf16, #tpu.memory_space<vmem>>, vector<1x8x8x16xbf16>
    %386 = vector.shape_cast %385 : vector<1x8x8x16xbf16> to vector<8x8x16xbf16>
    %387 = vector.shape_cast %386 : vector<8x8x16xbf16> to vector<64x16xbf16>
    %c0_388 = arith.constant 0 : index
    %c126_389 = arith.constant 126 : index
    %c0_390 = arith.constant 0 : index
    %c0_391 = arith.constant 0 : index
    %388 = vector.load %arg2[%c0_388, %c126_389, %c0_390, %c0_391] : memref<1x144x9x16xbf16, #tpu.memory_space<vmem>>, vector<1x8x8x16xbf16>
    %389 = vector.shape_cast %388 : vector<1x8x8x16xbf16> to vector<8x8x16xbf16>
    %390 = vector.shape_cast %389 : vector<8x8x16xbf16> to vector<64x16xbf16>
    %c0_392 = arith.constant 0 : index
    %c37 = arith.constant 37 : index
    %c0_393 = arith.constant 0 : index
    %c0_394 = arith.constant 0 : index
    %391 = vector.load %arg2[%c0_392, %c37, %c0_393, %c0_394] : memref<1x144x9x16xbf16, #tpu.memory_space<vmem>>, vector<1x8x8x16xbf16>
    %392 = vector.shape_cast %391 : vector<1x8x8x16xbf16> to vector<8x8x16xbf16>
    %393 = vector.shape_cast %392 : vector<8x8x16xbf16> to vector<64x16xbf16>
    %c0_395 = arith.constant 0 : index
    %c55 = arith.constant 55 : index
    %c0_396 = arith.constant 0 : index
    %c0_397 = arith.constant 0 : index
    %394 = vector.load %arg2[%c0_395, %c55, %c0_396, %c0_397] : memref<1x144x9x16xbf16, #tpu.memory_space<vmem>>, vector<1x8x8x16xbf16>
    %395 = vector.shape_cast %394 : vector<1x8x8x16xbf16> to vector<8x8x16xbf16>
    %396 = vector.shape_cast %395 : vector<8x8x16xbf16> to vector<64x16xbf16>
    %397 = tpu.concatenate %387, %390, %393, %396 in 0 : vector<64x16xbf16>, vector<64x16xbf16>, vector<64x16xbf16>, vector<64x16xbf16> -> vector<256x16xbf16>
    %c15 = arith.constant 15 : index
    %c0_398 = arith.constant 0 : index
    %c0_399 = arith.constant 0 : index
    %398 = vector.load %arg7[%c15, %c0_398, %c0_399] : memref<25x16x32xbf16, #tpu.memory_space<vmem>>, vector<1x16x32xbf16>
    %399 = vector.shape_cast %398 : vector<1x16x32xbf16> to vector<16x32xbf16>
    %cst_400 = arith.constant dense<0.000000e+00> : vector<256x32xf32>
    %400 = tpu.matmul %397, %399, %cst_400 {dimension_numbers = #tpu.dot_dimension_numbers<[1], [0], [0], [1], [0, 0, 1, 1], [], []>} : vector<256x16xbf16>, vector<16x32xbf16>, vector<256x32xf32> -> vector<256x32xf32>
    %401 = arith.addf %384, %400 : vector<256x32xf32>
    %c0_401 = arith.constant 0 : index
    %c117_402 = arith.constant 117 : index
    %c0_403 = arith.constant 0 : index
    %c0_404 = arith.constant 0 : index
    %402 = vector.load %arg2[%c0_401, %c117_402, %c0_403, %c0_404] : memref<1x144x9x16xbf16, #tpu.memory_space<vmem>>, vector<1x8x8x16xbf16>
    %403 = vector.shape_cast %402 : vector<1x8x8x16xbf16> to vector<8x8x16xbf16>
    %404 = vector.shape_cast %403 : vector<8x8x16xbf16> to vector<64x16xbf16>
    %c0_405 = arith.constant 0 : index
    %c135_406 = arith.constant 135 : index
    %c0_407 = arith.constant 0 : index
    %c0_408 = arith.constant 0 : index
    %405 = vector.load %arg2[%c0_405, %c135_406, %c0_407, %c0_408] : memref<1x144x9x16xbf16, #tpu.memory_space<vmem>>, vector<1x8x8x16xbf16>
    %406 = vector.shape_cast %405 : vector<1x8x8x16xbf16> to vector<8x8x16xbf16>
    %407 = vector.shape_cast %406 : vector<8x8x16xbf16> to vector<64x16xbf16>
    %c0_409 = arith.constant 0 : index
    %c46 = arith.constant 46 : index
    %c0_410 = arith.constant 0 : index
    %c0_411 = arith.constant 0 : index
    %408 = vector.load %arg2[%c0_409, %c46, %c0_410, %c0_411] : memref<1x144x9x16xbf16, #tpu.memory_space<vmem>>, vector<1x8x8x16xbf16>
    %409 = vector.shape_cast %408 : vector<1x8x8x16xbf16> to vector<8x8x16xbf16>
    %410 = vector.shape_cast %409 : vector<8x8x16xbf16> to vector<64x16xbf16>
    %c0_412 = arith.constant 0 : index
    %c64 = arith.constant 64 : index
    %c0_413 = arith.constant 0 : index
    %c0_414 = arith.constant 0 : index
    %411 = vector.load %arg2[%c0_412, %c64, %c0_413, %c0_414] : memref<1x144x9x16xbf16, #tpu.memory_space<vmem>>, vector<1x8x8x16xbf16>
    %412 = vector.shape_cast %411 : vector<1x8x8x16xbf16> to vector<8x8x16xbf16>
    %413 = vector.shape_cast %412 : vector<8x8x16xbf16> to vector<64x16xbf16>
    %414 = tpu.concatenate %404, %407, %410, %413 in 0 : vector<64x16xbf16>, vector<64x16xbf16>, vector<64x16xbf16>, vector<64x16xbf16> -> vector<256x16xbf16>
    %c16 = arith.constant 16 : index
    %c0_415 = arith.constant 0 : index
    %c0_416 = arith.constant 0 : index
    %415 = vector.load %arg7[%c16, %c0_415, %c0_416] : memref<25x16x32xbf16, #tpu.memory_space<vmem>>, vector<1x16x32xbf16>
    %416 = vector.shape_cast %415 : vector<1x16x32xbf16> to vector<16x32xbf16>
    %cst_417 = arith.constant dense<0.000000e+00> : vector<256x32xf32>
    %417 = tpu.matmul %414, %416, %cst_417 {dimension_numbers = #tpu.dot_dimension_numbers<[1], [0], [0], [1], [0, 0, 1, 1], [], []>} : vector<256x16xbf16>, vector<16x32xbf16>, vector<256x32xf32> -> vector<256x32xf32>
    %418 = arith.addf %401, %417 : vector<256x32xf32>
    %c0_418 = arith.constant 0 : index
    %c126_419 = arith.constant 126 : index
    %c0_420 = arith.constant 0 : index
    %c0_421 = arith.constant 0 : index
    %419 = vector.load %arg2[%c0_418, %c126_419, %c0_420, %c0_421] : memref<1x144x9x16xbf16, #tpu.memory_space<vmem>>, vector<1x8x8x16xbf16>
    %420 = vector.shape_cast %419 : vector<1x8x8x16xbf16> to vector<8x8x16xbf16>
    %421 = vector.shape_cast %420 : vector<8x8x16xbf16> to vector<64x16xbf16>
    %c0_422 = arith.constant 0 : index
    %c108_423 = arith.constant 108 : index
    %c1_424 = arith.constant 1 : index
    %c0_425 = arith.constant 0 : index
    %422 = vector.load %arg2[%c0_422, %c108_423, %c1_424, %c0_425] : memref<1x144x9x16xbf16, #tpu.memory_space<vmem>>, vector<1x8x8x16xbf16>
    %423 = vector.shape_cast %422 : vector<1x8x8x16xbf16> to vector<8x8x16xbf16>
    %424 = vector.shape_cast %423 : vector<8x8x16xbf16> to vector<64x16xbf16>
    %c0_426 = arith.constant 0 : index
    %c55_427 = arith.constant 55 : index
    %c0_428 = arith.constant 0 : index
    %c0_429 = arith.constant 0 : index
    %425 = vector.load %arg2[%c0_426, %c55_427, %c0_428, %c0_429] : memref<1x144x9x16xbf16, #tpu.memory_space<vmem>>, vector<1x8x8x16xbf16>
    %426 = vector.shape_cast %425 : vector<1x8x8x16xbf16> to vector<8x8x16xbf16>
    %427 = vector.shape_cast %426 : vector<8x8x16xbf16> to vector<64x16xbf16>
    %c0_430 = arith.constant 0 : index
    %c37_431 = arith.constant 37 : index
    %c1_432 = arith.constant 1 : index
    %c0_433 = arith.constant 0 : index
    %428 = vector.load %arg2[%c0_430, %c37_431, %c1_432, %c0_433] : memref<1x144x9x16xbf16, #tpu.memory_space<vmem>>, vector<1x8x8x16xbf16>
    %429 = vector.shape_cast %428 : vector<1x8x8x16xbf16> to vector<8x8x16xbf16>
    %430 = vector.shape_cast %429 : vector<8x8x16xbf16> to vector<64x16xbf16>
    %431 = tpu.concatenate %421, %424, %427, %430 in 0 : vector<64x16xbf16>, vector<64x16xbf16>, vector<64x16xbf16>, vector<64x16xbf16> -> vector<256x16xbf16>
    %c17 = arith.constant 17 : index
    %c0_434 = arith.constant 0 : index
    %c0_435 = arith.constant 0 : index
    %432 = vector.load %arg7[%c17, %c0_434, %c0_435] : memref<25x16x32xbf16, #tpu.memory_space<vmem>>, vector<1x16x32xbf16>
    %433 = vector.shape_cast %432 : vector<1x16x32xbf16> to vector<16x32xbf16>
    %cst_436 = arith.constant dense<0.000000e+00> : vector<256x32xf32>
    %434 = tpu.matmul %431, %433, %cst_436 {dimension_numbers = #tpu.dot_dimension_numbers<[1], [0], [0], [1], [0, 0, 1, 1], [], []>} : vector<256x16xbf16>, vector<16x32xbf16>, vector<256x32xf32> -> vector<256x32xf32>
    %435 = arith.addf %418, %434 : vector<256x32xf32>
    %c0_437 = arith.constant 0 : index
    %c135_438 = arith.constant 135 : index
    %c0_439 = arith.constant 0 : index
    %c0_440 = arith.constant 0 : index
    %436 = vector.load %arg2[%c0_437, %c135_438, %c0_439, %c0_440] : memref<1x144x9x16xbf16, #tpu.memory_space<vmem>>, vector<1x8x8x16xbf16>
    %437 = vector.shape_cast %436 : vector<1x8x8x16xbf16> to vector<8x8x16xbf16>
    %438 = vector.shape_cast %437 : vector<8x8x16xbf16> to vector<64x16xbf16>
    %c0_441 = arith.constant 0 : index
    %c117_442 = arith.constant 117 : index
    %c1_443 = arith.constant 1 : index
    %c0_444 = arith.constant 0 : index
    %439 = vector.load %arg2[%c0_441, %c117_442, %c1_443, %c0_444] : memref<1x144x9x16xbf16, #tpu.memory_space<vmem>>, vector<1x8x8x16xbf16>
    %440 = vector.shape_cast %439 : vector<1x8x8x16xbf16> to vector<8x8x16xbf16>
    %441 = vector.shape_cast %440 : vector<8x8x16xbf16> to vector<64x16xbf16>
    %c0_445 = arith.constant 0 : index
    %c64_446 = arith.constant 64 : index
    %c0_447 = arith.constant 0 : index
    %c0_448 = arith.constant 0 : index
    %442 = vector.load %arg2[%c0_445, %c64_446, %c0_447, %c0_448] : memref<1x144x9x16xbf16, #tpu.memory_space<vmem>>, vector<1x8x8x16xbf16>
    %443 = vector.shape_cast %442 : vector<1x8x8x16xbf16> to vector<8x8x16xbf16>
    %444 = vector.shape_cast %443 : vector<8x8x16xbf16> to vector<64x16xbf16>
    %c0_449 = arith.constant 0 : index
    %c46_450 = arith.constant 46 : index
    %c1_451 = arith.constant 1 : index
    %c0_452 = arith.constant 0 : index
    %445 = vector.load %arg2[%c0_449, %c46_450, %c1_451, %c0_452] : memref<1x144x9x16xbf16, #tpu.memory_space<vmem>>, vector<1x8x8x16xbf16>
    %446 = vector.shape_cast %445 : vector<1x8x8x16xbf16> to vector<8x8x16xbf16>
    %447 = vector.shape_cast %446 : vector<8x8x16xbf16> to vector<64x16xbf16>
    %448 = tpu.concatenate %438, %441, %444, %447 in 0 : vector<64x16xbf16>, vector<64x16xbf16>, vector<64x16xbf16>, vector<64x16xbf16> -> vector<256x16xbf16>
    %c18_453 = arith.constant 18 : index
    %c0_454 = arith.constant 0 : index
    %c0_455 = arith.constant 0 : index
    %449 = vector.load %arg7[%c18_453, %c0_454, %c0_455] : memref<25x16x32xbf16, #tpu.memory_space<vmem>>, vector<1x16x32xbf16>
    %450 = vector.shape_cast %449 : vector<1x16x32xbf16> to vector<16x32xbf16>
    %cst_456 = arith.constant dense<0.000000e+00> : vector<256x32xf32>
    %451 = tpu.matmul %448, %450, %cst_456 {dimension_numbers = #tpu.dot_dimension_numbers<[1], [0], [0], [1], [0, 0, 1, 1], [], []>} : vector<256x16xbf16>, vector<16x32xbf16>, vector<256x32xf32> -> vector<256x32xf32>
    %452 = arith.addf %435, %451 : vector<256x32xf32>
    %c0_457 = arith.constant 0 : index
    %c108_458 = arith.constant 108 : index
    %c1_459 = arith.constant 1 : index
    %c0_460 = arith.constant 0 : index
    %453 = vector.load %arg2[%c0_457, %c108_458, %c1_459, %c0_460] : memref<1x144x9x16xbf16, #tpu.memory_space<vmem>>, vector<1x8x8x16xbf16>
    %454 = vector.shape_cast %453 : vector<1x8x8x16xbf16> to vector<8x8x16xbf16>
    %455 = vector.shape_cast %454 : vector<8x8x16xbf16> to vector<64x16xbf16>
    %c0_461 = arith.constant 0 : index
    %c126_462 = arith.constant 126 : index
    %c1_463 = arith.constant 1 : index
    %c0_464 = arith.constant 0 : index
    %456 = vector.load %arg2[%c0_461, %c126_462, %c1_463, %c0_464] : memref<1x144x9x16xbf16, #tpu.memory_space<vmem>>, vector<1x8x8x16xbf16>
    %457 = vector.shape_cast %456 : vector<1x8x8x16xbf16> to vector<8x8x16xbf16>
    %458 = vector.shape_cast %457 : vector<8x8x16xbf16> to vector<64x16xbf16>
    %c0_465 = arith.constant 0 : index
    %c37_466 = arith.constant 37 : index
    %c1_467 = arith.constant 1 : index
    %c0_468 = arith.constant 0 : index
    %459 = vector.load %arg2[%c0_465, %c37_466, %c1_467, %c0_468] : memref<1x144x9x16xbf16, #tpu.memory_space<vmem>>, vector<1x8x8x16xbf16>
    %460 = vector.shape_cast %459 : vector<1x8x8x16xbf16> to vector<8x8x16xbf16>
    %461 = vector.shape_cast %460 : vector<8x8x16xbf16> to vector<64x16xbf16>
    %c0_469 = arith.constant 0 : index
    %c55_470 = arith.constant 55 : index
    %c1_471 = arith.constant 1 : index
    %c0_472 = arith.constant 0 : index
    %462 = vector.load %arg2[%c0_469, %c55_470, %c1_471, %c0_472] : memref<1x144x9x16xbf16, #tpu.memory_space<vmem>>, vector<1x8x8x16xbf16>
    %463 = vector.shape_cast %462 : vector<1x8x8x16xbf16> to vector<8x8x16xbf16>
    %464 = vector.shape_cast %463 : vector<8x8x16xbf16> to vector<64x16xbf16>
    %465 = tpu.concatenate %455, %458, %461, %464 in 0 : vector<64x16xbf16>, vector<64x16xbf16>, vector<64x16xbf16>, vector<64x16xbf16> -> vector<256x16xbf16>
    %c19_473 = arith.constant 19 : index
    %c0_474 = arith.constant 0 : index
    %c0_475 = arith.constant 0 : index
    %466 = vector.load %arg7[%c19_473, %c0_474, %c0_475] : memref<25x16x32xbf16, #tpu.memory_space<vmem>>, vector<1x16x32xbf16>
    %467 = vector.shape_cast %466 : vector<1x16x32xbf16> to vector<16x32xbf16>
    %cst_476 = arith.constant dense<0.000000e+00> : vector<256x32xf32>
    %468 = tpu.matmul %465, %467, %cst_476 {dimension_numbers = #tpu.dot_dimension_numbers<[1], [0], [0], [1], [0, 0, 1, 1], [], []>} : vector<256x16xbf16>, vector<16x32xbf16>, vector<256x32xf32> -> vector<256x32xf32>
    %469 = arith.addf %452, %468 : vector<256x32xf32>
    %c0_477 = arith.constant 0 : index
    %c1_478 = arith.constant 1 : index
    %c0_479 = arith.constant 0 : index
    %c0_480 = arith.constant 0 : index
    %470 = vector.load %arg2[%c0_477, %c1_478, %c0_479, %c0_480] : memref<1x144x9x16xbf16, #tpu.memory_space<vmem>>, vector<1x8x8x16xbf16>
    %471 = vector.shape_cast %470 : vector<1x8x8x16xbf16> to vector<8x8x16xbf16>
    %472 = vector.shape_cast %471 : vector<8x8x16xbf16> to vector<64x16xbf16>
    %c0_481 = arith.constant 0 : index
    %c19_482 = arith.constant 19 : index
    %c0_483 = arith.constant 0 : index
    %c0_484 = arith.constant 0 : index
    %473 = vector.load %arg2[%c0_481, %c19_482, %c0_483, %c0_484] : memref<1x144x9x16xbf16, #tpu.memory_space<vmem>>, vector<1x8x8x16xbf16>
    %474 = vector.shape_cast %473 : vector<1x8x8x16xbf16> to vector<8x8x16xbf16>
    %475 = vector.shape_cast %474 : vector<8x8x16xbf16> to vector<64x16xbf16>
    %c0_485 = arith.constant 0 : index
    %c73 = arith.constant 73 : index
    %c0_486 = arith.constant 0 : index
    %c0_487 = arith.constant 0 : index
    %476 = vector.load %arg2[%c0_485, %c73, %c0_486, %c0_487] : memref<1x144x9x16xbf16, #tpu.memory_space<vmem>>, vector<1x8x8x16xbf16>
    %477 = vector.shape_cast %476 : vector<1x8x8x16xbf16> to vector<8x8x16xbf16>
    %478 = vector.shape_cast %477 : vector<8x8x16xbf16> to vector<64x16xbf16>
    %c0_488 = arith.constant 0 : index
    %c91 = arith.constant 91 : index
    %c0_489 = arith.constant 0 : index
    %c0_490 = arith.constant 0 : index
    %479 = vector.load %arg2[%c0_488, %c91, %c0_489, %c0_490] : memref<1x144x9x16xbf16, #tpu.memory_space<vmem>>, vector<1x8x8x16xbf16>
    %480 = vector.shape_cast %479 : vector<1x8x8x16xbf16> to vector<8x8x16xbf16>
    %481 = vector.shape_cast %480 : vector<8x8x16xbf16> to vector<64x16xbf16>
    %482 = tpu.concatenate %472, %475, %478, %481 in 0 : vector<64x16xbf16>, vector<64x16xbf16>, vector<64x16xbf16>, vector<64x16xbf16> -> vector<256x16xbf16>
    %c20 = arith.constant 20 : index
    %c0_491 = arith.constant 0 : index
    %c0_492 = arith.constant 0 : index
    %483 = vector.load %arg7[%c20, %c0_491, %c0_492] : memref<25x16x32xbf16, #tpu.memory_space<vmem>>, vector<1x16x32xbf16>
    %484 = vector.shape_cast %483 : vector<1x16x32xbf16> to vector<16x32xbf16>
    %cst_493 = arith.constant dense<0.000000e+00> : vector<256x32xf32>
    %485 = tpu.matmul %482, %484, %cst_493 {dimension_numbers = #tpu.dot_dimension_numbers<[1], [0], [0], [1], [0, 0, 1, 1], [], []>} : vector<256x16xbf16>, vector<16x32xbf16>, vector<256x32xf32> -> vector<256x32xf32>
    %486 = arith.addf %469, %485 : vector<256x32xf32>
    %c0_494 = arith.constant 0 : index
    %c10_495 = arith.constant 10 : index
    %c0_496 = arith.constant 0 : index
    %c0_497 = arith.constant 0 : index
    %487 = vector.load %arg2[%c0_494, %c10_495, %c0_496, %c0_497] : memref<1x144x9x16xbf16, #tpu.memory_space<vmem>>, vector<1x8x8x16xbf16>
    %488 = vector.shape_cast %487 : vector<1x8x8x16xbf16> to vector<8x8x16xbf16>
    %489 = vector.shape_cast %488 : vector<8x8x16xbf16> to vector<64x16xbf16>
    %c0_498 = arith.constant 0 : index
    %c28_499 = arith.constant 28 : index
    %c0_500 = arith.constant 0 : index
    %c0_501 = arith.constant 0 : index
    %490 = vector.load %arg2[%c0_498, %c28_499, %c0_500, %c0_501] : memref<1x144x9x16xbf16, #tpu.memory_space<vmem>>, vector<1x8x8x16xbf16>
    %491 = vector.shape_cast %490 : vector<1x8x8x16xbf16> to vector<8x8x16xbf16>
    %492 = vector.shape_cast %491 : vector<8x8x16xbf16> to vector<64x16xbf16>
    %c0_502 = arith.constant 0 : index
    %c82 = arith.constant 82 : index
    %c0_503 = arith.constant 0 : index
    %c0_504 = arith.constant 0 : index
    %493 = vector.load %arg2[%c0_502, %c82, %c0_503, %c0_504] : memref<1x144x9x16xbf16, #tpu.memory_space<vmem>>, vector<1x8x8x16xbf16>
    %494 = vector.shape_cast %493 : vector<1x8x8x16xbf16> to vector<8x8x16xbf16>
    %495 = vector.shape_cast %494 : vector<8x8x16xbf16> to vector<64x16xbf16>
    %c0_505 = arith.constant 0 : index
    %c100 = arith.constant 100 : index
    %c0_506 = arith.constant 0 : index
    %c0_507 = arith.constant 0 : index
    %496 = vector.load %arg2[%c0_505, %c100, %c0_506, %c0_507] : memref<1x144x9x16xbf16, #tpu.memory_space<vmem>>, vector<1x8x8x16xbf16>
    %497 = vector.shape_cast %496 : vector<1x8x8x16xbf16> to vector<8x8x16xbf16>
    %498 = vector.shape_cast %497 : vector<8x8x16xbf16> to vector<64x16xbf16>
    %499 = tpu.concatenate %489, %492, %495, %498 in 0 : vector<64x16xbf16>, vector<64x16xbf16>, vector<64x16xbf16>, vector<64x16xbf16> -> vector<256x16xbf16>
    %c21 = arith.constant 21 : index
    %c0_508 = arith.constant 0 : index
    %c0_509 = arith.constant 0 : index
    %500 = vector.load %arg7[%c21, %c0_508, %c0_509] : memref<25x16x32xbf16, #tpu.memory_space<vmem>>, vector<1x16x32xbf16>
    %501 = vector.shape_cast %500 : vector<1x16x32xbf16> to vector<16x32xbf16>
    %cst_510 = arith.constant dense<0.000000e+00> : vector<256x32xf32>
    %502 = tpu.matmul %499, %501, %cst_510 {dimension_numbers = #tpu.dot_dimension_numbers<[1], [0], [0], [1], [0, 0, 1, 1], [], []>} : vector<256x16xbf16>, vector<16x32xbf16>, vector<256x32xf32> -> vector<256x32xf32>
    %503 = arith.addf %486, %502 : vector<256x32xf32>
    %c0_511 = arith.constant 0 : index
    %c19_512 = arith.constant 19 : index
    %c0_513 = arith.constant 0 : index
    %c0_514 = arith.constant 0 : index
    %504 = vector.load %arg2[%c0_511, %c19_512, %c0_513, %c0_514] : memref<1x144x9x16xbf16, #tpu.memory_space<vmem>>, vector<1x8x8x16xbf16>
    %505 = vector.shape_cast %504 : vector<1x8x8x16xbf16> to vector<8x8x16xbf16>
    %506 = vector.shape_cast %505 : vector<8x8x16xbf16> to vector<64x16xbf16>
    %c0_515 = arith.constant 0 : index
    %c1_516 = arith.constant 1 : index
    %c1_517 = arith.constant 1 : index
    %c0_518 = arith.constant 0 : index
    %507 = vector.load %arg2[%c0_515, %c1_516, %c1_517, %c0_518] : memref<1x144x9x16xbf16, #tpu.memory_space<vmem>>, vector<1x8x8x16xbf16>
    %508 = vector.shape_cast %507 : vector<1x8x8x16xbf16> to vector<8x8x16xbf16>
    %509 = vector.shape_cast %508 : vector<8x8x16xbf16> to vector<64x16xbf16>
    %c0_519 = arith.constant 0 : index
    %c91_520 = arith.constant 91 : index
    %c0_521 = arith.constant 0 : index
    %c0_522 = arith.constant 0 : index
    %510 = vector.load %arg2[%c0_519, %c91_520, %c0_521, %c0_522] : memref<1x144x9x16xbf16, #tpu.memory_space<vmem>>, vector<1x8x8x16xbf16>
    %511 = vector.shape_cast %510 : vector<1x8x8x16xbf16> to vector<8x8x16xbf16>
    %512 = vector.shape_cast %511 : vector<8x8x16xbf16> to vector<64x16xbf16>
    %c0_523 = arith.constant 0 : index
    %c73_524 = arith.constant 73 : index
    %c1_525 = arith.constant 1 : index
    %c0_526 = arith.constant 0 : index
    %513 = vector.load %arg2[%c0_523, %c73_524, %c1_525, %c0_526] : memref<1x144x9x16xbf16, #tpu.memory_space<vmem>>, vector<1x8x8x16xbf16>
    %514 = vector.shape_cast %513 : vector<1x8x8x16xbf16> to vector<8x8x16xbf16>
    %515 = vector.shape_cast %514 : vector<8x8x16xbf16> to vector<64x16xbf16>
    %516 = tpu.concatenate %506, %509, %512, %515 in 0 : vector<64x16xbf16>, vector<64x16xbf16>, vector<64x16xbf16>, vector<64x16xbf16> -> vector<256x16xbf16>
    %c22 = arith.constant 22 : index
    %c0_527 = arith.constant 0 : index
    %c0_528 = arith.constant 0 : index
    %517 = vector.load %arg7[%c22, %c0_527, %c0_528] : memref<25x16x32xbf16, #tpu.memory_space<vmem>>, vector<1x16x32xbf16>
    %518 = vector.shape_cast %517 : vector<1x16x32xbf16> to vector<16x32xbf16>
    %cst_529 = arith.constant dense<0.000000e+00> : vector<256x32xf32>
    %519 = tpu.matmul %516, %518, %cst_529 {dimension_numbers = #tpu.dot_dimension_numbers<[1], [0], [0], [1], [0, 0, 1, 1], [], []>} : vector<256x16xbf16>, vector<16x32xbf16>, vector<256x32xf32> -> vector<256x32xf32>
    %520 = arith.addf %503, %519 : vector<256x32xf32>
    %c0_530 = arith.constant 0 : index
    %c28_531 = arith.constant 28 : index
    %c0_532 = arith.constant 0 : index
    %c0_533 = arith.constant 0 : index
    %521 = vector.load %arg2[%c0_530, %c28_531, %c0_532, %c0_533] : memref<1x144x9x16xbf16, #tpu.memory_space<vmem>>, vector<1x8x8x16xbf16>
    %522 = vector.shape_cast %521 : vector<1x8x8x16xbf16> to vector<8x8x16xbf16>
    %523 = vector.shape_cast %522 : vector<8x8x16xbf16> to vector<64x16xbf16>
    %c0_534 = arith.constant 0 : index
    %c10_535 = arith.constant 10 : index
    %c1_536 = arith.constant 1 : index
    %c0_537 = arith.constant 0 : index
    %524 = vector.load %arg2[%c0_534, %c10_535, %c1_536, %c0_537] : memref<1x144x9x16xbf16, #tpu.memory_space<vmem>>, vector<1x8x8x16xbf16>
    %525 = vector.shape_cast %524 : vector<1x8x8x16xbf16> to vector<8x8x16xbf16>
    %526 = vector.shape_cast %525 : vector<8x8x16xbf16> to vector<64x16xbf16>
    %c0_538 = arith.constant 0 : index
    %c100_539 = arith.constant 100 : index
    %c0_540 = arith.constant 0 : index
    %c0_541 = arith.constant 0 : index
    %527 = vector.load %arg2[%c0_538, %c100_539, %c0_540, %c0_541] : memref<1x144x9x16xbf16, #tpu.memory_space<vmem>>, vector<1x8x8x16xbf16>
    %528 = vector.shape_cast %527 : vector<1x8x8x16xbf16> to vector<8x8x16xbf16>
    %529 = vector.shape_cast %528 : vector<8x8x16xbf16> to vector<64x16xbf16>
    %c0_542 = arith.constant 0 : index
    %c82_543 = arith.constant 82 : index
    %c1_544 = arith.constant 1 : index
    %c0_545 = arith.constant 0 : index
    %530 = vector.load %arg2[%c0_542, %c82_543, %c1_544, %c0_545] : memref<1x144x9x16xbf16, #tpu.memory_space<vmem>>, vector<1x8x8x16xbf16>
    %531 = vector.shape_cast %530 : vector<1x8x8x16xbf16> to vector<8x8x16xbf16>
    %532 = vector.shape_cast %531 : vector<8x8x16xbf16> to vector<64x16xbf16>
    %533 = tpu.concatenate %523, %526, %529, %532 in 0 : vector<64x16xbf16>, vector<64x16xbf16>, vector<64x16xbf16>, vector<64x16xbf16> -> vector<256x16xbf16>
    %c23 = arith.constant 23 : index
    %c0_546 = arith.constant 0 : index
    %c0_547 = arith.constant 0 : index
    %534 = vector.load %arg7[%c23, %c0_546, %c0_547] : memref<25x16x32xbf16, #tpu.memory_space<vmem>>, vector<1x16x32xbf16>
    %535 = vector.shape_cast %534 : vector<1x16x32xbf16> to vector<16x32xbf16>
    %cst_548 = arith.constant dense<0.000000e+00> : vector<256x32xf32>
    %536 = tpu.matmul %533, %535, %cst_548 {dimension_numbers = #tpu.dot_dimension_numbers<[1], [0], [0], [1], [0, 0, 1, 1], [], []>} : vector<256x16xbf16>, vector<16x32xbf16>, vector<256x32xf32> -> vector<256x32xf32>
    %537 = arith.addf %520, %536 : vector<256x32xf32>
    %c0_549 = arith.constant 0 : index
    %c1_550 = arith.constant 1 : index
    %c1_551 = arith.constant 1 : index
    %c0_552 = arith.constant 0 : index
    %538 = vector.load %arg2[%c0_549, %c1_550, %c1_551, %c0_552] : memref<1x144x9x16xbf16, #tpu.memory_space<vmem>>, vector<1x8x8x16xbf16>
    %539 = vector.shape_cast %538 : vector<1x8x8x16xbf16> to vector<8x8x16xbf16>
    %540 = vector.shape_cast %539 : vector<8x8x16xbf16> to vector<64x16xbf16>
    %c0_553 = arith.constant 0 : index
    %c19_554 = arith.constant 19 : index
    %c1_555 = arith.constant 1 : index
    %c0_556 = arith.constant 0 : index
    %541 = vector.load %arg2[%c0_553, %c19_554, %c1_555, %c0_556] : memref<1x144x9x16xbf16, #tpu.memory_space<vmem>>, vector<1x8x8x16xbf16>
    %542 = vector.shape_cast %541 : vector<1x8x8x16xbf16> to vector<8x8x16xbf16>
    %543 = vector.shape_cast %542 : vector<8x8x16xbf16> to vector<64x16xbf16>
    %c0_557 = arith.constant 0 : index
    %c73_558 = arith.constant 73 : index
    %c1_559 = arith.constant 1 : index
    %c0_560 = arith.constant 0 : index
    %544 = vector.load %arg2[%c0_557, %c73_558, %c1_559, %c0_560] : memref<1x144x9x16xbf16, #tpu.memory_space<vmem>>, vector<1x8x8x16xbf16>
    %545 = vector.shape_cast %544 : vector<1x8x8x16xbf16> to vector<8x8x16xbf16>
    %546 = vector.shape_cast %545 : vector<8x8x16xbf16> to vector<64x16xbf16>
    %c0_561 = arith.constant 0 : index
    %c91_562 = arith.constant 91 : index
    %c1_563 = arith.constant 1 : index
    %c0_564 = arith.constant 0 : index
    %547 = vector.load %arg2[%c0_561, %c91_562, %c1_563, %c0_564] : memref<1x144x9x16xbf16, #tpu.memory_space<vmem>>, vector<1x8x8x16xbf16>
    %548 = vector.shape_cast %547 : vector<1x8x8x16xbf16> to vector<8x8x16xbf16>
    %549 = vector.shape_cast %548 : vector<8x8x16xbf16> to vector<64x16xbf16>
    %550 = tpu.concatenate %540, %543, %546, %549 in 0 : vector<64x16xbf16>, vector<64x16xbf16>, vector<64x16xbf16>, vector<64x16xbf16> -> vector<256x16xbf16>
    %c24 = arith.constant 24 : index
    %c0_565 = arith.constant 0 : index
    %c0_566 = arith.constant 0 : index
    %551 = vector.load %arg7[%c24, %c0_565, %c0_566] : memref<25x16x32xbf16, #tpu.memory_space<vmem>>, vector<1x16x32xbf16>
    %552 = vector.shape_cast %551 : vector<1x16x32xbf16> to vector<16x32xbf16>
    %cst_567 = arith.constant dense<0.000000e+00> : vector<256x32xf32>
    %553 = tpu.matmul %550, %552, %cst_567 {dimension_numbers = #tpu.dot_dimension_numbers<[1], [0], [0], [1], [0, 0, 1, 1], [], []>} : vector<256x16xbf16>, vector<16x32xbf16>, vector<256x32xf32> -> vector<256x32xf32>
    %554 = arith.addf %537, %553 : vector<256x32xf32>
    %c0_568 = arith.constant 0 : index
    %c0_569 = arith.constant 0 : index
    %555 = vector.load %arg8[%c0_568, %c0_569] : memref<1x32xf32, #tpu.memory_space<vmem>>, vector<1x32xf32>
    %556 = vector.broadcast %555 : vector<1x32xf32> to vector<256x32xf32>
    %557 = arith.addf %554, %556 : vector<256x32xf32>
    %cst_570 = arith.constant 0.000000e+00 : f32
    %558 = vector.broadcast %cst_570 : f32 to vector<256x32xf32>
    %559 = arith.maximumf %557, %558 : vector<256x32xf32>
    %560 = arith.truncf %559 : vector<256x32xf32> to vector<256x32xbf16>
    %cst_571 = arith.constant 0.000000e+00 : bf16
    %561 = vector.broadcast %cst_571 : bf16 to vector<1x8x32xbf16>
    %cst_572 = arith.constant 0.000000e+00 : bf16
    %562 = vector.broadcast %cst_572 : bf16 to vector<9x1x32xbf16>
    %563 = vector.extract_strided_slice %560 {offsets = [0, 0], sizes = [64, 32], strides = [1, 1]} : vector<256x32xbf16> to vector<64x32xbf16>
    %564 = vector.shape_cast %563 : vector<64x32xbf16> to vector<8x8x32xbf16>
    %565 = tpu.concatenate %564, %561 in 0 : vector<8x8x32xbf16>, vector<1x8x32xbf16> -> vector<9x8x32xbf16>
    %566 = tpu.concatenate %565, %562 in 1 : vector<9x8x32xbf16>, vector<9x1x32xbf16> -> vector<9x9x32xbf16>
    %567 = vector.extract_strided_slice %560 {offsets = [64, 0], sizes = [64, 32], strides = [1, 1]} : vector<256x32xbf16> to vector<64x32xbf16>
    %568 = vector.shape_cast %567 : vector<64x32xbf16> to vector<8x8x32xbf16>
    %569 = tpu.concatenate %568, %561 in 0 : vector<8x8x32xbf16>, vector<1x8x32xbf16> -> vector<9x8x32xbf16>
    %570 = tpu.concatenate %562, %569 in 1 : vector<9x1x32xbf16>, vector<9x8x32xbf16> -> vector<9x9x32xbf16>
    %571 = vector.extract_strided_slice %560 {offsets = [128, 0], sizes = [64, 32], strides = [1, 1]} : vector<256x32xbf16> to vector<64x32xbf16>
    %572 = vector.shape_cast %571 : vector<64x32xbf16> to vector<8x8x32xbf16>
    %573 = tpu.concatenate %561, %572 in 0 : vector<1x8x32xbf16>, vector<8x8x32xbf16> -> vector<9x8x32xbf16>
    %574 = tpu.concatenate %573, %562 in 1 : vector<9x8x32xbf16>, vector<9x1x32xbf16> -> vector<9x9x32xbf16>
    %575 = vector.extract_strided_slice %560 {offsets = [192, 0], sizes = [64, 32], strides = [1, 1]} : vector<256x32xbf16> to vector<64x32xbf16>
    %576 = vector.shape_cast %575 : vector<64x32xbf16> to vector<8x8x32xbf16>
    %577 = tpu.concatenate %561, %576 in 0 : vector<1x8x32xbf16>, vector<8x8x32xbf16> -> vector<9x8x32xbf16>
    %578 = tpu.concatenate %562, %577 in 1 : vector<9x1x32xbf16>, vector<9x8x32xbf16> -> vector<9x9x32xbf16>
    %579 = vector.extract_strided_slice %578 {offsets = [0, 0, 0], sizes = [8, 8, 32], strides = [1, 1, 1]} : vector<9x9x32xbf16> to vector<8x8x32xbf16>
    %580 = vector.shape_cast %579 : vector<8x8x32xbf16> to vector<64x32xbf16>
    %c0_573 = arith.constant 0 : index
    %c0_574 = arith.constant 0 : index
    %c0_575 = arith.constant 0 : index
    %581 = vector.load %arg9[%c0_573, %c0_574, %c0_575] : memref<9x32x32xbf16, #tpu.memory_space<vmem>>, vector<1x32x32xbf16>
    %582 = vector.shape_cast %581 : vector<1x32x32xbf16> to vector<32x32xbf16>
    %cst_576 = arith.constant dense<0.000000e+00> : vector<64x32xf32>
    %583 = tpu.matmul %580, %582, %cst_576 {dimension_numbers = #tpu.dot_dimension_numbers<[1], [0], [0], [1], [0, 0, 1, 1], [], []>} : vector<64x32xbf16>, vector<32x32xbf16>, vector<64x32xf32> -> vector<64x32xf32>
    %584 = vector.extract_strided_slice %574 {offsets = [0, 0, 0], sizes = [8, 8, 32], strides = [1, 1, 1]} : vector<9x9x32xbf16> to vector<8x8x32xbf16>
    %585 = vector.shape_cast %584 : vector<8x8x32xbf16> to vector<64x32xbf16>
    %c1_577 = arith.constant 1 : index
    %c0_578 = arith.constant 0 : index
    %c0_579 = arith.constant 0 : index
    %586 = vector.load %arg9[%c1_577, %c0_578, %c0_579] : memref<9x32x32xbf16, #tpu.memory_space<vmem>>, vector<1x32x32xbf16>
    %587 = vector.shape_cast %586 : vector<1x32x32xbf16> to vector<32x32xbf16>
    %cst_580 = arith.constant dense<0.000000e+00> : vector<64x32xf32>
    %588 = tpu.matmul %585, %587, %cst_580 {dimension_numbers = #tpu.dot_dimension_numbers<[1], [0], [0], [1], [0, 0, 1, 1], [], []>} : vector<64x32xbf16>, vector<32x32xbf16>, vector<64x32xf32> -> vector<64x32xf32>
    %589 = arith.addf %583, %588 : vector<64x32xf32>
    %590 = vector.extract_strided_slice %578 {offsets = [0, 1, 0], sizes = [8, 8, 32], strides = [1, 1, 1]} : vector<9x9x32xbf16> to vector<8x8x32xbf16>
    %591 = vector.shape_cast %590 : vector<8x8x32xbf16> to vector<64x32xbf16>
    %c2_581 = arith.constant 2 : index
    %c0_582 = arith.constant 0 : index
    %c0_583 = arith.constant 0 : index
    %592 = vector.load %arg9[%c2_581, %c0_582, %c0_583] : memref<9x32x32xbf16, #tpu.memory_space<vmem>>, vector<1x32x32xbf16>
    %593 = vector.shape_cast %592 : vector<1x32x32xbf16> to vector<32x32xbf16>
    %cst_584 = arith.constant dense<0.000000e+00> : vector<64x32xf32>
    %594 = tpu.matmul %591, %593, %cst_584 {dimension_numbers = #tpu.dot_dimension_numbers<[1], [0], [0], [1], [0, 0, 1, 1], [], []>} : vector<64x32xbf16>, vector<32x32xbf16>, vector<64x32xf32> -> vector<64x32xf32>
    %595 = arith.addf %589, %594 : vector<64x32xf32>
    %596 = vector.extract_strided_slice %570 {offsets = [0, 0, 0], sizes = [8, 8, 32], strides = [1, 1, 1]} : vector<9x9x32xbf16> to vector<8x8x32xbf16>
    %597 = vector.shape_cast %596 : vector<8x8x32xbf16> to vector<64x32xbf16>
    %c3_585 = arith.constant 3 : index
    %c0_586 = arith.constant 0 : index
    %c0_587 = arith.constant 0 : index
    %598 = vector.load %arg9[%c3_585, %c0_586, %c0_587] : memref<9x32x32xbf16, #tpu.memory_space<vmem>>, vector<1x32x32xbf16>
    %599 = vector.shape_cast %598 : vector<1x32x32xbf16> to vector<32x32xbf16>
    %cst_588 = arith.constant dense<0.000000e+00> : vector<64x32xf32>
    %600 = tpu.matmul %597, %599, %cst_588 {dimension_numbers = #tpu.dot_dimension_numbers<[1], [0], [0], [1], [0, 0, 1, 1], [], []>} : vector<64x32xbf16>, vector<32x32xbf16>, vector<64x32xf32> -> vector<64x32xf32>
    %601 = arith.addf %595, %600 : vector<64x32xf32>
    %602 = vector.extract_strided_slice %566 {offsets = [0, 0, 0], sizes = [8, 8, 32], strides = [1, 1, 1]} : vector<9x9x32xbf16> to vector<8x8x32xbf16>
    %603 = vector.shape_cast %602 : vector<8x8x32xbf16> to vector<64x32xbf16>
    %c4_589 = arith.constant 4 : index
    %c0_590 = arith.constant 0 : index
    %c0_591 = arith.constant 0 : index
    %604 = vector.load %arg9[%c4_589, %c0_590, %c0_591] : memref<9x32x32xbf16, #tpu.memory_space<vmem>>, vector<1x32x32xbf16>
    %605 = vector.shape_cast %604 : vector<1x32x32xbf16> to vector<32x32xbf16>
    %cst_592 = arith.constant dense<0.000000e+00> : vector<64x32xf32>
    %606 = tpu.matmul %603, %605, %cst_592 {dimension_numbers = #tpu.dot_dimension_numbers<[1], [0], [0], [1], [0, 0, 1, 1], [], []>} : vector<64x32xbf16>, vector<32x32xbf16>, vector<64x32xf32> -> vector<64x32xf32>
    %607 = arith.addf %601, %606 : vector<64x32xf32>
    %608 = vector.extract_strided_slice %570 {offsets = [0, 1, 0], sizes = [8, 8, 32], strides = [1, 1, 1]} : vector<9x9x32xbf16> to vector<8x8x32xbf16>
    %609 = vector.shape_cast %608 : vector<8x8x32xbf16> to vector<64x32xbf16>
    %c5_593 = arith.constant 5 : index
    %c0_594 = arith.constant 0 : index
    %c0_595 = arith.constant 0 : index
    %610 = vector.load %arg9[%c5_593, %c0_594, %c0_595] : memref<9x32x32xbf16, #tpu.memory_space<vmem>>, vector<1x32x32xbf16>
    %611 = vector.shape_cast %610 : vector<1x32x32xbf16> to vector<32x32xbf16>
    %cst_596 = arith.constant dense<0.000000e+00> : vector<64x32xf32>
    %612 = tpu.matmul %609, %611, %cst_596 {dimension_numbers = #tpu.dot_dimension_numbers<[1], [0], [0], [1], [0, 0, 1, 1], [], []>} : vector<64x32xbf16>, vector<32x32xbf16>, vector<64x32xf32> -> vector<64x32xf32>
    %613 = arith.addf %607, %612 : vector<64x32xf32>
    %614 = vector.extract_strided_slice %578 {offsets = [1, 0, 0], sizes = [8, 8, 32], strides = [1, 1, 1]} : vector<9x9x32xbf16> to vector<8x8x32xbf16>
    %615 = vector.shape_cast %614 : vector<8x8x32xbf16> to vector<64x32xbf16>
    %c6_597 = arith.constant 6 : index
    %c0_598 = arith.constant 0 : index
    %c0_599 = arith.constant 0 : index
    %616 = vector.load %arg9[%c6_597, %c0_598, %c0_599] : memref<9x32x32xbf16, #tpu.memory_space<vmem>>, vector<1x32x32xbf16>
    %617 = vector.shape_cast %616 : vector<1x32x32xbf16> to vector<32x32xbf16>
    %cst_600 = arith.constant dense<0.000000e+00> : vector<64x32xf32>
    %618 = tpu.matmul %615, %617, %cst_600 {dimension_numbers = #tpu.dot_dimension_numbers<[1], [0], [0], [1], [0, 0, 1, 1], [], []>} : vector<64x32xbf16>, vector<32x32xbf16>, vector<64x32xf32> -> vector<64x32xf32>
    %619 = arith.addf %613, %618 : vector<64x32xf32>
    %620 = vector.extract_strided_slice %574 {offsets = [1, 0, 0], sizes = [8, 8, 32], strides = [1, 1, 1]} : vector<9x9x32xbf16> to vector<8x8x32xbf16>
    %621 = vector.shape_cast %620 : vector<8x8x32xbf16> to vector<64x32xbf16>
    %c7_601 = arith.constant 7 : index
    %c0_602 = arith.constant 0 : index
    %c0_603 = arith.constant 0 : index
    %622 = vector.load %arg9[%c7_601, %c0_602, %c0_603] : memref<9x32x32xbf16, #tpu.memory_space<vmem>>, vector<1x32x32xbf16>
    %623 = vector.shape_cast %622 : vector<1x32x32xbf16> to vector<32x32xbf16>
    %cst_604 = arith.constant dense<0.000000e+00> : vector<64x32xf32>
    %624 = tpu.matmul %621, %623, %cst_604 {dimension_numbers = #tpu.dot_dimension_numbers<[1], [0], [0], [1], [0, 0, 1, 1], [], []>} : vector<64x32xbf16>, vector<32x32xbf16>, vector<64x32xf32> -> vector<64x32xf32>
    %625 = arith.addf %619, %624 : vector<64x32xf32>
    %626 = vector.extract_strided_slice %578 {offsets = [1, 1, 0], sizes = [8, 8, 32], strides = [1, 1, 1]} : vector<9x9x32xbf16> to vector<8x8x32xbf16>
    %627 = vector.shape_cast %626 : vector<8x8x32xbf16> to vector<64x32xbf16>
    %c8_605 = arith.constant 8 : index
    %c0_606 = arith.constant 0 : index
    %c0_607 = arith.constant 0 : index
    %628 = vector.load %arg9[%c8_605, %c0_606, %c0_607] : memref<9x32x32xbf16, #tpu.memory_space<vmem>>, vector<1x32x32xbf16>
    %629 = vector.shape_cast %628 : vector<1x32x32xbf16> to vector<32x32xbf16>
    %cst_608 = arith.constant dense<0.000000e+00> : vector<64x32xf32>
    %630 = tpu.matmul %627, %629, %cst_608 {dimension_numbers = #tpu.dot_dimension_numbers<[1], [0], [0], [1], [0, 0, 1, 1], [], []>} : vector<64x32xbf16>, vector<32x32xbf16>, vector<64x32xf32> -> vector<64x32xf32>
    %631 = arith.addf %625, %630 : vector<64x32xf32>
    %c0_609 = arith.constant 0 : index
    %c0_610 = arith.constant 0 : index
    %632 = vector.load %arg10[%c0_609, %c0_610] : memref<1x32xf32, #tpu.memory_space<vmem>>, vector<1x32xf32>
    %633 = vector.broadcast %632 : vector<1x32xf32> to vector<64x32xf32>
    %634 = arith.addf %631, %633 : vector<64x32xf32>
    %cst_611 = arith.constant 0.000000e+00 : f32
    %635 = vector.broadcast %cst_611 : f32 to vector<64x32xf32>
    %636 = arith.maximumf %634, %635 : vector<64x32xf32>
    %637 = tpu.concatenate %130, %636 in 1 : vector<64x32xf32>, vector<64x32xf32> -> vector<64x64xf32>
    %638 = arith.truncf %637 : vector<64x64xf32> to vector<64x64xbf16>
    %639 = vector.shape_cast %638 : vector<64x64xbf16> to vector<8x8x64xbf16>
    %cst_612 = arith.constant 0.000000e+00 : bf16
    %640 = vector.broadcast %cst_612 : bf16 to vector<1x8x64xbf16>
    %641 = tpu.concatenate %640, %639, %640 in 0 : vector<1x8x64xbf16>, vector<8x8x64xbf16>, vector<1x8x64xbf16> -> vector<10x8x64xbf16>
    %cst_613 = arith.constant 0.000000e+00 : bf16
    %642 = vector.broadcast %cst_613 : bf16 to vector<10x1x64xbf16>
    %643 = tpu.concatenate %642, %641, %642 in 1 : vector<10x1x64xbf16>, vector<10x8x64xbf16>, vector<10x1x64xbf16> -> vector<10x10x64xbf16>
    %644 = vector.extract_strided_slice %643 {offsets = [0, 0, 0], sizes = [8, 8, 64], strides = [1, 1, 1]} : vector<10x10x64xbf16> to vector<8x8x64xbf16>
    %645 = vector.shape_cast %644 : vector<8x8x64xbf16> to vector<64x64xbf16>
    %c0_614 = arith.constant 0 : index
    %c0_615 = arith.constant 0 : index
    %c0_616 = arith.constant 0 : index
    %646 = vector.load %arg11[%c0_614, %c0_615, %c0_616] : memref<9x64x64xbf16, #tpu.memory_space<vmem>>, vector<1x64x64xbf16>
    %647 = vector.shape_cast %646 : vector<1x64x64xbf16> to vector<64x64xbf16>
    %cst_617 = arith.constant dense<0.000000e+00> : vector<64x64xf32>
    %648 = tpu.matmul %645, %647, %cst_617 {dimension_numbers = #tpu.dot_dimension_numbers<[1], [0], [0], [1], [0, 0, 1, 1], [], []>} : vector<64x64xbf16>, vector<64x64xbf16>, vector<64x64xf32> -> vector<64x64xf32>
    %649 = vector.extract_strided_slice %643 {offsets = [0, 1, 0], sizes = [8, 8, 64], strides = [1, 1, 1]} : vector<10x10x64xbf16> to vector<8x8x64xbf16>
    %650 = vector.shape_cast %649 : vector<8x8x64xbf16> to vector<64x64xbf16>
    %c1_618 = arith.constant 1 : index
    %c0_619 = arith.constant 0 : index
    %c0_620 = arith.constant 0 : index
    %651 = vector.load %arg11[%c1_618, %c0_619, %c0_620] : memref<9x64x64xbf16, #tpu.memory_space<vmem>>, vector<1x64x64xbf16>
    %652 = vector.shape_cast %651 : vector<1x64x64xbf16> to vector<64x64xbf16>
    %cst_621 = arith.constant dense<0.000000e+00> : vector<64x64xf32>
    %653 = tpu.matmul %650, %652, %cst_621 {dimension_numbers = #tpu.dot_dimension_numbers<[1], [0], [0], [1], [0, 0, 1, 1], [], []>} : vector<64x64xbf16>, vector<64x64xbf16>, vector<64x64xf32> -> vector<64x64xf32>
    %654 = arith.addf %648, %653 : vector<64x64xf32>
    %655 = vector.extract_strided_slice %643 {offsets = [0, 2, 0], sizes = [8, 8, 64], strides = [1, 1, 1]} : vector<10x10x64xbf16> to vector<8x8x64xbf16>
    %656 = vector.shape_cast %655 : vector<8x8x64xbf16> to vector<64x64xbf16>
    %c2_622 = arith.constant 2 : index
    %c0_623 = arith.constant 0 : index
    %c0_624 = arith.constant 0 : index
    %657 = vector.load %arg11[%c2_622, %c0_623, %c0_624] : memref<9x64x64xbf16, #tpu.memory_space<vmem>>, vector<1x64x64xbf16>
    %658 = vector.shape_cast %657 : vector<1x64x64xbf16> to vector<64x64xbf16>
    %cst_625 = arith.constant dense<0.000000e+00> : vector<64x64xf32>
    %659 = tpu.matmul %656, %658, %cst_625 {dimension_numbers = #tpu.dot_dimension_numbers<[1], [0], [0], [1], [0, 0, 1, 1], [], []>} : vector<64x64xbf16>, vector<64x64xbf16>, vector<64x64xf32> -> vector<64x64xf32>
    %660 = arith.addf %654, %659 : vector<64x64xf32>
    %661 = vector.extract_strided_slice %643 {offsets = [1, 0, 0], sizes = [8, 8, 64], strides = [1, 1, 1]} : vector<10x10x64xbf16> to vector<8x8x64xbf16>
    %662 = vector.shape_cast %661 : vector<8x8x64xbf16> to vector<64x64xbf16>
    %c3_626 = arith.constant 3 : index
    %c0_627 = arith.constant 0 : index
    %c0_628 = arith.constant 0 : index
    %663 = vector.load %arg11[%c3_626, %c0_627, %c0_628] : memref<9x64x64xbf16, #tpu.memory_space<vmem>>, vector<1x64x64xbf16>
    %664 = vector.shape_cast %663 : vector<1x64x64xbf16> to vector<64x64xbf16>
    %cst_629 = arith.constant dense<0.000000e+00> : vector<64x64xf32>
    %665 = tpu.matmul %662, %664, %cst_629 {dimension_numbers = #tpu.dot_dimension_numbers<[1], [0], [0], [1], [0, 0, 1, 1], [], []>} : vector<64x64xbf16>, vector<64x64xbf16>, vector<64x64xf32> -> vector<64x64xf32>
    %666 = arith.addf %660, %665 : vector<64x64xf32>
    %667 = vector.extract_strided_slice %643 {offsets = [1, 1, 0], sizes = [8, 8, 64], strides = [1, 1, 1]} : vector<10x10x64xbf16> to vector<8x8x64xbf16>
    %668 = vector.shape_cast %667 : vector<8x8x64xbf16> to vector<64x64xbf16>
    %c4_630 = arith.constant 4 : index
    %c0_631 = arith.constant 0 : index
    %c0_632 = arith.constant 0 : index
    %669 = vector.load %arg11[%c4_630, %c0_631, %c0_632] : memref<9x64x64xbf16, #tpu.memory_space<vmem>>, vector<1x64x64xbf16>
    %670 = vector.shape_cast %669 : vector<1x64x64xbf16> to vector<64x64xbf16>
    %cst_633 = arith.constant dense<0.000000e+00> : vector<64x64xf32>
    %671 = tpu.matmul %668, %670, %cst_633 {dimension_numbers = #tpu.dot_dimension_numbers<[1], [0], [0], [1], [0, 0, 1, 1], [], []>} : vector<64x64xbf16>, vector<64x64xbf16>, vector<64x64xf32> -> vector<64x64xf32>
    %672 = arith.addf %666, %671 : vector<64x64xf32>
    %673 = vector.extract_strided_slice %643 {offsets = [1, 2, 0], sizes = [8, 8, 64], strides = [1, 1, 1]} : vector<10x10x64xbf16> to vector<8x8x64xbf16>
    %674 = vector.shape_cast %673 : vector<8x8x64xbf16> to vector<64x64xbf16>
    %c5_634 = arith.constant 5 : index
    %c0_635 = arith.constant 0 : index
    %c0_636 = arith.constant 0 : index
    %675 = vector.load %arg11[%c5_634, %c0_635, %c0_636] : memref<9x64x64xbf16, #tpu.memory_space<vmem>>, vector<1x64x64xbf16>
    %676 = vector.shape_cast %675 : vector<1x64x64xbf16> to vector<64x64xbf16>
    %cst_637 = arith.constant dense<0.000000e+00> : vector<64x64xf32>
    %677 = tpu.matmul %674, %676, %cst_637 {dimension_numbers = #tpu.dot_dimension_numbers<[1], [0], [0], [1], [0, 0, 1, 1], [], []>} : vector<64x64xbf16>, vector<64x64xbf16>, vector<64x64xf32> -> vector<64x64xf32>
    %678 = arith.addf %672, %677 : vector<64x64xf32>
    %679 = vector.extract_strided_slice %643 {offsets = [2, 0, 0], sizes = [8, 8, 64], strides = [1, 1, 1]} : vector<10x10x64xbf16> to vector<8x8x64xbf16>
    %680 = vector.shape_cast %679 : vector<8x8x64xbf16> to vector<64x64xbf16>
    %c6_638 = arith.constant 6 : index
    %c0_639 = arith.constant 0 : index
    %c0_640 = arith.constant 0 : index
    %681 = vector.load %arg11[%c6_638, %c0_639, %c0_640] : memref<9x64x64xbf16, #tpu.memory_space<vmem>>, vector<1x64x64xbf16>
    %682 = vector.shape_cast %681 : vector<1x64x64xbf16> to vector<64x64xbf16>
    %cst_641 = arith.constant dense<0.000000e+00> : vector<64x64xf32>
    %683 = tpu.matmul %680, %682, %cst_641 {dimension_numbers = #tpu.dot_dimension_numbers<[1], [0], [0], [1], [0, 0, 1, 1], [], []>} : vector<64x64xbf16>, vector<64x64xbf16>, vector<64x64xf32> -> vector<64x64xf32>
    %684 = arith.addf %678, %683 : vector<64x64xf32>
    %685 = vector.extract_strided_slice %643 {offsets = [2, 1, 0], sizes = [8, 8, 64], strides = [1, 1, 1]} : vector<10x10x64xbf16> to vector<8x8x64xbf16>
    %686 = vector.shape_cast %685 : vector<8x8x64xbf16> to vector<64x64xbf16>
    %c7_642 = arith.constant 7 : index
    %c0_643 = arith.constant 0 : index
    %c0_644 = arith.constant 0 : index
    %687 = vector.load %arg11[%c7_642, %c0_643, %c0_644] : memref<9x64x64xbf16, #tpu.memory_space<vmem>>, vector<1x64x64xbf16>
    %688 = vector.shape_cast %687 : vector<1x64x64xbf16> to vector<64x64xbf16>
    %cst_645 = arith.constant dense<0.000000e+00> : vector<64x64xf32>
    %689 = tpu.matmul %686, %688, %cst_645 {dimension_numbers = #tpu.dot_dimension_numbers<[1], [0], [0], [1], [0, 0, 1, 1], [], []>} : vector<64x64xbf16>, vector<64x64xbf16>, vector<64x64xf32> -> vector<64x64xf32>
    %690 = arith.addf %684, %689 : vector<64x64xf32>
    %691 = vector.extract_strided_slice %643 {offsets = [2, 2, 0], sizes = [8, 8, 64], strides = [1, 1, 1]} : vector<10x10x64xbf16> to vector<8x8x64xbf16>
    %692 = vector.shape_cast %691 : vector<8x8x64xbf16> to vector<64x64xbf16>
    %c8_646 = arith.constant 8 : index
    %c0_647 = arith.constant 0 : index
    %c0_648 = arith.constant 0 : index
    %693 = vector.load %arg11[%c8_646, %c0_647, %c0_648] : memref<9x64x64xbf16, #tpu.memory_space<vmem>>, vector<1x64x64xbf16>
    %694 = vector.shape_cast %693 : vector<1x64x64xbf16> to vector<64x64xbf16>
    %cst_649 = arith.constant dense<0.000000e+00> : vector<64x64xf32>
    %695 = tpu.matmul %692, %694, %cst_649 {dimension_numbers = #tpu.dot_dimension_numbers<[1], [0], [0], [1], [0, 0, 1, 1], [], []>} : vector<64x64xbf16>, vector<64x64xbf16>, vector<64x64xf32> -> vector<64x64xf32>
    %696 = arith.addf %690, %695 : vector<64x64xf32>
    %c0_650 = arith.constant 0 : index
    %c0_651 = arith.constant 0 : index
    %697 = vector.load %arg12[%c0_650, %c0_651] : memref<1x64xf32, #tpu.memory_space<vmem>>, vector<1x64xf32>
    %698 = vector.broadcast %697 : vector<1x64xf32> to vector<64x64xf32>
    %699 = arith.addf %696, %698 : vector<64x64xf32>
    %cst_652 = arith.constant 0.000000e+00 : f32
    %700 = vector.broadcast %cst_652 : f32 to vector<64x64xf32>
    %701 = arith.maximumf %699, %700 : vector<64x64xf32>
    %702 = vector.shape_cast %701 : vector<64x64xf32> to vector<8x8x64xf32>
    %703 = arith.truncf %702 : vector<8x8x64xf32> to vector<8x8x64xbf16>
    %cst_653 = arith.constant 0.000000e+00 : bf16
    %704 = vector.broadcast %cst_653 : bf16 to vector<1x8x64xbf16>
    %705 = tpu.concatenate %704, %703, %704 in 0 : vector<1x8x64xbf16>, vector<8x8x64xbf16>, vector<1x8x64xbf16> -> vector<10x8x64xbf16>
    %cst_654 = arith.constant 0.000000e+00 : bf16
    %706 = vector.broadcast %cst_654 : bf16 to vector<10x1x64xbf16>
    %707 = tpu.concatenate %706, %705, %706 in 1 : vector<10x1x64xbf16>, vector<10x8x64xbf16>, vector<10x1x64xbf16> -> vector<10x10x64xbf16>
    %708 = vector.extract_strided_slice %707 {offsets = [0, 0, 0], sizes = [8, 8, 64], strides = [1, 1, 1]} : vector<10x10x64xbf16> to vector<8x8x64xbf16>
    %709 = vector.shape_cast %708 : vector<8x8x64xbf16> to vector<64x64xbf16>
    %c0_655 = arith.constant 0 : index
    %c0_656 = arith.constant 0 : index
    %c0_657 = arith.constant 0 : index
    %710 = vector.load %arg13[%c0_655, %c0_656, %c0_657] : memref<9x64x3xbf16, #tpu.memory_space<vmem>>, vector<1x64x3xbf16>
    %711 = vector.shape_cast %710 : vector<1x64x3xbf16> to vector<64x3xbf16>
    %cst_658 = arith.constant dense<0.000000e+00> : vector<64x3xf32>
    %712 = tpu.matmul %709, %711, %cst_658 {dimension_numbers = #tpu.dot_dimension_numbers<[1], [0], [0], [1], [0, 0, 1, 1], [], []>} : vector<64x64xbf16>, vector<64x3xbf16>, vector<64x3xf32> -> vector<64x3xf32>
    %713 = vector.extract_strided_slice %707 {offsets = [0, 1, 0], sizes = [8, 8, 64], strides = [1, 1, 1]} : vector<10x10x64xbf16> to vector<8x8x64xbf16>
    %714 = vector.shape_cast %713 : vector<8x8x64xbf16> to vector<64x64xbf16>
    %c1_659 = arith.constant 1 : index
    %c0_660 = arith.constant 0 : index
    %c0_661 = arith.constant 0 : index
    %715 = vector.load %arg13[%c1_659, %c0_660, %c0_661] : memref<9x64x3xbf16, #tpu.memory_space<vmem>>, vector<1x64x3xbf16>
    %716 = vector.shape_cast %715 : vector<1x64x3xbf16> to vector<64x3xbf16>
    %cst_662 = arith.constant dense<0.000000e+00> : vector<64x3xf32>
    %717 = tpu.matmul %714, %716, %cst_662 {dimension_numbers = #tpu.dot_dimension_numbers<[1], [0], [0], [1], [0, 0, 1, 1], [], []>} : vector<64x64xbf16>, vector<64x3xbf16>, vector<64x3xf32> -> vector<64x3xf32>
    %718 = arith.addf %712, %717 : vector<64x3xf32>
    %719 = vector.extract_strided_slice %707 {offsets = [0, 2, 0], sizes = [8, 8, 64], strides = [1, 1, 1]} : vector<10x10x64xbf16> to vector<8x8x64xbf16>
    %720 = vector.shape_cast %719 : vector<8x8x64xbf16> to vector<64x64xbf16>
    %c2_663 = arith.constant 2 : index
    %c0_664 = arith.constant 0 : index
    %c0_665 = arith.constant 0 : index
    %721 = vector.load %arg13[%c2_663, %c0_664, %c0_665] : memref<9x64x3xbf16, #tpu.memory_space<vmem>>, vector<1x64x3xbf16>
    %722 = vector.shape_cast %721 : vector<1x64x3xbf16> to vector<64x3xbf16>
    %cst_666 = arith.constant dense<0.000000e+00> : vector<64x3xf32>
    %723 = tpu.matmul %720, %722, %cst_666 {dimension_numbers = #tpu.dot_dimension_numbers<[1], [0], [0], [1], [0, 0, 1, 1], [], []>} : vector<64x64xbf16>, vector<64x3xbf16>, vector<64x3xf32> -> vector<64x3xf32>
    %724 = arith.addf %718, %723 : vector<64x3xf32>
    %725 = vector.extract_strided_slice %707 {offsets = [1, 0, 0], sizes = [8, 8, 64], strides = [1, 1, 1]} : vector<10x10x64xbf16> to vector<8x8x64xbf16>
    %726 = vector.shape_cast %725 : vector<8x8x64xbf16> to vector<64x64xbf16>
    %c3_667 = arith.constant 3 : index
    %c0_668 = arith.constant 0 : index
    %c0_669 = arith.constant 0 : index
    %727 = vector.load %arg13[%c3_667, %c0_668, %c0_669] : memref<9x64x3xbf16, #tpu.memory_space<vmem>>, vector<1x64x3xbf16>
    %728 = vector.shape_cast %727 : vector<1x64x3xbf16> to vector<64x3xbf16>
    %cst_670 = arith.constant dense<0.000000e+00> : vector<64x3xf32>
    %729 = tpu.matmul %726, %728, %cst_670 {dimension_numbers = #tpu.dot_dimension_numbers<[1], [0], [0], [1], [0, 0, 1, 1], [], []>} : vector<64x64xbf16>, vector<64x3xbf16>, vector<64x3xf32> -> vector<64x3xf32>
    %730 = arith.addf %724, %729 : vector<64x3xf32>
    %731 = vector.extract_strided_slice %707 {offsets = [1, 1, 0], sizes = [8, 8, 64], strides = [1, 1, 1]} : vector<10x10x64xbf16> to vector<8x8x64xbf16>
    %732 = vector.shape_cast %731 : vector<8x8x64xbf16> to vector<64x64xbf16>
    %c4_671 = arith.constant 4 : index
    %c0_672 = arith.constant 0 : index
    %c0_673 = arith.constant 0 : index
    %733 = vector.load %arg13[%c4_671, %c0_672, %c0_673] : memref<9x64x3xbf16, #tpu.memory_space<vmem>>, vector<1x64x3xbf16>
    %734 = vector.shape_cast %733 : vector<1x64x3xbf16> to vector<64x3xbf16>
    %cst_674 = arith.constant dense<0.000000e+00> : vector<64x3xf32>
    %735 = tpu.matmul %732, %734, %cst_674 {dimension_numbers = #tpu.dot_dimension_numbers<[1], [0], [0], [1], [0, 0, 1, 1], [], []>} : vector<64x64xbf16>, vector<64x3xbf16>, vector<64x3xf32> -> vector<64x3xf32>
    %736 = arith.addf %730, %735 : vector<64x3xf32>
    %737 = vector.extract_strided_slice %707 {offsets = [1, 2, 0], sizes = [8, 8, 64], strides = [1, 1, 1]} : vector<10x10x64xbf16> to vector<8x8x64xbf16>
    %738 = vector.shape_cast %737 : vector<8x8x64xbf16> to vector<64x64xbf16>
    %c5_675 = arith.constant 5 : index
    %c0_676 = arith.constant 0 : index
    %c0_677 = arith.constant 0 : index
    %739 = vector.load %arg13[%c5_675, %c0_676, %c0_677] : memref<9x64x3xbf16, #tpu.memory_space<vmem>>, vector<1x64x3xbf16>
    %740 = vector.shape_cast %739 : vector<1x64x3xbf16> to vector<64x3xbf16>
    %cst_678 = arith.constant dense<0.000000e+00> : vector<64x3xf32>
    %741 = tpu.matmul %738, %740, %cst_678 {dimension_numbers = #tpu.dot_dimension_numbers<[1], [0], [0], [1], [0, 0, 1, 1], [], []>} : vector<64x64xbf16>, vector<64x3xbf16>, vector<64x3xf32> -> vector<64x3xf32>
    %742 = arith.addf %736, %741 : vector<64x3xf32>
    %743 = vector.extract_strided_slice %707 {offsets = [2, 0, 0], sizes = [8, 8, 64], strides = [1, 1, 1]} : vector<10x10x64xbf16> to vector<8x8x64xbf16>
    %744 = vector.shape_cast %743 : vector<8x8x64xbf16> to vector<64x64xbf16>
    %c6_679 = arith.constant 6 : index
    %c0_680 = arith.constant 0 : index
    %c0_681 = arith.constant 0 : index
    %745 = vector.load %arg13[%c6_679, %c0_680, %c0_681] : memref<9x64x3xbf16, #tpu.memory_space<vmem>>, vector<1x64x3xbf16>
    %746 = vector.shape_cast %745 : vector<1x64x3xbf16> to vector<64x3xbf16>
    %cst_682 = arith.constant dense<0.000000e+00> : vector<64x3xf32>
    %747 = tpu.matmul %744, %746, %cst_682 {dimension_numbers = #tpu.dot_dimension_numbers<[1], [0], [0], [1], [0, 0, 1, 1], [], []>} : vector<64x64xbf16>, vector<64x3xbf16>, vector<64x3xf32> -> vector<64x3xf32>
    %748 = arith.addf %742, %747 : vector<64x3xf32>
    %749 = vector.extract_strided_slice %707 {offsets = [2, 1, 0], sizes = [8, 8, 64], strides = [1, 1, 1]} : vector<10x10x64xbf16> to vector<8x8x64xbf16>
    %750 = vector.shape_cast %749 : vector<8x8x64xbf16> to vector<64x64xbf16>
    %c7_683 = arith.constant 7 : index
    %c0_684 = arith.constant 0 : index
    %c0_685 = arith.constant 0 : index
    %751 = vector.load %arg13[%c7_683, %c0_684, %c0_685] : memref<9x64x3xbf16, #tpu.memory_space<vmem>>, vector<1x64x3xbf16>
    %752 = vector.shape_cast %751 : vector<1x64x3xbf16> to vector<64x3xbf16>
    %cst_686 = arith.constant dense<0.000000e+00> : vector<64x3xf32>
    %753 = tpu.matmul %750, %752, %cst_686 {dimension_numbers = #tpu.dot_dimension_numbers<[1], [0], [0], [1], [0, 0, 1, 1], [], []>} : vector<64x64xbf16>, vector<64x3xbf16>, vector<64x3xf32> -> vector<64x3xf32>
    %754 = arith.addf %748, %753 : vector<64x3xf32>
    %755 = vector.extract_strided_slice %707 {offsets = [2, 2, 0], sizes = [8, 8, 64], strides = [1, 1, 1]} : vector<10x10x64xbf16> to vector<8x8x64xbf16>
    %756 = vector.shape_cast %755 : vector<8x8x64xbf16> to vector<64x64xbf16>
    %c8_687 = arith.constant 8 : index
    %c0_688 = arith.constant 0 : index
    %c0_689 = arith.constant 0 : index
    %757 = vector.load %arg13[%c8_687, %c0_688, %c0_689] : memref<9x64x3xbf16, #tpu.memory_space<vmem>>, vector<1x64x3xbf16>
    %758 = vector.shape_cast %757 : vector<1x64x3xbf16> to vector<64x3xbf16>
    %cst_690 = arith.constant dense<0.000000e+00> : vector<64x3xf32>
    %759 = tpu.matmul %756, %758, %cst_690 {dimension_numbers = #tpu.dot_dimension_numbers<[1], [0], [0], [1], [0, 0, 1, 1], [], []>} : vector<64x64xbf16>, vector<64x3xbf16>, vector<64x3xf32> -> vector<64x3xf32>
    %760 = arith.addf %754, %759 : vector<64x3xf32>
    %c0_691 = arith.constant 0 : index
    %c0_692 = arith.constant 0 : index
    %761 = vector.load %arg14[%c0_691, %c0_692] : memref<1x3xf32, #tpu.memory_space<vmem>>, vector<1x3xf32>
    %762 = vector.broadcast %761 : vector<1x3xf32> to vector<64x3xf32>
    %763 = arith.addf %760, %762 : vector<64x3xf32>
    %764 = vector.extract_strided_slice %763 {offsets = [0, 0], sizes = [64, 2], strides = [1, 1]} : vector<64x3xf32> to vector<64x2xf32>
    %765 = math.tanh %764 : vector<64x2xf32>
    %cst_693 = arith.constant 1.200000e+00 : f32
    %766 = vector.broadcast %cst_693 : f32 to vector<64x2xf32>
    %767 = arith.mulf %765, %766 : vector<64x2xf32>
    %768 = vector.extract_strided_slice %763 {offsets = [0, 2], sizes = [64, 1], strides = [1, 1]} : vector<64x3xf32> to vector<64x1xf32>
    %769 = arith.negf %768 : vector<64x1xf32>
    %770 = math.exp %769 : vector<64x1xf32>
    %cst_694 = arith.constant 1.000000e+00 : f32
    %771 = vector.broadcast %cst_694 : f32 to vector<64x1xf32>
    %772 = arith.addf %771, %770 : vector<64x1xf32>
    %773 = arith.divf %771, %772 : vector<64x1xf32>
    %774 = vector.shape_cast %767 : vector<64x2xf32> to vector<1x8x8x2xf32>
    %c0_695 = arith.constant 0 : index
    %c0_696 = arith.constant 0 : index
    %c0_697 = arith.constant 0 : index
    %c0_698 = arith.constant 0 : index
    %775 = vector.load %arg15[%c0_695, %c0_696, %c0_697, %c0_698] : memref<1x8x8x2xf32, #tpu.memory_space<vmem>>, vector<1x8x8x2xf32>
    tpu.vector_store %arg15[%c0_695, %c0_696, %c0_697, %c0_698], %774 {strides = array<i32>} : memref<1x8x8x2xf32, #tpu.memory_space<vmem>>, vector<1x8x8x2xf32>,
    %776 = vector.shape_cast %773 : vector<64x1xf32> to vector<1x8x8x1xf32>
    %c0_699 = arith.constant 0 : index
    %c0_700 = arith.constant 0 : index
    %c0_701 = arith.constant 0 : index
    %c0_702 = arith.constant 0 : index
    %777 = vector.load %arg16[%c0_699, %c0_700, %c0_701, %c0_702] : memref<1x8x8x1xf32, #tpu.memory_space<vmem>>, vector<1x8x8x1xf32>
    tpu.vector_store %arg16[%c0_699, %c0_700, %c0_701, %c0_702], %776 {strides = array<i32>} : memref<1x8x8x1xf32, #tpu.memory_space<vmem>>, vector<1x8x8x1xf32>,
    return
  }
  func.func @transform_0(%arg0: i32) -> (i32, i32, i32, i32) {
    %c0_i32 = arith.constant 0 : i32
    %c0_i32_0 = arith.constant 0 : i32
    %c0_i32_1 = arith.constant 0 : i32
    %c0_i32_2 = arith.constant 0 : i32
    return %arg0, %c0_i32, %c0_i32_0, %c0_i32_1 : i32, i32, i32, i32
  }
  func.func @transform_1(%arg0: i32) -> (i32, i32, i32, i32) {
    %c0_i32 = arith.constant 0 : i32
    %c0_i32_0 = arith.constant 0 : i32
    %c0_i32_1 = arith.constant 0 : i32
    %c0_i32_2 = arith.constant 0 : i32
    return %arg0, %c0_i32, %c0_i32_0, %c0_i32_1 : i32, i32, i32, i32
  }
  func.func @transform_2(%arg0: i32) -> (i32, i32, i32) {
    %c0_i32 = arith.constant 0 : i32
    %c0_i32_0 = arith.constant 0 : i32
    %c0_i32_1 = arith.constant 0 : i32
    %c0_i32_2 = arith.constant 0 : i32
    return %c0_i32, %c0_i32_0, %c0_i32_1 : i32, i32, i32
  }
  func.func @transform_3(%arg0: i32) -> (i32, i32) {
    %c0_i32 = arith.constant 0 : i32
    %c0_i32_0 = arith.constant 0 : i32
    %c0_i32_1 = arith.constant 0 : i32
    return %c0_i32, %c0_i32_0 : i32, i32
  }
  func.func @transform_4(%arg0: i32) -> (i32, i32, i32) {
    %c0_i32 = arith.constant 0 : i32
    %c0_i32_0 = arith.constant 0 : i32
    %c0_i32_1 = arith.constant 0 : i32
    %c0_i32_2 = arith.constant 0 : i32
    return %c0_i32, %c0_i32_0, %c0_i32_1 : i32, i32, i32
  }
  func.func @transform_5(%arg0: i32) -> (i32, i32) {
    %c0_i32 = arith.constant 0 : i32
    %c0_i32_0 = arith.constant 0 : i32
    %c0_i32_1 = arith.constant 0 : i32
    return %c0_i32, %c0_i32_0 : i32, i32
  }
  func.func @transform_6(%arg0: i32) -> (i32, i32, i32) {
    %c0_i32 = arith.constant 0 : i32
    %c0_i32_0 = arith.constant 0 : i32
    %c0_i32_1 = arith.constant 0 : i32
    %c0_i32_2 = arith.constant 0 : i32
    return %c0_i32, %c0_i32_0, %c0_i32_1 : i32, i32, i32
  }
  func.func @transform_7(%arg0: i32) -> (i32, i32) {
    %c0_i32 = arith.constant 0 : i32
    %c0_i32_0 = arith.constant 0 : i32
    %c0_i32_1 = arith.constant 0 : i32
    return %c0_i32, %c0_i32_0 : i32, i32
  }
  func.func @transform_8(%arg0: i32) -> (i32, i32, i32) {
    %c0_i32 = arith.constant 0 : i32
    %c0_i32_0 = arith.constant 0 : i32
    %c0_i32_1 = arith.constant 0 : i32
    %c0_i32_2 = arith.constant 0 : i32
    return %c0_i32, %c0_i32_0, %c0_i32_1 : i32, i32, i32
  }
  func.func @transform_9(%arg0: i32) -> (i32, i32) {
    %c0_i32 = arith.constant 0 : i32
    %c0_i32_0 = arith.constant 0 : i32
    %c0_i32_1 = arith.constant 0 : i32
    return %c0_i32, %c0_i32_0 : i32, i32
  }
  func.func @transform_10(%arg0: i32) -> (i32, i32, i32) {
    %c0_i32 = arith.constant 0 : i32
    %c0_i32_0 = arith.constant 0 : i32
    %c0_i32_1 = arith.constant 0 : i32
    %c0_i32_2 = arith.constant 0 : i32
    return %c0_i32, %c0_i32_0, %c0_i32_1 : i32, i32, i32
  }
  func.func @transform_11(%arg0: i32) -> (i32, i32) {
    %c0_i32 = arith.constant 0 : i32
    %c0_i32_0 = arith.constant 0 : i32
    %c0_i32_1 = arith.constant 0 : i32
    return %c0_i32, %c0_i32_0 : i32, i32
  }
  func.func @transform_12(%arg0: i32) -> (i32, i32, i32) {
    %c0_i32 = arith.constant 0 : i32
    %c0_i32_0 = arith.constant 0 : i32
    %c0_i32_1 = arith.constant 0 : i32
    %c0_i32_2 = arith.constant 0 : i32
    return %c0_i32, %c0_i32_0, %c0_i32_1 : i32, i32, i32
  }
  func.func @transform_13(%arg0: i32) -> (i32, i32) {
    %c0_i32 = arith.constant 0 : i32
    %c0_i32_0 = arith.constant 0 : i32
    %c0_i32_1 = arith.constant 0 : i32
    return %c0_i32, %c0_i32_0 : i32, i32
  }
  func.func @transform_14(%arg0: i32) -> (i32, i32, i32, i32) {
    %c0_i32 = arith.constant 0 : i32
    %c0_i32_0 = arith.constant 0 : i32
    %c0_i32_1 = arith.constant 0 : i32
    %c0_i32_2 = arith.constant 0 : i32
    return %arg0, %c0_i32, %c0_i32_0, %c0_i32_1 : i32, i32, i32, i32
  }
  func.func @transform_15(%arg0: i32) -> (i32, i32, i32, i32) {
    %c0_i32 = arith.constant 0 : i32
    %c0_i32_0 = arith.constant 0 : i32
    %c0_i32_1 = arith.constant 0 : i32
    %c0_i32_2 = arith.constant 0 : i32
    return %arg0, %c0_i32, %c0_i32_0, %c0_i32_1 : i32, i32, i32, i32
  }
}

</mosaic_0001>

<bundles_post_ra>
// kernel: keypoint_detector_forward.1
= control target key start
LH: loop header
LB: loop body
LE: loop exit
PB: predicated region body
PF: predicated region fallthrough
CT: control target
= control target key end

     0   :  { %s23379_s18 = smov 0   ;;  %s28520_s0 = inlined_call_operand.vmem [shape: bf16[2,10,10,32], index: 0, kind: input, shape index: {}]   ;;  %s28521_s1 = inlined_call_operand.vmem [shape: bf16[2,144,9,16], index: 1, kind: input, shape index: {}]   ;;  %s28522_s2 = inlined_call_operand.vmem [shape: bf16[9,32,32], index: 2, kind: input, shape index: {}]   ;;  %s28523_s3 = inlined_call_operand.vmem [shape: f32[1,32], index: 3, kind: input, shape index: {}]   ;;  %s28524_s4 = inlined_call_operand.vmem [shape: bf16[9,32,32], index: 4, kind: input, shape index: {}]   ;;  %s28525_s5 = inlined_call_operand.vmem [shape: f32[1,32], index: 5, kind: input, shape index: {}]   ;;  %s28526_s6 = inlined_call_operand.vmem [shape: bf16[25,16,32], index: 6, kind: input, shape index: {}]   ;;  %s28527_s7 = inlined_call_operand.vmem [shape: f32[1,32], index: 7, kind: input, shape index: {}]   ;;  %s28528_s8 = inlined_call_operand.vmem [shape: bf16[9,32,32], index: 8, kind: input, shape index: {}]   ;;  %s28529_s9 = inlined_call_operand.vmem [shape: f32[1,32], index: 9, kind: input, shape index: {}]   ;;  %s28530_s10 = inlined_call_operand.vmem [shape: bf16[9,64,64], index: 10, kind: input, shape index: {}]   ;;  %s28531_s11 = inlined_call_operand.vmem [shape: f32[1,64], index: 11, kind: input, shape index: {}]   ;;  %s28532_s12 = inlined_call_operand.vmem [shape: bf16[9,64,3], index: 12, kind: input, shape index: {}]   ;;  %s28533_s13 = inlined_call_operand.vmem [shape: f32[1,3], index: 13, kind: input, shape index: {}]   ;;  %s28534_s14 = inlined_call_operand.vmem [shape: f32[2,8,8,2], index: 14, kind: output, shape index: {0}]   ;;  %s28535_s15 = inlined_call_operand.vmem [shape: f32[2,8,8,1], index: 15, kind: output, shape index: {1}]  }
   0x1 LB: > { %s17393_s19 = sadd.s32 4294967295, %s23294_s18   ;;  %p17397_p0 = scmp.ge.s32.totalorder %s23294_s18, 1  ;;  %s23294_s18 = sphi %s23379_s18, %s26_s18  }
   0x2   : > { %p450_p1 = scmp.lt.s32.totalorder %s23294_s18, 3 }
   0x4   : > { %p451_p2 = pnand %p17397_p0, %p450_p1 }
   0x6   : > { %454 = sbr.rel (%p451_p2) target bundleno = 2811 (0xafb), region = 76 }
   0xd   : > { %v22900_v0 = vld [vmem:[%s28522_s2 + $0x10] sm:$0xff]   ;;  %p508_p3 = scmp.lt.s32.totalorder %s17393_s19, 1  ;;  %v22901_v1 = vld [vmem:[%s28522_s2 + $0x18] sm:$0xff]   ;;  %v22902_v2 = vld [vmem:[%s28522_s2] sm:$0xff]   ;;  %vm549_vm0 = vsmask.f32 3328 }
   0xe   : > { %20318 = vmatprep.subr.bf16.mxu0 %v22900_v0  ;;  %21780 = vmatprep.subr.bf16.mxu1 %v22900_v0  ;;  %vm550_vm1 = vsmask.f32 7440  ;;  %vm693_vm3 = vcmask 261120   ;;  %v22903_v51 = vld [vmem:[%s28522_s2 + $0x8] sm:$0xff]   ;;  %v22905_v52 = vld [vmem:[%s28522_s2 + $0x20] sm:$0xff]   ;;  %vm904_vm4 = vcmask 1042432  }
   0xf   : > { %s28869_s19 = smov (!%p508_p3, %s17393_s19), 1  ;;  %20319 = vmatpush3.bf16.msra.mxu0 %v22900_v0  ;;  %21782 = vmatpush3.bf16.msra.mxu1 %v22900_v0  ;;  %vm23429_vm2 = vmor %vm549_vm0, %vm550_vm1  ;;  %vm905_vm5 = vcmask 1046532   ;;  %v22908_v59 = vld [vmem:[%s28522_s2 + $0x28] sm:$0xff]   ;;  %v28635_v0 = vmov 0  ;;  %vm3657_vm7 = vcmask 130048   ;;  %vm2242_vm8 = vcmask 1040384  }
  0x10   : > { %20320 = vmatprep.subr.bf16.mxu0 %v22901_v1  ;;  %s22872_s24 = smul.u32 80, %s28869_s19  ;;  %21781 = vmatprep.subr.bf16.mxu1 %v22901_v1  ;;  %vm23467_vm6 = vmor %vm904_vm4, %vm905_vm5  ;;  %vm2243_vm9 = vsmask.f32 256  ;;  %vm2255_vm10 = vsmask.f32 4352  ;;  %vm2254_vm12 = vcmask 1044480  }
  0x11   : > { %v28636_v0 = vsel %vm23467_vm6, 4294967295, %v28635_v0  ;;  %s22873_s27 = smul.u32 1152, %s28869_s19  ;;  %vm24407_vm11 = vmand %vm2242_vm8, %vm2243_vm9  ;;  %vm12847_vm14 = vcmask 1043456   ;;  %s23297_s23 = smov 32   ;;  %vm14747_vm15 = vcmask 523264   ;;  %v23151_v27 = vld [vmem:[%s28532_s12 + $0x60] sm:$0xff]  }
  0x12   : > { %s23402_s29 = scalar_lea.vmem %s28520_s0, %s22872_s24  ;;  %28637 = vst [vmem:[#allocation2_spill] sm:$0xff] %v28636_v0  ;;  %vm24427_vm13 = vmand %vm2254_vm12, %vm2255_vm10  ;;  %s19545_s16 = sshll.u32 %s28869_s19, 6  ;;  %vm17243_vm0 = vcmask 15360   ;;  %vm17284_vm1 = vcmask 7168  }
  0x13   : > { %20321 = vmatpush3.bf16.msra.mxu0 %v22901_v1  ;;  %v529_v3 = vld [vmem:[%s23402_s29] sm:$0xf]  ;;  %v530_v4 = vld [vmem:[%s23402_s29 + $0x8] sm:$0xf]  ;;  %v23407_v5 = vld [vmem:[%s23402_s29 + $0x4] sm:$0x1]  ;;  %21783 = vmatpush3.bf16.msra.mxu1 %v22901_v1  ;;  %s23872_s20 = scalar_lea.vmem %s28521_s1, %s22873_s27  ;;  %s28486_s22 = scalar_lea.vmem %s28534_s14, %s19545_s16 }
  0x14   : > { %v23410_v6 = vld [vmem:[%s23402_s29 + $0xc] sm:$0x1]  ;;  %v553_v7 = vshrl.u32 %v529_v3, 16  ;;  %v556_v8 = vshll.u32 %v529_v3, 16  ;;  %v562_v9 = vshll.u32 %v23407_v5, 16  ;;  %v567_v10 = vshrl.u32 %v530_v4, 16  ;;  %20330 = vmatprep.subr.bf16.mxu0 %v22902_v2 }
  0x15   : > { %v570_v11 = vshll.u32 %v530_v4, 16  ;;  %v576_v12 = vshll.u32 %v23410_v6, 16  ;;  %v23415_v13 = vld [vmem:[%s23402_s29 + $0x10] sm:$0xf]  ;;  %v532_v18 = vld [vmem:[%s23402_s29 + $0x18] sm:$0xf]  ;;  %v17418_v49 = vcombine.low %v529_v3, %v530_v4 }
  0x16   : > { %v555_v14 = vrot.slane %v553_v7, 4  ;;  %v558_v15 = vrot.slane %v556_v8, 5  ;;  %v564_v16 = vrot.slane %v562_v9, 5  ;;  %v569_v17 = vrot.slane %v567_v10, 4  ;;  %v23419_v21 = vld [vmem:[%s23402_s29 + $0x14] sm:$0x1] }
  0x17   : > { %v572_v19 = vrot.slane %v570_v11, 5  ;;  %v578_v20 = vrot.slane %v576_v12, 5  ;;  %v23422_v22 = vld [vmem:[%s23402_s29 + $0x1c] sm:$0x1]  ;;  %v581_v24 = vshrl.u32 %v23415_v13, 16  ;;  %v584_v25 = vshll.u32 %v23415_v13, 16 }
  0x18   : > { %v559_v23 = vor.u32 %v558_v15, %v555_v14  ;;  %v590_v26 = vshll.u32 %v23419_v21, 16  ;;  %v595_v29 = vshrl.u32 %v532_v18, 16  ;;  %v598_v30 = vshll.u32 %v532_v18, 16  ;;  %v23452_v53 = vld [vmem:[%s23402_s29 + $0x20] sm:$0xf]  ;;  %v22910_v9 = vld [vmem:[%s28522_s2 + $0x30] sm:$0xff]  }
  0x19   : > { %v573_v28 = vor.u32 %v572_v19, %v569_v17  ;;  %v604_v31 = vshll.u32 %v23422_v22, 16  ;;  %v583_v33 = vrot.slane %v581_v24, 4  ;;  %v586_v34 = vrot.slane %v584_v25, 5  ;;  %v23455_v54 = vld [vmem:[%s23402_s29 + $0x28] sm:$0xf] }
  0x1a   : > { %v560_v32 = vrot.slane %v559_v23, 4  ;;  %v597_v36 = vrot.slane %v595_v29, 4  ;;  %v600_v37 = vrot.slane %v598_v30, 5  ;;  %v592_v40 = vrot.slane %v590_v26, 5  ;;  %v880_v55 = vld [vmem:[%s23402_s29] sm:$0xe] }
  0x1b   : > { %v574_v35 = vrot.slane %v573_v28, 4  ;;  %v587_v39 = vor.u32 %v586_v34, %v583_v33  ;;  %v606_v43 = vrot.slane %v604_v31, 5  ;;  %v881_v56 = vld [vmem:[%s23402_s29 + $0x8] sm:$0xe]  ;;  %v17419_v57 = vcombine.low %v23415_v13, %v532_v18  ;;  %v535_v1 = vld [vmem:[%s23402_s29 + $0x30] sm:$0xf] }
  0x1c   : > { %v565_v38 = vsel %vm23429_vm2, %v560_v32, %v564_v16  ;;  %v601_v42 = vor.u32 %v600_v37, %v597_v36  ;;  %v17420_v58 = vcombine.low %v23452_v53, %v23455_v54  ;;  %v909_v60 = vrot.slane %v23407_v5, 5  ;;  %v882_v3 = vld [vmem:[%s23402_s29 + $0x10] sm:$0xe]  ;;  %v883_v4 = vld [vmem:[%s23402_s29 + $0x18] sm:$0xe] }
  0x1d   : > { %v579_v41 = vsel %vm23429_vm2, %v574_v35, %v578_v20  ;;  %v588_v45 = vrot.slane %v587_v39, 4  ;;  %v913_v61 = vrot.slane %v23410_v6, 5  ;;  %v17428_v62 = vrot.slane %v880_v55, 9  ;;  %v23480_v5 = vld [vmem:[%s23402_s29 + $0x24] sm:$0x1] }
  0x1e   : > { %v17408_v44 = vcombine.low %v565_v38, %v579_v41  ;;  %v602_v46 = vrot.slane %v601_v42, 4  ;;  %v17429_v63 = vrot.slane %v881_v56, 9  ;;  %v884_v6 = vld [vmem:[%s23402_s29 + $0x20] sm:$0xe]  ;;  %v23491_v10 = vld [vmem:[%s23402_s29 + $0x2c] sm:$0x1] }
  0x1f   : > { %v593_v47 = vsel %vm23429_vm2, %v588_v45, %v592_v40  ;;  %v910_v7 = vsel %vm23467_vm6, %v17428_v62, %v909_v60  ;;  %v885_v11 = vld [vmem:[%s23402_s29 + $0x28] sm:$0xe]  ;;  %v917_v12 = vrot.slane %v23419_v21, 5  ;;  %v921_v13 = vrot.slane %v23422_v22, 5  ;;  %v23501_v25 = vld [vmem:[%s23402_s29 + $0x34] sm:$0x1] }
  0x20   : > { %20322 = vmatprep.mubr.msk.bf16.mxu0 %vm693_vm3, %v17408_v44  ;;  %v607_v48 = vsel %vm23429_vm2, %v602_v46, %v606_v43  ;;  %v914_v8 = vsel %vm23467_vm6, %v17429_v63, %v913_v61  ;;  %v17430_v15 = vrot.slane %v882_v3, 9  ;;  %v17431_v16 = vrot.slane %v883_v4, 9  ;;  %v23505_v26 = vld [vmem:[%s23402_s29 + $0x3c] sm:$0x1]  ;;  %v886_v28 = vld [vmem:[%s23402_s29 + $0x30] sm:$0xe] }
  0x21   : > { %v17409_v50 = vcombine.low %v593_v47, %v607_v48  ;;  %v17432_v17 = vrot.slane %v884_v6, 9  ;;  %v925_v18 = vrot.slane %v23480_v5, 5  ;;  %v17440_v19 = vcombine.low %v910_v7, %v914_v8  ;;  %v887_v29 = vld [vmem:[%s23402_s29 + $0x38] sm:$0xe]  ;;  %v17472_v34 = vld [vmem:[%s23402_s29 + $0x8] sm:$0xf] }
  0x22   : > { %v17433_v20 = vrot.slane %v885_v11, 9  ;;  %v929_v23 = vrot.slane %v23491_v10, 5  ;;  %v637_v21 = vshrl.u32 %v535_v1, 16  ;;  %v640_v22 = vshll.u32 %v535_v1, 16  ;;  %v17474_v35 = vld [vmem:[%s23402_s29 + $0x10] sm:$0xf] }
  0x23   : > { %20323 = vmatmul.mubr.msk.bf16.vlgmr.msra.gmra.mrb[0].mxu0 %vm693_vm3, %v17409_v50  ;;  %v918_v30 = vsel %vm23467_vm6, %v17430_v15, %v917_v12  ;;  %v922_v31 = vsel %vm23467_vm6, %v17431_v16, %v921_v13  ;;  %v926_v32 = vsel %vm23467_vm6, %v17432_v17, %v925_v18  ;;  %v17434_v36 = vrot.slane %v886_v28, 9  ;;  %v23523_v42 = vld [vmem:[%s23402_s29 + $0xc] sm:$0x1]  ;;  %v23526_v43 = vld [vmem:[%s23402_s29 + $0x14] sm:$0x1]  ;;  %v22911_v56 = vld [vmem:[%s28522_s2 + $0x38] sm:$0xff]  }
  0x24   : > { %20331 = vmatpush3.bf16.msra.mxu0 %v22902_v2  ;;  %20334 = vmatprep.mubr.msk.bf16.mxu0 %vm693_vm3, %v17418_v49  ;;  %v23474_v2 = vld [vmem:[%s23402_s29 + $0x38] sm:$0xf]  ;;  %v930_v33 = vsel %vm23467_vm6, %v17433_v20, %v929_v23  ;;  %v933_v37 = vrot.slane %v23501_v25, 5  ;;  %v17435_v38 = vrot.slane %v887_v29, 9  ;;  %v937_v39 = vrot.slane %v23505_v26, 5 }
  0x25   : > { %20332 = vmatprep.subr.bf16.mxu0 %v22903_v51  ;;  %v17421_v14 = vcombine.low %v535_v1, %v23474_v2  ;;  %v651_v24 = vshrl.u32 %v23474_v2, 16  ;;  %v17441_v40 = vcombine.low %v918_v30, %v922_v31  ;;  %v17442_v41 = vcombine.low %v926_v32, %v930_v33  ;;  %v17476_v44 = vld [vmem:[%s23402_s29 + $0x18] sm:$0xf]  ;;  %v17478_v49 = vld [vmem:[%s23402_s29 + $0x20] sm:$0xf] }
  0x26   : > { %v1201_v45 = vshrl.u32 %v17472_v34, 16  ;;  %v1204_v46 = vshll.u32 %v17472_v34, 16  ;;  %v1215_v47 = vshrl.u32 %v17474_v35, 16  ;;  %v1218_v48 = vshll.u32 %v17474_v35, 16  ;;  %v17480_v61 = vld [vmem:[%s23402_s29 + $0x28] sm:$0xf] }
  0x27   : > { %v23530_v50 = vrot.slane %v637_v21, 4  ;;  %v654_v55 = vshll.u32 %v23474_v2, 16  ;;  %v1232_v60 = vshll.u32 %v17476_v44, 16  ;;  %v934_v62 = vsel %vm23467_vm6, %v17434_v36, %v933_v37  ;;  %v23551_v1 = vld [vmem:[%s28522_s2 + $0x40] sm:$0xff]   ;;  %v17482_v12 = vld [vmem:[%s23402_s29 + $0x30] sm:$0xf] }
  0x28   : > { %20333 = vmatpush3.bf16.msra.mxu0 %v22903_v51  ;;  %v23532_v51 = vrot.slane %v640_v22, 5  ;;  %v938_v63 = vsel %vm23467_vm6, %v17435_v38, %v937_v39  ;;  %v1243_v3 = vshrl.u32 %v17478_v49, 16  ;;  %v1246_v4 = vshll.u32 %v17478_v49, 16  ;;  %v22912_v15 = vld [vmem:[%s23402_s29 + $0x8] ss:$8 sps:$4 sm:$0xff]  }
  0x29   : > { %20342 = vmatprep.subr.bf16.mxu0 %v22905_v52  ;;  %v1203_v6 = vrot.slane %v1201_v45, 4  ;;  %v1206_v7 = vrot.slane %v1204_v46, 5  ;;  %v1217_v8 = vrot.slane %v1215_v47, 4  ;;  %v1220_v11 = vrot.slane %v1218_v48, 5  ;;  %v17484_v21 = vld [vmem:[%s23402_s29 + $0x38] sm:$0xf] }
  0x2a   : > { %v1257_v13 = vshrl.u32 %v17480_v61, 16  ;;  %v1234_v18 = vrot.slane %v1232_v60, 5  ;;  %v1245_v20 = vrot.slane %v1243_v3, 4  ;;  %v1248_v23 = vrot.slane %v1246_v4, 5  ;;  %v23562_v22 = vld [vmem:[%s23402_s29 + $0x1c] sm:$0x1] }
  0x2b   : > { %v1271_v28 = vshrl.u32 %v17482_v12, 16  ;;  %v1274_v29 = vshll.u32 %v17482_v12, 16  ;;  %v1207_v30 = vor.u32 %v1206_v7, %v1203_v6  ;;  %v1221_v31 = vor.u32 %v1220_v11, %v1217_v8  ;;  %v23569_v32 = vld [vmem:[%s23402_s29 + $0x2c] sm:$0x1]  ;;  %v17486_v35 = vld [vmem:[%s23402_s29 + $0x40] sm:$0xf] }
  0x2c   : > { %v1259_v33 = vrot.slane %v1257_v13, 4  ;;  %v23573_v36 = vld [vmem:[%s23402_s29 + $0x34] sm:$0x1]  ;;  %v23576_v37 = vld [vmem:[%s23402_s29 + $0x3c] sm:$0x1]  ;;  %v1285_v38 = vshrl.u32 %v17484_v21, 16 }
  0x2d   : > { %v1288_v39 = vshll.u32 %v17484_v21, 16  ;;  %v1302_v45 = vshll.u32 %v17486_v35, 16  ;;  %v22914_v46 = vld [vmem:[%s23402_s29 + $0x18] ss:$8 sps:$4 sm:$0xff]   ;;  %v1208_v47 = vrot.slane %v1207_v30, 4  ;;  %v1222_v48 = vrot.slane %v1221_v31, 4 }
  0x2e   : > { %v1238_v49 = vshll.u32 %v23562_v22, 16  ;;  %v1266_v60 = vshll.u32 %v23569_v32, 16  ;;  %v1294_v4 = vshll.u32 %v23576_v37, 16  ;;  %v23591_v6 = vrot.slane %v654_v55, 5  ;;  %v22915_v7 = vld [vmem:[%s23402_s29 + $0x28] ss:$8 sps:$4 sm:$0xff]  }
  0x2f   : > { %20335 = vmatmul.mubr.msk.bf16.vlgmr.msra.gmra.mrb[0].mxu0 %vm693_vm3, %v17419_v57  ;;  %v1210_v57 = vshll.u32 %v23523_v42, 16  ;;  %v1290_v3 = vrot.slane %v1288_v39, 5  ;;  %v1304_v12 = vrot.slane %v1302_v45, 5  ;;  %v22916_v13 = vld [vmem:[%s28522_s2 + $0x48] sm:$0xff]   ;;  %v23620_v21 = vld [vmem:[%s28522_s2 + $0x50] sm:$0xff]   ;;  %v643_v39 = vor.u32 %v23532_v51, %v23530_v50 }
  0x30   : > { %20343 = vmatpush3.bf16.msra.mxu0 %v22905_v52  ;;  %20338 = vmatprep.mubr.msk.bf16.mxu0 %vm693_vm3, %v17420_v58  ;;  %v23534_v52 = vrot.slane %v651_v24, 4  ;;  %v1224_v58 = vshll.u32 %v23526_v43, 16  ;;  %v23565_v24 = vld [vmem:[%s23402_s29 + $0x24] sm:$0x1]  ;;  %v17502_v55 = vld [vmem:[%s23402_s29 + $0x8] sm:$0xe] }
  0x31   : > { %20344 = vmatprep.subr.bf16.mxu0 %v22908_v59  ;;  %v23556_v16 = vrot.slane %v1210_v57, 5  ;;  %v23626_v30 = vrot.slane %v1294_v4, 5  ;;  %v1468_v4 = vrot.slane %v23569_v32, 5  ;;  %v18486_v0 = vld [vmem:[%s23872_s20 + $0x74] sm:$0x1] }
  0x32   : > { %v23558_v17 = vrot.slane %v1224_v58, 5  ;;  %v1249_v58 = vor.u32 %v1248_v23, %v1245_v20  ;;  %v23613_v23 = vrot.slane %v1266_v60, 5  ;;  %v17554_v60 = vld [vmem:[%s23402_s29 + $0x10] sm:$0xf] }
  0x34   : > { %20345 = vmatpush3.bf16.msra.mxu0 %v22908_v59  ;;  %v1229_v59 = vshrl.u32 %v17476_v44, 16  ;;  %v1299_v44 = vshrl.u32 %v17486_v35, 16  ;;  %v23611_v20 = vrot.slane %v1249_v58, 4  ;;  %v17504_v35 = vld [vmem:[%s23402_s29 + $0x18] sm:$0xe]  ;;  %v1460_v58 = vrot.slane %v23562_v22, 5 }
  0x35   : > { %20354 = vmatprep.subr.bf16.mxu0 %v22910_v9 }
  0x36   : > { %v1301_v11 = vrot.slane %v1299_v44, 4  ;;  %v1452_v44 = vrot.slane %v23523_v42, 5  ;;  %v657_v42 = vor.u32 %v23591_v6, %v23534_v52  ;;  %v23805_v6 = vld [vmem:[%s23402_s29 + $0x3c] sm:$0x1] }
  0x37   : > { %20339 = vmatmul.mubr.msk.bf16.gmra.mrb[4].mxu0 %vm693_vm3, %v17421_v14  ;;  %v1260_v14 = vshll.u32 %v17480_v61, 16  ;;  %v23585_v61 = vld [vmem:[%s23402_s29 + $0x44] sm:$0x1] }
  0x38   : > { %20346 = vmatprep.mubr.msk.bf16.mxu0 %vm693_vm3, %v17440_v19  ;;  %v17443_v19 = vcombine.low %v934_v62, %v938_v63  ;;  %v1280_v62 = vshll.u32 %v23573_v36, 16  ;;  %v1287_v63 = vrot.slane %v1285_v38, 4  ;;  %v1308_v2 = vshll.u32 %v23585_v61, 16  ;;  %v17505_v38 = vld [vmem:[%s23402_s29 + $0x20] sm:$0xe] }
  0x39   : > { %v1262_v34 = vrot.slane %v1260_v14, 5  ;;  %v1213_v14 = vsel %vm23429_vm2, %v1208_v47, %v23556_v16  ;;  %v17503_v16 = vld [vmem:[%s23402_s29 + $0x10] sm:$0xe] }
  0x3a   : > { %v17511_v45 = vrot.slane %v17503_v16, 9 }
  0x3f   : > { %20347 = vmatmul.mubr.msk.bf16.vlgmr.msra.gmra.mrb[0].mxu0 %vm693_vm3, %v17441_v40  ;;  %v1273_v40 = vrot.slane %v1271_v28, 4 }
  0x40   : > { %20355 = vmatpush3.bf16.msra.mxu0 %v22910_v9  ;;  %20350 = vmatprep.mubr.msk.bf16.mxu0 %vm693_vm3, %v17442_v41  ;;  %v1231_v9 = vrot.slane %v1229_v59, 4  ;;  %v1276_v41 = vrot.slane %v1274_v29, 5  ;;  %v1263_v59 = vor.u32 %v1262_v34, %v1259_v33  ;;  %v1291_v29 = vor.u32 %v1290_v3, %v1287_v63 }
  0x41   : > { %20356 = vmatprep.subr.bf16.mxu0 %v22911_v56  ;;  %v1305_v33 = vor.u32 %v1304_v12, %v1301_v11  ;;  %v17510_v34 = vrot.slane %v17502_v55, 9  ;;  %v1464_v63 = vrot.slane %v23565_v24, 5  ;;  %v17508_v11 = vld [vmem:[%s23402_s29 + $0x38] sm:$0xe]  ;;  %v17509_v12 = vld [vmem:[%s23402_s29 + $0x40] sm:$0xe] }
  0x42   : > { %v1235_v57 = vor.u32 %v1234_v18, %v1231_v9  ;;  %v1277_v8 = vor.u32 %v1276_v41, %v1273_v40  ;;  %v1227_v18 = vsel %vm23429_vm2, %v1222_v48, %v23558_v17  ;;  %v23622_v28 = vrot.slane %v1263_v59, 4  ;;  %v22917_v40 = vld [vmem:[%s23402_s29 + $0x38] ss:$8 sps:$4 sm:$0xff]  }
  0x43   : > { %v23624_v17 = vrot.slane %v1280_v62, 5  ;;  %v1310_v41 = vrot.slane %v1308_v2, 5  ;;  %v17492_v47 = vcombine.low %v1213_v14, %v1227_v18  ;;  %v17513_v59 = vrot.slane %v17505_v38, 9 }
  0x44   : > { %20357 = vmatpush3.bf16.msra.mxu0 %v22911_v56  ;;  %v1252_v56 = vshll.u32 %v23565_v24, 16  ;;  %v23630_v31 = vrot.slane %v1277_v8, 4  ;;  %v1306_v62 = vrot.slane %v1305_v33, 4  ;;  %v1269_v8 = vsel %vm23429_vm2, %v23622_v28, %v23613_v23 }
  0x45   : > { %20366 = vmatprep.subr.bf16.mxu0 %v23551_v1  ;;  %v23667_v24 = vsel %vm23467_vm6, %v17510_v34, %v1452_v44  ;;  %v1472_v14 = vrot.slane %v23573_v36, 5  ;;  %v1747_v2 = vshll.u32 %v17554_v60, 16  ;;  %v23695_v16 = vsel %vm23467_vm6, %v17513_v59, %v1464_v63  ;;  %v17558_v34 = vld [vmem:[%s23402_s29 + $0x20] sm:$0xf]  ;;  %v17562_v63 = vld [vmem:[%s23402_s29 + $0x30] sm:$0xf] }
  0x46   : > { %v23602_v9 = vrot.slane %v1252_v56, 5  ;;  %v17507_v56 = vld [vmem:[%s23402_s29 + $0x30] sm:$0xe]  ;;  %v1283_v22 = vsel %vm23429_vm2, %v23630_v31, %v23624_v17  ;;  %v1311_v36 = vsel %vm23429_vm2, %v1306_v62, %v1310_v41  ;;  %v17516_v17 = vrot.slane %v17508_v11, 9 }
  0x47   : > { %20351 = vmatmul.mubr.msk.bf16.gmra.mrb[4].mxu0 %vm693_vm3, %v17443_v19  ;;  %v23609_v19 = vrot.slane %v1235_v57, 4  ;;  %v1292_v57 = vrot.slane %v1291_v29, 4  ;;  %v1476_v29 = vrot.slane %v23576_v37, 5  ;;  %v1480_v31 = vrot.slane %v23585_v61, 5 }
  0x48   : > { %20358 = vmatprep.mubr.msk.bf16.mxu0 %vm693_vm3, %v22912_v15  ;;  %v23600_v15 = vrot.slane %v1238_v49, 5  ;;  %v1255_v49 = vsel %vm23429_vm2, %v23611_v20, %v23602_v9  ;;  %v1744_v9 = vshrl.u32 %v17554_v60, 16  ;;  %v17494_v37 = vcombine.low %v1269_v8, %v1283_v22  ;;  %v23753_v22 = vld [vmem:[%s28522_s2 + $0x60] sm:$0xff]  }
  0x49   : > { %v1297_v55 = vsel %vm23429_vm2, %v1292_v57, %v23626_v30  ;;  %v17517_v30 = vrot.slane %v17509_v12, 9  ;;  %v23724_v57 = vld [vmem:[%s23402_s29 + $0x24] sm:$0x1]  ;;  %v23736_v59 = vsel %vm23467_vm6, %v17516_v17, %v1476_v29  ;;  %v626_v17 = vshll.u32 %v23455_v54, 16 }
  0x4a   : > { %v1241_v48 = vsel %vm23429_vm2, %v23609_v19, %v23600_v15  ;;  %v23677_v15 = vld [vmem:[%s23402_s29 + $0x14] sm:$0x1]  ;;  %v23688_v19 = vld [vmem:[%s23402_s29 + $0x1c] sm:$0x1]  ;;  %v23709_v38 = vrot.slane %v1744_v9, 4  ;;  %v1800_v9 = vshrl.u32 %v17562_v63, 16 }
  0x4b   : > { %v1753_v33 = vshll.u32 %v23677_v15, 16  ;;  %v1767_v41 = vshll.u32 %v23688_v19, 16  ;;  %v17493_v44 = vcombine.low %v1241_v48, %v1255_v49  ;;  %v22919_v48 = vld [vmem:[%s28522_s2 + $0x58] sm:$0xff]   ;;  %v23740_v60 = vsel %vm23467_vm6, %v17517_v30, %v1480_v31  ;;  %v17566_v30 = vld [vmem:[%s23402_s29 + $0x40] sm:$0xf] }
  0x4d   : > { %v23742_v62 = vrot.slane %v1753_v33, 5 }
  0x4f   : > { %20359 = vmatmul.mubr.msk.bf16.vlgmr.msra.gmra.mrb[0].mxu0 %vm693_vm3, %v22914_v46  ;;  %v17506_v46 = vld [vmem:[%s23402_s29 + $0x28] sm:$0xe] }
  0x50   : > { %20367 = vmatpush3.bf16.msra.mxu0 %v23551_v1  ;;  %20362 = vmatprep.mubr.msk.bf16.mxu0 %vm693_vm3, %v22915_v7  ;;  %v1456_v1 = vrot.slane %v23526_v43, 5  ;;  %v17512_v43 = vrot.slane %v17504_v35, 9  ;;  %v17514_v3 = vrot.slane %v17506_v46, 9  ;;  %v17556_v7 = vld [vmem:[%s23402_s29 + $0x18] sm:$0xf]  ;;  %v17495_v46 = vcombine.low %v1297_v55, %v1311_v36 }
  0x51   : > { %20368 = vmatprep.subr.bf16.mxu0 %v22916_v13  ;;  %v1758_v20 = vshrl.u32 %v17556_v7, 16  ;;  %v1761_v23 = vshll.u32 %v17556_v7, 16  ;;  %v1775_v7 = vshll.u32 %v17558_v34, 16  ;;  %v612_v55 = vshll.u32 %v23452_v53, 16 }
  0x52   : > { %v23671_v32 = vsel %vm23467_vm6, %v17511_v45, %v1456_v1  ;;  %v23685_v18 = vsel %vm23467_vm6, %v17512_v43, %v1460_v58  ;;  %v23699_v28 = vsel %vm23467_vm6, %v17514_v3, %v1468_v4  ;;  %v17560_v1 = vld [vmem:[%s23402_s29 + $0x28] sm:$0xf]  ;;  %v23727_v43 = vld [vmem:[%s23402_s29 + $0x2c] sm:$0x1]  ;;  %v1772_v58 = vshrl.u32 %v17558_v34, 16 }
  0x53   : > { %v23714_v45 = vrot.slane %v1758_v20, 4  ;;  %v23716_v61 = vrot.slane %v1761_v23, 5  ;;  %v23747_v4 = vrot.slane %v1767_v41, 5  ;;  %v1786_v8 = vshrl.u32 %v17560_v1, 16 }
  0x54   : > { %20369 = vmatpush3.bf16.msra.mxu0 %v22916_v13  ;;  %v17515_v13 = vrot.slane %v17507_v56, 9  ;;  %v17523_v56 = vcombine.low %v23685_v18, %v23695_v16  ;;  %v1789_v11 = vshll.u32 %v17560_v1, 16  ;;  %v1795_v12 = vshll.u32 %v23727_v43, 16  ;;  %v17585_v18 = vld [vmem:[%s23402_s29 + $0x18] sm:$0xe]  ;;  %v23864_v16 = vld [vmem:[%s28522_s2 + $0x70] sm:$0xff]  }
  0x55   : > { %20378 = vmatprep.subr.bf16.mxu0 %v23620_v21  ;;  %v1803_v20 = vshll.u32 %v17562_v63, 16  ;;  %v618_v23 = vshll.u32 %v23480_v5, 16  ;;  %v623_v36 = vshrl.u32 %v23455_v54, 16  ;;  %v23769_v29 = vrot.slane %v1775_v7, 5 }
  0x56   : > { %v23707_v35 = vsel %vm23467_vm6, %v17515_v13, %v1472_v14  ;;  %v17564_v13 = vld [vmem:[%s23402_s29 + $0x38] sm:$0xf]  ;;  %v23762_v14 = vrot.slane %v1772_v58, 4  ;;  %v614_v33 = vrot.slane %v612_v55, 5  ;;  %v23774_v34 = vrot.slane %v1789_v11, 5 }
  0x57   : > { %20363 = vmatmul.mubr.msk.bf16.gmra.mrb[4].mxu0 %vm693_vm3, %v22917_v40  ;;  %v23711_v40 = vrot.slane %v1747_v2, 5  ;;  %v17524_v49 = vcombine.low %v23699_v28, %v23707_v35  ;;  %v609_v2 = vshrl.u32 %v23452_v53, 16  ;;  %v625_v53 = vrot.slane %v623_v36, 4 }
  0x58   : > { %20370 = vmatprep.mubr.msk.bf16.mxu0 %vm693_vm3, %v17492_v47  ;;  %v17522_v47 = vcombine.low %v23667_v24, %v23671_v32  ;;  %v1764_v24 = vor.u32 %v23716_v61, %v23714_v45  ;;  %v1781_v32 = vshll.u32 %v23724_v57, 16  ;;  %v23776_v41 = vrot.slane %v1800_v9, 4  ;;  %v17568_v61 = vld [vmem:[%s23402_s29 + $0x48] sm:$0xf] }
  0x59   : > { %v1750_v3 = vor.u32 %v23711_v40, %v23709_v38  ;;  %v611_v31 = vrot.slane %v609_v2, 4  ;;  %v1814_v38 = vshrl.u32 %v17564_v13, 16  ;;  %v628_v40 = vrot.slane %v626_v17, 5  ;;  %v23812_v17 = vld [vmem:[%s23402_s29 + $0x44] sm:$0x1] }
  0x5a   : > { %v632_v54 = vshll.u32 %v23491_v10, 16  ;;  %v1817_v45 = vshll.u32 %v17564_v13, 16  ;;  %v1828_v1 = vshrl.u32 %v17566_v30, 16  ;;  %v1831_v10 = vshll.u32 %v17566_v30, 16 }
  0x5b   : > { %v615_v5 = vor.u32 %v614_v33, %v611_v31  ;;  %v629_v58 = vor.u32 %v628_v40, %v625_v53  ;;  %v658_v13 = vrot.slane %v657_v42, 4  ;;  %v660_v9 = vshll.u32 %v23505_v26, 16  ;;  %v23802_v26 = vld [vmem:[%s23402_s29 + $0x34] sm:$0x1] }
  0x5c   : > { %v634_v7 = vrot.slane %v632_v54, 5  ;;  %v1842_v2 = vshrl.u32 %v17568_v61, 16  ;;  %v1845_v50 = vshll.u32 %v17568_v61, 16  ;;  %v23799_v52 = vrot.slane %v1764_v24, 4 }
  0x5d   : > { %v616_v63 = vrot.slane %v615_v5, 4  ;;  %v630_v11 = vrot.slane %v629_v58, 4  ;;  %v1778_v36 = vor.u32 %v23769_v29, %v23762_v14  ;;  %v1830_v30 = vrot.slane %v1828_v1, 4  ;;  %v22921_v14 = vld [vmem:[%s28522_s2 + $0x68] sm:$0xff]   ;;  %v17586_v58 = vld [vmem:[%s23402_s29 + $0x20] sm:$0xe] }
  0x5e   : > { %v1844_v33 = vrot.slane %v1842_v2, 4  ;;  %v1809_v40 = vshll.u32 %v23802_v26, 16  ;;  %v23834_v54 = vrot.slane %v1781_v32, 5  ;;  %v17594_v2 = vrot.slane %v17586_v58, 9  ;;  %v18178_v58 = vld [vmem:[%s23872_s20 + $0x12c] sm:$0x1] }
  0x5f   : > { %20371 = vmatmul.mubr.msk.bf16.vlgmr.msra.gmra.mrb[0].mxu0 %vm693_vm3, %v17493_v44  ;;  %v620_v44 = vrot.slane %v618_v23, 5  ;;  %v635_v55 = vsel %vm23429_vm2, %v630_v11, %v634_v7  ;;  %v23797_v23 = vrot.slane %v1750_v3, 4  ;;  %v1833_v3 = vrot.slane %v1831_v10, 5  ;;  %v17588_v11 = vld [vmem:[%s23402_s29 + $0x30] sm:$0xe] }
  0x60   : > { %20379 = vmatpush3.bf16.msra.mxu0 %v23620_v21  ;;  %20374 = vmatprep.mubr.msk.bf16.mxu0 %vm693_vm3, %v17494_v37  ;;  %v23771_v21 = vrot.slane %v1786_v8, 4  ;;  %v23780_v37 = vrot.slane %v1803_v20, 5  ;;  %v646_v8 = vshll.u32 %v23501_v25, 16  ;;  %v662_v20 = vrot.slane %v660_v9, 5 }
  0x61   : > { %20380 = vmatprep.subr.bf16.mxu0 %v22919_v48  ;;  %v621_v25 = vsel %vm23429_vm2, %v616_v63, %v620_v44  ;;  %v1823_v44 = vshll.u32 %v23805_v6, 16  ;;  %v1834_v32 = vor.u32 %v1833_v3, %v1830_v30  ;;  %v1811_v63 = vrot.slane %v1809_v40, 5 }
  0x62   : > { %v648_v51 = vrot.slane %v646_v8, 5  ;;  %v17410_v42 = vcombine.low %v621_v25, %v635_v55  ;;  %v663_v24 = vsel %vm23429_vm2, %v658_v13, %v662_v20  ;;  %v1792_v31 = vor.u32 %v23774_v34, %v23771_v21  ;;  %v23827_v21 = vld [vmem:[%s23402_s29 + $0x4c] sm:$0x1]  ;;  %v17589_v25 = vld [vmem:[%s23402_s29 + $0x38] sm:$0xe] }
  0x63   : > { %v1806_v29 = vor.u32 %v23780_v37, %v23776_v41  ;;  %v17525_v34 = vcombine.low %v23736_v59, %v23740_v60  ;;  %v1756_v41 = vsel %vm23429_vm2, %v23797_v23, %v23742_v62  ;;  %v1770_v59 = vsel %vm23429_vm2, %v23799_v52, %v23747_v4  ;;  %v17584_v37 = vld [vmem:[%s23402_s29 + $0x10] sm:$0xe] }
  0x64   : > { %20381 = vmatpush3.bf16.msra.mxu0 %v22919_v48  ;;  %v644_v48 = vrot.slane %v643_v39, 4  ;;  %v1816_v39 = vrot.slane %v1814_v38, 4  ;;  %v1847_v38 = vrot.slane %v1845_v50, 5  ;;  %20326 = vmatprep.mubr.msk.bf16.mxu1 %vm693_vm3, %v17410_v42  ;;  %v23852_v60 = vrot.slane %v1795_v12, 5 }
  0x65   : > { %20390 = vmatprep.subr.bf16.mxu0 %v23753_v22  ;;  %v1793_v12 = vrot.slane %v1792_v31, 4  ;;  %v1851_v1 = vshll.u32 %v23827_v21, 16  ;;  %v1825_v35 = vrot.slane %v1823_v44, 5  ;;  %v1995_v8 = vrot.slane %v23677_v15, 5  ;;  %v17591_v31 = vld [vmem:[%s23402_s29 + $0x48] sm:$0xe] }
  0x66   : > { %v1848_v61 = vor.u32 %v1847_v38, %v1844_v33  ;;  %v17593_v10 = vrot.slane %v17585_v18, 9  ;;  %v1835_v13 = vrot.slane %v1834_v32, 4  ;;  %v1999_v9 = vrot.slane %v23688_v19, 5  ;;  %v22925_v32 = vld [vmem:[%s23402_s29 + $0x30] ss:$8 sps:$4 sm:$0xff]  }
  0x67   : > { %20375 = vmatmul.mubr.msk.bf16.gmra.mrb[4].mxu0 %vm693_vm3, %v17495_v46  ;;  %v1819_v46 = vrot.slane %v1817_v45, 5  ;;  %v1837_v45 = vshll.u32 %v23812_v17, 16  ;;  %v2003_v50 = vrot.slane %v23724_v57, 5  ;;  %v2007_v20 = vrot.slane %v23727_v43, 5 }
  0x68   : > { %20382 = vmatprep.mubr.msk.bf16.mxu0 %vm693_vm3, %v17522_v47  ;;  %v649_v47 = vsel %vm23429_vm2, %v644_v48, %v648_v51  ;;  %v17592_v48 = vrot.slane %v17584_v37, 9  ;;  %v22922_v51 = vld [vmem:[%s23402_s29 + $0x10] ss:$8 sps:$4 sm:$0xff]   ;;  %v1798_v19 = vsel %vm23429_vm2, %v1793_v12, %v23852_v60  ;;  %v17596_v43 = vrot.slane %v17588_v11, 9  ;;  %v22924_v60 = vld [vmem:[%s23402_s29 + $0x20] ss:$8 sps:$4 sm:$0xff]  }
  0x69   : > { %v17411_v53 = vcombine.low %v649_v47, %v663_v24  ;;  %v1820_v5 = vor.u32 %v1819_v46, %v1816_v39  ;;  %v1839_v7 = vrot.slane %v1837_v45, 5  ;;  %v1849_v39 = vrot.slane %v1848_v61, 4  ;;  %v17590_v47 = vld [vmem:[%s23402_s29 + $0x40] sm:$0xe] }
  0x6a   : > { %v1853_v46 = vrot.slane %v1851_v1, 5  ;;  %v2011_v30 = vrot.slane %v23802_v26, 5  ;;  %v17597_v3 = vrot.slane %v17589_v25, 9  ;;  %v2015_v24 = vrot.slane %v23805_v6, 5  ;;  %v18177_v6 = vld [vmem:[%s23872_s20 + $0x128] sm:$0xf] }
  0x6b   : > { %20327 = vmatmul.mubr.msk.bf16.vlgmr.msra.gmra.mrb[0].mxu1 %vm693_vm3, %v17411_v53  ;;  %v1821_v28 = vrot.slane %v1820_v5, 4  ;;  %v1840_v33 = vsel %vm23429_vm2, %v1835_v13, %v1839_v7  ;;  %v23902_v38 = vsel %vm23467_vm6, %v17592_v48, %v1995_v8  ;;  %v23906_v53 = vsel %vm23467_vm6, %v17593_v10, %v1999_v9  ;;  %v18176_v1 = vld [vmem:[%s23872_s20 + $0x124] sm:$0x1]  ;;  %v18180_v48 = vld [vmem:[%s23872_s20 + $0x134] sm:$0x1] }
  0x6c   : > { %v23910_v26 = vsel %vm23467_vm6, %v17594_v2, %v2003_v50  ;;  %v17598_v44 = vrot.slane %v17590_v47, 9  ;;  %v2023_v45 = vrot.slane %v23827_v21, 5  ;;  %v23926_v37 = vsel %vm23467_vm6, %v17596_v43, %v2011_v30  ;;  %v18185_v8 = vld [vmem:[%s23872_s20 + $0x148] sm:$0xf]  ;;  %v18187_v2 = vld [vmem:[%s23872_s20 + $0x150] sm:$0xf] }
  0x6d   : > { %v1826_v42 = vsel %vm23429_vm2, %v1821_v28, %v1825_v35  ;;  %v23930_v18 = vsel %vm23467_vm6, %v17597_v3, %v2015_v24  ;;  %v17604_v61 = vcombine.low %v23902_v38, %v23906_v53  ;;  %v6366_v7 = vshll.u32 %v18177_v6, 16 }
  0x6e   : > { %v17606_v28 = vcombine.low %v23926_v37, %v23930_v18  ;;  %v6358_v10 = vshll.u32 %v18176_v1, 16  ;;  %v6386_v43 = vshll.u32 %v18180_v48, 16  ;;  %v6433_v30 = vshrl.u32 %v18187_v2, 16  ;;  %v18293_v48 = vld [vmem:[%s23872_s20 + $0x1b0] sm:$0xf] }
  0x6f   : > { %20383 = vmatmul.mubr.msk.bf16.vlgmr.msra.gmra.mrb[0].mxu0 %vm693_vm3, %v17523_v56  ;;  %v1779_v56 = vrot.slane %v1778_v36, 4  ;;  %v18175_v36 = vld [vmem:[%s23872_s20 + $0x120] sm:$0xf]  ;;  %v6368_v47 = vrot.slane %v6366_v7, 5 }
  0x70   : > { %20391 = vmatpush3.bf16.msra.mxu0 %v23753_v22  ;;  %20386 = vmatprep.mubr.msk.bf16.mxu0 %vm693_vm3, %v17524_v49  ;;  %v1807_v22 = vrot.slane %v1806_v29, 4  ;;  %v17587_v49 = vld [vmem:[%s23402_s29 + $0x28] sm:$0xe]  ;;  %v6349_v40 = vshrl.u32 %v18175_v36, 16  ;;  %v6352_v5 = vshll.u32 %v18175_v36, 16 }
  0x71   : > { %20392 = vmatprep.subr.bf16.mxu0 %v22921_v14  ;;  %v17595_v55 = vrot.slane %v17587_v49, 9  ;;  %v1784_v15 = vsel %vm23429_vm2, %v1779_v56, %v23834_v54  ;;  %v17599_v54 = vrot.slane %v17591_v31, 9  ;;  %v6363_v56 = vshrl.u32 %v18177_v6, 16  ;;  %v18182_v36 = vld [vmem:[%s23872_s20 + $0x13c] sm:$0x1] }
  0x72   : > { %v1812_v57 = vsel %vm23429_vm2, %v1807_v22, %v1811_v63  ;;  %v23944_v21 = vcombine.low %v1784_v15, %v1798_v19  ;;  %v18179_v22 = vld [vmem:[%s23872_s20 + $0x130] sm:$0xf]  ;;  %v6351_v62 = vrot.slane %v6349_v40, 4  ;;  %v6354_v23 = vrot.slane %v6352_v5, 5  ;;  %v22926_v63 = vld [vmem:[%s28522_s2 + $0x78] sm:$0xff]  }
  0x73   : > { %v23918_v29 = vsel %vm23467_vm6, %v17595_v55, %v2007_v20  ;;  %v23946_v12 = vcombine.low %v1812_v57, %v1826_v42  ;;  %v23970_v49 = vsel %vm23467_vm6, %v17599_v54, %v2023_v45  ;;  %v6365_v11 = vrot.slane %v6363_v56, 4  ;;  %v23982_v55 = vld [vmem:[%s28522_s2 + $0x80] sm:$0xff]   ;;  %v18186_v5 = vld [vmem:[%s23872_s20 + $0x14c] sm:$0x1]  ;;  %v18188_v56 = vld [vmem:[%s23872_s20 + $0x154] sm:$0x1] }
  0x74   : > { %20393 = vmatpush3.bf16.msra.mxu0 %v22921_v14  ;;  %v1854_v14 = vsel %vm23429_vm2, %v1849_v39, %v1853_v46  ;;  %v17605_v52 = vcombine.low %v23910_v26, %v23918_v29  ;;  %v6377_v13 = vshrl.u32 %v18179_v22, 16  ;;  %v6380_v9 = vshll.u32 %v18179_v22, 16  ;;  %v18189_v46 = vld [vmem:[%s23872_s20 + $0x158] sm:$0xf]  ;;  %v22927_v42 = vld [vmem:[%s23402_s29 + $0x40] ss:$8 sps:$4 sm:$0xff]   ;;  %s527_s29 = scalar_lea.vmem %s28535_s15, %s19545_s16 }
  0x75   : > { %20402 = vmatprep.subr.bf16.mxu0 %v23864_v16  ;;  %v23953_v4 = vcombine.low %v1840_v33, %v1854_v14  ;;  %v6355_v20 = vor.u32 %v6354_v23, %v6351_v62  ;;  %v6372_v15 = vshll.u32 %v18178_v58, 16  ;;  %v6419_v19 = vshrl.u32 %v18185_v8, 16  ;;  %v18184_v31 = vld [vmem:[%s23872_s20 + $0x144] sm:$0x1]  ;;  %v18190_v22 = vld [vmem:[%s23872_s20 + $0x15c] sm:$0x1] }
  0x76   : > { %v6422_v57 = vshll.u32 %v18185_v8, 16  ;;  %v6379_v3 = vrot.slane %v6377_v13, 4  ;;  %v6382_v24 = vrot.slane %v6380_v9, 5  ;;  %v6447_v33 = vshrl.u32 %v18189_v46, 16  ;;  %v18194_v29 = vld [vmem:[%s23872_s20 + $0x36c] sm:$0x1] }
  0x77   : > { %20387 = vmatmul.mubr.msk.bf16.gmra.mrb[4].mxu0 %vm693_vm3, %v17525_v34  ;;  %v2019_v34 = vrot.slane %v23812_v17, 5  ;;  %v23942_v17 = vcombine.low %v1756_v41, %v1770_v59  ;;  %v18181_v41 = vld [vmem:[%s23872_s20 + $0x138] sm:$0xf]  ;;  %v18183_v59 = vld [vmem:[%s23872_s20 + $0x140] sm:$0xf]  ;;  %v6450_v6 = vshll.u32 %v18189_v46, 16  ;;  %v6369_v58 = vor.u32 %v6368_v47, %v6365_v11 }
  0x78   : > { %20394 = vmatprep.mubr.msk.bf16.mxu0 %vm693_vm3, %v22922_v51  ;;  %v6391_v50 = vshrl.u32 %v18181_v41, 16  ;;  %v6394_v25 = vshll.u32 %v18181_v41, 16  ;;  %v6405_v51 = vshrl.u32 %v18183_v59, 16  ;;  %v6408_v39 = vshll.u32 %v18183_v59, 16 }
  0x79   : > { %v23966_v35 = vsel %vm23467_vm6, %v17598_v44, %v2019_v34  ;;  %v23988_v54 = vrot.slane %v6358_v10, 5  ;;  %v23990_v45 = vrot.slane %v6372_v15, 5  ;;  %v23994_v1 = vrot.slane %v6355_v20, 4 }
  0x7a   : > { %v6393_v14 = vrot.slane %v6391_v50, 4  ;;  %v6396_v40 = vrot.slane %v6394_v25, 5  ;;  %v6407_v44 = vrot.slane %v6405_v51, 4  ;;  %v6410_v34 = vrot.slane %v6408_v39, 5 }
  0x7b   : > { %v6435_v62 = vrot.slane %v6433_v30, 4  ;;  %v23997_v41 = vrot.slane %v6386_v43, 5  ;;  %v6400_v59 = vshll.u32 %v18182_v36, 16  ;;  %v6452_v7 = vrot.slane %v6450_v6, 5  ;;  %v18297_v36 = vld [vmem:[%s23872_s20 + $0x1c0] sm:$0xf] }
  0x7c   : > { %v6383_v8 = vor.u32 %v6382_v24, %v6379_v3  ;;  %v6397_v10 = vor.u32 %v6396_v40, %v6393_v14  ;;  %v6411_v13 = vor.u32 %v6410_v34, %v6407_v44  ;;  %v6414_v9 = vshll.u32 %v18184_v31, 16  ;;  %v22929_v43 = vld [vmem:[%s28522_s2 + $0x88] sm:$0xff]   ;;  %v18294_v14 = vld [vmem:[%s23872_s20 + $0x1b4] sm:$0x1] }
  0x7d   : > { %v6428_v50 = vshll.u32 %v18186_v5, 16  ;;  %v6442_v25 = vshll.u32 %v18188_v56, 16  ;;  %v6456_v51 = vshll.u32 %v18190_v22, 16  ;;  %v6370_v39 = vrot.slane %v6369_v58, 4  ;;  %v18296_v5 = vld [vmem:[%s23872_s20 + $0x1bc] sm:$0x1] }
  0x7e   : > { %v7361_v20 = vshrl.u32 %v18293_v48, 16  ;;  %v7364_v15 = vshll.u32 %v18293_v48, 16  ;;  %v6398_v30 = vrot.slane %v6397_v10, 4  ;;  %v6416_v3 = vrot.slane %v6414_v9, 5  ;;  %v18299_v22 = vld [vmem:[%s23872_s20 + $0x1c8] sm:$0xf] }
  0x7f   : > { %20395 = vmatmul.mubr.msk.bf16.vlgmr.msra.gmra.mrb[0].mxu0 %vm693_vm3, %v22924_v60  ;;  %v6421_v60 = vrot.slane %v6419_v19, 4  ;;  %v6402_v19 = vrot.slane %v6400_v59, 5  ;;  %v6430_v31 = vrot.slane %v6428_v50, 5  ;;  %v6458_v6 = vrot.slane %v6456_v51, 5  ;;  %v18301_v48 = vld [vmem:[%s23872_s20 + $0x1d0] sm:$0xf] }
  0x80   : > { %20403 = vmatpush3.bf16.msra.mxu0 %v23864_v16  ;;  %20398 = vmatprep.mubr.msk.bf16.mxu0 %vm693_vm3, %v22925_v32  ;;  %v6436_v16 = vshll.u32 %v18187_v2, 16  ;;  %v6424_v32 = vrot.slane %v6422_v57, 5  ;;  %v18295_v2 = vld [vmem:[%s23872_s20 + $0x1b8] sm:$0xf]  ;;  %v7363_v44 = vrot.slane %v7361_v20, 4  ;;  %v7366_v34 = vrot.slane %v7364_v15, 5 }
  0x81   : > { %20404 = vmatprep.subr.bf16.mxu0 %v22926_v63  ;;  %v7378_v47 = vshll.u32 %v18295_v2, 16  ;;  %v6375_v59 = vsel %vm23429_vm2, %v6370_v39, %v23990_v45  ;;  %v18300_v10 = vld [vmem:[%s23872_s20 + $0x1cc] sm:$0x1]  ;;  %v7403_v9 = vshrl.u32 %v18299_v22, 16  ;;  %v18303_v51 = vld [vmem:[%s23872_s20 + $0x1d8] sm:$0xf]  ;;  %v17607_v39 = vcombine.low %v23966_v35, %v23970_v49 }
  0x82   : > { %v6438_v23 = vrot.slane %v6436_v16, 5  ;;  %v6425_v11 = vor.u32 %v6424_v32, %v6421_v60  ;;  %v6412_v16 = vrot.slane %v6411_v13, 4  ;;  %v7389_v60 = vshrl.u32 %v18297_v36, 16 }
  0x83   : > { %v7380_v58 = vrot.slane %v7378_v47, 5  ;;  %v7417_v20 = vshrl.u32 %v18301_v48, 16  ;;  %v7420_v15 = vshll.u32 %v18301_v48, 16 }
  0x84   : > { %20405 = vmatpush3.bf16.msra.mxu0 %v22926_v63  ;;  %v6449_v63 = vrot.slane %v6447_v33, 4  ;;  %v6439_v46 = vor.u32 %v6438_v23, %v6435_v62  ;;  %v6426_v24 = vrot.slane %v6425_v11, 4  ;;  %v6444_v33 = vrot.slane %v6442_v25, 5 }
  0x85   : > { %20414 = vmatprep.subr.bf16.mxu0 %v23982_v55  ;;  %v7392_v62 = vshll.u32 %v18297_v36, 16  ;;  %v6361_v23 = vsel %vm23429_vm2, %v23994_v1, %v23988_v54  ;;  %v6417_v54 = vsel %vm23429_vm2, %v6412_v16, %v6416_v3  ;;  %v7370_v1 = vshll.u32 %v18294_v14, 16 }
  0x86   : > { %v6453_v57 = vor.u32 %v6452_v7, %v6449_v63  ;;  %v6440_v40 = vrot.slane %v6439_v46, 4  ;;  %v6403_v7 = vsel %vm23429_vm2, %v6398_v30, %v6402_v19  ;;  %v6431_v45 = vsel %vm23429_vm2, %v6426_v24, %v6430_v31  ;;  %v18305_v19 = vld [vmem:[%s23872_s20 + $0x1e0] sm:$0xf] }
  0x87   : > { %20399 = vmatmul.mubr.msk.bf16.gmra.mrb[4].mxu0 %vm693_vm3, %v22927_v42  ;;  %v7375_v42 = vshrl.u32 %v18295_v2, 16  ;;  %v7391_v13 = vrot.slane %v7389_v60, 4  ;;  %v7394_v50 = vrot.slane %v7392_v62, 5  ;;  %v7406_v25 = vshll.u32 %v18299_v22, 16  ;;  %v18191_v30 = vld [vmem:[%s23872_s20 + $0x360] sm:$0xf] }
  0x88   : > { %20406 = vmatprep.mubr.msk.bf16.mxu0 %vm693_vm3, %v23942_v17  ;;  %v6384_v17 = vrot.slane %v6383_v8, 4  ;;  %v6454_v32 = vrot.slane %v6453_v57, 4  ;;  %v18298_v8 = vld [vmem:[%s23872_s20 + $0x1c4] sm:$0x1]  ;;  %v24047_v46 = vcombine.low %v6361_v23, %v6375_v59  ;;  %v18307_v57 = vld [vmem:[%s23872_s20 + $0x1e8] sm:$0xf]  ;;  %v24053_v47 = vcombine.low %v6417_v54, %v6431_v45 }
  0x89   : > { %v7377_v56 = vrot.slane %v7375_v42, 4  ;;  %v7372_v36 = vrot.slane %v7370_v1, 5  ;;  %v7398_v24 = vshll.u32 %v18298_v8, 16  ;;  %v7405_v31 = vrot.slane %v7403_v9, 4  ;;  %v18193_v23 = vld [vmem:[%s23872_s20 + $0x368] sm:$0xf] }
  0x8a   : > { %v6389_v63 = vsel %vm23429_vm2, %v6384_v17, %v23997_v41  ;;  %v7384_v41 = vshll.u32 %v18296_v5, 16  ;;  %v6459_v2 = vsel %vm23429_vm2, %v6454_v32, %v6458_v6  ;;  %28638 = vst [vmem:[#allocation3_spill] sm:$0xff] %v24047_v46  ;;  %28640 = vst [vmem:[#allocation5_spill] sm:$0xff] %v24053_v47  ;;  %v7395_v14 = vor.u32 %v7394_v50, %v7391_v13  ;;  %v18306_v45 = vld [vmem:[%s23872_s20 + $0x1e4] sm:$0x1]  ;;  %v24082_v1 = vld [vmem:[%s28526_s6 + $0x50] sm:$0xff]  }
  0x8b   : > { %v7381_v11 = vor.u32 %v7380_v58, %v7377_v56  ;;  %v24051_v42 = vcombine.low %v6389_v63, %v6403_v7  ;;  %v7419_v5 = vrot.slane %v7417_v20, 4  ;;  %v7434_v60 = vshll.u32 %v18303_v51, 16  ;;  %v18304_v7 = vld [vmem:[%s23872_s20 + $0x1dc] sm:$0x1]  ;;  %v18308_v8 = vld [vmem:[%s23872_s20 + $0x1ec] sm:$0x1] }
  0x8c   : > { %v7386_v17 = vrot.slane %v7384_v41, 5  ;;  %v7445_v32 = vshrl.u32 %v18305_v19, 16  ;;  %v7448_v56 = vshll.u32 %v18305_v19, 16  ;;  %v7459_v58 = vshrl.u32 %v18307_v57, 16  ;;  %v18195_v13 = vld [vmem:[%s23872_s20 + $0x370] sm:$0xf] }
  0x8d   : > { %28639 = vst [vmem:[#allocation4_spill] sm:$0xff] %v24051_v42  ;;  %v7382_v6 = vrot.slane %v7381_v11, 4  ;;  %v7462_v22 = vshll.u32 %v18307_v57, 16  ;;  %v6477_v59 = vshrl.u32 %v18191_v30, 16  ;;  %v6480_v63 = vshll.u32 %v18191_v30, 16 }
  0x8e   : > { %v24073_v53 = vrot.slane %v7395_v14, 4  ;;  %v7447_v9 = vrot.slane %v7445_v32, 4  ;;  %v7461_v11 = vrot.slane %v7459_v58, 4  ;;  %v6491_v20 = vshrl.u32 %v18193_v23, 16  ;;  %v18201_v32 = vld [vmem:[%s23872_s20 + $0x388] sm:$0xf] }
  0x8f   : > { %20407 = vmatmul.mubr.msk.bf16.vlgmr.msra.gmra.mrb[0].mxu0 %vm693_vm3, %v23944_v21  ;;  %v24031_v21 = vld [vmem:[%s28526_s6 + $0x48] sm:$0xff]   ;;  %v7387_v38 = vsel %vm23429_vm2, %v7382_v6, %v7386_v17  ;;  %v7464_v50 = vrot.slane %v7462_v22, 5  ;;  %v6505_v17 = vshrl.u32 %v18195_v13, 16  ;;  %v6508_v30 = vshll.u32 %v18195_v13, 16 }
  0x90   : > { %20415 = vmatpush3.bf16.msra.mxu0 %v23982_v55  ;;  %20410 = vmatprep.mubr.msk.bf16.mxu0 %vm693_vm3, %v23946_v12  ;;  %v6445_v12 = vsel %vm23429_vm2, %v6440_v40, %v6444_v33  ;;  %v7367_v55 = vor.u32 %v7366_v34, %v7363_v44  ;;  %v18302_v33 = vld [vmem:[%s23872_s20 + $0x1d4] sm:$0x1]  ;;  %v7408_v40 = vrot.slane %v7406_v25, 5  ;;  %v7422_v44 = vrot.slane %v7420_v15, 5 }
  0x91   : > { %20416 = vmatprep.subr.bf16.mxu0 %v22929_v43  ;;  %v24057_v16 = vcombine.low %v6445_v12, %v6459_v2  ;;  %v7431_v34 = vshrl.u32 %v18303_v51, 16  ;;  %v7426_v54 = vshll.u32 %v18302_v33, 16  ;;  %v7450_v2 = vrot.slane %v7448_v56, 5 }
  0x92   : > { %v7368_v3 = vrot.slane %v7367_v55, 4  ;;  %v7409_v41 = vor.u32 %v7408_v40, %v7405_v31  ;;  %v7423_v48 = vor.u32 %v7422_v44, %v7419_v5  ;;  %v7436_v55 = vrot.slane %v7434_v60, 5  ;;  %v18199_v40 = vld [vmem:[%s23872_s20 + $0x380] sm:$0xf] }
  0x93   : > { %28641 = vst [vmem:[#allocation6_spill] sm:$0xff] %v24057_v16  ;;  %v7433_v12 = vrot.slane %v7431_v34, 4  ;;  %v6479_v25 = vrot.slane %v6477_v59, 4  ;;  %v6482_v51 = vrot.slane %v6480_v63, 5  ;;  %v6494_v15 = vshll.u32 %v18193_v23, 16 }
  0x94   : > { %20417 = vmatpush3.bf16.msra.mxu0 %v22929_v43  ;;  %v7412_v43 = vshll.u32 %v18300_v10, 16  ;;  %v7373_v62 = vsel %vm23429_vm2, %v7368_v3, %v7372_v36  ;;  %v18192_v10 = vld [vmem:[%s23872_s20 + $0x364] sm:$0x1]  ;;  %v24089_v57 = vrot.slane %v7426_v54, 5  ;;  %v18197_v36 = vld [vmem:[%s23872_s20 + $0x378] sm:$0xf]  ;;  %v7451_v14 = vor.u32 %v7450_v2, %v7447_v9 }
  0x95   : > { %20840 = vmatprep.subr.bf16.mxu0 %v24031_v21  ;;  %v24087_v19 = vcombine.low %v7373_v62, %v7387_v38  ;;  %v24096_v3 = vrot.slane %v7409_v41, 4  ;;  %v7440_v31 = vshll.u32 %v18304_v7, 16  ;;  %v7454_v33 = vshll.u32 %v18306_v45, 16  ;;  %v18196_v34 = vld [vmem:[%s23872_s20 + $0x374] sm:$0x1] }
  0x96   : > { %v7437_v6 = vor.u32 %v7436_v55, %v7433_v12  ;;  %v7468_v26 = vshll.u32 %v18308_v8, 16  ;;  %v6483_v5 = vor.u32 %v6482_v51, %v6479_v25  ;;  %v6493_v44 = vrot.slane %v6491_v20, 4  ;;  %v18203_v23 = vld [vmem:[%s23872_s20 + $0x390] sm:$0xf]  ;;  %v18205_v59 = vld [vmem:[%s23872_s20 + $0x398] sm:$0xf] }
  0x97   : > { %20411 = vmatmul.mubr.msk.bf16.gmra.mrb[4].mxu0 %vm693_vm3, %v23953_v4  ;;  %v24068_v4 = vrot.slane %v7398_v24, 5  ;;  %v24098_v24 = vrot.slane %v7423_v48, 4  ;;  %v6507_v37 = vrot.slane %v6505_v17, 4  ;;  %v6510_v18 = vrot.slane %v6508_v30, 5  ;;  %v18309_v45 = vld [vmem:[%s23872_s20 + $0x3f0] sm:$0xf] }
  0x98   : > { %20418 = vmatprep.mubr.msk.bf16.mxu0 %vm693_vm3, %v17604_v61  ;;  %v24075_v61 = vrot.slane %v7412_v43, 5  ;;  %v7465_v43 = vor.u32 %v7464_v50, %v7461_v11  ;;  %v6522_v60 = vshll.u32 %v18197_v36, 16  ;;  %v24110_v56 = vrot.slane %v7440_v31, 5  ;;  %v18198_v55 = vld [vmem:[%s23872_s20 + $0x37c] sm:$0x1] }
  0x99   : > { %v24112_v58 = vrot.slane %v7454_v33, 5  ;;  %v6533_v22 = vshrl.u32 %v18199_v40, 16  ;;  %v6536_v62 = vshll.u32 %v18199_v40, 16  ;;  %v24116_v63 = vrot.slane %v7437_v6, 4  ;;  %v18200_v11 = vld [vmem:[%s23872_s20 + $0x384] sm:$0x1] }
  0x9a   : > { %v24118_v38 = vrot.slane %v7451_v14, 4  ;;  %v24120_v7 = vrot.slane %v7468_v26, 5  ;;  %v24125_v41 = vrot.slane %v7465_v43, 4  ;;  %v24127_v48 = vrot.slane %v6483_v5, 4  ;;  %v18311_v31 = vld [vmem:[%s23872_s20 + $0x3f8] sm:$0xf] }
  0x9b   : > { %v6500_v12 = vshll.u32 %v18194_v29, 16  ;;  %v6514_v8 = vshll.u32 %v18196_v34, 16  ;;  %v6511_v13 = vor.u32 %v6510_v18, %v6507_v37  ;;  %v6524_v2 = vrot.slane %v6522_v60, 5  ;;  %v18202_v29 = vld [vmem:[%s23872_s20 + $0x38c] sm:$0x1]  ;;  %v24153_v18 = vld [vmem:[%s28526_s6 + $0x58] sm:$0xff]  }
  0x9c   : > { %v6535_v50 = vrot.slane %v6533_v22, 4  ;;  %v6538_v25 = vrot.slane %v6536_v62, 5  ;;  %v6547_v51 = vshrl.u32 %v18201_v32, 16  ;;  %v6550_v20 = vshll.u32 %v18201_v32, 16  ;;  %v18204_v40 = vld [vmem:[%s23872_s20 + $0x394] sm:$0x1] }
  0x9d   : > { %v6575_v17 = vshrl.u32 %v18205_v59, 16  ;;  %v6578_v30 = vshll.u32 %v18205_v59, 16  ;;  %v24138_v35 = vrot.slane %v6500_v12, 5  ;;  %v24140_v49 = vrot.slane %v6514_v8, 5  ;;  %v18206_v34 = vld [vmem:[%s23872_s20 + $0x39c] sm:$0x1] }
  0x9e   : > { %v7492_v33 = vshll.u32 %v18309_v45, 16  ;;  %v24144_v14 = vrot.slane %v6511_v13, 4  ;;  %v6528_v26 = vshll.u32 %v18198_v55, 16  ;;  %v6539_v5 = vor.u32 %v6538_v25, %v6535_v50  ;;  %v18313_v37 = vld [vmem:[%s23872_s20 + $0x400] sm:$0xf] }
  0x9f   : > { %20419 = vmatmul.mubr.msk.bf16.vlgmr.msra.gmra.mrb[0].mxu0 %vm693_vm3, %v17605_v52  ;;  %v6486_v52 = vshll.u32 %v18192_v10, 16  ;;  %v6577_v32 = vrot.slane %v6575_v17, 4  ;;  %v6580_v22 = vrot.slane %v6578_v30, 5  ;;  %v18310_v62 = vld [vmem:[%s23872_s20 + $0x3f4] sm:$0x1]  ;;  %v7506_v12 = vshll.u32 %v18311_v31, 16 }
  0xa0   : > { %20841 = vmatpush3.bf16.msra.mxu0 %v24031_v21  ;;  %20422 = vmatprep.mubr.msk.bf16.mxu0 %vm693_vm3, %v17606_v28  ;;  %v6496_v21 = vrot.slane %v6494_v15, 5  ;;  %v6519_v28 = vshrl.u32 %v18197_v36, 16  ;;  %v6561_v15 = vshrl.u32 %v18203_v23, 16  ;;  %v6564_v36 = vshll.u32 %v18203_v23, 16  ;;  %v18315_v55 = vld [vmem:[%s23872_s20 + $0x408] sm:$0xf] }
  0xa1   : > { %20874 = vmatprep.subr.bf16.mxu0 %v24082_v1  ;;  %v24122_v54 = vrot.slane %v6486_v52, 5  ;;  %v6542_v52 = vshll.u32 %v18200_v11, 16  ;;  %v7494_v59 = vrot.slane %v7492_v33, 5  ;;  %v24157_v8 = vrot.slane %v6528_v26, 5  ;;  %v18312_v13 = vld [vmem:[%s23872_s20 + $0x3fc] sm:$0x1] }
  0xa2   : > { %v6497_v10 = vor.u32 %v6496_v21, %v6493_v44  ;;  %v6521_v9 = vrot.slane %v6519_v28, 4  ;;  %v6549_v44 = vrot.slane %v6547_v51, 4  ;;  %v6552_v21 = vrot.slane %v6550_v20, 5  ;;  %v18314_v26 = vld [vmem:[%s23872_s20 + $0x404] sm:$0x1] }
  0xa3   : > { %v6563_v28 = vrot.slane %v6561_v15, 4  ;;  %v6566_v60 = vrot.slane %v6564_v36, 5  ;;  %v6556_v25 = vshll.u32 %v18202_v29, 16  ;;  %v6570_v51 = vshll.u32 %v18204_v40, 16  ;;  %v18316_v29 = vld [vmem:[%s23872_s20 + $0x40c] sm:$0x1] }
  0xa4   : > { %v24142_v6 = vrot.slane %v6497_v10, 4  ;;  %v6525_v43 = vor.u32 %v6524_v2, %v6521_v9  ;;  %v24159_v10 = vrot.slane %v6542_v52, 5  ;;  %v7517_v9 = vshrl.u32 %v18313_v37, 16  ;;  %v18317_v52 = vld [vmem:[%s23872_s20 + $0x410] sm:$0xf] }
  0xa5   : > { %v7520_v2 = vshll.u32 %v18313_v37, 16  ;;  %v6553_v50 = vor.u32 %v6552_v21, %v6549_v44  ;;  %v24169_v20 = vrot.slane %v6539_v5, 4  ;;  %v6567_v15 = vor.u32 %v6566_v60, %v6563_v28  ;;  %v18318_v5 = vld [vmem:[%s23872_s20 + $0x414] sm:$0x1]  ;;  %v18319_v21 = vld [vmem:[%s23872_s20 + $0x418] sm:$0xf] }
  0xa6   : > { %v24164_v11 = vrot.slane %v6525_v43, 4  ;;  %v6584_v36 = vshll.u32 %v18206_v34, 16  ;;  %v7498_v17 = vshll.u32 %v18310_v62, 16  ;;  %v6581_v30 = vor.u32 %v6580_v22, %v6577_v32 }
  0xa7   : > { %20423 = vmatmul.mubr.msk.bf16.gmra.mrb[4].mxu0 %vm693_vm3, %v17607_v39  ;;  %v7489_v39 = vshrl.u32 %v18309_v45, 16  ;;  %v7503_v45 = vshrl.u32 %v18311_v31, 16  ;;  %v7508_v33 = vrot.slane %v7506_v12, 5  ;;  %v7522_v40 = vrot.slane %v7520_v2, 5 }
  0xa8   : > { %20842 = vmatprep.mubr.msk.bf16.mxu0 %vm3657_vm7, %v24047_v46  ;;  %v7531_v43 = vshrl.u32 %v18315_v55, 16  ;;  %v7534_v44 = vshll.u32 %v18315_v55, 16  ;;  %v24177_v37 = vrot.slane %v6553_v50, 4  ;;  %v24179_v28 = vrot.slane %v6556_v25, 5 }
  0xa9   : > { %v7491_v23 = vrot.slane %v7489_v39, 4  ;;  %v7505_v39 = vrot.slane %v7503_v45, 4  ;;  %v24181_v34 = vrot.slane %v6570_v51, 5  ;;  %v7512_v60 = vshll.u32 %v18312_v13, 16 }
  0xaa   : > { %v24183_v32 = vrot.slane %v6567_v15, 4  ;;  %v24185_v22 = vrot.slane %v6584_v36, 5  ;;  %v7545_v62 = vshrl.u32 %v18317_v52, 16  ;;  %v24191_v12 = vrot.slane %v7498_v17, 5 }
  0xab   : > { %v7495_v31 = vor.u32 %v7494_v59, %v7491_v23  ;;  %v7548_v23 = vshll.u32 %v18317_v52, 16  ;;  %v24187_v59 = vrot.slane %v6581_v30, 4  ;;  %v7526_v55 = vshll.u32 %v18314_v26, 16  ;;  %v18321_v26 = vld [vmem:[%s23872_s20 + $0x420] sm:$0xf] }
  0xac   : > { %v7533_v50 = vrot.slane %v7531_v43, 4  ;;  %v7536_v25 = vrot.slane %v7534_v44, 5  ;;  %v24195_v13 = vrot.slane %v7512_v60, 5  ;;  %v7540_v51 = vshll.u32 %v18316_v29, 16 }
  0xad   : > { %v24189_v45 = vrot.slane %v7495_v31, 4  ;;  %v7554_v15 = vshll.u32 %v18318_v5, 16  ;;  %v7559_v36 = vshrl.u32 %v18319_v21, 16  ;;  %v7401_v17 = vsel %vm23429_vm2, %v24073_v53, %v24068_v4  ;;  %v18320_v31 = vld [vmem:[%s23872_s20 + $0x41c] sm:$0x1] }
  0xae   : > { %v7415_v30 = vsel %vm23429_vm2, %v24096_v3, %v24075_v61  ;;  %v7429_v52 = vsel %vm23429_vm2, %v24098_v24, %v24089_v57  ;;  %v24219_v29 = vrot.slane %v7526_v55, 5  ;;  %v7537_v61 = vor.u32 %v7536_v25, %v7533_v50  ;;  %v18322_v3 = vld [vmem:[%s23872_s20 + $0x424] sm:$0x1] }
  0xaf   : > { %20843 = vmatmul.mubr.msk.bf16.vlgmr.msra.gmra.mrb[8].mxu0 %vm3657_vm7, %v24051_v42  ;;  %v7542_v43 = vrot.slane %v7540_v51, 5  ;;  %v7556_v44 = vrot.slane %v7554_v15, 5  ;;  %v7562_v57 = vshll.u32 %v18319_v21, 16  ;;  %v7568_v24 = vshll.u32 %v18320_v31, 16 }
  0xb0   : > { %20875 = vmatpush3.bf16.msra.mxu0 %v24082_v1  ;;  %20846 = vmatprep.mubr.msk.bf16.mxu0 %vm3657_vm7, %v24053_v47  ;;  %v7519_v1 = vrot.slane %v7517_v9, 4  ;;  %v7509_v9 = vor.u32 %v7508_v33, %v7505_v39  ;;  %v7547_v39 = vrot.slane %v7545_v62, 4  ;;  %v7550_v33 = vrot.slane %v7548_v23, 5 }
  0xb1   : > { %20908 = vmatprep.subr.bf16.mxu0 %v24153_v18  ;;  %v7561_v62 = vrot.slane %v7559_v36, 4  ;;  %v7573_v23 = vshrl.u32 %v18321_v26, 16  ;;  %v7576_v47 = vshll.u32 %v18321_v26, 16  ;;  %v7457_v55 = vsel %vm23429_vm2, %v24118_v38, %v24112_v58  ;;  %v18324_v36 = vld [vmem:[%s23872_s20 + $0x42c] sm:$0x1] }
  0xb2   : > { %v7523_v2 = vor.u32 %v7522_v40, %v7519_v1  ;;  %v7510_v4 = vrot.slane %v7509_v9, 4  ;;  %v18323_v1 = vld [vmem:[%s23872_s20 + $0x428] sm:$0xf]  ;;  %v18326_v40 = vcombine.low %v7401_v17, %v7415_v30  ;;  %v7551_v60 = vor.u32 %v7550_v33, %v7547_v39 }
  0xb3   : > { %v7471_v21 = vsel %vm23429_vm2, %v24125_v41, %v24120_v7  ;;  %v6489_v50 = vsel %vm23429_vm2, %v24127_v48, %v24122_v54  ;;  %v6503_v25 = vsel %vm23429_vm2, %v24142_v6, %v24138_v35  ;;  %v7570_v38 = vrot.slane %v7568_v24, 5  ;;  %v22943_v24 = vld [vmem:[%s23872_s20 + $0x28] ss:$8 sps:$4 sm:$0xff]  }
  0xb4   : > { %v24217_v53 = vrot.slane %v7523_v2, 4  ;;  %v7552_v9 = vrot.slane %v7551_v60, 4  ;;  %v7564_v2 = vrot.slane %v7562_v57, 5  ;;  %v18328_v51 = vcombine.low %v7457_v55, %v7471_v21  ;;  %v24341_v60 = vld [vmem:[%s23872_s20 + $0x2f0] ss:$8 sps:$4 sm:$0xff]  }
  0xb5   : > { %v24241_v58 = vcombine.low %v6489_v50, %v6503_v25  ;;  %v7575_v7 = vrot.slane %v7573_v23, 4  ;;  %v6517_v54 = vsel %vm23429_vm2, %v24144_v14, %v24140_v49  ;;  %v6531_v41 = vsel %vm23429_vm2, %v24164_v11, %v24157_v8  ;;  %v22942_v57 = vld [vmem:[%s23872_s20 + $0x18] ss:$8 sps:$4 sm:$0xff]   ;;  %v22967_v23 = vld [vmem:[%s28524_s4 + $0x10] sm:$0xff]  }
  0xb6   : > { %v7578_v48 = vrot.slane %v7576_v47, 5  ;;  %v7590_v35 = vshll.u32 %v18323_v1, 16  ;;  %v6545_v6 = vsel %vm23429_vm2, %v24169_v20, %v24159_v10  ;;  %v6559_v15 = vsel %vm23429_vm2, %v24177_v37, %v24179_v28  ;;  %20426 = vmatprep.subr.bf16.mxu1 %v22967_v23  ;;  %v22968_v55 = vld [vmem:[%s28524_s4 + $0x18] sm:$0xff]   ;;  %v22946_v21 = vld [vmem:[%s23872_s20 + $0xa8] ss:$8 sps:$4 sm:$0xff]   ;;  %v22969_v25 = vld [vmem:[%s28524_s4] sm:$0xff]  }
  0xb7   : > { %20847 = vmatmul.mubr.msk.bf16.gmra.mrb[12].mxu0 %vm3657_vm7, %v24057_v16  ;;  %v7538_v16 = vrot.slane %v7537_v61, 4  ;;  %28642 = vst [vmem:[#allocation7_spill] sm:$0xff] %v24241_v58  ;;  %v24263_v17 = vcombine.low %v6517_v54, %v6531_v41  ;;  %v24265_v49 = vcombine.low %v6545_v6, %v6559_v15  ;;  %v7565_v14 = vor.u32 %v7564_v2, %v7561_v62  ;;  %v22941_v62 = vld [vmem:[%s23872_s20 + $0x8] ss:$8 sps:$4 sm:$0xff]   ;;  %v22951_v41 = vld [vmem:[%s23872_s20 + $0x298] ss:$8 sps:$4 sm:$0xff]  }
  0xb8   : > { %20850 = vmatprep.mubr.msk.bf16.mxu0 %vm3657_vm7, %v24087_v19  ;;  %v7443_v19 = vsel %vm23429_vm2, %v24116_v63, %v24110_v56  ;;  %v7582_v56 = vshll.u32 %v18322_v3, 16  ;;  %v7587_v63 = vshrl.u32 %v18323_v1, 16  ;;  %v7596_v8 = vshll.u32 %v18324_v36, 16  ;;  %v22934_v3 = vld [vmem:[%s23872_s20 + $0x250] ss:$8 sps:$4 sm:$0xff]   ;;  %20427 = vmatpush3.bf16.msra.mxu1 %v22967_v23  ;;  %v24386_v15 = vld [vmem:[%s28526_s6 + $0x68] sm:$0xff]  }
  0xb9   : > { %v18327_v5 = vcombine.low %v7429_v52, %v7443_v19  ;;  %28643 = vst [vmem:[#allocation8_spill] sm:$0xff] %v24263_v17  ;;  %28644 = vst [vmem:[#allocation9_spill] sm:$0xff] %v24265_v49  ;;  %v6573_v10 = vsel %vm23429_vm2, %v24183_v32, %v24181_v34  ;;  %v6587_v11 = vsel %vm23429_vm2, %v24187_v59, %v24185_v22  ;;  %v7566_v20 = vrot.slane %v7565_v14, 4  ;;  %v22935_v1 = vld [vmem:[%s23872_s20 + $0x260] ss:$8 sps:$4 sm:$0xff]  }
  0xba   : > { %v7589_v47 = vrot.slane %v7587_v63, 4  ;;  %v7592_v37 = vrot.slane %v7590_v35, 5  ;;  %v7501_v28 = vsel %vm23429_vm2, %v24189_v45, %v24191_v12  ;;  %v7515_v30 = vsel %vm23429_vm2, %v7510_v4, %v24195_v13  ;;  %v22945_v63 = vld [vmem:[%s23872_s20 + $0x98] ss:$8 sps:$4 sm:$0xff]   ;;  %20428 = vmatprep.subr.bf16.mxu1 %v22968_v55  ;;  %v22948_v2 = vld [vmem:[%s23872_s20 + $0xc8] ss:$8 sps:$4 sm:$0xff]  }
  0xbb   : > { %v24286_v31 = vcombine.low %v6573_v10, %v6587_v11  ;;  %v7579_v39 = vor.u32 %v7578_v48, %v7575_v7  ;;  %v24288_v34 = vcombine.low %v7501_v28, %v7515_v30  ;;  %v7584_v59 = vrot.slane %v7582_v56, 5  ;;  %v22944_v56 = vld [vmem:[%s23872_s20 + $0x38] ss:$8 sps:$4 sm:$0xff]   ;;  %v22949_v50 = vld [vmem:[%s23872_s20 + $0x288] ss:$8 sps:$4 sm:$0xff]  }
  0xbc   : > { %v7593_v32 = vor.u32 %v7592_v37, %v7589_v47  ;;  %v7529_v45 = vsel %vm23429_vm2, %v24217_v53, %v24219_v29  ;;  %v7543_v12 = vsel %vm23429_vm2, %v7538_v16, %v7542_v43  ;;  %v7598_v33 = vrot.slane %v7596_v8, 5  ;;  %v22932_v29 = vld [vmem:[%s23872_s20 + $0x240] ss:$8 sps:$4 sm:$0xff]   ;;  %v22936_v43 = vld [vmem:[%s23872_s20 + $0x270] ss:$8 sps:$4 sm:$0xff]   ;;  %20429 = vmatpush3.bf16.msra.mxu1 %v22968_v55 }
  0xbd   : > { %28645 = vst [vmem:[#allocation10_spill] sm:$0xff] %v24286_v31  ;;  %28646 = vst [vmem:[#allocation11_spill] sm:$0xff] %v24288_v34  ;;  %v7580_v22 = vrot.slane %v7579_v39, 4  ;;  %v7557_v26 = vsel %vm23429_vm2, %v7552_v9, %v7556_v44  ;;  %v7571_v52 = vsel %vm23429_vm2, %v7566_v20, %v7570_v38  ;;  %v24304_v19 = vcombine.low %v7529_v45, %v7543_v12  ;;  %v24332_v44 = vld [vmem:[%s23872_s20 + $0x2d0] ss:$8 sps:$4 sm:$0xff]  }
  0xbe   : > { %v7594_v13 = vrot.slane %v7593_v32, 4  ;;  %v24306_v4 = vcombine.low %v7557_v26, %v7571_v52  ;;  %v22947_v9 = vld [vmem:[%s23872_s20 + $0xb8] ss:$8 sps:$4 sm:$0xff]   ;;  %v17882_v38 = vld [vmem:[%s23872_s20 + $0x248] sm:$0xf]  ;;  %20438 = vmatprep.subr.bf16.mxu1 %v22969_v25 }
  0xbf   : > { %20851 = vmatmul.mubr.msk.bf16.gmra.mrb[16].mxu0 %vm3657_vm7, %v18326_v40  ;;  %28647 = vst [vmem:[#allocation12_spill] sm:$0xff] %v24304_v19  ;;  %v7585_v16 = vsel %vm23429_vm2, %v7580_v22, %v7584_v59  ;;  %v22950_v40 = vld [vmem:[%s28526_s6 + $0x60] sm:$0xff]   ;;  %v4241_v48 = vshrl.u32 %v17882_v38, 16  ;;  %v4244_v35 = vshll.u32 %v17882_v38, 16  ;;  %v22952_v6 = vld [vmem:[%s23872_s20 + $0x2a8] ss:$8 sps:$4 sm:$0xff]  }
  0xc0   : > { %20854 = vmatprep.mubr.msk.bf16.mxu0 %vm3657_vm7, %v18327_v5  ;;  %28648 = vst [vmem:[#allocation13_spill] sm:$0xff] %v24306_v4  ;;  %v7599_v53 = vsel %vm23429_vm2, %v7594_v13, %v7598_v33  ;;  %v24338_v5 = vld [vmem:[%s23872_s20 + $0x2e0] ss:$8 sps:$4 sm:$0xff]   ;;  %v17881_v47 = vld [vmem:[%s23872_s20 + $0x244] sm:$0x1] }
  0xc1   : > { %v24317_v61 = vcombine.low %v7585_v16, %v7599_v53  ;;  %v4243_v8 = vrot.slane %v4241_v48, 4  ;;  %v4246_v10 = vrot.slane %v4244_v35, 5  ;;  %v17883_v11 = vld [vmem:[%s23872_s20 + $0x24c] sm:$0x1]  ;;  %v17884_v20 = vld [vmem:[%s23872_s20 + $0x250] sm:$0xf] }
  0xc2   : > { %v22953_v37 = vld [vmem:[%s23872_s20 + $0x2b8] ss:$8 sps:$4 sm:$0xff]   ;;  %v4236_v32 = vshll.u32 %v17881_v47, 16  ;;  %v4250_v59 = vshll.u32 %v17883_v11, 16  ;;  %v24398_v45 = vld [vmem:[%s23872_s20 + $0x254] sm:$0x1] }
  0xc3   : > { %28649 = vst [vmem:[#allocation14_spill] sm:$0xff] %v24317_v61  ;;  %v17886_v28 = vld [vmem:[%s23872_s20 + $0x258] sm:$0xf]  ;;  %v4247_v22 = vor.u32 %v4246_v10, %v4243_v8  ;;  %v24401_v12 = vld [vmem:[%s23872_s20 + $0x25c] sm:$0x1]  ;;  %v4255_v13 = vshrl.u32 %v17884_v20, 16 }
  0xc4   : > { %v22954_v30 = vld [vmem:[%s23872_s20 + $0x318] ss:$8 sps:$4 sm:$0xff]   ;;  %v4258_v33 = vshll.u32 %v17884_v20, 16  ;;  %v4269_v26 = vshrl.u32 %v17886_v28, 16  ;;  %v28538_v16 = vmov 0   ;;  %v4278_v55 = vshll.u32 %v24401_v12, 16 }
  0xc5   : > { %v17888_v52 = vld [vmem:[%s23872_s20 + $0x260] sm:$0xf]  ;;  %v2173_v53 = vrot.slane %v28538_v16, 7  ;;  %v17890_v23 = vld [vmem:[%s23872_s20 + $0x268] sm:$0xf] }
  0xc6   : > { %v17892_v25 = vld [vmem:[%s23872_s20 + $0x270] sm:$0xf]  ;;  %v22956_v38 = vld [vmem:[%s23872_s20 + $0x338] ss:$8 sps:$4 sm:$0xff]  }
  0xc7   : > { %20855 = vmatmul.mubr.msk.bf16.gmra.mrb[20].mxu0 %vm3657_vm7, %v18328_v51  ;;  %v17880_v51 = vld [vmem:[%s23872_s20 + $0x240] sm:$0xf]  ;;  %v17894_v48 = vld [vmem:[%s23872_s20 + $0x278] sm:$0xf]  ;;  %v22957_v47 = vld [vmem:[%s23872_s20 + $0x348] ss:$8 sps:$4 sm:$0xff]  }
  0xc8   : > { %20858 = vmatprep.mubr.msk.bf16.mxu0 %vm3657_vm7, %v24241_v58  ;;  %v4227_v7 = vshrl.u32 %v17880_v51, 16  ;;  %v4230_v54 = vshll.u32 %v17880_v51, 16  ;;  %v24434_v51 = vsel %vm24407_vm11, 0, %v2173_v53  ;;  %v4325_v10 = vshrl.u32 %v17894_v48, 16  ;;  %v22958_v11 = vld [vmem:[%s23872_s20 + $0x50] ss:$8 sps:$4 sm:$0xff]  }
  0xc9   : > { %28656 = vst [vmem:[#allocation17_spill] sm:$0xff] %v24434_v51  ;;  %v24441_v35 = vsel %vm24427_vm13, %v24434_v51, 0  ;;  %v17893_v53 = vld [vmem:[%s23872_s20 + $0x274] sm:$0x1] }
  0xca   : > { %v4229_v36 = vrot.slane %v4227_v7, 4  ;;  %v4232_v14 = vrot.slane %v4230_v54, 5  ;;  %v4297_v54 = vshrl.u32 %v17890_v23, 16  ;;  %28657 = vst [vmem:[#allocation18_spill] sm:$0xff] %v24441_v35 }
  0xcc   : > { %v4233_v39 = vor.u32 %v4232_v14, %v4229_v36  ;;  %v4314_v36 = vshll.u32 %v17892_v25, 16  ;;  %v24446_v14 = vcombine.low %v24441_v35, %v24441_v35 }
  0xce   : > { %28658 = vst [vmem:[#allocation19_spill] sm:$0xff] %v24446_v14 }
  0xcf   : > { %20859 = vmatmul.mubr.msk.bf16.gmra.mrb[24].mxu0 %vm3657_vm7, %v24263_v17  ;;  %v18450_v17 = vld [vmem:[%s23872_s20 + $0x38] sm:$0xf] }
  0xd0   : > { %20862 = vmatprep.mubr.msk.bf16.mxu0 %vm3657_vm7, %v24265_v49 }
  0xd7   : > { %20863 = vmatmul.mubr.msk.bf16.gmra.mrb[28].mxu0 %vm3657_vm7, %v24286_v31 }
  0xd8   : > { %20866 = vmatprep.mubr.msk.bf16.mxu0 %vm3657_vm7, %v24288_v34 }
  0xdf   : > { %20867 = vmatmul.mubr.msk.bf16.gmra.mrb[32].mxu0 %vm3657_vm7, %v24304_v19 }
  0xe0   : > { %20870 = vmatprep.mubr.msk.bf16.mxu0 %vm3657_vm7, %v24306_v4  ;;  %v18445_v4 = vld [vmem:[%s23872_s20 + $0x24] sm:$0x1] }
  0xe1   : > { %v8486_v31 = vshll.u32 %v18445_v4, 16 }
  0xe7   : > { %20871 = vmatmul.mubr.msk.bf16.gmra.mrb[36].mxu0 %vm3657_vm7, %v24317_v61  ;;  %v18448_v61 = vld [vmem:[%s23872_s20 + $0x30] sm:$0xf] }
  0xe8   : > { %20876 = vmatprep.mubr.msk.bf16.mxu0 %vm3657_vm7, %v22932_v29  ;;  %v28650_v29 = vmov 0 }
  0xe9   : > { %v28651_v29 = vsel %vm24407_vm11, 4294967295, %v28650_v29 }
  0xea   : > { %28652 = vst [vmem:[#allocation15_spill] sm:$0xff] %v28651_v29  ;;  %v23227_v29 = vld [vmem:[%s28524_s4] sm:$0xff]  }
  0xef   : > { %20877 = vmatmul.mubr.msk.bf16.vlgmr.msra.gmra.mrb[8].mxu0 %vm3657_vm7, %v22934_v3  ;;  %v24411_v3 = vrot.slane %v4233_v39, 4 }
  0xf0   : > { %20909 = vmatpush3.bf16.msra.mxu0 %v24153_v18  ;;  %20880 = vmatprep.mubr.msk.bf16.mxu0 %vm3657_vm7, %v22935_v1  ;;  %v24348_v18 = vld [vmem:[%s23872_s20 + $0x300] ss:$8 sps:$4 sm:$0xff]   ;;  %v4264_v1 = vshll.u32 %v24398_v45, 16 }
  0xf1   : > { %20942 = vmatprep.subr.bf16.mxu0 %v22950_v40 }
  0xf7   : > { %20881 = vmatmul.mubr.msk.bf16.gmra.mrb[12].mxu0 %vm3657_vm7, %v22936_v43  ;;  %v24415_v43 = vrot.slane %v4236_v32, 5  ;;  %v17889_v32 = vld [vmem:[%s23872_s20 + $0x264] sm:$0x1] }
  0xf8   : > { %20884 = vmatprep.mubr.msk.bf16.mxu0 %vm3657_vm7, %v24332_v44 }
  0xf9   : > { %v4239_v4 = vsel %vm23429_vm2, %v24411_v3, %v24415_v43 }
  0xff   : > { %20885 = vmatmul.mubr.msk.bf16.gmra.mrb[16].mxu0 %vm3657_vm7, %v24338_v5 }
 0x100   : > { %20888 = vmatprep.mubr.msk.bf16.mxu0 %vm3657_vm7, %v24341_v60 }
 0x107   : > { %20889 = vmatmul.mubr.msk.bf16.gmra.mrb[20].mxu0 %vm3657_vm7, %v24348_v18 }
 0x108   : > { %20892 = vmatprep.mubr.msk.bf16.mxu0 %vm3657_vm7, %v22941_v62  ;;  %v24417_v62 = vrot.slane %v4247_v22, 4  ;;  %v17891_v22 = vld [vmem:[%s23872_s20 + $0x26c] sm:$0x1] }
 0x10f   : > { %20893 = vmatmul.mubr.msk.bf16.gmra.mrb[24].mxu0 %vm3657_vm7, %v22942_v57  ;;  %v24419_v57 = vrot.slane %v4250_v59, 5  ;;  %v2314_v59 = vshll.u32 %v24446_v14, 16 }
 0x110   : > { %20896 = vmatprep.mubr.msk.bf16.mxu0 %vm3657_vm7, %v22943_v24  ;;  %v4257_v24 = vrot.slane %v4255_v13, 4 }
 0x117   : > { %20897 = vmatmul.mubr.msk.bf16.gmra.mrb[28].mxu0 %vm3657_vm7, %v22944_v56  ;;  %v4260_v56 = vrot.slane %v4258_v33, 5 }
 0x118   : > { %20900 = vmatprep.mubr.msk.bf16.mxu0 %vm3657_vm7, %v22945_v63  ;;  %v4271_v63 = vrot.slane %v4269_v26, 4  ;;  %v4299_v26 = vrot.slane %v4297_v54, 4  ;;  %v22959_v54 = vld [vmem:[%s23872_s20 + $0x60] ss:$8 sps:$4 sm:$0xff]  }
 0x119   : > { %v4261_v45 = vor.u32 %v4260_v56, %v4257_v24  ;;  %v2316_v24 = vrot.slane %v2314_v59, 5  ;;  %v24466_v56 = vrot.slane %v4264_v1, 5 }
 0x11f   : > { %20901 = vmatmul.mubr.msk.bf16.gmra.mrb[32].mxu0 %vm3657_vm7, %v22946_v21  ;;  %v4283_v21 = vshrl.u32 %v17888_v52, 16 }
 0x120   : > { %20904 = vmatprep.mubr.msk.bf16.mxu0 %vm3657_vm7, %v22947_v9  ;;  %v22955_v9 = vld [vmem:[%s23872_s20 + $0x328] ss:$8 sps:$4 sm:$0xff]  }
 0x121   : > { %v4285_v13 = vrot.slane %v4283_v21, 4  ;;  %v4292_v21 = vshll.u32 %v17889_v32, 16 }
 0x127   : > { %20905 = vmatmul.mubr.msk.bf16.gmra.mrb[36].mxu0 %vm3657_vm7, %v22948_v2  ;;  %v28653_v2 = vmov 0 }
 0x128   : > { %20910 = vmatprep.mubr.msk.bf16.mxu0 %vm3657_vm7, %v22949_v50  ;;  %v28654_v2 = vsel %vm24427_vm13, 4294967295, %v28653_v2  ;;  %v4286_v50 = vshll.u32 %v17888_v52, 16 }
 0x129   : > { %28655 = vst [vmem:[#allocation16_spill] sm:$0xff] %v28654_v2 }
 0x12a   : > { %v4288_v33 = vrot.slane %v4286_v50, 5  ;;  %v4306_v50 = vshll.u32 %v17891_v22, 16 }
 0x12c   : > { %v24487_v16 = vrot.slane %v4306_v50, 5  ;;  %v18442_v50 = vld [vmem:[%s23872_s20 + $0x18] sm:$0xf] }
 0x12d   : > { %v8463_v42 = vshrl.u32 %v18442_v50, 16  ;;  %v8466_v46 = vshll.u32 %v18442_v50, 16 }
 0x12f   : > { %20911 = vmatmul.mubr.msk.bf16.vlgmr.msra.gmra.mrb[8].mxu0 %vm3657_vm7, %v22951_v41  ;;  %v4300_v41 = vshll.u32 %v17890_v23, 16  ;;  %v4316_v23 = vrot.slane %v4314_v36, 5  ;;  %v24478_v36 = vcombine.high %v24441_v35, %v24441_v35 }
 0x130   : > { %20943 = vmatpush3.bf16.msra.mxu0 %v22950_v40  ;;  %20914 = vmatprep.mubr.msk.bf16.mxu0 %vm3657_vm7, %v22952_v6  ;;  %v4272_v40 = vshll.u32 %v17886_v28, 16  ;;  %v4311_v6 = vshrl.u32 %v17892_v25, 16 }
 0x131   : > { %20976 = vmatprep.subr.bf16.mxu0 %v24386_v15  ;;  %v4302_v52 = vrot.slane %v4300_v41, 5  ;;  %v24472_v41 = vrot.slane %v4261_v45, 4  ;;  %28659 = vst [vmem:[#allocation20_spill] sm:$0xff] %v24478_v36  ;;  %v2320_v45 = vshll.u32 %v24478_v36, 16 }
 0x132   : > { %v4274_v7 = vrot.slane %v4272_v40, 5  ;;  %v4313_v40 = vrot.slane %v4311_v6, 4  ;;  %v4320_v6 = vshll.u32 %v17893_v53, 16  ;;  %v18441_v53 = vld [vmem:[%s23872_s20 + $0x14] sm:$0x1] }
 0x133   : > { %v4303_v1 = vor.u32 %v4302_v52, %v4299_v26 }
 0x134   : > { %v4275_v12 = vor.u32 %v4274_v7, %v4271_v63  ;;  %v24468_v63 = vrot.slane %v4278_v55, 5  ;;  %v17895_v7 = vld [vmem:[%s23872_s20 + $0x27c] sm:$0x1]  ;;  %v18439_v55 = vld [vmem:[%s23872_s20 + $0xc] sm:$0x1] }
 0x135   : > { %v4334_v22 = vshll.u32 %v17895_v7, 16  ;;  %v22961_v7 = vld [vmem:[%s23872_s20 + $0x80] ss:$8 sps:$4 sm:$0xff]  }
 0x137   : > { %20915 = vmatmul.mubr.msk.bf16.gmra.mrb[12].mxu0 %vm3657_vm7, %v22953_v37  ;;  %v4328_v37 = vshll.u32 %v17894_v48, 16  ;;  %v24474_v48 = vrot.slane %v4275_v12, 4  ;;  %v24485_v12 = vrot.slane %v4292_v21, 5  ;;  %v24506_v21 = vrot.slane %v2320_v45, 5  ;;  %v18443_v45 = vld [vmem:[%s23872_s20 + $0x1c] sm:$0x1] }
 0x138   : > { %20918 = vmatprep.mubr.msk.bf16.mxu0 %vm3657_vm7, %v22954_v30  ;;  %v2311_v30 = vshrl.u32 %v24446_v14, 16  ;;  %v8472_v50 = vshll.u32 %v18443_v45, 16  ;;  %v22964_v14 = vld [vmem:[%s23872_s20 + $0x100] ss:$8 sps:$4 sm:$0xff]  }
 0x139   : > { %v4330_v25 = vrot.slane %v4328_v37, 5  ;;  %v18440_v37 = vld [vmem:[%s23872_s20 + $0x10] sm:$0xf] }
 0x13a   : > { %v8449_v26 = vshrl.u32 %v18440_v37, 16 }
 0x13e   : > { %v24450_v8 = vpop.f32.mrb[0].mxu1 }
 0x13f   : > { %20919 = vmatmul.mubr.msk.bf16.gmra.mrb[16].mxu0 %vm3657_vm7, %v22955_v9  ;;  %v24453_v20 = vpop.f32.mrb[1].mxu1  ;;  %v4327_v9 = vrot.slane %v4325_v10, 4  ;;  %v4317_v10 = vor.u32 %v4316_v23, %v4313_v40  ;;  %v24493_v40 = vrot.slane %v4303_v1, 4 }
 0x140   : > { %20922 = vmatprep.mubr.msk.bf16.mxu0 %vm3657_vm7, %v22956_v38  ;;  %v24455_v28 = vpop.f32.mrb[2].mxu1  ;;  %v2313_v38 = vrot.slane %v2311_v30, 4  ;;  %v22960_v30 = vld [vmem:[%s23872_s20 + $0x70] ss:$8 sps:$4 sm:$0xff]  }
 0x141   : > { %v24458_v39 = vpop.f32.mrb[3].mxu1  ;;  %v4331_v32 = vor.u32 %v4330_v25, %v4327_v9  ;;  %v24495_v23 = vrot.slane %v4317_v10, 4  ;;  %v24497_v9 = vrot.slane %v4320_v6, 5  ;;  %v18444_v6 = vld [vmem:[%s23872_s20 + $0x20] sm:$0xf]  ;;  %v4309_v43 = vsel %vm23429_vm2, %v24493_v40, %v24487_v16 }
 0x142   : > { %v2317_v59 = vor.u32 %v2316_v24, %v2313_v38  ;;  %v24502_v38 = vrot.slane %v4334_v22, 5  ;;  %v8451_v22 = vrot.slane %v8449_v26, 4  ;;  %v8477_v19 = vshrl.u32 %v18444_v6, 16 }
 0x143   : > { %v24500_v25 = vrot.slane %v4331_v32, 4  ;;  %v8468_v26 = vrot.slane %v8466_v46, 5 }
 0x144   : > { %v24504_v24 = vrot.slane %v2317_v59, 4  ;;  %v18446_v59 = vld [vmem:[%s23872_s20 + $0x28] sm:$0xf]  ;;  %v8479_v49 = vrot.slane %v8477_v19, 4  ;;  %v22965_v19 = vld [vmem:[%s23872_s20 + $0x110] ss:$8 sps:$4 sm:$0xff]  }
 0x145   : > { %v8494_v1 = vshll.u32 %v18446_v59, 16  ;;  %v4337_v16 = vsel %vm23429_vm2, %v24500_v25, %v24502_v38 }
 0x147   : > { %20923 = vmatmul.mubr.msk.bf16.gmra.mrb[20].mxu0 %vm3657_vm7, %v22957_v47  ;;  %v4289_v47 = vor.u32 %v4288_v33, %v4285_v13  ;;  %v8444_v33 = vshll.u32 %v18439_v55, 16  ;;  %v8496_v58 = vrot.slane %v8494_v1, 5  ;;  %v4253_v1 = vsel %vm23429_vm2, %v24417_v62, %v24419_v57  ;;  %v18447_v57 = vld [vmem:[%s23872_s20 + $0x2c] sm:$0x1] }
 0x148   : > { %20926 = vmatprep.mubr.msk.bf16.mxu0 %vm3657_vm7, %v22958_v11  ;;  %v18438_v11 = vld [vmem:[%s23872_s20 + $0x8] sm:$0xf] }
 0x149   : > { %v8435_v51 = vshrl.u32 %v18438_v11, 16  ;;  %v8438_v13 = vshll.u32 %v18438_v11, 16  ;;  %v24491_v52 = vrot.slane %v4289_v47, 4  ;;  %v8458_v47 = vshll.u32 %v18441_v53, 16  ;;  %v22962_v11 = vld [vmem:[%s23872_s20 + $0xe0] ss:$8 sps:$4 sm:$0xff]  }
 0x14a   : > { %v24514_v32 = vrot.slane %v8444_v33, 5  ;;  %v8491_v53 = vshrl.u32 %v18446_v59, 16  ;;  %v8465_v33 = vrot.slane %v8463_v42, 4  ;;  %v22963_v59 = vld [vmem:[%s23872_s20 + $0xf0] ss:$8 sps:$4 sm:$0xff]   ;;  %v8522_v42 = vshll.u32 %v18450_v17, 16 }
 0x14b   : > { %v8437_v55 = vrot.slane %v8435_v51, 4  ;;  %v24520_v10 = vrot.slane %v8458_v47, 5  ;;  %v8505_v51 = vshrl.u32 %v18448_v61, 16  ;;  %v18452_v47 = vld [vmem:[%s23872_s20 + $0x40] sm:$0xf]  ;;  %v4295_v3 = vsel %vm23429_vm2, %v24491_v52, %v24485_v12 }
 0x14c   : > { %v8533_v46 = vshrl.u32 %v18452_v47, 16  ;;  %v8536_v45 = vshll.u32 %v18452_v47, 16  ;;  %v8469_v52 = vor.u32 %v8468_v26, %v8465_v33  ;;  %v8524_v33 = vrot.slane %v8522_v42, 5 }
 0x14d   : > { %v8507_v36 = vrot.slane %v8505_v51, 4  ;;  %v18453_v51 = vld [vmem:[%s23872_s20 + $0x44] sm:$0x1] }
 0x14e   : > { %v8538_v26 = vrot.slane %v8536_v45, 5 }
 0x14f   : > { %20927 = vmatmul.mubr.msk.bf16.gmra.mrb[24].mxu0 %vm3657_vm7, %v22959_v54  ;;  %v8452_v54 = vshll.u32 %v18440_v37, 16  ;;  %v8480_v37 = vshll.u32 %v18444_v6, 16 }
 0x150   : > { %20930 = vmatprep.mubr.msk.bf16.mxu0 %vm3657_vm7, %v22960_v30  ;;  %v8440_v30 = vrot.slane %v8438_v13, 5  ;;  %v8508_v13 = vshll.u32 %v18448_v61, 16 }
 0x151   : > { %v8454_v34 = vrot.slane %v8452_v54, 5  ;;  %v8482_v6 = vrot.slane %v8480_v37, 5  ;;  %v8493_v54 = vrot.slane %v8491_v53, 4  ;;  %v18451_v53 = vld [vmem:[%s23872_s20 + $0x3c] sm:$0x1] }
 0x152   : > { %v8510_v61 = vrot.slane %v8508_v13, 5  ;;  %v8441_v62 = vor.u32 %v8440_v30, %v8437_v55  ;;  %v8500_v55 = vshll.u32 %v18447_v57, 16  ;;  %v8528_v45 = vshll.u32 %v18451_v53, 16  ;;  %v24606_v57 = vld [vmem:[%s28523_s3] ss:$0 sm:$0xff] }
 0x153   : > { %v8483_v40 = vor.u32 %v8482_v6, %v8479_v49  ;;  %v8497_v25 = vor.u32 %v8496_v58, %v8493_v54  ;;  %v8535_v49 = vrot.slane %v8533_v46, 4  ;;  %v17940_v6 = vld [vmem:[%s23872_s20 + $0x28c] sm:$0x1] }
 0x154   : > { %v24571_v12 = vrot.slane %v8441_v62, 4  ;;  %v8511_v38 = vor.u32 %v8510_v61, %v8507_v36  ;;  %v8470_v36 = vrot.slane %v8469_v52, 4  ;;  %v8502_v47 = vrot.slane %v8500_v55, 5  ;;  %v24633_v52 = vld [vmem:[%s23872_s20 + $0x29c] sm:$0x1] }
 0x155   : > { %v8484_v54 = vrot.slane %v8483_v40, 4  ;;  %v8498_v42 = vrot.slane %v8497_v25, 4  ;;  %28665 = vst [vmem:[#allocation26_spill] sm:$0xff] %v24633_v52  ;;  %v24636_v40 = vld [vmem:[%s23872_s20 + $0x2a0] sm:$0xf] }
 0x156   : > { %v8512_v46 = vrot.slane %v8511_v38, 4 }
 0x157   : > { %20931 = vmatmul.mubr.msk.bf16.gmra.mrb[28].mxu0 %vm3657_vm7, %v22961_v7  ;;  %v8519_v7 = vshrl.u32 %v18450_v17, 16  ;;  %v4267_v17 = vsel %vm23429_vm2, %v24472_v41, %v24466_v56  ;;  %v8455_v56 = vor.u32 %v8454_v34, %v8451_v22  ;;  %v24557_v41 = vcombine.low %v4239_v4, %v4253_v1  ;;  %v17939_v22 = vld [vmem:[%s23872_s20 + $0x288] sm:$0xf] }
 0x158   : > { %20934 = vmatprep.mubr.msk.bf16.mxu0 %vm3657_vm7, %v22962_v11  ;;  %v18449_v11 = vld [vmem:[%s23872_s20 + $0x34] sm:$0x1]  ;;  %v24573_v34 = vrot.slane %v8472_v50, 5  ;;  %v4736_v58 = vshll.u32 %v17939_v22, 16  ;;  %v8539_v1 = vor.u32 %v8538_v26, %v8535_v49 }
 0x159   : > { %28660 = vst [vmem:[#allocation21_spill] sm:$0xff] %v24557_v41  ;;  %v8514_v30 = vshll.u32 %v18449_v11, 16  ;;  %v8521_v13 = vrot.slane %v8519_v7, 4  ;;  %v17942_v7 = vld [vmem:[%s23872_s20 + $0x294] sm:$0x1]  ;;  %v8447_v11 = vsel %vm23429_vm2, %v24571_v12, %v24514_v32  ;;  %v8503_v32 = vsel %vm23429_vm2, %v8498_v42, %v8502_v47 }
 0x15a   : > { %v4756_v62 = vshll.u32 %v17942_v7, 16  ;;  %v8530_v12 = vrot.slane %v8528_v45, 5 }
 0x15b   : > { %v8516_v61 = vrot.slane %v8514_v30, 5  ;;  %v8525_v4 = vor.u32 %v8524_v33, %v8521_v13  ;;  %v8540_v30 = vrot.slane %v8539_v1, 4  ;;  %v24650_v13 = vld [vmem:[%s23872_s20 + $0x2a4] sm:$0x1] }
 0x15c   : > { %v24645_v25 = vrot.slane %v4756_v62, 5  ;;  %28666 = vst [vmem:[#allocation27_spill] sm:$0xff] %v24650_v13 }
 0x15d   : > { %v8526_v55 = vrot.slane %v8525_v4, 4 }
 0x15f   : > { %20935 = vmatmul.mubr.msk.bf16.gmra.mrb[32].mxu0 %vm3657_vm7, %v22963_v59  ;;  %v4733_v59 = vshrl.u32 %v17939_v22, 16 }
 0x160   : > { %20938 = vmatprep.mubr.msk.bf16.mxu0 %vm3657_vm7, %v22964_v14  ;;  %v4281_v14 = vsel %vm23429_vm2, %v24474_v48, %v24468_v63  ;;  %v24561_v63 = vcombine.low %v4295_v3, %v4309_v43  ;;  %v4323_v48 = vsel %vm23429_vm2, %v24495_v23, %v24497_v9  ;;  %v24579_v23 = vrot.slane %v8455_v56, 4 }
 0x161   : > { %v24559_v37 = vcombine.low %v4267_v17, %v4281_v14  ;;  %v24581_v9 = vrot.slane %v8486_v31, 5  ;;  %v24585_v50 = vcombine.low %v4323_v48, %v4337_v16  ;;  %v17941_v31 = vld [vmem:[%s23872_s20 + $0x290] sm:$0xf]  ;;  %v4735_v14 = vrot.slane %v4733_v59, 4  ;;  %v24623_v16 = vld [vmem:[%s23872_s20 + $0x298] sm:$0xf] }
 0x162   : > { %28662 = vst [vmem:[#allocation23_spill] sm:$0xff] %v24561_v63  ;;  %v4747_v17 = vshrl.u32 %v17941_v31, 16  ;;  %v4738_v3 = vrot.slane %v4736_v58, 5  ;;  %v4750_v43 = vshll.u32 %v17941_v31, 16  ;;  %v8461_v56 = vsel %vm23429_vm2, %v24579_v23, %v24520_v10 }
 0x163   : > { %28661 = vst [vmem:[#allocation22_spill] sm:$0xff] %v24559_v37  ;;  %28663 = vst [vmem:[#allocation24_spill] sm:$0xff] %v24585_v50  ;;  %v8475_v48 = vsel %vm23429_vm2, %v8470_v36, %v24573_v34  ;;  %v8517_v10 = vsel %vm23429_vm2, %v8512_v46, %v8516_v61  ;;  %v4761_v38 = vshrl.u32 %v24623_v16, 16  ;;  %v24656_v59 = vcombine.low %v8447_v11, %v8461_v56 }
 0x164   : > { %v4739_v23 = vor.u32 %v4738_v3, %v4735_v14  ;;  %v24665_v42 = vcombine.low %v8503_v32, %v8517_v10  ;;  %v8531_v46 = vsel %vm23429_vm2, %v8526_v55, %v8530_v12 }
 0x165   : > { %28667 = vst [vmem:[#allocation28_spill] sm:$0xff] %v24656_v59 }
 0x166   : > { %28669 = vst [vmem:[#allocation30_spill] sm:$0xff] %v24665_v42  ;;  %v24678_v3 = vrot.slane %v4739_v23, 4 }
 0x167   : > { %20939 = vmatmul.mubr.msk.bf16.gmra.mrb[36].mxu0 %vm3657_vm7, %v22965_v19  ;;  %v8542_v19 = vshll.u32 %v18453_v51, 16 }
 0x168   : > { %20944 = vmatprep.mubr.msk.bf16.mxu0 %vm3657_vm7, %v24332_v44  ;;  %v24591_v44 = vsel %vm23429_vm2, %v24504_v24, %v24506_v21  ;;  %v24599_v24 = vld [vmem:[%s28526_s6 + $0x70] sm:$0xff]   ;;  %v4742_v21 = vshll.u32 %v17940_v6, 16 }
 0x169   : > { %28664 = vst [vmem:[#allocation25_spill] sm:$0xff] %v24591_v44  ;;  %v8544_v34 = vrot.slane %v8542_v19, 5 }
 0x16b   : > { %v8545_v4 = vsel %vm23429_vm2, %v8540_v30, %v8544_v34 }
 0x16c   : > { %v24686_v10 = vcombine.low %v8531_v46, %v8545_v4 }
 0x16e   : > { %28670 = vst [vmem:[#allocation31_spill] sm:$0xff] %v24686_v10 }
 0x16f   : > { %20945 = vmatmul.mubr.msk.bf16.vlgmr.msra.gmra.mrb[8].mxu0 %vm3657_vm7, %v24338_v5  ;;  %v8489_v5 = vsel %vm23429_vm2, %v8484_v54, %v24581_v9  ;;  %v24643_v9 = vrot.slane %v4750_v43, 5  ;;  %v24662_v54 = vld [vmem:[%s23872_s20 + $0x2a8] sm:$0xf]  ;;  %v24680_v43 = vrot.slane %v4761_v38, 4 }
 0x170   : > { %20977 = vmatpush3.bf16.msra.mxu0 %v24386_v15  ;;  %20948 = vmatprep.mubr.msk.bf16.mxu0 %vm3657_vm7, %v24341_v60  ;;  %v24639_v15 = vrot.slane %v4742_v21, 5  ;;  %v24641_v60 = vrot.slane %v4747_v17, 4  ;;  %v24658_v58 = vcombine.low %v8475_v48, %v8489_v5  ;;  %v24674_v21 = vld [vmem:[%s23872_s20 + $0x2b0] sm:$0xf]  ;;  %v23223_v48 = vld [vmem:[%s23872_s20 + $0x98] ss:$8 sps:$4 sm:$0xff]  }
 0x171   : > { %21010 = vmatprep.subr.bf16.mxu0 %v24599_v24 }
 0x172   : > { %v20420_v22 = vpop.f32.mrb[0].mxu0  ;;  %28668 = vst [vmem:[#allocation29_spill] sm:$0xff] %v24658_v58 }
 0x173   : > { %v2148_v53 = vadd.f32 %v20420_v22, %v24606_v57  ;;  %v2100_v51 = vpop.f32.mrb[1].mxu0 }
 0x174   : > { %v2146_v6 = vadd.f32 %v24606_v57, %v2100_v51  ;;  %v20421_v31 = vpop.f32.mrb[2].mxu0 }
 0x175   : > { %v2156_v47 = vmax.f32 %v2148_v53, 0.0  ;;  %v2149_v61 = vadd.f32 %v20421_v31, %v24606_v57  ;;  %v2103_v7 = vpop.f32.mrb[3].mxu0 }
 0x176   : > { %v2154_v45 = vmax.f32 %v2146_v6, 0.0  ;;  %v2147_v19 = vadd.f32 %v24606_v57, %v2103_v7 }
 0x177   : > { %v2164_v17 = vpack.c.bf16 %v2156_v47, %v2156_v47  ;;  %v2157_v14 = vmax.f32 %v2149_v61, 0.0  ;;  %20949 = vmatmul.mubr.msk.bf16.gmra.mrb[12].mxu0 %vm3657_vm7, %v24348_v18 }
 0x178   : > { %v2162_v62 = vpack.c.bf16 %v2154_v45, %v2154_v45  ;;  %v2155_v11 = vmax.f32 %v2147_v19, 0.0  ;;  %20952 = vmatprep.mubr.msk.bf16.mxu0 %vm3657_vm7, %v24557_v41 }
 0x179   : > { %v2192_v5 = vshrl.u32 %v2164_v17, 16  ;;  %v2165_v32 = vpack.c.bf16 %v2157_v14, %v2157_v14  ;;  %v2195_v18 = vshll.u32 %v2164_v17, 16 }
 0x17a   : > { %v2178_v34 = vshrl.u32 %v2162_v62, 16  ;;  %v2181_v55 = vshll.u32 %v2162_v62, 16  ;;  %v2163_v30 = vpack.c.bf16 %v2155_v11, %v2155_v11  ;;  %v20424_v22 = vpop.f32.mrb[4].mxu0 }
 0x17b   : > { %v2194_v23 = vrot.slane %v2192_v5, 7  ;;  %v2199_v38 = vshrl.u32 %v2165_v32, 16  ;;  %v2202_v53 = vshll.u32 %v2165_v32, 16  ;;  %v21784_v51 = vadd.f32 %v20424_v22, %v24450_v8  ;;  %v2116_v6 = vpop.f32.mrb[5].mxu0 }
 0x17c   : > { %v2180_v31 = vrot.slane %v2178_v34, 7  ;;  %v2185_v47 = vshrl.u32 %v2163_v30, 16  ;;  %v2188_v61 = vshll.u32 %v2163_v30, 16  ;;  %v21785_v7 = vadd.f32 %v2116_v6, %v24453_v20  ;;  %v20425_v46 = vpop.f32.mrb[6].mxu0 }
 0x17d   : > { %v2197_v45 = vor.u32 %v2195_v18, %v2194_v23  ;;  %v2201_v19 = vrot.slane %v2199_v38, 7  ;;  %v2152_v4 = vadd.f32 %v21784_v51, %v24606_v57  ;;  %v21786_v17 = vadd.f32 %v20425_v46, %v24455_v28  ;;  %v2119_v14 = vpop.f32.mrb[7].mxu0 }
 0x17e   : > { %v2183_v62 = vor.u32 %v2181_v55, %v2180_v31  ;;  %v2187_v11 = vrot.slane %v2185_v47, 7  ;;  %v2150_v5 = vadd.f32 %v21785_v7, %v24606_v57  ;;  %v21787_v8 = vadd.f32 %v2119_v14, %v24458_v39 }
 0x17f   : > { %v2248_v32 = vsel %vm24407_vm11, 0, %v2197_v45  ;;  %v2204_v34 = vor.u32 %v2202_v53, %v2201_v19  ;;  %v2160_v30 = vmax.f32 %v2152_v4, 0.0  ;;  %v2153_v20 = vadd.f32 %v21786_v17, %v24606_v57  ;;  %20953 = vmatmul.mubr.msk.bf16.gmra.mrb[16].mxu0 %vm3657_vm7, %v24559_v37 }
 0x180   : > { %v24702_v28 = vsel %vm24427_vm13, %v2248_v32, 0  ;;  %v2246_v18 = vsel %vm24407_vm11, 0, %v2183_v62  ;;  %v2190_v55 = vor.u32 %v2188_v61, %v2187_v11  ;;  %v2158_v22 = vmax.f32 %v2150_v5, 0.0  ;;  %20956 = vmatprep.mubr.msk.bf16.mxu0 %vm3657_vm7, %v24561_v63 }
 0x181   : > { %28671 = vst [vmem:[#allocation32_spill] sm:$0xff] %v24702_v28  ;;  %v24710_v39 = vcombine.low %v24702_v28, %v24702_v28  ;;  %v24714_v23 = vcombine.high %v24702_v28, %v24702_v28  ;;  %v24718_v38 = vsel %vm24427_vm13, %v2246_v18, 0  ;;  %v2249_v53 = vsel %vm24407_vm11, 0, %v2204_v34 }
 0x182   : > { %v24724_v51 = vcombine.low %v24718_v38, %v24718_v38  ;;  %v24728_v6 = vsel %vm24427_vm13, %v2249_v53, 0  ;;  %v2247_v31 = vsel %vm24407_vm11, 0, %v2190_v55  ;;  %v24739_v45 = vcombine.high %v24718_v38, %v24718_v38 }
 0x183   : > { %v2353_v61 = vshrl.u32 %v24710_v39, 16  ;;  %v2356_v7 = vshll.u32 %v24710_v39, 16  ;;  %v2362_v46 = vshll.u32 %v24714_v23, 16  ;;  %v24745_v17 = vcombine.low %v24728_v6, %v24728_v6 }
 0x184   : > { %v24755_v5 = vcombine.high %v24728_v6, %v24728_v6  ;;  %v24759_v32 = vsel %vm24427_vm13, %v2247_v31, 0  ;;  %v2168_v53 = vpack.c.bf16 %v2160_v30, %v2160_v30  ;;  %v2161_v14 = vmax.f32 %v2153_v20, 0.0 }
 0x185   : > { %v24749_v62 = vrot.slane %v2353_v61, 4  ;;  %v24751_v11 = vrot.slane %v2356_v7, 5  ;;  %v24763_v34 = vcombine.low %v24759_v32, %v24759_v32  ;;  %v24767_v18 = vcombine.high %v24759_v32, %v24759_v32 }
 0x186   : > { %v24771_v55 = vcombine.low %v24759_v32, %v24702_v28  ;;  %v24773_v61 = vrot.slane %v2362_v46, 5  ;;  %v2166_v7 = vpack.c.bf16 %v2158_v22, %v2158_v22  ;;  %v2151_v31 = vadd.f32 %v21787_v8, %v24606_v57 }
 0x187   : > { %20957 = vmatmul.mubr.msk.bf16.gmra.mrb[20].mxu0 %vm3657_vm7, %v24585_v50  ;;  %v2339_v1 = vshrl.u32 %v24763_v34, 16  ;;  %v2342_v49 = vshll.u32 %v24763_v34, 16  ;;  %v2348_v12 = vshll.u32 %v24767_v18, 16  ;;  %v2325_v30 = vshrl.u32 %v24724_v51, 16 }
 0x188   : > { %20960 = vmatprep.mubr.msk.bf16.mxu0 %vm3657_vm7, %v23223_v48  ;;  %v2220_v22 = vshrl.u32 %v2168_v53, 16  ;;  %v2206_v57 = vshrl.u32 %v2166_v7, 16  ;;  %v2223_v36 = vshll.u32 %v2168_v53, 16  ;;  %v2209_v26 = vshll.u32 %v2166_v7, 16 }
 0x189   : > { %v2341_v8 = vrot.slane %v2339_v1, 4  ;;  %v2344_v56 = vrot.slane %v2342_v49, 5  ;;  %v2169_v19 = vpack.c.bf16 %v2161_v14, %v2161_v14  ;;  %v2159_v4 = vmax.f32 %v2151_v31, 0.0 }
 0x18a   : > { %v2222_v33 = vrot.slane %v2220_v22, 7  ;;  %v2208_v47 = vrot.slane %v2206_v57, 7  ;;  %v2350_v50 = vrot.slane %v2348_v12, 5  ;;  %v2328_v48 = vshll.u32 %v24724_v51, 16  ;;  %v23224_v22 = vld [vmem:[%s23872_s20 + $0xa8] ss:$8 sps:$4 sm:$0xff]  }
 0x18b   : > { %v2334_v63 = vshll.u32 %v24739_v45, 16  ;;  %v2345_v37 = vor.u32 %v2344_v56, %v2341_v8  ;;  %v2227_v20 = vshrl.u32 %v2169_v19, 16  ;;  %v2327_v28 = vrot.slane %v2325_v30, 4 }
 0x18c   : > { %v2225_v46 = vor.u32 %v2223_v36, %v2222_v33  ;;  %v2211_v41 = vor.u32 %v2209_v26, %v2208_v47  ;;  %v2230_v1 = vshll.u32 %v2169_v19, 16  ;;  %v2167_v49 = vpack.c.bf16 %v2159_v4, %v2159_v4  ;;  %v23225_v47 = vld [vmem:[%s23872_s20 + $0xb8] ss:$8 sps:$4 sm:$0xff]  }
 0x18d   : > { %v2330_v53 = vrot.slane %v2328_v48, 5  ;;  %v2346_v7 = vrot.slane %v2345_v37, 4  ;;  %v2229_v31 = vrot.slane %v2227_v20, 7  ;;  %v2359_v33 = vor.u32 %v24751_v11, %v24749_v62 }
 0x18e   : > { %v2252_v14 = vsel %vm24407_vm11, 0, %v2225_v46  ;;  %v2250_v12 = vsel %vm24407_vm11, 0, %v2211_v41  ;;  %v2213_v36 = vshrl.u32 %v2167_v49, 16  ;;  %v2336_v56 = vrot.slane %v2334_v63, 5 }
 0x18f   : > { %20961 = vmatmul.mubr.msk.bf16.gmra.mrb[24].mxu0 %vm3657_vm7, %v23224_v22  ;;  %v24798_v26 = vsel %vm24427_vm13, %v2252_v14, 0  ;;  %v24802_v37 = vsel %vm24427_vm13, %v2250_v12, 0  ;;  %v2216_v62 = vshll.u32 %v2167_v49, 16  ;;  %v2232_v11 = vor.u32 %v2230_v1, %v2229_v31 }
 0x190   : > { %20964 = vmatprep.mubr.msk.bf16.mxu0 %vm3657_vm7, %v23225_v47  ;;  %v24808_v41 = vcombine.low %v24798_v26, %v24798_v26  ;;  %v24812_v19 = vcombine.high %v24798_v26, %v24798_v26  ;;  %v24816_v4 = vcombine.low %v24802_v37, %v24802_v37  ;;  %v2215_v30 = vrot.slane %v2213_v36, 7 }
 0x191   : > { %v2331_v46 = vor.u32 %v2330_v53, %v2327_v28  ;;  %v24820_v63 = vsel %vm23429_vm2, %v2346_v7, %v2350_v50  ;;  %v2360_v20 = vrot.slane %v2359_v33, 4  ;;  %v2367_v57 = vshrl.u32 %v24745_v17, 16 }
 0x192   : > { %v2370_v8 = vshll.u32 %v24745_v17, 16  ;;  %v2376_v48 = vshll.u32 %v24755_v5, 16  ;;  %v2253_v14 = vsel %vm24407_vm11, 0, %v2232_v11  ;;  %v2218_v12 = vor.u32 %v2216_v62, %v2215_v30  ;;  %v23226_v30 = vld [vmem:[%s23872_s20 + $0xc8] ss:$8 sps:$4 sm:$0xff]  }
 0x193   : > { %v2332_v49 = vrot.slane %v2331_v46, 4  ;;  %v2381_v1 = vshrl.u32 %v24816_v4, 16  ;;  %v24830_v28 = vcombine.high %v24802_v37, %v24802_v37  ;;  %v24834_v50 = vsel %vm24427_vm13, %v2253_v14, 0 }
 0x194   : > { %v2369_v53 = vrot.slane %v2367_v57, 4  ;;  %v2372_v7 = vrot.slane %v2370_v8, 5  ;;  %v24838_v31 = vcombine.low %v24834_v50, %v24834_v50  ;;  %v2251_v22 = vsel %vm24407_vm11, 0, %v2218_v12 }
 0x195   : > { %v24844_v33 = vsel %vm23429_vm2, %v2332_v49, %v2336_v56  ;;  %v24849_v36 = vsel %vm23429_vm2, %v2360_v20, %v24773_v61  ;;  %v24853_v47 = vsel %vm24427_vm13, %v2251_v22, 0  ;;  %v22970_v61 = vld [vmem:[%s28524_s4 + $0x8] sm:$0xff]   ;;  %v2378_v57 = vrot.slane %v2376_v48, 5 }
 0x196   : > { %28672 = vst [vmem:[#allocation33_spill] sm:$0xff] %v24849_v36  ;;  %v17635_v62 = vcombine.low %v24591_v44, %v24844_v33  ;;  %v24859_v11 = vcombine.low %v24820_v63, %v24849_v36  ;;  %v2373_v56 = vor.u32 %v2372_v7, %v2369_v53  ;;  %v24868_v46 = vcombine.low %v24853_v47, %v24853_v47 }
 0x197   : > { %20965 = vmatmul.mubr.msk.bf16.gmra.mrb[28].mxu0 %vm3657_vm7, %v23226_v30  ;;  %v24872_v20 = vcombine.high %v24853_v47, %v24853_v47  ;;  %v2383_v8 = vrot.slane %v2381_v1, 4  ;;  %v2384_v12 = vshll.u32 %v24816_v4, 16  ;;  %v2390_v49 = vshll.u32 %v24830_v28, 16 }
 0x198   : > { %28673 = vst [vmem:[#allocation34_spill] sm:$0xff] %v24859_v11  ;;  %20968 = vmatprep.mubr.msk.bf16.mxu0 %vm3657_vm7, %v24656_v59  ;;  %20430 = vmatprep.mubr.msk.bf16.mxu1 %vm693_vm3, %v17635_v62  ;;  %v2374_v14 = vrot.slane %v2373_v56, 4  ;;  %v2409_v53 = vshrl.u32 %v24808_v41, 16  ;;  %v2395_v7 = vshrl.u32 %v24868_v46, 16  ;;  %v2398_v48 = vshll.u32 %v24868_v46, 16 }
 0x199   : > { %20431 = vmatmul.mubr.msk.bf16.vlgmr.msra.gmra.mrb[4].mxu1 %vm693_vm3, %v24859_v11  ;;  %v2404_v1 = vshll.u32 %v24872_v20, 16  ;;  %v2412_v22 = vshll.u32 %v24808_v41, 16  ;;  %v2386_v30 = vrot.slane %v2384_v12, 5  ;;  %v2392_v56 = vrot.slane %v2390_v49, 5 }
 0x19a   : > { %v24888_v62 = vsel %vm23429_vm2, %v2374_v14, %v2378_v57  ;;  %v2411_v2 = vrot.slane %v2409_v53, 4  ;;  %20439 = vmatpush3.bf16.msra.mxu1 %v23227_v29  ;;  %v2397_v59 = vrot.slane %v2395_v7, 4  ;;  %v2400_v11 = vrot.slane %v2398_v48, 5  ;;  %v24898_v57 = vld [vmem:[%s28524_s4 + $0x20] sm:$0xff]  }
 0x19b   : > { %v2406_v13 = vrot.slane %v2404_v1, 5  ;;  %20440 = vmatprep.subr.bf16.mxu1 %v22970_v61  ;;  %v24902_v14 = vcombine.high %v24834_v50, %v24834_v50  ;;  %v2387_v12 = vor.u32 %v2386_v30, %v2383_v8  ;;  %v2414_v49 = vrot.slane %v2412_v22, 5 }
 0x19c   : > { %v2418_v29 = vshll.u32 %v24812_v19, 16  ;;  %v2401_v53 = vor.u32 %v2400_v11, %v2397_v59  ;;  %v24907_v7 = vcombine.low %v24728_v6, %v24802_v37  ;;  %v24911_v48 = vcombine.low %v24853_v47, %v24798_v26 }
 0x19d   : > { %v17656_v1 = vrot.slane %v24724_v51, 9  ;;  %v2388_v44 = vrot.slane %v2387_v12, 4  ;;  %v2415_v36 = vor.u32 %v2414_v49, %v2411_v2  ;;  %v17645_v52 = vcombine.low %v24441_v35, %v24718_v38 }
 0x19e   : > { %20441 = vmatpush3.bf16.msra.mxu1 %v22970_v61  ;;  %v2627_v59 = vrot.slane %v24739_v45, 5  ;;  %v2402_v11 = vrot.slane %v2401_v53, 4  ;;  %v28674_v8 = vrot.slane %v24767_v18, 5  ;;  %v28675_v51 = vrot.slane %v24763_v34, 9 }
 0x19f   : > { %20969 = vmatmul.mubr.msk.bf16.gmra.mrb[32].mxu0 %vm3657_vm7, %v24658_v58  ;;  %20450 = vmatprep.subr.bf16.mxu1 %v24898_v57  ;;  %v28676_v22 = vrot.slane %v24714_v23, 5  ;;  %v28677_v61 = vrot.slane %v24710_v39, 9  ;;  %v17659_v30 = vrot.slane %v24745_v17, 9  ;;  %v24941_v12 = vsel %vm23429_vm2, %v2388_v44, %v2392_v56 }
 0x1a0   : > { %20972 = vmatprep.mubr.msk.bf16.mxu0 %vm3657_vm7, %v24665_v42  ;;  %v24928_v2 = vsel %vm23467_vm6, %v28675_v51, %v28674_v8  ;;  %v2416_v18 = vrot.slane %v2415_v36, 4  ;;  %v2420_v34 = vrot.slane %v2418_v29, 5  ;;  %v24949_v23 = vcombine.low %v24888_v62, %v24941_v12  ;;  %v17948_v8 = vld [vmem:[%s23872_s20 + $0x2ac] sm:$0x1] }
 0x1a1   : > { %v24936_v45 = vsel %vm23467_vm6, %v28677_v61, %v28676_v22  ;;  %v24953_v39 = vsel %vm23429_vm2, %v2402_v11, %v2406_v13  ;;  %v24957_v17 = vsel %vm23467_vm6, %v17656_v1, %v2627_v59  ;;  %v2639_v44 = vrot.slane %v24755_v5, 5  ;;  %v17951_v11 = vld [vmem:[%s23872_s20 + $0x2b8] sm:$0xf] }
 0x1a2   : > { %v24945_v49 = vcombine.low %v24928_v2, %v24936_v45  ;;  %v24962_v36 = vsel %vm23429_vm2, %v2416_v18, %v2420_v34  ;;  %v17660_v56 = vrot.slane %v24816_v4, 9  ;;  %v2643_v29 = vrot.slane %v24830_v28, 5  ;;  %20434 = vmatprep.mubr.msk.bf16.mxu1 %vm693_vm3, %v24949_v23  ;;  %v23228_v18 = vld [vmem:[%s23872_s20 + $0x318] ss:$8 sps:$4 sm:$0xff]   ;;  %v22973_v28 = vld [vmem:[%s28524_s4 + $0x28] sm:$0xff]  }
 0x1a3   : > { %v17661_v53 = vrot.slane %v24868_v46, 9  ;;  %v24971_v13 = vcombine.low %v24953_v39, %v24962_v36  ;;  %v24975_v5 = vsel %vm23467_vm6, %v17659_v30, %v2639_v44  ;;  %v2647_v1 = vrot.slane %v24872_v20, 5 }
 0x1a4   : > { %v17662_v59 = vrot.slane %v24808_v41, 9  ;;  %v24981_v4 = vsel %vm23467_vm6, %v17660_v56, %v2643_v29  ;;  %v2651_v46 = vrot.slane %v24812_v19, 5  ;;  %v2879_v30 = vshrl.u32 %v24838_v31, 16 }
 0x1a5   : > { %20435 = vmatmul.mubr.msk.bf16.gmra.mrb[8].mxu1 %vm693_vm3, %v24971_v13  ;;  %v24992_v20 = vcombine.low %v24975_v5, %v24981_v4  ;;  %v24996_v41 = vsel %vm23467_vm6, %v17661_v53, %v2647_v1  ;;  %v4806_v34 = vshll.u32 %v24674_v21, 16  ;;  %v2882_v44 = vshll.u32 %v24838_v31, 16 }
 0x1a6   : > { %20442 = vmatprep.mubr.msk.bf16.mxu1 %vm693_vm3, %v17645_v52  ;;  %v25007_v51 = vsel %vm23467_vm6, %v17662_v59, %v2651_v46  ;;  %v28679_v29 = vor.u32 %v24643_v9, %v24641_v60  ;;  %v28680_v1 = vshll.u32 %v24623_v16, 16  ;;  %v2881_v46 = vrot.slane %v2879_v30, 4  ;;  %v17950_v9 = vld [vmem:[%s23872_s20 + $0x2b4] sm:$0x1] }
 0x1a7   : > { %20973 = vmatmul.mubr.msk.bf16.gmra.mrb[36].mxu0 %vm3657_vm7, %v24686_v10  ;;  %v25018_v52 = vcombine.low %v24996_v41, %v25007_v51  ;;  %v28681_v61 = vshrl.u32 %v24636_v40, 16  ;;  %v28682_v56 = vshll.u32 %v24636_v40, 16  ;;  %v2884_v60 = vrot.slane %v2882_v44, 5 }
 0x1a8   : > { %20978 = vmatprep.mubr.msk.bf16.mxu0 %vm3657_vm7, %v23228_v18  ;;  %v4754_v53 = vrot.slane %v28679_v29, 4  ;;  %v4766_v59 = vrot.slane %v28680_v1, 5  ;;  %v2888_v16 = vshll.u32 %v24902_v14, 16  ;;  %v28683_v30 = vshrl.u32 %v24662_v54, 16 }
 0x1a9   : > { %28678 = vst [vmem:[#allocation35_spill] sm:$0xff] %v25018_v52  ;;  %v4777_v22 = vrot.slane %v28681_v61, 4  ;;  %v4780_v19 = vrot.slane %v28682_v56, 5  ;;  %v28684_v1 = vshll.u32 %v24662_v54, 16  ;;  %v28685_v10 = vshrl.u32 %v24674_v21, 16 }
 0x1aa   : > { %v4791_v29 = vrot.slane %v28683_v30, 4  ;;  %v4808_v61 = vrot.slane %v4806_v34, 5  ;;  %v2885_v58 = vor.u32 %v2884_v60, %v2881_v46  ;;  %v4745_v40 = vsel %vm23429_vm2, %v24678_v3, %v24639_v15  ;;  %v25064_v15 = vld [vmem:[%s28526_s6 + $0x78] sm:$0xff]   ;;  %v28688_v30 = vld [vmem:[#allocation19_spill] sm:$0xff] }
 0x1ab   : > { %v4794_v18 = vrot.slane %v28684_v1, 5  ;;  %v4805_v42 = vrot.slane %v28685_v10, 4  ;;  %v4759_v44 = vsel %vm23429_vm2, %v4754_v53, %v24645_v25  ;;  %v4767_v56 = vor.u32 %v4766_v59, %v24680_v43  ;;  %v17953_v10 = vld [vmem:[%s23872_s20 + $0x2c0] sm:$0xf] }
 0x1ac   : > { %v17707_v54 = vrot.slane %v24838_v31, 9  ;;  %v4781_v21 = vor.u32 %v4780_v19, %v4777_v22  ;;  %v2886_v34 = vrot.slane %v2885_v58, 4  ;;  %v2890_v46 = vrot.slane %v2888_v16, 5  ;;  %v23229_v58 = vld [vmem:[%s23872_s20 + $0x328] ss:$8 sps:$4 sm:$0xff]   ;;  %v28691_v1 = vld [vmem:[#allocation26_spill] sm:$0xff] }
 0x1ad   : > { %20443 = vmatmul.mubr.msk.bf16.vlgmr.msra.gmra.mrb[4].mxu1 %vm693_vm3, %v24771_v55  ;;  %v3001_v60 = vrot.slane %v24902_v14, 5  ;;  %v4795_v25 = vor.u32 %v4794_v18, %v4791_v29  ;;  %v4798_v3 = vshll.u32 %v17948_v8, 16  ;;  %v4812_v43 = vshll.u32 %v17950_v9, 16  ;;  %v22974_v14 = vld [vmem:[%s28524_s4 + $0x30] sm:$0xff]   ;;  %v23230_v8 = vld [vmem:[%s23872_s20 + $0x338] ss:$8 sps:$4 sm:$0xff]  }
 0x1ae   : > { %20446 = vmatprep.mubr.msk.bf16.mxu1 %vm693_vm3, %v24907_v7  ;;  %20451 = vmatpush3.bf16.msra.mxu1 %v24898_v57  ;;  %v4817_v31 = vshrl.u32 %v17951_v11, 16  ;;  %v4809_v19 = vor.u32 %v4808_v61, %v4805_v42  ;;  %v4820_v22 = vshll.u32 %v17951_v11, 16  ;;  %v25076_v53 = vsel %vm23429_vm2, %v2886_v34, %v2890_v46  ;;  %v28686_v16 = vld [vmem:[#allocation20_spill] sm:$0xff]  ;;  %v28693_v34 = vld [vmem:[#allocation27_spill] sm:$0xff]  ;;  %v17954_v11 = vld [vmem:[%s23872_s20 + $0x2c4] sm:$0x1] }
 0x1af   : > { %20452 = vmatprep.subr.bf16.mxu1 %v22973_v28  ;;  %20979 = vmatmul.mubr.msk.bf16.vlgmr.msra.gmra.mrb[8].mxu0 %vm3657_vm7, %v23229_v58  ;;  %v25080_v57 = vsel %vm23467_vm6, %v17707_v54, %v3001_v60  ;;  %v4831_v59 = vshrl.u32 %v17953_v10, 16  ;;  %v4834_v18 = vshll.u32 %v17953_v10, 16  ;;  %v28687_v9 = vrot.slane %v28686_v16, 5 }
 0x1b0   : > { %21011 = vmatpush3.bf16.msra.mxu0 %v24599_v24  ;;  %20982 = vmatprep.mubr.msk.bf16.mxu0 %vm3657_vm7, %v23230_v8  ;;  %v28689_v29 = vrot.slane %v28688_v30, 9  ;;  %v28692_v61 = vshll.u32 %v28691_v1, 16  ;;  %v28694_v46 = vshll.u32 %v28693_v34, 16  ;;  %v25102_v60 = vcombine.low %v4745_v40, %v4759_v44  ;;  %v17952_v30 = vld [vmem:[%s23872_s20 + $0x2bc] sm:$0x1] }
 0x1b1   : > { %21044 = vmatprep.subr.bf16.mxu0 %v25064_v15  ;;  %v4768_v58 = vrot.slane %v4767_v56, 4  ;;  %v4782_v8 = vrot.slane %v4781_v21, 4  ;;  %v4800_v16 = vrot.slane %v4798_v3, 5  ;;  %v4819_v42 = vrot.slane %v4817_v31, 4  ;;  %v25112_v40 = vld [vmem:[%s23872_s20 + $0x348] ss:$8 sps:$4 sm:$0xff]  }
 0x1b2   : > { %v25095_v24 = vsel %vm23467_vm6, %v28689_v29, %v28687_v9  ;;  %v4772_v54 = vrot.slane %v28692_v61, 5  ;;  %v4786_v10 = vrot.slane %v28694_v46, 5  ;;  %20453 = vmatpush3.bf16.msra.mxu1 %v22973_v28  ;;  %28695 = vst [vmem:[#allocation19_spill] sm:$0xff] %v25102_v60  ;;  %v4796_v9 = vrot.slane %v4795_v25, 4  ;;  %28696 = vst [vmem:[#allocation26_spill] sm:$0xff] %v25112_v40 }
 0x1b3   : > { %28690 = vst [vmem:[#allocation20_spill] sm:$0xff] %v25095_v24  ;;  %20462 = vmatprep.subr.bf16.mxu1 %v22974_v14  ;;  %v4814_v29 = vrot.slane %v4812_v43, 5  ;;  %v4822_v1 = vrot.slane %v4820_v22, 5  ;;  %v17667_v61 = vcombine.low %v25095_v24, %v24957_v17  ;;  %v4810_v34 = vrot.slane %v4809_v19, 4  ;;  %v18477_v22 = vld [vmem:[%s23872_s20 + $0x50] sm:$0xf] }
 0x1b4   : > { %v4833_v46 = vrot.slane %v4831_v59, 4  ;;  %v4836_v28 = vrot.slane %v4834_v18, 5  ;;  %v4773_v44 = vsel %vm23429_vm2, %v4768_v58, %v4772_v54  ;;  %v4787_v56 = vsel %vm23429_vm2, %v4782_v8, %v4786_v10  ;;  %v22975_v59 = vld [vmem:[%s28524_s4 + $0x38] sm:$0xff]  }
 0x1b5   : > { %20447 = vmatmul.mubr.msk.bf16.gmra.mrb[8].mxu1 %vm693_vm3, %v24911_v48  ;;  %v4826_v21 = vshll.u32 %v17952_v30, 16  ;;  %v4840_v25 = vshll.u32 %v17954_v11, 16  ;;  %v4801_v3 = vsel %vm23429_vm2, %v4796_v9, %v4800_v16  ;;  %v4815_v43 = vsel %vm23429_vm2, %v4810_v34, %v4814_v29  ;;  %v18479_v18 = vld [vmem:[%s23872_s20 + $0x58] sm:$0xf]  ;;  %v18480_v34 = vld [vmem:[%s23872_s20 + $0x5c] sm:$0x1] }
 0x1b6   : > { %20454 = vmatprep.mubr.msk.bf16.mxu1 %vm693_vm3, %v17667_v61  ;;  %v4823_v31 = vor.u32 %v4822_v1, %v4819_v42  ;;  %v4837_v19 = vor.u32 %v4836_v28, %v4833_v46  ;;  %v25131_v54 = vcombine.low %v4773_v44, %v4787_v56  ;;  %v25133_v11 = vcombine.low %v4801_v3, %v4815_v43  ;;  %v22976_v1 = vld [vmem:[%s28524_s4 + $0x40] sm:$0xff]   ;;  %v18478_v61 = vld [vmem:[%s23872_s20 + $0x54] sm:$0x1] }
 0x1b7   : > { %20983 = vmatmul.mubr.msk.bf16.gmra.mrb[12].mxu0 %vm3657_vm7, %v25112_v40  ;;  %v4828_v10 = vrot.slane %v4826_v21, 5  ;;  %v4842_v58 = vrot.slane %v4840_v25, 5  ;;  %v8789_v30 = vshrl.u32 %v18477_v22, 16  ;;  %v8792_v9 = vshll.u32 %v18477_v22, 16  ;;  %v18481_v43 = vld [vmem:[%s23872_s20 + $0x60] sm:$0xf] }
 0x1b8   : > { %20986 = vmatprep.mubr.msk.bf16.mxu0 %vm3657_vm7, %v25102_v60  ;;  %28697 = vst [vmem:[#allocation27_spill] sm:$0xff] %v25131_v54  ;;  %28698 = vst [vmem:[#allocation36_spill] sm:$0xff] %v25133_v11  ;;  %v4824_v8 = vrot.slane %v4823_v31, 4  ;;  %v4838_v16 = vrot.slane %v4837_v19, 4  ;;  %v8803_v42 = vshrl.u32 %v18479_v18, 16  ;;  %v8806_v29 = vshll.u32 %v18479_v18, 16 }
 0x1b9   : > { %v8791_v28 = vrot.slane %v8789_v30, 4  ;;  %v8794_v44 = vrot.slane %v8792_v9, 5  ;;  %v8798_v25 = vshll.u32 %v18478_v61, 16  ;;  %v8812_v3 = vshll.u32 %v18480_v34, 16  ;;  %v18483_v19 = vld [vmem:[%s23872_s20 + $0x68] sm:$0xf] }
 0x1ba   : > { %v4829_v46 = vsel %vm23429_vm2, %v4824_v8, %v4828_v10  ;;  %v8805_v56 = vrot.slane %v8803_v42, 4  ;;  %v8808_v21 = vrot.slane %v8806_v29, 5  ;;  %v18485_v22 = vld [vmem:[%s23872_s20 + $0x70] sm:$0xf]  ;;  %v8820_v8 = vshll.u32 %v18481_v43, 16 }
 0x1bb   : > { %v8795_v18 = vor.u32 %v8794_v44, %v8791_v28  ;;  %v25164_v30 = vrot.slane %v8798_v25, 5  ;;  %v25166_v9 = vrot.slane %v8812_v3, 5  ;;  %v8831_v42 = vshrl.u32 %v18483_v19, 16 }
 0x1bc   : > { %v8809_v10 = vor.u32 %v8808_v21, %v8805_v56  ;;  %v8834_v29 = vshll.u32 %v18483_v19, 16  ;;  %v8845_v61 = vshrl.u32 %v18485_v22, 16  ;;  %v8848_v34 = vshll.u32 %v18485_v22, 16  ;;  %v18482_v56 = vld [vmem:[%s23872_s20 + $0x64] sm:$0x1] }
 0x1bd   : > { %20455 = vmatmul.mubr.msk.bf16.vlgmr.msra.gmra.mrb[4].mxu1 %vm693_vm3, %v24945_v49  ;;  %v8796_v28 = vrot.slane %v8795_v18, 4  ;;  %v18484_v21 = vld [vmem:[%s23872_s20 + $0x6c] sm:$0x1]  ;;  %v8822_v3 = vrot.slane %v8820_v8, 5  ;;  %v18491_v19 = vld [vmem:[%s23872_s20 + $0x88] sm:$0xf] }
 0x1be   : > { %20458 = vmatprep.mubr.msk.bf16.mxu1 %vm693_vm3, %v24992_v20  ;;  %20463 = vmatpush3.bf16.msra.mxu1 %v22974_v14  ;;  %v4843_v14 = vsel %vm23429_vm2, %v4838_v16, %v4842_v58  ;;  %v8817_v58 = vshrl.u32 %v18481_v43, 16  ;;  %v18487_v16 = vld [vmem:[%s23872_s20 + $0x78] sm:$0xf]  ;;  %v8810_v44 = vrot.slane %v8809_v10, 4  ;;  %v18489_v43 = vld [vmem:[%s23872_s20 + $0x80] sm:$0xf] }
 0x1bf   : > { %20464 = vmatprep.subr.bf16.mxu1 %v22975_v59  ;;  %20987 = vmatmul.mubr.msk.bf16.gmra.mrb[16].mxu0 %vm3657_vm7, %v25131_v54  ;;  %v25153_v31 = vcombine.low %v4829_v46, %v4843_v14  ;;  %v23232_v46 = vld [vmem:[%s23872_s20 + $0xe0] ss:$8 sps:$4 sm:$0xff]   ;;  %v8833_v22 = vrot.slane %v8831_v42, 4  ;;  %v28701_v54 = vld [vmem:[#allocation32_spill] sm:$0xff]  ;;  %v8873_v8 = vshrl.u32 %v18489_v43, 16  ;;  %v8876_v42 = vshll.u32 %v18489_v43, 16 }
 0x1c0   : > { %20990 = vmatprep.mubr.msk.bf16.mxu0 %vm3657_vm7, %v25133_v11  ;;  %v22977_v14 = vld [vmem:[%s28524_s4 + $0x48] sm:$0xff]   ;;  %v8819_v25 = vrot.slane %v8817_v58, 4  ;;  %v28702_v18 = vcombine.low %v28701_v54, %v24728_v6  ;;  %v25187_v10 = vld [vmem:[%s28524_s4 + $0x50] sm:$0xff]   ;;  %v18488_v58 = vld [vmem:[%s23872_s20 + $0x7c] sm:$0x1]  ;;  %v8801_v6 = vsel %vm23429_vm2, %v8796_v28, %v25164_v30  ;;  %v8826_v54 = vshll.u32 %v18482_v56, 16 }
 0x1c1   : > { %28699 = vst [vmem:[#allocation37_spill] sm:$0xff] %v25153_v31  ;;  %v8815_v43 = vsel %vm23429_vm2, %v8810_v44, %v25166_v9  ;;  %v8854_v60 = vshll.u32 %v18486_v0, 16  ;;  %v8868_v28 = vshll.u32 %v18488_v58, 16  ;;  %v8875_v56 = vrot.slane %v8873_v8, 4 }
 0x1c2   : > { %20465 = vmatpush3.bf16.msra.mxu1 %v22975_v59  ;;  %v28700_v59 = vcombine.low %v24718_v38, %v24759_v32  ;;  %v8859_v38 = vshrl.u32 %v18487_v16, 16  ;;  %v8862_v32 = vshll.u32 %v18487_v16, 16  ;;  %v8828_v44 = vrot.slane %v8826_v54, 5 }
 0x1c3   : > { %20474 = vmatprep.subr.bf16.mxu1 %v22976_v1  ;;  %v8856_v0 = vrot.slane %v8854_v60, 5  ;;  %v28706_v58 = vcombine.low %v24844_v33, %v24820_v63  ;;  %v22979_v63 = vld [vmem:[%s28524_s4 + $0x58] sm:$0xff]  }
 0x1c4   : > { %v8861_v16 = vrot.slane %v8859_v38, 4  ;;  %v8864_v11 = vrot.slane %v8862_v32, 5  ;;  %v8840_v38 = vshll.u32 %v18484_v21, 16  ;;  %v18490_v32 = vld [vmem:[%s23872_s20 + $0x84] sm:$0x1]  ;;  %v8878_v21 = vrot.slane %v8876_v42, 5 }
 0x1c5   : > { %20459 = vmatmul.mubr.msk.bf16.gmra.mrb[8].mxu1 %vm693_vm3, %v25018_v52 }
 0x1c6   : > { %20466 = vmatprep.mubr.msk.bf16.mxu1 %vm693_vm3, %v28700_v59  ;;  %v8836_v59 = vrot.slane %v8834_v29, 5  ;;  %v8887_v29 = vshrl.u32 %v18491_v19, 16  ;;  %v8865_v30 = vor.u32 %v8864_v11, %v8861_v16  ;;  %v28705_v11 = vcombine.low %v24798_v26, %v24834_v50 }
 0x1c7   : > { %20991 = vmatmul.mubr.msk.bf16.gmra.mrb[20].mxu0 %vm3657_vm7, %v25153_v31  ;;  %v8847_v31 = vrot.slane %v8845_v61, 4  ;;  %v8890_v61 = vshll.u32 %v18491_v19, 16  ;;  %v8823_v19 = vor.u32 %v8822_v3, %v8819_v25  ;;  %v8842_v3 = vrot.slane %v8840_v38, 5 }
 0x1c8   : > { %20994 = vmatprep.mubr.msk.bf16.mxu0 %vm3657_vm7, %v23232_v46  ;;  %v8850_v46 = vrot.slane %v8848_v34, 5  ;;  %v28703_v34 = vcombine.low %v24802_v37, %v24853_v47  ;;  %v8837_v37 = vor.u32 %v8836_v59, %v8833_v22  ;;  %v18492_v47 = vld [vmem:[%s23872_s20 + $0x8c] sm:$0x1]  ;;  %v8889_v40 = vrot.slane %v8887_v29, 4  ;;  %v23235_v29 = vld [vmem:[%s23872_s20 + $0x110] ss:$8 sps:$4 sm:$0xff]  }
 0x1c9   : > { %v8892_v24 = vrot.slane %v8890_v61, 5  ;;  %v8896_v52 = vshll.u32 %v18492_v47, 16  ;;  %v8824_v9 = vrot.slane %v8823_v19, 4  ;;  %v25207_v22 = vcombine.low %v8801_v6, %v8815_v43  ;;  %v17998_v61 = vld [vmem:[%s23872_s20 + $0x2d0] sm:$0xf] }
 0x1ca   : > { %v8838_v25 = vrot.slane %v8837_v37, 4  ;;  %v8866_v59 = vrot.slane %v8865_v30, 4  ;;  %v18000_v6 = vld [vmem:[%s23872_s20 + $0x2d8] sm:$0xf]  ;;  %v28711_v19 = vcombine.low %v24941_v12, %v24953_v39  ;;  %v5239_v37 = vshrl.u32 %v17998_v61, 16 }
 0x1cb   : > { %28704 = vst [vmem:[#allocation32_spill] sm:$0xff] %v25207_v22  ;;  %v8893_v16 = vor.u32 %v8892_v24, %v8889_v40  ;;  %v8898_v42 = vrot.slane %v8896_v52, 5  ;;  %v8829_v26 = vsel %vm23429_vm2, %v8824_v9, %v8828_v44  ;;  %v5242_v47 = vshll.u32 %v17998_v61, 16  ;;  %v18002_v44 = vld [vmem:[%s23872_s20 + $0x2e0] sm:$0xf] }
 0x1cc   : > { %v8843_v60 = vsel %vm23429_vm2, %v8838_v25, %v8842_v3  ;;  %v5241_v30 = vrot.slane %v5239_v37, 4  ;;  %v18004_v25 = vld [vmem:[%s23872_s20 + $0x2e8] sm:$0xf]  ;;  %v28713_v3 = vcombine.low %v24962_v36, %v25076_v53  ;;  %v18005_v37 = vld [vmem:[%s23872_s20 + $0x2ec] sm:$0x1] }
 0x1cd   : > { %20467 = vmatmul.mubr.msk.bf16.vlgmr.msra.gmra.mrb[4].mxu1 %vm693_vm3, %v28702_v18  ;;  %v23233_v18 = vld [vmem:[%s23872_s20 + $0xf0] ss:$8 sps:$4 sm:$0xff]   ;;  %v8894_v40 = vrot.slane %v8893_v16, 4  ;;  %v25234_v54 = vcombine.low %v8829_v26, %v8843_v60  ;;  %v5281_v36 = vshrl.u32 %v18004_v25, 16 }
 0x1ce   : > { %20470 = vmatprep.mubr.msk.bf16.mxu1 %vm693_vm3, %v28703_v34  ;;  %20475 = vmatpush3.bf16.msra.mxu1 %v22976_v1  ;;  %v23234_v34 = vld [vmem:[%s23872_s20 + $0x100] ss:$8 sps:$4 sm:$0xff]   ;;  %v8851_v1 = vor.u32 %v8850_v46, %v8847_v31  ;;  %v8879_v46 = vor.u32 %v8878_v21, %v8875_v56  ;;  %v18001_v21 = vld [vmem:[%s23872_s20 + $0x2dc] sm:$0x1]  ;;  %v18008_v16 = vld [vmem:[%s23872_s20 + $0x2f8] sm:$0xf] }
 0x1cf   : > { %20476 = vmatprep.subr.bf16.mxu1 %v22977_v14  ;;  %20995 = vmatmul.mubr.msk.bf16.gmra.mrb[24].mxu0 %vm3657_vm7, %v23233_v18  ;;  %v8882_v18 = vshll.u32 %v18490_v32, 16  ;;  %28707 = vst [vmem:[#allocation38_spill] sm:$0xff] %v25234_v54  ;;  %v28709_v32 = vld [vmem:[#allocation33_spill] sm:$0xff]  ;;  %v8899_v39 = vsel %vm23429_vm2, %v8894_v40, %v8898_v42  ;;  %v5284_v42 = vshll.u32 %v18004_v25, 16  ;;  %v5309_v26 = vshrl.u32 %v18008_v16, 16  ;;  %v22983_v25 = vld [vmem:[%s28524_s4 + $0x70] sm:$0xff]  }
 0x1d0   : > { %20998 = vmatprep.mubr.msk.bf16.mxu0 %vm3657_vm7, %v23234_v34  ;;  %v8852_v31 = vrot.slane %v8851_v1, 4  ;;  %v8880_v24 = vrot.slane %v8879_v46, 4  ;;  %v28710_v43 = vcombine.low %v28709_v32, %v24888_v62  ;;  %v22980_v62 = vld [vmem:[%s28524_s4 + $0x60] sm:$0xff]   ;;  %v5253_v34 = vshrl.u32 %v18000_v6, 16 }
 0x1d1   : > { %v8884_v8 = vrot.slane %v8882_v18, 5  ;;  %v5256_v1 = vshll.u32 %v18000_v6, 16  ;;  %v5267_v46 = vshrl.u32 %v18002_v44, 16  ;;  %v5312_v60 = vshll.u32 %v18008_v16, 16  ;;  %v18003_v6 = vld [vmem:[%s23872_s20 + $0x2e4] sm:$0x1] }
 0x1d2   : > { %20477 = vmatpush3.bf16.msra.mxu1 %v22977_v14  ;;  %v8870_v14 = vrot.slane %v8868_v28, 5  ;;  %v8857_v33 = vsel %vm23429_vm2, %v8852_v31, %v8856_v0  ;;  %v5244_v28 = vrot.slane %v5242_v47, 5  ;;  %v5255_v18 = vrot.slane %v5253_v34, 4  ;;  %v18006_v31 = vld [vmem:[%s23872_s20 + $0x2f0] sm:$0xf] }
 0x1d3   : > { %20486 = vmatprep.subr.bf16.mxu1 %v25187_v10  ;;  %v8885_v12 = vsel %vm23429_vm2, %v8880_v24, %v8884_v8  ;;  %v5258_v9 = vrot.slane %v5256_v1, 5  ;;  %v28714_v0 = vcombine.low %v24957_v17, %v24928_v2  ;;  %v5270_v8 = vshll.u32 %v18002_v44, 16  ;;  %v18010_v47 = vld [vmem:[%s23872_s20 + $0x300] sm:$0xf]  ;;  %v18012_v34 = vld [vmem:[%s23872_s20 + $0x308] sm:$0xf] }
 0x1d4   : > { %v8871_v52 = vsel %vm23429_vm2, %v8866_v59, %v8870_v14  ;;  %v25259_v56 = vcombine.low %v8885_v12, %v8899_v39  ;;  %v5262_v14 = vshll.u32 %v18001_v21, 16  ;;  %v5295_v2 = vshrl.u32 %v18006_v31, 16  ;;  %v28718_v44 = vld [vmem:[#allocation22_spill] sm:$0xff] }
 0x1d5   : > { %20471 = vmatmul.mubr.msk.bf16.gmra.mrb[8].mxu1 %vm693_vm3, %v28705_v11  ;;  %v25236_v38 = vcombine.low %v8857_v33, %v8871_v52  ;;  %v5245_v11 = vor.u32 %v5244_v28, %v5241_v30  ;;  %v5298_v17 = vshll.u32 %v18006_v31, 16  ;;  %v5269_v40 = vrot.slane %v5267_v46, 4  ;;  %v25292_v28 = vld [vmem:[%s28526_s6 + $0x80] sm:$0xff]   ;;  %v28719_v31 = vld [vmem:[#allocation23_spill] sm:$0xff] }
 0x1d6   : > { %20478 = vmatprep.mubr.msk.bf16.mxu1 %vm693_vm3, %v28706_v58  ;;  %28712 = vst [vmem:[#allocation33_spill] sm:$0xff] %v25259_v56  ;;  %v5259_v58 = vor.u32 %v5258_v9, %v5255_v18  ;;  %v5264_v24 = vrot.slane %v5262_v14, 5  ;;  %v5272_v32 = vrot.slane %v5270_v8, 5  ;;  %v28716_v1 = vcombine.low %v24936_v45, %v24975_v5  ;;  %v18007_v18 = vld [vmem:[%s23872_s20 + $0x2f4] sm:$0x1] }
 0x1d7   : > { %20999 = vmatmul.mubr.msk.bf16.gmra.mrb[28].mxu0 %vm3657_vm7, %v23235_v29  ;;  %28708 = vst [vmem:[#allocation39_spill] sm:$0xff] %v25236_v38  ;;  %v28715_v29 = vld [vmem:[#allocation21_spill] sm:$0xff]  ;;  %v5246_v33 = vrot.slane %v5245_v11, 4  ;;  %v5297_v12 = vrot.slane %v5295_v2, 4  ;;  %v5300_v39 = vrot.slane %v5298_v17, 5  ;;  %v5314_v30 = vrot.slane %v5312_v60, 5 }
 0x1d8   : > { %21002 = vmatprep.mubr.msk.bf16.mxu0 %vm3657_vm7, %v25207_v22  ;;  %v5260_v61 = vrot.slane %v5259_v58, 4  ;;  %v28717_v21 = vcombine.low %v24981_v4, %v24996_v41  ;;  %v5276_v5 = vshll.u32 %v18003_v6, 16  ;;  %v18009_v9 = vld [vmem:[%s23872_s20 + $0x2fc] sm:$0x1]  ;;  %v5273_v41 = vor.u32 %v5272_v32, %v5269_v40 }
 0x1d9   : > { %v5326_v11 = vshll.u32 %v18010_v47, 16  ;;  %v5340_v14 = vshll.u32 %v18012_v34, 16  ;;  %v5301_v46 = vor.u32 %v5300_v39, %v5297_v12  ;;  %v5304_v16 = vshll.u32 %v18007_v18, 16 }
 0x1da   : > { %v5265_v4 = vsel %vm23429_vm2, %v5260_v61, %v5264_v24  ;;  %v5318_v8 = vshll.u32 %v18009_v9, 16  ;;  %v28721_v40 = vcombine.low %v25007_v51, %v25080_v57 }
 0x1db   : > { %v5342_v24 = vrot.slane %v5340_v14, 5  ;;  %v5302_v61 = vrot.slane %v5301_v46, 4 }
 0x1dc   : > { %v5320_v32 = vrot.slane %v5318_v8, 5  ;;  %v18519_v8 = vld [vmem:[%s23872_s20 + $0xa4] sm:$0x1] }
 0x1dd   : > { %20479 = vmatmul.mubr.msk.bf16.vlgmr.msra.gmra.mrb[4].mxu1 %vm693_vm3, %v28710_v43  ;;  %v5283_v43 = vrot.slane %v5281_v36, 4  ;;  %v5278_v36 = vrot.slane %v5276_v5, 5 }
 0x1de   : > { %20482 = vmatprep.mubr.msk.bf16.mxu1 %vm693_vm3, %v28711_v19  ;;  %20487 = vmatpush3.bf16.msra.mxu1 %v25187_v10  ;;  %v17999_v10 = vld [vmem:[%s23872_s20 + $0x2d4] sm:$0x1]  ;;  %v5286_v19 = vrot.slane %v5284_v42, 5 }
 0x1df   : > { %20488 = vmatprep.subr.bf16.mxu1 %v22979_v63  ;;  %21003 = vmatmul.mubr.msk.bf16.gmra.mrb[32].mxu0 %vm3657_vm7, %v25234_v54  ;;  %v5248_v59 = vshll.u32 %v17999_v10, 16  ;;  %v5311_v10 = vrot.slane %v5309_v26, 4  ;;  %v18011_v26 = vld [vmem:[%s23872_s20 + $0x304] sm:$0x1]  ;;  %v4089_v54 = vld [vmem:[%s23872_s20 + $0x1c] sm:$0x1] }
 0x1e0   : > { %21006 = vmatprep.mubr.msk.bf16.mxu0 %vm3657_vm7, %v25236_v38  ;;  %v4087_v38 = vld [vmem:[%s23872_s20 + $0x14] sm:$0x1] }
 0x1e1   : > { %v5250_v52 = vrot.slane %v5248_v59, 5  ;;  %v5337_v59 = vshrl.u32 %v18012_v34, 16  ;;  %v5315_v58 = vor.u32 %v5314_v30, %v5311_v10  ;;  %v22984_v10 = vld [vmem:[%s28524_s4 + $0x78] sm:$0xff]  }
 0x1e2   : > { %20489 = vmatpush3.bf16.msra.mxu1 %v22979_v63  ;;  %v22982_v63 = vld [vmem:[%s28524_s4 + $0x68] sm:$0xff]  }
 0x1e3   : > { %20498 = vmatprep.subr.bf16.mxu1 %v22980_v62  ;;  %v5251_v45 = vsel %vm23429_vm2, %v5246_v33, %v5250_v52  ;;  %v5328_v33 = vrot.slane %v5326_v11, 5  ;;  %v5339_v52 = vrot.slane %v5337_v59, 4  ;;  %v5316_v6 = vrot.slane %v5315_v58, 4 }
 0x1e4   : > { %v25313_v42 = vcombine.low %v5251_v45, %v5265_v4  ;;  %v18516_v45 = vld [vmem:[%s23872_s20 + $0x98] sm:$0xf] }
 0x1e5   : > { %20483 = vmatmul.mubr.msk.bf16.gmra.mrb[8].mxu1 %vm693_vm3, %v28713_v3  ;;  %v5287_v3 = vor.u32 %v5286_v19, %v5283_v43  ;;  %v18013_v43 = vld [vmem:[%s23872_s20 + $0x30c] sm:$0x1]  ;;  %v28722_v19 = vld [vmem:[#allocation24_spill] sm:$0xff]  ;;  %v5321_v39 = vsel %vm23429_vm2, %v5316_v6, %v5320_v32 }
 0x1e6   : > { %20490 = vmatprep.mubr.msk.bf16.mxu1 %vm693_vm3, %v28714_v0  ;;  %v5323_v0 = vshrl.u32 %v18010_v47, 16  ;;  %28720 = vst [vmem:[#allocation21_spill] sm:$0xff] %v25313_v42  ;;  %v5332_v47 = vshll.u32 %v18011_v26, 16  ;;  %v5346_v12 = vshll.u32 %v18013_v43, 16  ;;  %v18524_v26 = vld [vmem:[%s23872_s20 + $0xb8] sm:$0xf] }
 0x1e7   : > { %21007 = vmatmul.mubr.msk.bf16.gmra.mrb[36].mxu0 %vm3657_vm7, %v25259_v56  ;;  %v5288_v2 = vrot.slane %v5287_v3, 4  ;;  %v9143_v3 = vshrl.u32 %v18516_v45, 16  ;;  %v28727_v43 = vld [vmem:[#allocation28_spill] sm:$0xff]  ;;  %v25688_v56 = vld [vmem:[%s23872_s20 + $0x300] ss:$8 sps:$4 sm:$0xff]  }
 0x1e8   : > { %21012 = vmatprep.mubr.msk.bf16.mxu0 %vm3657_vm7, %v28715_v29  ;;  %v5325_v60 = vrot.slane %v5323_v0, 4  ;;  %v5348_v4 = vrot.slane %v5346_v12, 5  ;;  %v22985_v0 = vld [vmem:[%s28524_s4 + $0x80] sm:$0xff]  }
 0x1e9   : > { %v9145_v14 = vrot.slane %v9143_v3, 4  ;;  %v18528_v3 = vld [vmem:[%s23872_s20 + $0xc8] sm:$0xf] }
 0x1ea   : > { %v5329_v34 = vor.u32 %v5328_v33, %v5325_v60  ;;  %v28726_v60 = vld [vmem:[#allocation34_spill] sm:$0xff] }
 0x1ec   : > { %v5330_v18 = vrot.slane %v5329_v34, 4 }
 0x1ed   : > { %20491 = vmatmul.mubr.msk.bf16.vlgmr.msra.gmra.mrb[4].mxu1 %vm693_vm3, %v28716_v1  ;;  %v5343_v1 = vor.u32 %v5342_v24, %v5339_v52  ;;  %v9166_v24 = vshll.u32 %v18519_v8, 16  ;;  %v28728_v8 = vld [vmem:[#allocation29_spill] sm:$0xff] }
 0x1ee   : > { %20494 = vmatprep.mubr.msk.bf16.mxu1 %vm693_vm3, %v28717_v21  ;;  %20499 = vmatpush3.bf16.msra.mxu1 %v22980_v62  ;;  %v5290_v62 = vshll.u32 %v18005_v37, 16  ;;  %v5334_v21 = vrot.slane %v5332_v47, 5  ;;  %v9202_v47 = vshll.u32 %v18524_v26, 16 }
 0x1ef   : > { %20500 = vmatprep.subr.bf16.mxu1 %v22982_v63  ;;  %21013 = vmatmul.mubr.msk.bf16.vlgmr.msra.gmra.mrb[8].mxu0 %vm3657_vm7, %v28718_v44  ;;  %v5344_v9 = vrot.slane %v5343_v1, 4  ;;  %v22986_v1 = vld [vmem:[%s28524_s4 + $0x88] sm:$0xff]  }
 0x1f0   : > { %21045 = vmatpush3.bf16.msra.mxu0 %v25064_v15  ;;  %21016 = vmatprep.mubr.msk.bf16.mxu0 %vm3657_vm7, %v28719_v31  ;;  %v5274_v15 = vrot.slane %v5273_v41, 4  ;;  %v5292_v17 = vrot.slane %v5290_v62, 5  ;;  %v18518_v41 = vld [vmem:[%s23872_s20 + $0xa0] sm:$0xf]  ;;  %v9146_v62 = vshll.u32 %v18516_v45, 16 }
 0x1f1   : > { %21078 = vmatprep.subr.bf16.mxu0 %v25292_v28  ;;  %v9157_v11 = vshrl.u32 %v18518_v41, 16  ;;  %v9160_v59 = vshll.u32 %v18518_v41, 16  ;;  %v18521_v45 = vld [vmem:[%s23872_s20 + $0xac] sm:$0x1]  ;;  %v18523_v41 = vld [vmem:[%s23872_s20 + $0xb4] sm:$0x1] }
 0x1f2   : > { %20501 = vmatpush3.bf16.msra.mxu1 %v22982_v63  ;;  %v5306_v63 = vrot.slane %v5304_v16, 5  ;;  %v5279_v37 = vsel %vm23429_vm2, %v5274_v15, %v5278_v36  ;;  %v5293_v51 = vsel %vm23429_vm2, %v5288_v2, %v5292_v17  ;;  %v9148_v46 = vrot.slane %v9146_v62, 5  ;;  %v18520_v2 = vld [vmem:[%s23872_s20 + $0xa8] sm:$0xf]  ;;  %v18522_v17 = vld [vmem:[%s23872_s20 + $0xb0] sm:$0xf] }
 0x1f3   : > { %20510 = vmatprep.subr.bf16.mxu1 %v22983_v25  ;;  %v25338_v30 = vcombine.low %v5279_v37, %v5293_v51  ;;  %v17726_v16 = vcombine.low %v24834_v50, %v24441_v35  ;;  %v9159_v36 = vrot.slane %v9157_v11, 4  ;;  %v9162_v15 = vrot.slane %v9160_v59, 5 }
 0x1f4   : > { %v9149_v33 = vor.u32 %v9148_v46, %v9145_v14  ;;  %v9185_v6 = vshrl.u32 %v18522_v17, 16  ;;  %v9188_v32 = vshll.u32 %v18522_v17, 16  ;;  %v9199_v37 = vshrl.u32 %v18524_v26, 16  ;;  %v18525_v46 = vld [vmem:[%s23872_s20 + $0xbc] sm:$0x1] }
 0x1f5   : > { %20495 = vmatmul.mubr.msk.bf16.gmra.mrb[8].mxu1 %vm693_vm3, %v28721_v40  ;;  %28723 = vst [vmem:[#allocation22_spill] sm:$0xff] %v25338_v30  ;;  %v9171_v40 = vshrl.u32 %v18520_v2, 16  ;;  %v9163_v50 = vor.u32 %v9162_v15, %v9159_v36  ;;  %v9204_v11 = vrot.slane %v9202_v47, 5  ;;  %v9180_v14 = vshll.u32 %v18521_v45, 16  ;;  %v22987_v36 = vld [vmem:[%s28526_s6 + $0x8] sm:$0xff]  }
 0x1f6   : > { %20502 = vmatprep.mubr.msk.bf16.mxu1 %vm693_vm3, %v24771_v55  ;;  %v5307_v55 = vsel %vm23429_vm2, %v5302_v61, %v5306_v63  ;;  %v18526_v61 = vld [vmem:[%s23872_s20 + $0xc0] sm:$0xf]  ;;  %v9174_v63 = vshll.u32 %v18520_v2, 16  ;;  %v9150_v12 = vrot.slane %v9149_v33, 4  ;;  %v9201_v62 = vrot.slane %v9199_v37, 4 }
 0x1f7   : > { %21017 = vmatmul.mubr.msk.bf16.gmra.mrb[12].mxu0 %vm3657_vm7, %v28722_v19  ;;  %v25341_v5 = vcombine.low %v5307_v55, %v5321_v39  ;;  %v9213_v51 = vshrl.u32 %v18526_v61, 16  ;;  %v9216_v34 = vshll.u32 %v18526_v61, 16  ;;  %v9168_v39 = vrot.slane %v9166_v24, 5  ;;  %v28729_v2 = vld [vmem:[#allocation30_spill] sm:$0xff] }
 0x1f8   : > { %21020 = vmatprep.mubr.msk.bf16.mxu0 %vm3657_vm7, %v25313_v42  ;;  %v9227_v17 = vshrl.u32 %v18528_v3, 16  ;;  %v9230_v26 = vshll.u32 %v18528_v3, 16  ;;  %v9208_v24 = vshll.u32 %v18525_v46, 16  ;;  %v18652_v42 = vld [vmem:[%s23872_s20 + $0x154] sm:$0x1] }
 0x1f9   : > { %28724 = vst [vmem:[#allocation23_spill] sm:$0xff] %v25341_v5  ;;  %v9215_v59 = vrot.slane %v9213_v51, 4 }
 0x1fa   : > { %v9210_v45 = vrot.slane %v9208_v24, 5  ;;  %v22990_v24 = vld [vmem:[%s23872_s20 + $0x68] ss:$8 sps:$4 sm:$0xff]  }
 0x1fd   : > { %20503 = vmatmul.mubr.msk.bf16.vlgmr.msra.gmra.mrb[4].mxu1 %vm693_vm3, %v24907_v7  ;;  %v5335_v7 = vsel %vm23429_vm2, %v5330_v18, %v5334_v21  ;;  %v9164_v21 = vrot.slane %v9163_v50, 4  ;;  %v9176_v18 = vrot.slane %v9174_v63, 5  ;;  %v28730_v50 = vld [vmem:[#allocation25_spill] sm:$0xff] }
 0x1fe   : > { %20506 = vmatprep.mubr.msk.bf16.mxu1 %vm693_vm3, %v24911_v48  ;;  %20511 = vmatpush3.bf16.msra.mxu1 %v22983_v25  ;;  %v5349_v48 = vsel %vm23429_vm2, %v5344_v9, %v5348_v4  ;;  %v18517_v25 = vld [vmem:[%s23872_s20 + $0x9c] sm:$0x1]  ;;  %v9187_v9 = vrot.slane %v9185_v6, 4  ;;  %v9190_v4 = vrot.slane %v9188_v32, 5  ;;  %v17737_v63 = vcombine.low %v25076_v53, %v28730_v50 }
 0x1ff   : > { %20512 = vmatprep.subr.bf16.mxu1 %v22984_v10  ;;  %21021 = vmatmul.mubr.msk.bf16.gmra.mrb[16].mxu0 %vm3657_vm7, %v25338_v30  ;;  %v25362_v58 = vcombine.low %v5335_v7, %v5349_v48  ;;  %v9152_v52 = vshll.u32 %v18517_v25, 16  ;;  %v9218_v7 = vrot.slane %v9216_v34, 5  ;;  %v18530_v48 = vld [vmem:[%s23872_s20 + $0xd0] sm:$0xf]  ;;  %v9182_v6 = vrot.slane %v9180_v14, 5  ;;  %v23010_v14 = vld [vmem:[%s28526_s6] sm:$0xff]  }
 0x200   : > { %21024 = vmatprep.mubr.msk.bf16.mxu0 %vm3657_vm7, %v25341_v5  ;;  %v9244_v33 = vshll.u32 %v18530_v48, 16  ;;  %v18529_v34 = vld [vmem:[%s23872_s20 + $0xcc] sm:$0x1] }
 0x201   : > { %28725 = vst [vmem:[#allocation40_spill] sm:$0xff] %v25362_v58  ;;  %v9154_v55 = vrot.slane %v9152_v52, 5  ;;  %v9205_v52 = vor.u32 %v9204_v11, %v9201_v62 }
 0x202   : > { %20513 = vmatpush3.bf16.msra.mxu1 %v22984_v10  ;;  %v9173_v10 = vrot.slane %v9171_v40, 4  ;;  %v9219_v40 = vor.u32 %v9218_v7, %v9215_v59 }
 0x203   : > { %20522 = vmatprep.subr.bf16.mxu1 %v22985_v0  ;;  %v9155_v25 = vsel %vm23429_vm2, %v9150_v12, %v9154_v55  ;;  %v9229_v12 = vrot.slane %v9227_v17, 4  ;;  %v9232_v55 = vrot.slane %v9230_v26, 5  ;;  %v22988_v17 = vld [vmem:[%s23872_s20 + $0x48] ss:$8 sps:$4 sm:$0xff]  }
 0x204   : > { %v9177_v15 = vor.u32 %v9176_v18, %v9173_v10  ;;  %v9246_v10 = vrot.slane %v9244_v33, 5  ;;  %v9220_v18 = vrot.slane %v9219_v40, 4  ;;  %v28736_v26 = vld [vmem:[#allocation20_spill] sm:$0xff]  ;;  %v22992_v33 = vld [vmem:[%s23872_s20 + $0x360] ss:$8 sps:$4 sm:$0xff]  }
 0x205   : > { %20507 = vmatmul.mubr.msk.bf16.gmra.mrb[8].mxu1 %vm693_vm3, %v17726_v16  ;;  %v18527_v16 = vld [vmem:[%s23872_s20 + $0xc4] sm:$0x1]  ;;  %v9233_v62 = vor.u32 %v9232_v55, %v9229_v12  ;;  %v22994_v40 = vld [vmem:[%s23872_s20 + $0x370] ss:$8 sps:$4 sm:$0xff]   ;;  %v25493_v12 = vld [vmem:[%s23872_s20 + $0x400] ss:$8 sps:$4 sm:$0xff]  }
 0x206   : > { %20514 = vmatprep.mubr.msk.bf16.mxu1 %vm693_vm3, %v28726_v60  ;;  %v9241_v60 = vshrl.u32 %v18530_v48, 16  ;;  %v9222_v61 = vshll.u32 %v18527_v16, 16  ;;  %v9178_v37 = vrot.slane %v9177_v15, 4  ;;  %v25496_v55 = vld [vmem:[%s23872_s20 + $0x410] ss:$8 sps:$4 sm:$0xff]  }
 0x207   : > { %21025 = vmatmul.mubr.msk.bf16.gmra.mrb[20].mxu0 %vm3657_vm7, %v25362_v58  ;;  %v9234_v16 = vrot.slane %v9233_v62, 4  ;;  %v23239_v62 = vld [vmem:[%s23872_s20 + $0x2b8] ss:$8 sps:$4 sm:$0xff]  }
 0x208   : > { %21028 = vmatprep.mubr.msk.bf16.mxu0 %vm3657_vm7, %v28727_v43  ;;  %v9224_v53 = vrot.slane %v9222_v61, 5  ;;  %v22997_v61 = vld [vmem:[%s23872_s20 + $0x380] ss:$8 sps:$4 sm:$0xff]   ;;  %v4096_v43 = vld [vmem:[%s23872_s20 + $0x38] sm:$0xf] }
 0x20d   : > { %20515 = vmatmul.mubr.msk.bf16.vlgmr.msra.gmra.mrb[4].mxu1 %vm693_vm3, %v24949_v23  ;;  %v9169_v23 = vsel %vm23429_vm2, %v9164_v21, %v9168_v39  ;;  %v9243_v39 = vrot.slane %v9241_v60, 4  ;;  %v9206_v21 = vrot.slane %v9205_v52, 4  ;;  %v17748_v60 = vcombine.low %v25080_v57, %v28736_v26  ;;  %v22989_v52 = vld [vmem:[%s23872_s20 + $0x58] ss:$8 sps:$4 sm:$0xff]   ;;  %v25457_v57 = vld [vmem:[%s28526_s6 + $0x10] sm:$0xff]  }
 0x20e   : > { %20518 = vmatprep.mubr.msk.bf16.mxu1 %vm693_vm3, %v24971_v13  ;;  %20523 = vmatpush3.bf16.msra.mxu1 %v22985_v0  ;;  %v9191_v13 = vor.u32 %v9190_v4, %v9187_v9  ;;  %v9194_v0 = vshll.u32 %v18523_v41, 16  ;;  %v25402_v32 = vcombine.low %v9155_v25, %v9169_v23  ;;  %v28732_v9 = vld [vmem:[#allocation31_spill] sm:$0xff]  ;;  %v9183_v4 = vsel %vm23429_vm2, %v9178_v37, %v9182_v6  ;;  %v22991_v6 = vld [vmem:[%s23872_s20 + $0x78] ss:$8 sps:$4 sm:$0xff]  }
 0x20f   : > { %20524 = vmatprep.subr.bf16.mxu1 %v22986_v1  ;;  %21029 = vmatmul.mubr.msk.bf16.gmra.mrb[24].mxu0 %vm3657_vm7, %v28728_v8  ;;  %v9236_v41 = vshll.u32 %v18529_v34, 16  ;;  %v9247_v11 = vor.u32 %v9246_v10, %v9243_v39  ;;  %v9211_v7 = vsel %vm23429_vm2, %v9206_v21, %v9210_v45  ;;  %v25474_v37 = vld [vmem:[%s23872_s20 + $0xd8] ss:$8 sps:$4 sm:$0xff]   ;;  %v25507_v39 = vld [vmem:[%s23872_s20 + $0x108] ss:$8 sps:$4 sm:$0xff]  }
 0x210   : > { %21032 = vmatprep.mubr.msk.bf16.mxu0 %vm3657_vm7, %v28729_v2  ;;  %28731 = vst [vmem:[#allocation34_spill] sm:$0xff] %v25402_v32  ;;  %v9192_v47 = vrot.slane %v9191_v13, 4  ;;  %v9196_v51 = vrot.slane %v9194_v0, 5  ;;  %v28735_v13 = vld [vmem:[#allocation35_spill] sm:$0xff]  ;;  %v25490_v34 = vld [vmem:[%s23872_s20 + $0xf8] ss:$8 sps:$4 sm:$0xff]  }
 0x211   : > { %v9238_v25 = vrot.slane %v9236_v41, 5  ;;  %v9248_v23 = vrot.slane %v9247_v11, 4  ;;  %v25510_v10 = vld [vmem:[%s23872_s20 + $0x420] ss:$8 sps:$4 sm:$0xff]   ;;  %v25683_v26 = vld [vmem:[%s23872_s20 + $0x230] ss:$8 sps:$4 sm:$0xff]  }
 0x212   : > { %20525 = vmatpush3.bf16.msra.mxu1 %v22986_v1  ;;  %v18531_v1 = vld [vmem:[%s23872_s20 + $0xd4] sm:$0x1]  ;;  %v9197_v3 = vsel %vm23429_vm2, %v9192_v47, %v9196_v51  ;;  %v22998_v47 = vld [vmem:[%s23872_s20 + $0x390] ss:$8 sps:$4 sm:$0xff]  }
 0x213   : > { %20534 = vmatprep.subr.bf16.mxu1 %v22987_v36  ;;  %v9250_v59 = vshll.u32 %v18531_v1, 16  ;;  %v25421_v48 = vcombine.low %v9183_v4, %v9197_v3  ;;  %v9239_v0 = vsel %vm23429_vm2, %v9234_v16, %v9238_v25  ;;  %v25478_v51 = vld [vmem:[%s23872_s20 + $0x3f0] ss:$8 sps:$4 sm:$0xff]  }
 0x214   : > { %v23005_v21 = vld [vmem:[%s23872_s20 + $0x128] ss:$8 sps:$4 sm:$0xff]   ;;  %v23237_v1 = vld [vmem:[%s23872_s20 + $0x298] ss:$8 sps:$4 sm:$0xff]  }
 0x215   : > { %20519 = vmatmul.mubr.msk.bf16.gmra.mrb[8].mxu1 %vm693_vm3, %v17737_v63  ;;  %28733 = vst [vmem:[#allocation41_spill] sm:$0xff] %v25421_v48  ;;  %v9252_v15 = vrot.slane %v9250_v59, 5  ;;  %v25464_v63 = vld [vmem:[%s28526_s6 + $0x88] sm:$0xff]   ;;  %v23008_v41 = vld [vmem:[%s23872_s20 + $0x158] ss:$8 sps:$4 sm:$0xff]  }
 0x216   : > { %20526 = vmatprep.mubr.msk.bf16.mxu1 %vm693_vm3, %v24945_v49  ;;  %v9225_v49 = vsel %vm23429_vm2, %v9220_v18, %v9224_v53  ;;  %v23236_v45 = vld [vmem:[%s23872_s20 + $0x288] ss:$8 sps:$4 sm:$0xff]   ;;  %v23006_v18 = vld [vmem:[%s23872_s20 + $0x138] ss:$8 sps:$4 sm:$0xff]  }
 0x217   : > { %21033 = vmatmul.mubr.msk.bf16.gmra.mrb[28].mxu0 %vm3657_vm7, %v28732_v9  ;;  %v25426_v46 = vcombine.low %v9211_v7, %v9225_v49  ;;  %v23007_v53 = vld [vmem:[%s23872_s20 + $0x148] ss:$8 sps:$4 sm:$0xff]   ;;  %v25530_v3 = vld [vmem:[%s23872_s20 + $0x1b8] ss:$8 sps:$4 sm:$0xff]  }
 0x218   : > { %21036 = vmatprep.mubr.msk.bf16.mxu0 %vm3657_vm7, %v25402_v32  ;;  %v23238_v4 = vld [vmem:[%s23872_s20 + $0x2a8] ss:$8 sps:$4 sm:$0xff]   ;;  %v23240_v11 = vld [vmem:[%s23872_s20 + $0x318] ss:$8 sps:$4 sm:$0xff]  }
 0x219   : > { %28734 = vst [vmem:[#allocation42_spill] sm:$0xff] %v25426_v46  ;;  %v25540_v59 = vld [vmem:[%s23872_s20 + $0x1c8] ss:$8 sps:$4 sm:$0xff]   ;;  %v25543_v7 = vld [vmem:[%s23872_s20 + $0x1d8] ss:$8 sps:$4 sm:$0xff]  }
 0x21a   : > { %v23241_v49 = vld [vmem:[%s23872_s20 + $0x328] ss:$8 sps:$4 sm:$0xff]   ;;  %v23242_v25 = vld [vmem:[%s23872_s20 + $0x338] ss:$8 sps:$4 sm:$0xff]  }
 0x21b   : > { %v25555_v16 = vld [vmem:[%s23872_s20 + $0x1e8] ss:$8 sps:$4 sm:$0xff]  }
 0x21c   : > { %v4092_v32 = vld [vmem:[%s23872_s20 + $0x28] sm:$0xf]  ;;  %v4094_v8 = vld [vmem:[%s23872_s20 + $0x30] sm:$0xf] }
 0x21d   : > { %20527 = vmatmul.mubr.msk.bf16.vlgmr.msra.gmra.mrb[4].mxu1 %vm693_vm3, %v24992_v20  ;;  %v9253_v20 = vsel %vm23429_vm2, %v9248_v23, %v9252_v15  ;;  %v23018_v23 = vld [vmem:[%s23872_s20 + $0x3a8] ss:$8 sps:$4 sm:$0xff]   ;;  %v28738_v15 = vld [vmem:[#allocation26_spill] sm:$0xff] }
 0x21e   : > { %20530 = vmatprep.mubr.msk.bf16.mxu1 %vm693_vm3, %v28735_v13  ;;  %20535 = vmatpush3.bf16.msra.mxu1 %v22987_v36  ;;  %v25443_v36 = vcombine.low %v9239_v0, %v9253_v20  ;;  %v23013_v13 = vld [vmem:[%s23872_s20 + $0x10] ss:$8 sps:$4 sm:$0xff]   ;;  %v23016_v0 = vld [vmem:[%s23872_s20 + $0x20] ss:$8 sps:$4 sm:$0xff]  }
 0x21f   : > { %21037 = vmatmul.mubr.msk.bf16.gmra.mrb[32].mxu0 %vm3657_vm7, %v25421_v48  ;;  %20568 = vmatprep.subr.bf16.mxu1 %v23010_v14  ;;  %v23020_v20 = vld [vmem:[%s23872_s20 + $0x3b8] ss:$8 sps:$4 sm:$0xff]  }
 0x220   : > { %21040 = vmatprep.mubr.msk.bf16.mxu0 %vm3657_vm7, %v25426_v46  ;;  %28737 = vst [vmem:[#allocation35_spill] sm:$0xff] %v25443_v36  ;;  %v4090_v48 = vld [vmem:[%s23872_s20 + $0x20] sm:$0xf] }
 0x225   : > { %20531 = vmatmul.mubr.msk.bf16.gmra.mrb[8].mxu1 %vm693_vm3, %v17748_v60  ;;  %v23023_v60 = vld [vmem:[%s23872_s20 + $0x3c8] ss:$8 sps:$4 sm:$0xff]  }
 0x226   : > { %20536 = vmatprep.mubr.msk.bf16.mxu1 %vm3657_vm7, %v22988_v17  ;;  %v25570_v17 = vld [vmem:[%s28526_s6 + $0x18] sm:$0xff]  }
 0x227   : > { %21041 = vmatmul.mubr.msk.bf16.gmra.mrb[36].mxu0 %vm3657_vm7, %v25443_v36 }
 0x228   : > { %21046 = vmatprep.mubr.msk.bf16.mxu0 %vm3657_vm7, %v22992_v33  ;;  %v25577_v33 = vld [vmem:[%s28526_s6 + $0x90] sm:$0xff]  }
 0x22d   : > { %20537 = vmatmul.mubr.msk.bf16.vlgmr.msra.gmra.mrb[12].mxu1 %vm3657_vm7, %v22989_v52  ;;  %v23017_v52 = vld [vmem:[%s23872_s20 + $0x30] ss:$8 sps:$4 sm:$0xff]  }
 0x22e   : > { %20540 = vmatprep.mubr.msk.bf16.mxu1 %vm3657_vm7, %v22990_v24  ;;  %20569 = vmatpush3.bf16.msra.mxu1 %v23010_v14  ;;  %v23012_v14 = vld [vmem:[%s23872_s20] ss:$8 sps:$4 sm:$0xff]   ;;  %v25588_v24 = vld [vmem:[%s23872_s20 + $0x90] ss:$8 sps:$4 sm:$0xff]  }
 0x22f   : > { %21047 = vmatmul.mubr.msk.bf16.vlgmr.msra.gmra.mrb[8].mxu0 %vm3657_vm7, %v22994_v40  ;;  %20602 = vmatprep.subr.bf16.mxu1 %v25457_v57  ;;  %v23024_v40 = vld [vmem:[%s23872_s20 + $0x3d8] ss:$8 sps:$4 sm:$0xff]  }
 0x230   : > { %21079 = vmatpush3.bf16.msra.mxu0 %v25292_v28  ;;  %21050 = vmatprep.mubr.msk.bf16.mxu0 %vm3657_vm7, %v22997_v61  ;;  %v25487_v28 = vld [vmem:[%s23872_s20 + $0xe8] ss:$8 sps:$4 sm:$0xff]  }
 0x231   : > { %21112 = vmatprep.subr.bf16.mxu0 %v25464_v63  ;;  %v25601_v61 = vld [vmem:[%s23872_s20 + $0xa0] ss:$8 sps:$4 sm:$0xff]  }
 0x235   : > { %20541 = vmatmul.mubr.msk.bf16.gmra.mrb[16].mxu1 %vm3657_vm7, %v22991_v6  ;;  %v25607_v6 = vld [vmem:[%s23872_s20 + $0x448] ss:$8 sps:$4 sm:$0xff]  }
 0x236   : > { %20544 = vmatprep.mubr.msk.bf16.mxu1 %vm3657_vm7, %v25474_v37 }
 0x237   : > { %21051 = vmatmul.mubr.msk.bf16.gmra.mrb[12].mxu0 %vm3657_vm7, %v22998_v47  ;;  %v25610_v47 = vld [vmem:[%s23872_s20 + $0x458] ss:$8 sps:$4 sm:$0xff]  }
 0x238   : > { %21054 = vmatprep.mubr.msk.bf16.mxu0 %vm3657_vm7, %v25478_v51 }
 0x23d   : > { %20545 = vmatmul.mubr.msk.bf16.gmra.mrb[20].mxu1 %vm3657_vm7, %v25487_v28 }
 0x23e   : > { %20548 = vmatprep.mubr.msk.bf16.mxu1 %vm3657_vm7, %v25490_v34 }
 0x23f   : > { %21055 = vmatmul.mubr.msk.bf16.gmra.mrb[16].mxu0 %vm3657_vm7, %v25493_v12 }
 0x240   : > { %21058 = vmatprep.mubr.msk.bf16.mxu0 %vm3657_vm7, %v25496_v55 }
 0x245   : > { %20549 = vmatmul.mubr.msk.bf16.gmra.mrb[24].mxu1 %vm3657_vm7, %v25507_v39 }
 0x246   : > { %20552 = vmatprep.mubr.msk.bf16.mxu1 %vm3657_vm7, %v23236_v45  ;;  %v25624_v45 = vld [vmem:[%s23872_s20 + $0x468] ss:$8 sps:$4 sm:$0xff]  }
 0x247   : > { %21059 = vmatmul.mubr.msk.bf16.gmra.mrb[20].mxu0 %vm3657_vm7, %v25510_v10 }
 0x248   : > { %21062 = vmatprep.mubr.msk.bf16.mxu0 %vm3657_vm7, %v23005_v21  ;;  %v25621_v21 = vld [vmem:[%s23872_s20 + $0xc0] ss:$8 sps:$4 sm:$0xff]  }
 0x24d   : > { %20553 = vmatmul.mubr.msk.bf16.gmra.mrb[28].mxu1 %vm3657_vm7, %v23237_v1  ;;  %v23032_v1 = vld [vmem:[%s23872_s20 + $0x180] ss:$8 sps:$4 sm:$0xff]  }
 0x24e   : > { %20556 = vmatprep.mubr.msk.bf16.mxu1 %vm3657_vm7, %v23238_v4  ;;  %v23033_v4 = vld [vmem:[%s23872_s20 + $0x190] ss:$8 sps:$4 sm:$0xff]  }
 0x24f   : > { %21063 = vmatmul.mubr.msk.bf16.gmra.mrb[24].mxu0 %vm3657_vm7, %v23006_v18  ;;  %v23031_v18 = vld [vmem:[%s23872_s20 + $0x170] ss:$8 sps:$4 sm:$0xff]  }
 0x250   : > { %21066 = vmatprep.mubr.msk.bf16.mxu0 %vm3657_vm7, %v23007_v53  ;;  %v23243_v53 = vld [vmem:[%s23872_s20 + $0x240] ss:$8 sps:$4 sm:$0xff]  }
 0x255   : > { %20557 = vmatmul.mubr.msk.bf16.gmra.mrb[32].mxu1 %vm3657_vm7, %v23239_v62  ;;  %v23245_v62 = vld [vmem:[%s23872_s20 + $0x260] ss:$8 sps:$4 sm:$0xff]  }
 0x256   : > { %20560 = vmatprep.mubr.msk.bf16.mxu1 %vm3657_vm7, %v23240_v11  ;;  %v23034_v11 = vld [vmem:[%s23872_s20 + $0x1a0] ss:$8 sps:$4 sm:$0xff]  }
 0x257   : > { %21067 = vmatmul.mubr.msk.bf16.gmra.mrb[28].mxu0 %vm3657_vm7, %v23008_v41  ;;  %v23244_v41 = vld [vmem:[%s23872_s20 + $0x250] ss:$8 sps:$4 sm:$0xff]  }
 0x258   : > { %21070 = vmatprep.mubr.msk.bf16.mxu0 %vm3657_vm7, %v25530_v3 }
 0x25d   : > { %20561 = vmatmul.mubr.msk.bf16.gmra.mrb[36].mxu1 %vm3657_vm7, %v23241_v49  ;;  %v25644_v49 = vld [vmem:[%s23872_s20 + $0x200] ss:$8 sps:$4 sm:$0xff]  }
 0x25e   : > { %20564 = vmatprep.mubr.msk.bf16.mxu1 %vm3657_vm7, %v23242_v25  ;;  %v23246_v25 = vld [vmem:[%s23872_s20 + $0x270] ss:$8 sps:$4 sm:$0xff]  }
 0x25f   : > { %21071 = vmatmul.mubr.msk.bf16.gmra.mrb[32].mxu0 %vm3657_vm7, %v25540_v59 }
 0x260   : > { %21074 = vmatprep.mubr.msk.bf16.mxu0 %vm3657_vm7, %v25543_v7 }
 0x265   : > { %20565 = vmatmul.mubr.msk.bf16.gmra.mrb[40].mxu1 %vm3657_vm7, %v28738_v15  ;;  %v4084_v15 = vld [vmem:[%s23872_s20 + $0x8] sm:$0xf] }
 0x266   : > { %20570 = vmatprep.mubr.msk.bf16.mxu1 %vm3657_vm7, %v23012_v14  ;;  %v25649_v14 = vld [vmem:[%s23872_s20 + $0x2d0] ss:$8 sps:$4 sm:$0xff]  }
 0x267   : > { %21075 = vmatmul.mubr.msk.bf16.gmra.mrb[36].mxu0 %vm3657_vm7, %v25555_v16 }
 0x268   : > { %21080 = vmatprep.mubr.msk.bf16.mxu0 %vm3657_vm7, %v23018_v23  ;;  %v4082_v23 = vld [vmem:[%s23872_s20] sm:$0xf] }
 0x26d   : > { %20571 = vmatmul.mubr.msk.bf16.vlgmr.msra.gmra.mrb[12].mxu1 %vm3657_vm7, %v23013_v13  ;;  %v25659_v13 = vld [vmem:[%s23872_s20 + $0x210] ss:$8 sps:$4 sm:$0xff]  }
 0x26e   : > { %20574 = vmatprep.mubr.msk.bf16.mxu1 %vm3657_vm7, %v23016_v0  ;;  %20603 = vmatpush3.bf16.msra.mxu1 %v25457_v57  ;;  %v25592_v57 = vld [vmem:[%s23872_s20 + $0x438] ss:$8 sps:$4 sm:$0xff]  }
 0x26f   : > { %21081 = vmatmul.mubr.msk.bf16.vlgmr.msra.gmra.mrb[8].mxu0 %vm3657_vm7, %v23020_v20  ;;  %20636 = vmatprep.subr.bf16.mxu1 %v25570_v17  ;;  %v25662_v0 = vld [vmem:[%s23872_s20 + $0x220] ss:$8 sps:$4 sm:$0xff]   ;;  %v4099_v20 = vshrl.u32 %v4082_v23, 16 }
 0x270   : > { %21113 = vmatpush3.bf16.msra.mxu0 %v25464_v63  ;;  %21084 = vmatprep.mubr.msk.bf16.mxu0 %vm3657_vm7, %v23023_v60  ;;  %v25604_v63 = vld [vmem:[%s23872_s20 + $0xb0] ss:$8 sps:$4 sm:$0xff]   ;;  %v4102_v60 = vshll.u32 %v4082_v23, 16 }
 0x271   : > { %21146 = vmatprep.subr.bf16.mxu0 %v25577_v33  ;;  %v4086_v23 = vld [vmem:[%s23872_s20 + $0x10] sm:$0xf] }
 0x272   : > { %v4127_v46 = vshrl.u32 %v4086_v23, 16 }
 0x275   : > { %20575 = vmatmul.mubr.msk.bf16.gmra.mrb[16].mxu1 %vm3657_vm7, %v23017_v52  ;;  %v25665_v52 = vld [vmem:[%s23872_s20 + $0x2e0] ss:$8 sps:$4 sm:$0xff]  }
 0x276   : > { %20578 = vmatprep.mubr.msk.bf16.mxu1 %vm3657_vm7, %v25588_v24 }
 0x277   : > { %21085 = vmatmul.mubr.msk.bf16.gmra.mrb[12].mxu0 %vm3657_vm7, %v23024_v40  ;;  %v4113_v40 = vshrl.u32 %v4084_v15, 16 }
 0x278   : > { %21088 = vmatprep.mubr.msk.bf16.mxu0 %vm3657_vm7, %v25592_v57 }
 0x27d   : > { %20579 = vmatmul.mubr.msk.bf16.gmra.mrb[20].mxu1 %vm3657_vm7, %v25601_v61 }
 0x27e   : > { %20582 = vmatprep.mubr.msk.bf16.mxu1 %vm3657_vm7, %v25604_v63 }
 0x27f   : > { %21089 = vmatmul.mubr.msk.bf16.gmra.mrb[16].mxu0 %vm3657_vm7, %v25607_v6 }
 0x280   : > { %21092 = vmatprep.mubr.msk.bf16.mxu0 %vm3657_vm7, %v25610_v47 }
 0x285   : > { %20583 = vmatmul.mubr.msk.bf16.gmra.mrb[24].mxu1 %vm3657_vm7, %v25621_v21 }
 0x286   : > { %20586 = vmatprep.mubr.msk.bf16.mxu1 %vm3657_vm7, %v23243_v53  ;;  %v25670_v53 = vld [vmem:[%s23872_s20 + $0x2f0] ss:$8 sps:$4 sm:$0xff]  }
 0x287   : > { %21093 = vmatmul.mubr.msk.bf16.gmra.mrb[20].mxu0 %vm3657_vm7, %v25624_v45 }
 0x288   : > { %21096 = vmatprep.mubr.msk.bf16.mxu0 %vm3657_vm7, %v23031_v18  ;;  %v4116_v18 = vshll.u32 %v4084_v15, 16  ;;  %v4088_v15 = vld [vmem:[%s23872_s20 + $0x18] sm:$0xf] }
 0x28d   : > { %20587 = vmatmul.mubr.msk.bf16.gmra.mrb[28].mxu1 %vm3657_vm7, %v23244_v41  ;;  %v4104_v41 = vrot.slane %v4102_v60, 5  ;;  %v4130_v60 = vshll.u32 %v4086_v23, 16 }
 0x28e   : > { %20590 = vmatprep.mubr.msk.bf16.mxu1 %vm3657_vm7, %v23245_v62  ;;  %v4085_v62 = vld [vmem:[%s23872_s20 + $0xc] sm:$0x1] }
 0x28f   : > { %21097 = vmatmul.mubr.msk.bf16.gmra.mrb[24].mxu0 %vm3657_vm7, %v23032_v1  ;;  %v4083_v1 = vld [vmem:[%s23872_s20 + $0x4] sm:$0x1]  ;;  %v4122_v36 = vshll.u32 %v4085_v62, 16  ;;  %v4172_v62 = vshll.u32 %v4092_v32, 16  ;;  %v4132_v22 = vrot.slane %v4130_v60, 5 }
 0x290   : > { %21100 = vmatprep.mubr.msk.bf16.mxu0 %vm3657_vm7, %v23033_v4  ;;  %v4101_v4 = vrot.slane %v4099_v20, 4  ;;  %v4108_v35 = vshll.u32 %v4083_v1, 16  ;;  %v4155_v1 = vshrl.u32 %v4090_v48, 16 }
 0x291   : > { %v4124_v23 = vrot.slane %v4122_v36, 5  ;;  %v4174_v5 = vrot.slane %v4172_v62, 5  ;;  %v4150_v36 = vshll.u32 %v4089_v54, 16  ;;  %v4183_v54 = vshrl.u32 %v4094_v8, 16 }
 0x292   : > { %v4105_v50 = vor.u32 %v4104_v41, %v4101_v4  ;;  %v4158_v4 = vshll.u32 %v4090_v48, 16  ;;  %v4169_v41 = vshrl.u32 %v4092_v32, 16  ;;  %v4157_v48 = vrot.slane %v4155_v1, 4  ;;  %v25718_v1 = vld [vmem:[%s28526_s6 + $0x98] sm:$0xff]  }
 0x294   : > { %v4160_v58 = vrot.slane %v4158_v4, 5  ;;  %v4171_v32 = vrot.slane %v4169_v41, 4  ;;  %v4197_v4 = vshrl.u32 %v4096_v43, 16 }
 0x295   : > { %20591 = vmatmul.mubr.msk.bf16.gmra.mrb[32].mxu1 %vm3657_vm7, %v23246_v25  ;;  %v4118_v25 = vrot.slane %v4116_v18, 5  ;;  %v4144_v18 = vshll.u32 %v4088_v15, 16 }
 0x296   : > { %20594 = vmatprep.mubr.msk.bf16.mxu1 %vm3657_vm7, %v25649_v14 }
 0x297   : > { %21101 = vmatmul.mubr.msk.bf16.gmra.mrb[28].mxu0 %vm3657_vm7, %v23034_v11  ;;  %v4115_v11 = vrot.slane %v4113_v40, 4  ;;  %v4141_v40 = vshrl.u32 %v4088_v15, 16  ;;  %v4129_v15 = vrot.slane %v4127_v46, 4  ;;  %v4146_v2 = vrot.slane %v4144_v18, 5  ;;  %v4091_v46 = vld [vmem:[%s23872_s20 + $0x24] sm:$0x1] }
 0x298   : > { %21104 = vmatprep.mubr.msk.bf16.mxu0 %vm3657_vm7, %v25644_v49 }
 0x299   : > { %v4119_v20 = vor.u32 %v4118_v25, %v4115_v11  ;;  %v4106_v11 = vrot.slane %v4105_v50, 4  ;;  %v4110_v25 = vrot.slane %v4108_v35, 5  ;;  %v4143_v9 = vrot.slane %v4141_v40, 4  ;;  %v25705_v35 = vld [vmem:[%s28526_s6 + $0x20] sm:$0xff]  }
 0x29a   : > { %v4136_v50 = vshll.u32 %v4087_v38, 16  ;;  %v4133_v40 = vor.u32 %v4132_v22, %v4129_v15  ;;  %v4186_v38 = vshll.u32 %v4094_v8, 16  ;;  %v4161_v22 = vor.u32 %v4160_v58, %v4157_v48  ;;  %v4095_v58 = vld [vmem:[%s23872_s20 + $0x34] sm:$0x1]  ;;  %v4097_v48 = vld [vmem:[%s23872_s20 + $0x3c] sm:$0x1] }
 0x29b   : > { %v4147_v18 = vor.u32 %v4146_v2, %v4143_v9  ;;  %v4164_v2 = vshll.u32 %v4091_v46, 16  ;;  %v4175_v9 = vor.u32 %v4174_v5, %v4171_v32  ;;  %v4192_v32 = vshll.u32 %v4095_v58, 16  ;;  %v18645_v58 = vld [vmem:[%s23872_s20 + $0x138] sm:$0xf] }
 0x29c   : > { %v4138_v62 = vrot.slane %v4136_v50, 5  ;;  %v4134_v8 = vrot.slane %v4133_v40, 4  ;;  %v4188_v5 = vrot.slane %v4186_v38, 5 }
 0x29d   : > { %20595 = vmatmul.mubr.msk.bf16.gmra.mrb[36].mxu1 %vm3657_vm7, %v25665_v52  ;;  %v4166_v15 = vrot.slane %v4164_v2, 5 }
 0x29e   : > { %20598 = vmatprep.mubr.msk.bf16.mxu1 %vm3657_vm7, %v25670_v53 }
 0x29f   : > { %21105 = vmatmul.mubr.msk.bf16.gmra.mrb[32].mxu0 %vm3657_vm7, %v25659_v13 }
 0x2a0   : > { %21108 = vmatprep.mubr.msk.bf16.mxu0 %vm3657_vm7, %v25662_v0 }
 0x2a5   : > { %20599 = vmatmul.mubr.msk.bf16.gmra.mrb[40].mxu1 %vm3657_vm7, %v25688_v56 }
 0x2a6   : > { %20604 = vmatprep.mubr.msk.bf16.mxu1 %vm3657_vm7, %v25588_v24  ;;  %v4120_v24 = vrot.slane %v4119_v20, 4  ;;  %v4111_v20 = vsel %vm23429_vm2, %v4106_v11, %v4110_v25  ;;  %v4199_v11 = vrot.slane %v4197_v4, 4 }
 0x2a7   : > { %21109 = vmatmul.mubr.msk.bf16.gmra.mrb[36].mxu0 %vm3657_vm7, %v25683_v26 }
 0x2a8   : > { %21114 = vmatprep.mubr.msk.bf16.mxu0 %vm3657_vm7, %v25478_v51  ;;  %v4093_v51 = vld [vmem:[%s23872_s20 + $0x2c] sm:$0x1]  ;;  %v4125_v60 = vsel %vm23429_vm2, %v4120_v24, %v4124_v23  ;;  %v4162_v23 = vrot.slane %v4161_v22, 4  ;;  %v18643_v22 = vld [vmem:[%s23872_s20 + $0x130] sm:$0xf] }
 0x2a9   : > { %v4178_v41 = vshll.u32 %v4093_v51, 16  ;;  %v4206_v51 = vshll.u32 %v4097_v48, 16  ;;  %v10096_v48 = vshll.u32 %v18645_v58, 16 }
 0x2ab   : > { %v4180_v24 = vrot.slane %v4178_v41, 5 }
 0x2ad   : > { %20605 = vmatmul.mubr.msk.bf16.vlgmr.msra.gmra.mrb[12].mxu1 %vm3657_vm7, %v25601_v61  ;;  %v4200_v61 = vshll.u32 %v4096_v43, 16  ;;  %v25729_v43 = vcombine.low %v4111_v20, %v4125_v60  ;;  %v28739_v60 = vld [vmem:[#allocation7_spill] sm:$0xff] }
 0x2ae   : > { %20608 = vmatprep.mubr.msk.bf16.mxu1 %vm3657_vm7, %v25604_v63  ;;  %20637 = vmatpush3.bf16.msra.mxu1 %v25570_v17  ;;  %v4148_v17 = vrot.slane %v4147_v18, 4  ;;  %v4152_v63 = vrot.slane %v4150_v36, 5  ;;  %v4194_v18 = vrot.slane %v4192_v32, 5  ;;  %v18651_v32 = vld [vmem:[%s23872_s20 + $0x150] sm:$0xf] }
 0x2af   : > { %21115 = vmatmul.mubr.msk.bf16.vlgmr.msra.gmra.mrb[8].mxu0 %vm3657_vm7, %v25493_v12  ;;  %20670 = vmatprep.subr.bf16.mxu1 %v25705_v35  ;;  %v4185_v12 = vrot.slane %v4183_v54, 4  ;;  %v4202_v25 = vrot.slane %v4200_v61, 5  ;;  %v4208_v61 = vrot.slane %v4206_v51, 5 }
 0x2b0   : > { %21147 = vmatpush3.bf16.msra.mxu0 %v25577_v33  ;;  %21118 = vmatprep.mubr.msk.bf16.mxu0 %vm3657_vm7, %v25496_v55  ;;  %v4176_v33 = vrot.slane %v4175_v9, 4  ;;  %v4139_v55 = vsel %vm23429_vm2, %v4134_v8, %v4138_v62  ;;  %v4153_v50 = vsel %vm23429_vm2, %v4148_v17, %v4152_v63  ;;  %v28740_v8 = vld [vmem:[#allocation8_spill] sm:$0xff]  ;;  %v10079_v17 = vshrl.u32 %v18643_v22, 16 }
 0x2b1   : > { %21180 = vmatprep.subr.bf16.mxu0 %v25718_v1  ;;  %v4189_v36 = vor.u32 %v4188_v5, %v4185_v12  ;;  %v4203_v46 = vor.u32 %v4202_v25, %v4199_v11  ;;  %v25750_v40 = vcombine.low %v4139_v55, %v4153_v50  ;;  %v10082_v63 = vshll.u32 %v18643_v22, 16  ;;  %v28741_v12 = vld [vmem:[#allocation9_spill] sm:$0xff]  ;;  %v18647_v5 = vld [vmem:[%s23872_s20 + $0x140] sm:$0xf]  ;;  %v18642_v25 = vld [vmem:[%s23872_s20 + $0x12c] sm:$0x1] }
 0x2b2   : > { %v4181_v20 = vsel %vm23429_vm2, %v4176_v33, %v4180_v24  ;;  %v10093_v24 = vshrl.u32 %v18645_v58, 16  ;;  %v18649_v55 = vld [vmem:[%s23872_s20 + $0x148] sm:$0xf]  ;;  %v10081_v50 = vrot.slane %v10079_v17, 4  ;;  %v10110_v51 = vshll.u32 %v18647_v5, 16 }
 0x2b3   : > { %v4190_v38 = vrot.slane %v4189_v36, 4  ;;  %v4204_v4 = vrot.slane %v4203_v46, 4  ;;  %v10084_v36 = vrot.slane %v10082_v63, 5  ;;  %v10107_v46 = vshrl.u32 %v18647_v5, 16  ;;  %v18653_v5 = vld [vmem:[%s23872_s20 + $0x158] sm:$0xf] }
 0x2b4   : > { %v10138_v22 = vshll.u32 %v18651_v32, 16  ;;  %v10112_v58 = vrot.slane %v10110_v51, 5 }
 0x2b5   : > { %20609 = vmatmul.mubr.msk.bf16.gmra.mrb[16].mxu1 %vm3657_vm7, %v25621_v21  ;;  %v4167_v21 = vsel %vm23429_vm2, %v4162_v23, %v4166_v15  ;;  %v4195_v41 = vsel %vm23429_vm2, %v4190_v38, %v4194_v18  ;;  %v4209_v62 = vsel %vm23429_vm2, %v4204_v4, %v4208_v61  ;;  %v18644_v23 = vld [vmem:[%s23872_s20 + $0x134] sm:$0x1]  ;;  %v18646_v18 = vld [vmem:[%s23872_s20 + $0x13c] sm:$0x1]  ;;  %v18648_v38 = vld [vmem:[%s23872_s20 + $0x144] sm:$0x1]  ;;  %v10085_v17 = vor.u32 %v10084_v36, %v10081_v50 }
 0x2b6   : > { %20612 = vmatprep.mubr.msk.bf16.mxu1 %vm3657_vm7, %v25729_v43  ;;  %v25752_v54 = vcombine.low %v4167_v21, %v4181_v20  ;;  %v25770_v11 = vcombine.low %v4195_v41, %v4209_v62  ;;  %v10074_v21 = vshll.u32 %v18642_v25, 16  ;;  %v10088_v20 = vshll.u32 %v18644_v23, 16  ;;  %v28743_v41 = vld [vmem:[#allocation10_spill] sm:$0xff] }
 0x2b7   : > { %21119 = vmatmul.mubr.msk.bf16.gmra.mrb[12].mxu0 %vm3657_vm7, %v25510_v10  ;;  %v18641_v10 = vld [vmem:[%s23872_s20 + $0x128] sm:$0xf]  ;;  %v10121_v4 = vshrl.u32 %v18649_v55, 16  ;;  %v10124_v61 = vshll.u32 %v18649_v55, 16  ;;  %v10109_v63 = vrot.slane %v10107_v46, 4  ;;  %v10116_v30 = vshll.u32 %v18648_v38, 16 }
 0x2b8   : > { %21122 = vmatprep.mubr.msk.bf16.mxu0 %vm3657_vm7, %v28739_v60  ;;  %v10065_v2 = vshrl.u32 %v18641_v10, 16  ;;  %v10068_v9 = vshll.u32 %v18641_v10, 16  ;;  %28742 = vst [vmem:[#allocation26_spill] sm:$0xff] %v25770_v11  ;;  %v10135_v10 = vshrl.u32 %v18651_v32, 16  ;;  %v18655_v25 = vld [vmem:[%s23872_s20 + $0x160] sm:$0xf] }
 0x2b9   : > { %v10076_v23 = vrot.slane %v10074_v21, 5  ;;  %v10090_v55 = vrot.slane %v10088_v20, 5  ;;  %v10102_v32 = vshll.u32 %v18646_v18, 16  ;;  %v10163_v50 = vshrl.u32 %v18655_v25, 16 }
 0x2ba   : > { %v10067_v15 = vrot.slane %v10065_v2, 4  ;;  %v10070_v33 = vrot.slane %v10068_v9, 5  ;;  %v10095_v2 = vrot.slane %v10093_v24, 4  ;;  %v10098_v9 = vrot.slane %v10096_v48, 5 }
 0x2bb   : > { %v10123_v24 = vrot.slane %v10121_v4, 4  ;;  %v10126_v48 = vrot.slane %v10124_v61, 5  ;;  %v10166_v36 = vshll.u32 %v18655_v25, 16  ;;  %v10086_v51 = vrot.slane %v10085_v17, 4  ;;  %v17925_v25 = vld [vmem:[%s23872_s20 + $0x50] sm:$0xf] }
 0x2bc   : > { %v10071_v62 = vor.u32 %v10070_v33, %v10067_v15  ;;  %v10149_v15 = vshrl.u32 %v18653_v5, 16  ;;  %v10152_v33 = vshll.u32 %v18653_v5, 16  ;;  %v10144_v20 = vshll.u32 %v18652_v42, 16 }
 0x2bd   : > { %20613 = vmatmul.mubr.msk.bf16.gmra.mrb[20].mxu1 %vm3657_vm7, %v25750_v40  ;;  %v10104_v18 = vrot.slane %v10102_v32, 5  ;;  %v10118_v38 = vrot.slane %v10116_v30, 5  ;;  %v10127_v4 = vor.u32 %v10126_v48, %v10123_v24  ;;  %v10091_v30 = vsel %vm23429_vm2, %v10086_v51, %v10090_v55  ;;  %v17924_v51 = vld [vmem:[%s23872_s20 + $0x4c] sm:$0x1] }
 0x2be   : > { %20616 = vmatprep.mubr.msk.bf16.mxu1 %vm3657_vm7, %v25752_v54  ;;  %v10072_v46 = vrot.slane %v10071_v62, 4  ;;  %v10151_v62 = vrot.slane %v10149_v15, 4  ;;  %v10154_v17 = vrot.slane %v10152_v33, 5  ;;  %v4619_v55 = vshrl.u32 %v17925_v25, 16  ;;  %v17927_v33 = vld [vmem:[%s23872_s20 + $0x58] sm:$0xf] }
 0x2bf   : > { %21123 = vmatmul.mubr.msk.bf16.gmra.mrb[16].mxu0 %vm3657_vm7, %v28740_v8  ;;  %v4622_v15 = vshll.u32 %v17925_v25, 16 }
 0x2c0   : > { %21126 = vmatprep.mubr.msk.bf16.mxu0 %vm3657_vm7, %v28741_v12  ;;  %v10140_v12 = vrot.slane %v10138_v22, 5  ;;  %v18656_v22 = vld [vmem:[%s23872_s20 + $0x164] sm:$0x1]  ;;  %v10077_v42 = vsel %vm23429_vm2, %v10072_v46, %v10076_v23  ;;  %v10155_v24 = vor.u32 %v10154_v17, %v10151_v62  ;;  %v4636_v62 = vshll.u32 %v17927_v33, 16 }
 0x2c1   : > { %v10172_v5 = vshll.u32 %v18656_v22, 16  ;;  %v4633_v22 = vshrl.u32 %v17927_v33, 16  ;;  %v4621_v17 = vrot.slane %v4619_v55, 4 }
 0x2c3   : > { %v10174_v46 = vrot.slane %v10172_v5, 5  ;;  %v17930_v5 = vld [vmem:[%s23872_s20 + $0x64] sm:$0x1]  ;;  %v4635_v25 = vrot.slane %v4633_v22, 4 }
 0x2c5   : > { %20617 = vmatmul.mubr.msk.bf16.gmra.mrb[24].mxu1 %vm3657_vm7, %v25770_v11  ;;  %v10137_v11 = vrot.slane %v10135_v10, 4  ;;  %v18654_v10 = vld [vmem:[%s23872_s20 + $0x15c] sm:$0x1] }
 0x2c6   : > { %20620 = vmatprep.mubr.msk.bf16.mxu1 %vm3657_vm7, %v25649_v14  ;;  %v18650_v14 = vld [vmem:[%s23872_s20 + $0x14c] sm:$0x1] }
 0x2c7   : > { %21127 = vmatmul.mubr.msk.bf16.gmra.mrb[20].mxu0 %vm3657_vm7, %v28743_v41  ;;  %v10099_v41 = vor.u32 %v10098_v9, %v10095_v2  ;;  %v10130_v21 = vshll.u32 %v18650_v14, 16  ;;  %v10141_v61 = vor.u32 %v10140_v12, %v10137_v11  ;;  %v10165_v2 = vrot.slane %v10163_v50, 4 }
 0x2c8   : > { %21130 = vmatprep.mubr.msk.bf16.mxu0 %vm3657_vm7, %v25530_v3  ;;  %v10113_v3 = vor.u32 %v10112_v58, %v10109_v63  ;;  %v10168_v9 = vrot.slane %v10166_v36, 5  ;;  %v17923_v63 = vld [vmem:[%s23872_s20 + $0x48] sm:$0xf]  ;;  %v10146_v11 = vrot.slane %v10144_v20, 5  ;;  %v10158_v58 = vshll.u32 %v18654_v10, 16 }
 0x2c9   : > { %v10142_v32 = vrot.slane %v10141_v61, 4  ;;  %v4605_v14 = vshrl.u32 %v17923_v63, 16  ;;  %v4608_v23 = vshll.u32 %v17923_v63, 16  ;;  %v17928_v63 = vld [vmem:[%s23872_s20 + $0x5c] sm:$0x1] }
 0x2ca   : > { %v10114_v12 = vrot.slane %v10113_v3, 4  ;;  %v10169_v48 = vor.u32 %v10168_v9, %v10165_v2  ;;  %v10160_v36 = vrot.slane %v10158_v58, 5  ;;  %v17926_v3 = vld [vmem:[%s23872_s20 + $0x54] sm:$0x1]  ;;  %v4624_v2 = vrot.slane %v4622_v15, 5 }
 0x2cb   : > { %v10147_v20 = vsel %vm23429_vm2, %v10142_v32, %v10146_v11  ;;  %v4610_v61 = vrot.slane %v4608_v23, 5  ;;  %v4628_v9 = vshll.u32 %v17926_v3, 16  ;;  %v17931_v11 = vld [vmem:[%s23872_s20 + $0x68] sm:$0xf]  ;;  %v17933_v3 = vld [vmem:[%s23872_s20 + $0x70] sm:$0xf] }
 0x2cc   : > { %v10119_v50 = vsel %vm23429_vm2, %v10114_v12, %v10118_v38  ;;  %v10156_v38 = vrot.slane %v10155_v24, 4  ;;  %v10170_v10 = vrot.slane %v10169_v48, 4  ;;  %v4642_v24 = vshll.u32 %v17928_v63, 16  ;;  %v18250_v48 = vld [vmem:[%s23872_s20 + $0x3a8] sm:$0xf] }
 0x2cd   : > { %20621 = vmatmul.mubr.msk.bf16.gmra.mrb[28].mxu1 %vm3657_vm7, %v25665_v52  ;;  %v10100_v52 = vrot.slane %v10099_v41, 4  ;;  %v25806_v41 = vcombine.low %v10077_v42, %v10091_v30  ;;  %v25841_v23 = vrot.slane %v4628_v9, 5  ;;  %v4661_v33 = vshrl.u32 %v17931_v11, 16 }
 0x2ce   : > { %20624 = vmatprep.mubr.msk.bf16.mxu1 %vm3657_vm7, %v25670_v53  ;;  %v10132_v53 = vrot.slane %v10130_v21, 5  ;;  %v10175_v58 = vsel %vm23429_vm2, %v10170_v10, %v10174_v46  ;;  %v4656_v46 = vshll.u32 %v17930_v5, 16  ;;  %v25861_v22 = vrot.slane %v4642_v24, 5  ;;  %v18251_v5 = vld [vmem:[%s23872_s20 + $0x3ac] sm:$0x1] }
 0x2cf   : > { %21131 = vmatmul.mubr.msk.bf16.gmra.mrb[24].mxu0 %vm3657_vm7, %v25540_v59  ;;  %v10128_v59 = vrot.slane %v10127_v4, 4  ;;  %v4607_v4 = vrot.slane %v4605_v14, 4  ;;  %v4625_v14 = vor.u32 %v4624_v2, %v4621_v17  ;;  %v4663_v2 = vrot.slane %v4661_v33, 4 }
 0x2d0   : > { %21134 = vmatprep.mubr.msk.bf16.mxu0 %vm3657_vm7, %v25543_v7  ;;  %v10105_v7 = vsel %vm23429_vm2, %v10100_v52, %v10104_v18  ;;  %v17929_v18 = vld [vmem:[%s23872_s20 + $0x60] sm:$0xf] }
 0x2d1   : > { %v10133_v21 = vsel %vm23429_vm2, %v10128_v59, %v10132_v53  ;;  %v4647_v42 = vshrl.u32 %v17929_v18, 16  ;;  %v4650_v30 = vshll.u32 %v17929_v18, 16  ;;  %v25829_v52 = vcombine.low %v10105_v7, %v10119_v50  ;;  %v18252_v50 = vld [vmem:[%s23872_s20 + $0x3b0] sm:$0xf] }
 0x2d2   : > { %v25831_v12 = vcombine.low %v10133_v21, %v10147_v20  ;;  %v4611_v53 = vor.u32 %v4610_v61, %v4607_v4  ;;  %v4638_v59 = vrot.slane %v4636_v62, 5  ;;  %v4664_v7 = vshll.u32 %v17931_v11, 16  ;;  %v17934_v4 = vld [vmem:[%s23872_s20 + $0x74] sm:$0x1]  ;;  %v17935_v61 = vld [vmem:[%s23872_s20 + $0x78] sm:$0xf] }
 0x2d3   : > { %v4649_v55 = vrot.slane %v4647_v42, 4  ;;  %v4652_v15 = vrot.slane %v4650_v30, 5  ;;  %v6983_v18 = vshrl.u32 %v18250_v48, 16  ;;  %v25859_v10 = vrot.slane %v4625_v14, 4 }
 0x2d4   : > { %28744 = vst [vmem:[#allocation7_spill] sm:$0xff] %v25831_v12  ;;  %v4639_v20 = vor.u32 %v4638_v59, %v4635_v25  ;;  %v6997_v62 = vshrl.u32 %v18252_v50, 16  ;;  %v4666_v9 = vrot.slane %v4664_v7, 5  ;;  %v4675_v42 = vshrl.u32 %v17933_v3, 16 }
 0x2d5   : > { %20625 = vmatmul.mubr.msk.bf16.gmra.mrb[32].mxu1 %vm3657_vm7, %v25688_v56  ;;  %v4614_v56 = vshll.u32 %v17924_v51, 16  ;;  %v17932_v51 = vld [vmem:[%s23872_s20 + $0x6c] sm:$0x1]  ;;  %v4653_v17 = vor.u32 %v4652_v15, %v4649_v55  ;;  %v4678_v30 = vshll.u32 %v17933_v3, 16  ;;  %v4689_v11 = vshrl.u32 %v17935_v61, 16 }
 0x2d6   : > { %20628 = vmatprep.mubr.msk.bf16.mxu1 %vm3657_vm7, %v28715_v29  ;;  %v4670_v63 = vshll.u32 %v17932_v51, 16  ;;  %v6985_v25 = vrot.slane %v6983_v18, 4  ;;  %v4631_v24 = vsel %vm23429_vm2, %v25859_v10, %v25841_v23  ;;  %v25882_v55 = vld [vmem:[%s23872_s20 + $0x80] sm:$0xf]  ;;  %v18253_v15 = vld [vmem:[%s23872_s20 + $0x3b4] sm:$0x1]  ;;  %v4667_v51 = vor.u32 %v4666_v9, %v4663_v2 }
 0x2d7   : > { %21135 = vmatmul.mubr.msk.bf16.gmra.mrb[28].mxu0 %vm3657_vm7, %v25555_v16  ;;  %v10161_v16 = vsel %vm23429_vm2, %v10156_v38, %v10160_v36  ;;  %v25839_v32 = vrot.slane %v4614_v56, 5  ;;  %v25847_v36 = vrot.slane %v4611_v53, 4  ;;  %v6986_v38 = vshll.u32 %v18250_v48, 16  ;;  %v25879_v48 = vld [vmem:[%s23872_s20 + $0x7c] sm:$0x1] }
 0x2d8   : > { %21138 = vmatprep.mubr.msk.bf16.mxu0 %vm3657_vm7, %v25806_v41  ;;  %v25853_v21 = vcombine.low %v10161_v16, %v10175_v58  ;;  %v7000_v56 = vshll.u32 %v18252_v50, 16  ;;  %v4684_v53 = vshll.u32 %v17934_v4, 16  ;;  %v25865_v16 = vrot.slane %v4639_v20, 4  ;;  %v18254_v50 = vld [vmem:[%s23872_s20 + $0x3b8] sm:$0xf] }
 0x2d9   : > { %v25867_v58 = vrot.slane %v4656_v46, 5  ;;  %v6988_v59 = vrot.slane %v6986_v38, 5  ;;  %v4617_v14 = vsel %vm23429_vm2, %v25847_v36, %v25839_v32  ;;  %v6999_v33 = vrot.slane %v6997_v62, 4  ;;  %v18256_v36 = vld [vmem:[%s23872_s20 + $0x3c0] sm:$0xf] }
 0x2da   : > { %28745 = vst [vmem:[#allocation8_spill] sm:$0xff] %v25853_v21  ;;  %v7002_v7 = vrot.slane %v7000_v56, 5  ;;  %v25886_v46 = vrot.slane %v4653_v17, 4  ;;  %v25888_v3 = vrot.slane %v4670_v63, 5  ;;  %v4692_v32 = vshll.u32 %v17935_v61, 16 }
 0x2db   : > { %v25893_v23 = vrot.slane %v4675_v42, 4  ;;  %v25895_v20 = vrot.slane %v4678_v30, 5  ;;  %v25897_v4 = vrot.slane %v4684_v53, 5  ;;  %v25899_v18 = vrot.slane %v4689_v11, 4  ;;  %v18258_v38 = vld [vmem:[%s23872_s20 + $0x3c8] sm:$0xf] }
 0x2dc   : > { %v6989_v10 = vor.u32 %v6988_v59, %v6985_v25  ;;  %v6992_v62 = vshll.u32 %v18251_v5, 16  ;;  %v7006_v56 = vshll.u32 %v18253_v15, 16  ;;  %v7011_v61 = vshrl.u32 %v18254_v50, 16  ;;  %v18260_v17 = vld [vmem:[%s23872_s20 + $0x3d0] sm:$0xf] }
 0x2dd   : > { %20629 = vmatmul.mubr.msk.bf16.gmra.mrb[36].mxu1 %vm3657_vm7, %v28718_v44  ;;  %v7003_v2 = vor.u32 %v7002_v7, %v6999_v33  ;;  %v7014_v9 = vshll.u32 %v18254_v50, 16  ;;  %v7025_v63 = vshrl.u32 %v18256_v36, 16  ;;  %v7028_v42 = vshll.u32 %v18256_v36, 16  ;;  %v18255_v36 = vld [vmem:[%s23872_s20 + $0x3bc] sm:$0x1] }
 0x2de   : > { %20632 = vmatprep.mubr.msk.bf16.mxu1 %vm3657_vm7, %v28719_v31  ;;  %v25909_v30 = vrot.slane %v4667_v51, 4  ;;  %v25911_v53 = vrot.slane %v4692_v32, 5  ;;  %v4703_v11 = vshrl.u32 %v25882_v55, 16  ;;  %v7039_v5 = vshrl.u32 %v18258_v38, 16 }
 0x2df   : > { %21139 = vmatmul.mubr.msk.bf16.gmra.mrb[32].mxu0 %vm3657_vm7, %v25829_v52  ;;  %v7042_v25 = vshll.u32 %v18258_v38, 16  ;;  %v7053_v59 = vshrl.u32 %v18260_v17, 16  ;;  %v7056_v15 = vshll.u32 %v18260_v17, 16  ;;  %v6990_v33 = vrot.slane %v6989_v10, 4  ;;  %v18257_v10 = vld [vmem:[%s23872_s20 + $0x3c4] sm:$0x1] }
 0x2e0   : > { %21142 = vmatprep.mubr.msk.bf16.mxu0 %vm3657_vm7, %v25831_v12  ;;  %v6994_v7 = vrot.slane %v6992_v62, 5  ;;  %v7008_v50 = vrot.slane %v7006_v56, 5  ;;  %v7004_v51 = vrot.slane %v7003_v2, 4  ;;  %v7027_v32 = vrot.slane %v7025_v63, 4  ;;  %v18262_v62 = vld [vmem:[%s23872_s20 + $0x3d8] sm:$0xf] }
 0x2e1   : > { %v17955_v12 = vcombine.low %v4617_v14, %v4631_v24  ;;  %v18264_v56 = vld [vmem:[%s23872_s20 + $0x3e0] sm:$0xf]  ;;  %v7044_v17 = vrot.slane %v7042_v25, 5  ;;  %v7055_v2 = vrot.slane %v7053_v59, 4  ;;  %v4681_v24 = vor.u32 %v25895_v20, %v25893_v23  ;;  %v18261_v25 = vld [vmem:[%s23872_s20 + $0x3d4] sm:$0x1] }
 0x2e2   : > { %v25933_v14 = vld [vmem:[%s28526_s6 + $0xa0] sm:$0xff]   ;;  %v4706_v63 = vshll.u32 %v25882_v55, 16  ;;  %v7009_v59 = vsel %vm23429_vm2, %v7004_v51, %v7008_v50  ;;  %v7034_v38 = vshll.u32 %v18257_v10, 16  ;;  %v7067_v23 = vshrl.u32 %v18262_v62, 16 }
 0x2e3   : > { %v7081_v20 = vshrl.u32 %v18264_v56, 16  ;;  %v7062_v50 = vshll.u32 %v18261_v25, 16  ;;  %v17938_v10 = vld [vmem:[%s23872_s20 + $0x84] sm:$0x1] }
 0x2e4   : > { %v4708_v51 = vrot.slane %v4706_v63, 5 }
 0x2e5   : > { %20633 = vmatmul.mubr.msk.bf16.gmra.mrb[40].mxu1 %vm3657_vm7, %v28722_v19  ;;  %v7030_v19 = vrot.slane %v7028_v42, 5  ;;  %v7020_v42 = vshll.u32 %v18255_v36, 16  ;;  %v7083_v25 = vrot.slane %v7081_v20, 4 }
 0x2e6   : > { %20638 = vmatprep.mubr.msk.bf16.mxu1 %vm3657_vm7, %v25474_v37  ;;  %v25919_v37 = vld [vmem:[%s28526_s6 + $0x28] sm:$0xff]  }
 0x2e7   : > { %21143 = vmatmul.mubr.msk.bf16.gmra.mrb[36].mxu0 %vm3657_vm7, %v25853_v21  ;;  %v7016_v21 = vrot.slane %v7014_v9, 5  ;;  %v7058_v9 = vrot.slane %v7056_v15, 5  ;;  %v7031_v15 = vor.u32 %v7030_v19, %v7027_v32 }
 0x2e8   : > { %21148 = vmatprep.mubr.msk.bf16.mxu0 %vm3657_vm7, %v25592_v57  ;;  %v7013_v57 = vrot.slane %v7011_v61, 4  ;;  %v7041_v61 = vrot.slane %v7039_v5, 4  ;;  %v18259_v5 = vld [vmem:[%s23872_s20 + $0x3cc] sm:$0x1] }
 0x2e9   : > { %v7048_v19 = vshll.u32 %v18259_v5, 16  ;;  %v18263_v5 = vld [vmem:[%s23872_s20 + $0x3dc] sm:$0x1] }
 0x2ed   : > { %20639 = vmatmul.mubr.msk.bf16.vlgmr.msra.gmra.mrb[12].mxu1 %vm3657_vm7, %v25487_v28  ;;  %v6995_v28 = vsel %vm23429_vm2, %v6990_v33, %v6994_v7  ;;  %v7045_v7 = vor.u32 %v7044_v17, %v7041_v61  ;;  %v7032_v61 = vrot.slane %v7031_v15, 4  ;;  %v7036_v17 = vrot.slane %v7034_v38, 5 }
 0x2ee   : > { %20642 = vmatprep.mubr.msk.bf16.mxu1 %vm3657_vm7, %v25490_v34  ;;  %20671 = vmatpush3.bf16.msra.mxu1 %v25705_v35  ;;  %v7017_v34 = vor.u32 %v7016_v21, %v7013_v57  ;;  %v7070_v35 = vshll.u32 %v18262_v62, 16  ;;  %v7059_v21 = vor.u32 %v7058_v9, %v7055_v2  ;;  %v4705_v57 = vrot.slane %v4703_v11, 4 }
 0x2ef   : > { %21149 = vmatmul.mubr.msk.bf16.vlgmr.msra.gmra.mrb[8].mxu0 %vm3657_vm7, %v25607_v6  ;;  %20704 = vmatprep.subr.bf16.mxu1 %v25919_v37  ;;  %v7084_v6 = vshll.u32 %v18264_v56, 16  ;;  %v25963_v62 = vcombine.low %v6995_v28, %v7009_v59  ;;  %v7069_v2 = vrot.slane %v7067_v23, 4  ;;  %v7046_v11 = vrot.slane %v7045_v7, 4 }
 0x2f0   : > { %v25950_v55 = vpop.f32.mrb[4].mxu1  ;;  %21181 = vmatpush3.bf16.msra.mxu0 %v25718_v1  ;;  %21152 = vmatprep.mubr.msk.bf16.mxu0 %vm3657_vm7, %v25610_v47  ;;  %v4682_v1 = vrot.slane %v4681_v24, 4  ;;  %v7022_v47 = vrot.slane %v7020_v42, 5  ;;  %v7018_v56 = vrot.slane %v7017_v34, 4  ;;  %v7072_v9 = vrot.slane %v7070_v35, 5 }
 0x2f1   : > { %28746 = vst [vmem:[#allocation43_spill] sm:$0xff] %v25950_v55  ;;  %v25955_v33 = vpop.f32.mrb[5].mxu1  ;;  %21214 = vmatprep.subr.bf16.mxu0 %v25933_v14  ;;  %v7086_v55 = vrot.slane %v7084_v6, 5  ;;  %v7050_v24 = vrot.slane %v7048_v19, 5  ;;  %v7060_v63 = vrot.slane %v7059_v21, 4  ;;  %v7064_v42 = vrot.slane %v7062_v50, 5 }
 0x2f2   : > { %28747 = vst [vmem:[#allocation44_spill] sm:$0xff] %v25955_v33  ;;  %v25958_v36 = vpop.f32.mrb[6].mxu1  ;;  %v4659_v38 = vsel %vm23429_vm2, %v25886_v46, %v25867_v58  ;;  %v4695_v28 = vor.u32 %v25911_v53, %v25899_v18  ;;  %v4709_v59 = vor.u32 %v4708_v51, %v4705_v57  ;;  %v4712_v34 = vshll.u32 %v17938_v10, 16  ;;  %v18680_v51 = vld [vmem:[%s23872_s20 + $0x170] sm:$0xf] }
 0x2f3   : > { %28748 = vst [vmem:[#allocation45_spill] sm:$0xff] %v25958_v36  ;;  %v25960_v32 = vpop.f32.mrb[7].mxu1  ;;  %v18265_v36 = vld [vmem:[%s23872_s20 + $0x3e4] sm:$0x1]  ;;  %v7023_v58 = vsel %vm23429_vm2, %v7018_v56, %v7022_v47  ;;  %v7076_v46 = vshll.u32 %v18263_v5, 16  ;;  %v7073_v18 = vor.u32 %v7072_v9, %v7069_v2  ;;  %v7087_v53 = vor.u32 %v7086_v55, %v7083_v25 }
 0x2f4   : > { %28749 = vst [vmem:[#allocation46_spill] sm:$0xff] %v25960_v32  ;;  %v7090_v23 = vshll.u32 %v18265_v36, 16  ;;  %v28753_v35 = vshll.u32 %v25879_v48, 16  ;;  %v7051_v6 = vsel %vm23429_vm2, %v7046_v11, %v7050_v24  ;;  %v7065_v7 = vsel %vm23429_vm2, %v7060_v63, %v7064_v42  ;;  %v17755_v55 = vld [vmem:[%s28525_s5] ss:$0 sm:$0xff] }
 0x2f5   : > { %20643 = vmatmul.mubr.msk.bf16.gmra.mrb[16].mxu1 %vm3657_vm7, %v25507_v39  ;;  %v4673_v39 = vsel %vm23429_vm2, %v25909_v30, %v25888_v3  ;;  %v4696_v50 = vrot.slane %v4695_v28, 4  ;;  %v4710_v36 = vrot.slane %v4709_v59, 4  ;;  %v7078_v57 = vrot.slane %v7076_v46, 5  ;;  %v18681_v28 = vld [vmem:[%s23872_s20 + $0x174] sm:$0x1] }
 0x2f6   : > { %20646 = vmatprep.mubr.msk.bf16.mxu1 %vm3657_vm7, %v17955_v12  ;;  %v4687_v12 = vsel %vm23429_vm2, %v4682_v1, %v25897_v4  ;;  %v28752_v4 = vsel %vm23429_vm2, %v25865_v16, %v25861_v22  ;;  %v4700_v20 = vrot.slane %v28753_v35, 5  ;;  %v4714_v22 = vrot.slane %v4712_v34, 5  ;;  %v18858_v32 = vld [vmem:[%s23872_s20 + $0x280] sm:$0xf] }
 0x2f7   : > { %21153 = vmatmul.mubr.msk.bf16.gmra.mrb[12].mxu0 %vm3657_vm7, %v25624_v45  ;;  %v7037_v45 = vsel %vm23429_vm2, %v7032_v61, %v7036_v17  ;;  %v17956_v30 = vcombine.low %v28752_v4, %v4659_v38  ;;  %v17957_v21 = vcombine.low %v4673_v39, %v4687_v12  ;;  %v26016_v47 = vcombine.low %v7051_v6, %v7065_v7  ;;  %v18682_v17 = vld [vmem:[%s23872_s20 + $0x178] sm:$0xf]  ;;  %v18683_v12 = vld [vmem:[%s23872_s20 + $0x17c] sm:$0x1] }
 0x2f8   : > { %v25987_v15 = vpop.f32.mrb[8].mxu1  ;;  %21156 = vmatprep.mubr.msk.bf16.mxu0 %vm3657_vm7, %v25963_v62  ;;  %v26013_v1 = vcombine.low %v7023_v58, %v7037_v45  ;;  %v7074_v10 = vrot.slane %v7073_v18, 4  ;;  %v7088_v56 = vrot.slane %v7087_v53, 4  ;;  %v7092_v61 = vrot.slane %v7090_v23, 5  ;;  %v18684_v45 = vld [vmem:[%s23872_s20 + $0x180] sm:$0xf] }
 0x2f9   : > { %28750 = vst [vmem:[#allocation47_spill] sm:$0xff] %v25987_v15  ;;  %v25993_v3 = vpop.f32.mrb[9].mxu1  ;;  %v4701_v5 = vsel %vm23429_vm2, %v4696_v50, %v4700_v20  ;;  %v4715_v2 = vsel %vm23429_vm2, %v4710_v36, %v4714_v22  ;;  %v10419_v9 = vshrl.u32 %v18680_v51, 16  ;;  %v10422_v25 = vshll.u32 %v18680_v51, 16  ;;  %v18686_v18 = vld [vmem:[%s23872_s20 + $0x188] sm:$0xf] }
 0x2fa   : > { %28751 = vst [vmem:[#allocation48_spill] sm:$0xff] %v25993_v3  ;;  %v20533_v19 = vpop.f32.mrb[10].mxu1  ;;  %v10433_v11 = vshrl.u32 %v18682_v17, 16  ;;  %v10436_v24 = vshll.u32 %v18682_v17, 16  ;;  %v7079_v63 = vsel %vm23429_vm2, %v7074_v10, %v7078_v57  ;;  %v7093_v42 = vsel %vm23429_vm2, %v7088_v56, %v7092_v61  ;;  %v23251_v23 = vld [vmem:[%s23872_s20 + $0x318] ss:$8 sps:$4 sm:$0xff]  }
 0x2fb   : > { %v26009_v16 = vadd.f32 %v20533_v19, %v17755_v55  ;;  %v26011_v48 = vpop.f32.mrb[11].mxu1  ;;  %v17958_v38 = vcombine.low %v4701_v5, %v4715_v2  ;;  %v10421_v59 = vrot.slane %v10419_v9, 4  ;;  %v10424_v34 = vrot.slane %v10422_v25, 5  ;;  %v18688_v20 = vld [vmem:[%s23872_s20 + $0x190] sm:$0xf] }
 0x2fc   : > { %28755 = vst [vmem:[#allocation50_spill] sm:$0xff] %v26011_v48  ;;  %v26034_v39 = vcombine.low %v7079_v63, %v7093_v42  ;;  %v10435_v58 = vrot.slane %v10433_v11, 4  ;;  %v10438_v46 = vrot.slane %v10436_v24, 5  ;;  %v10428_v53 = vshll.u32 %v18681_v28, 16  ;;  %v18690_v6 = vld [vmem:[%s23872_s20 + $0x198] sm:$0xf] }
 0x2fd   : > { %28754 = vst [vmem:[#allocation49_spill] sm:$0xff] %v26009_v16  ;;  %20647 = vmatmul.mubr.msk.bf16.gmra.mrb[20].mxu1 %vm3657_vm7, %v17956_v30  ;;  %v10425_v4 = vor.u32 %v10424_v34, %v10421_v59  ;;  %v10442_v30 = vshll.u32 %v18683_v12, 16  ;;  %v10447_v35 = vshrl.u32 %v18684_v45, 16  ;;  %v10450_v55 = vshll.u32 %v18684_v45, 16  ;;  %v18685_v61 = vld [vmem:[%s23872_s20 + $0x184] sm:$0x1] }
 0x2fe   : > { %20650 = vmatprep.mubr.msk.bf16.mxu1 %vm3657_vm7, %v17957_v21  ;;  %v10439_v7 = vor.u32 %v10438_v46, %v10435_v58  ;;  %v10461_v19 = vshrl.u32 %v18686_v18, 16  ;;  %v10464_v21 = vshll.u32 %v18686_v18, 16  ;;  %v10475_v50 = vshrl.u32 %v18688_v20, 16  ;;  %v18687_v2 = vld [vmem:[%s23872_s20 + $0x18c] sm:$0x1] }
 0x2ff   : > { %21157 = vmatmul.mubr.msk.bf16.gmra.mrb[16].mxu0 %vm3657_vm7, %v26013_v1  ;;  %v10478_v36 = vshll.u32 %v18688_v20, 16  ;;  %v10489_v22 = vshrl.u32 %v18690_v6, 16  ;;  %v10492_v57 = vshll.u32 %v18690_v6, 16  ;;  %v10426_v51 = vrot.slane %v10425_v4, 4  ;;  %v23252_v24 = vld [vmem:[%s23872_s20 + $0x328] ss:$8 sps:$4 sm:$0xff]  }
 0x300   : > { %21160 = vmatprep.mubr.msk.bf16.mxu0 %vm3657_vm7, %v26016_v47  ;;  %v10430_v10 = vrot.slane %v10428_v53, 5  ;;  %v10444_v56 = vrot.slane %v10442_v30, 5  ;;  %v10449_v17 = vrot.slane %v10447_v35, 4  ;;  %v10440_v5 = vrot.slane %v10439_v7, 4  ;;  %v18694_v59 = vld [vmem:[%s23872_s20 + $0x1a8] sm:$0xf] }
 0x301   : > { %v10452_v9 = vrot.slane %v10450_v55, 5  ;;  %v10463_v25 = vrot.slane %v10461_v19, 4  ;;  %v10466_v11 = vrot.slane %v10464_v21, 5  ;;  %v10477_v63 = vrot.slane %v10475_v50, 4  ;;  %v23253_v34 = vld [vmem:[%s23872_s20 + $0x338] ss:$8 sps:$4 sm:$0xff]  }
 0x302   : > { %v10480_v42 = vrot.slane %v10478_v36, 5  ;;  %v10494_v28 = vrot.slane %v10492_v57, 5  ;;  %v10456_v12 = vshll.u32 %v18685_v61, 16  ;;  %v10470_v58 = vshll.u32 %v18687_v2, 16  ;;  %v18689_v46 = vld [vmem:[%s23872_s20 + $0x194] sm:$0x1] }
 0x303   : > { %v18691_v45 = vld [vmem:[%s23872_s20 + $0x19c] sm:$0x1]  ;;  %v10431_v18 = vsel %vm23429_vm2, %v10426_v51, %v10430_v10  ;;  %v10445_v53 = vsel %vm23429_vm2, %v10440_v5, %v10444_v56  ;;  %v10467_v4 = vor.u32 %v10466_v11, %v10463_v25  ;;  %v10517_v20 = vshrl.u32 %v18694_v59, 16  ;;  %v18693_v51 = vld [vmem:[%s23872_s20 + $0x1a4] sm:$0x1] }
 0x304   : > { %v10520_v6 = vshll.u32 %v18694_v59, 16  ;;  %v10481_v7 = vor.u32 %v10480_v42, %v10477_v63  ;;  %v10498_v19 = vshll.u32 %v18691_v45, 16  ;;  %v10458_v21 = vrot.slane %v10456_v12, 5  ;;  %v18695_v10 = vld [vmem:[%s23872_s20 + $0x1ac] sm:$0x1] }
 0x305   : > { %20651 = vmatmul.mubr.msk.bf16.gmra.mrb[24].mxu1 %vm3657_vm7, %v17958_v38  ;;  %v10491_v38 = vrot.slane %v10489_v22, 4  ;;  %v18696_v50 = vcombine.low %v10431_v18, %v10445_v53  ;;  %v10468_v22 = vrot.slane %v10467_v4, 4  ;;  %v10472_v57 = vrot.slane %v10470_v58, 5  ;;  %v23254_v5 = vld [vmem:[%s23872_s20 + $0x348] ss:$8 sps:$4 sm:$0xff]  }
 0x306   : > { %20654 = vmatprep.mubr.msk.bf16.mxu1 %vm3657_vm7, %v23251_v23  ;;  %v10453_v23 = vor.u32 %v10452_v9, %v10449_v17  ;;  %v10519_v17 = vrot.slane %v10517_v20, 4  ;;  %v10482_v2 = vrot.slane %v10481_v7, 4  ;;  %v10500_v11 = vrot.slane %v10498_v19, 5  ;;  %v28757_v20 = vld [vmem:[#allocation27_spill] sm:$0xff]  ;;  %v18849_v16 = vld [vmem:[%s23872_s20 + $0x25c] sm:$0x1] }
 0x307   : > { %21161 = vmatmul.mubr.msk.bf16.gmra.mrb[20].mxu0 %vm3657_vm7, %v26034_v39  ;;  %v10495_v55 = vor.u32 %v10494_v28, %v10491_v38  ;;  %v10526_v63 = vshll.u32 %v18695_v10, 16  ;;  %v10473_v38 = vsel %vm23429_vm2, %v10468_v22, %v10472_v57  ;;  %v17985_v22 = vld [vmem:[%s23872_s20 + $0x9c] sm:$0x1]  ;;  %v17986_v10 = vld [vmem:[%s23872_s20 + $0xa0] sm:$0xf] }
 0x308   : > { %21164 = vmatprep.mubr.msk.bf16.mxu0 %vm3657_vm7, %v25644_v49  ;;  %v18692_v49 = vld [vmem:[%s23872_s20 + $0x1a0] sm:$0xf]  ;;  %v10454_v36 = vrot.slane %v10453_v23, 4  ;;  %v18856_v15 = vld [vmem:[%s23872_s20 + $0x278] sm:$0xf] }
 0x309   : > { %v10503_v30 = vshrl.u32 %v18692_v49, 16  ;;  %v10506_v35 = vshll.u32 %v18692_v49, 16  ;;  %v10496_v25 = vrot.slane %v10495_v55, 4  ;;  %v28756_v49 = vld [vmem:[#allocation19_spill] sm:$0xff]  ;;  %v10528_v18 = vrot.slane %v10526_v63, 5 }
 0x30a   : > { %v10459_v42 = vsel %vm23429_vm2, %v10454_v36, %v10458_v21  ;;  %v17983_v21 = vld [vmem:[%s23872_s20 + $0x94] sm:$0x1] }
 0x30b   : > { %v10505_v56 = vrot.slane %v10503_v30, 4  ;;  %v10508_v61 = vrot.slane %v10506_v35, 5  ;;  %v10501_v58 = vsel %vm23429_vm2, %v10496_v25, %v10500_v11  ;;  %v17992_v25 = vld [vmem:[%s23872_s20 + $0xb8] sm:$0xf] }
 0x30c   : > { %v28759_v11 = vld [vmem:[#allocation37_spill] sm:$0xff] }
 0x30d   : > { %20655 = vmatmul.mubr.msk.bf16.gmra.mrb[28].mxu1 %vm3657_vm7, %v23252_v24  ;;  %v10512_v24 = vshll.u32 %v18693_v51, 16  ;;  %v10509_v28 = vor.u32 %v10508_v61, %v10505_v56  ;;  %v17988_v56 = vld [vmem:[%s23872_s20 + $0xa8] sm:$0xf] }
 0x30e   : > { %20658 = vmatprep.mubr.msk.bf16.mxu1 %vm3657_vm7, %v23253_v34  ;;  %v17982_v34 = vld [vmem:[%s23872_s20 + $0x90] sm:$0xf]  ;;  %v5153_v63 = vshrl.u32 %v17988_v56, 16 }
 0x30f   : > { %21165 = vmatmul.mubr.msk.bf16.gmra.mrb[24].mxu0 %vm3657_vm7, %v25659_v13  ;;  %v10484_v13 = vshll.u32 %v18689_v46, 16  ;;  %v18697_v46 = vcombine.low %v10459_v42, %v10473_v38  ;;  %v10514_v45 = vrot.slane %v10512_v24, 5  ;;  %v5111_v53 = vshrl.u32 %v17982_v34, 16 }
 0x310   : > { %21168 = vmatprep.mubr.msk.bf16.mxu0 %vm3657_vm7, %v25662_v0  ;;  %v10522_v0 = vrot.slane %v10520_v6, 5  ;;  %v10510_v4 = vrot.slane %v10509_v28, 4  ;;  %v5114_v35 = vshll.u32 %v17982_v34, 16  ;;  %v5142_v24 = vshll.u32 %v17986_v10, 16 }
 0x311   : > { %v10486_v9 = vrot.slane %v10484_v13, 5  ;;  %v28758_v13 = vld [vmem:[#allocation36_spill] sm:$0xff]  ;;  %v5156_v42 = vshll.u32 %v17988_v56, 16  ;;  %v5184_v34 = vshll.u32 %v17992_v25, 16  ;;  %v26128_v56 = vld [vmem:[%s28526_s6 + $0xa8] sm:$0xff]  }
 0x312   : > { %v10523_v59 = vor.u32 %v10522_v0, %v10519_v17  ;;  %v10515_v55 = vsel %vm23429_vm2, %v10510_v4, %v10514_v45  ;;  %v5116_v36 = vrot.slane %v5114_v35, 5  ;;  %v5120_v17 = vshll.u32 %v17983_v21, 16  ;;  %v17996_v35 = vld [vmem:[%s23872_s20 + $0xc8] sm:$0xf] }
 0x313   : > { %v10487_v12 = vsel %vm23429_vm2, %v10482_v2, %v10486_v9  ;;  %v5139_v2 = vshrl.u32 %v17986_v10, 16  ;;  %v17990_v9 = vld [vmem:[%s23872_s20 + $0xb0] sm:$0xf]  ;;  %v5158_v4 = vrot.slane %v5156_v42, 5  ;;  %v17995_v42 = vld [vmem:[%s23872_s20 + $0xc4] sm:$0x1] }
 0x314   : > { %v18698_v23 = vcombine.low %v10487_v12, %v10501_v58  ;;  %v10524_v30 = vrot.slane %v10523_v59, 4  ;;  %v5167_v38 = vshrl.u32 %v17990_v9, 16  ;;  %v5170_v28 = vshll.u32 %v17990_v9, 16 }
 0x315   : > { %20659 = vmatmul.mubr.msk.bf16.gmra.mrb[32].mxu1 %vm3657_vm7, %v23254_v5  ;;  %v5134_v5 = vshll.u32 %v17985_v22, 16  ;;  %v5181_v59 = vshrl.u32 %v17992_v25, 16  ;;  %v5122_v58 = vrot.slane %v5120_v17, 5  ;;  %v5141_v45 = vrot.slane %v5139_v2, 4 }
 0x316   : > { %20662 = vmatprep.mubr.msk.bf16.mxu1 %vm3657_vm7, %v28756_v49  ;;  %v10529_v19 = vsel %vm23429_vm2, %v10524_v30, %v10528_v18  ;;  %v17994_v30 = vld [vmem:[%s23872_s20 + $0xc0] sm:$0xf] }
 0x317   : > { %21169 = vmatmul.mubr.msk.bf16.gmra.mrb[28].mxu0 %vm3657_vm7, %v25683_v26  ;;  %v17984_v26 = vld [vmem:[%s23872_s20 + $0x98] sm:$0xf]  ;;  %v18699_v61 = vcombine.low %v10515_v55, %v10529_v19  ;;  %v26115_v55 = vld [vmem:[%s28526_s6 + $0x30] sm:$0xff]   ;;  %v5198_v17 = vshll.u32 %v17994_v30, 16 }
 0x318   : > { %21172 = vmatprep.mubr.msk.bf16.mxu0 %vm3657_vm7, %v18696_v50  ;;  %v5125_v6 = vshrl.u32 %v17984_v26, 16  ;;  %v5128_v7 = vshll.u32 %v17984_v26, 16  ;;  %v5113_v50 = vrot.slane %v5111_v53, 4  ;;  %v5136_v26 = vrot.slane %v5134_v5, 5 }
 0x319   : > { %v5144_v53 = vrot.slane %v5142_v24, 5 }
 0x31a   : > { %v5127_v57 = vrot.slane %v5125_v6, 4  ;;  %v5130_v51 = vrot.slane %v5128_v7, 5  ;;  %v5117_v0 = vor.u32 %v5116_v36, %v5113_v50  ;;  %v5172_v6 = vrot.slane %v5170_v28, 5  ;;  %v17991_v50 = vld [vmem:[%s23872_s20 + $0xb4] sm:$0x1] }
 0x31b   : > { %v5183_v7 = vrot.slane %v5181_v59, 4  ;;  %v17993_v36 = vld [vmem:[%s23872_s20 + $0xbc] sm:$0x1]  ;;  %v5176_v2 = vshll.u32 %v17991_v50, 16  ;;  %v5200_v28 = vrot.slane %v5198_v17, 5 }
 0x31c   : > { %v5131_v49 = vor.u32 %v5130_v51, %v5127_v57  ;;  %v5118_v12 = vrot.slane %v5117_v0, 4  ;;  %v5145_v51 = vor.u32 %v5144_v53, %v5141_v45  ;;  %v5209_v0 = vshrl.u32 %v17996_v35, 16  ;;  %v28761_v45 = vld [vmem:[#allocation26_spill] sm:$0xff] }
 0x31d   : > { %20663 = vmatmul.mubr.msk.bf16.gmra.mrb[36].mxu1 %vm3657_vm7, %v28757_v20  ;;  %v5169_v20 = vrot.slane %v5167_v38, 4  ;;  %v5190_v25 = vshll.u32 %v17993_v36, 16 }
 0x31e   : > { %20666 = vmatprep.mubr.msk.bf16.mxu1 %vm3657_vm7, %v28758_v13  ;;  %v5132_v18 = vrot.slane %v5131_v49, 4  ;;  %v5186_v13 = vrot.slane %v5184_v34, 5  ;;  %v5123_v22 = vsel %vm23429_vm2, %v5118_v12, %v5122_v58  ;;  %v5146_v24 = vrot.slane %v5145_v51, 4  ;;  %v18721_v51 = vld [vmem:[%s23872_s20 + $0x1c0] sm:$0xf] }
 0x31f   : > { %21173 = vmatmul.mubr.msk.bf16.gmra.mrb[32].mxu0 %vm3657_vm7, %v18697_v46  ;;  %v17987_v46 = vld [vmem:[%s23872_s20 + $0xa4] sm:$0x1]  ;;  %v5173_v5 = vor.u32 %v5172_v6, %v5169_v20  ;;  %v5211_v59 = vrot.slane %v5209_v0, 4  ;;  %v5178_v58 = vrot.slane %v5176_v2, 5  ;;  %v10790_v2 = vshll.u32 %v18721_v51, 16 }
 0x320   : > { %21176 = vmatprep.mubr.msk.bf16.mxu0 %vm3657_vm7, %v18698_v23  ;;  %v5155_v23 = vrot.slane %v5153_v63, 4  ;;  %v5148_v19 = vshll.u32 %v17987_v46, 16  ;;  %v5137_v57 = vsel %vm23429_vm2, %v5132_v18, %v5136_v26  ;;  %v5187_v9 = vor.u32 %v5186_v13, %v5183_v7  ;;  %v17997_v46 = vld [vmem:[%s23872_s20 + $0xcc] sm:$0x1] }
 0x321   : > { %v18014_v49 = vcombine.low %v5123_v22, %v5137_v57  ;;  %v5174_v12 = vrot.slane %v5173_v5, 4  ;;  %v28763_v7 = vld [vmem:[#allocation11_spill] sm:$0xff]  ;;  %v18719_v57 = vld [vmem:[%s23872_s20 + $0x1b8] sm:$0xf]  ;;  %v10787_v5 = vshrl.u32 %v18721_v51, 16 }
 0x322   : > { %v5159_v10 = vor.u32 %v5158_v4, %v5155_v23  ;;  %v5188_v26 = vrot.slane %v5187_v9, 4  ;;  %v10773_v17 = vshrl.u32 %v18719_v57, 16  ;;  %v10776_v0 = vshll.u32 %v18719_v57, 16  ;;  %v28765_v9 = vld [vmem:[#allocation13_spill] sm:$0xff]  ;;  %v18731_v51 = vld [vmem:[%s23872_s20 + $0x1e8] sm:$0xf] }
 0x323   : > { %v5179_v20 = vsel %vm23429_vm2, %v5174_v12, %v5178_v58 }
 0x324   : > { %v5160_v63 = vrot.slane %v5159_v10, 4 }
 0x325   : > { %20667 = vmatmul.mubr.msk.bf16.gmra.mrb[40].mxu1 %vm3657_vm7, %v28759_v11  ;;  %v5150_v11 = vrot.slane %v5148_v19, 5 }
 0x326   : > { %20672 = vmatprep.mubr.msk.bf16.mxu1 %vm3657_vm7, %v25729_v43  ;;  %v17989_v43 = vld [vmem:[%s23872_s20 + $0xac] sm:$0x1] }
 0x327   : > { %21177 = vmatmul.mubr.msk.bf16.gmra.mrb[36].mxu0 %vm3657_vm7, %v18699_v61  ;;  %v5162_v21 = vshll.u32 %v17989_v43, 16  ;;  %v5195_v61 = vshrl.u32 %v17994_v30, 16  ;;  %v5151_v18 = vsel %vm23429_vm2, %v5146_v24, %v5150_v11  ;;  %v5204_v43 = vshll.u32 %v17995_v42, 16  ;;  %v18720_v11 = vld [vmem:[%s23872_s20 + $0x1bc] sm:$0x1] }
 0x328   : > { %21182 = vmatprep.mubr.msk.bf16.mxu0 %vm3657_vm7, %v28739_v60  ;;  %v5218_v30 = vshll.u32 %v17997_v46, 16  ;;  %v10778_v24 = vrot.slane %v10776_v0, 5  ;;  %v10792_v42 = vrot.slane %v10790_v2, 5  ;;  %v28766_v46 = vld [vmem:[#allocation14_spill] sm:$0xff]  ;;  %v18733_v0 = vld [vmem:[%s23872_s20 + $0x1f0] sm:$0xf] }
 0x329   : > { %v5197_v38 = vrot.slane %v5195_v61, 4  ;;  %v5206_v19 = vrot.slane %v5204_v43, 5  ;;  %v18728_v2 = vld [vmem:[%s23872_s20 + $0x1dc] sm:$0x1] }
 0x32a   : > { %v5220_v22 = vrot.slane %v5218_v30, 5 }
 0x32b   : > { %v5201_v23 = vor.u32 %v5200_v28, %v5197_v38  ;;  %v18723_v38 = vld [vmem:[%s23872_s20 + $0x1c8] sm:$0xf]  ;;  %v18725_v28 = vld [vmem:[%s23872_s20 + $0x1d0] sm:$0xf] }
 0x32c   : > { %v10801_v58 = vshrl.u32 %v18723_v38, 16  ;;  %v10815_v43 = vshrl.u32 %v18725_v28, 16 }
 0x32d   : > { %20673 = vmatmul.mubr.msk.bf16.vlgmr.msra.gmra.mrb[12].mxu1 %vm3657_vm7, %v25750_v40  ;;  %v5212_v40 = vshll.u32 %v17996_v35, 16  ;;  %v28762_v35 = vld [vmem:[#allocation10_spill] sm:$0xff]  ;;  %v5202_v50 = vrot.slane %v5201_v23, 4 }
 0x32e   : > { %20676 = vmatprep.mubr.msk.bf16.mxu1 %vm3657_vm7, %v25752_v54  ;;  %20705 = vmatpush3.bf16.msra.mxu1 %v25919_v37  ;;  %v28760_v54 = vld [vmem:[#allocation9_spill] sm:$0xff]  ;;  %v5164_v37 = vrot.slane %v5162_v21, 5 }
 0x32f   : > { %21183 = vmatmul.mubr.msk.bf16.vlgmr.msra.gmra.mrb[8].mxu0 %vm3657_vm7, %v28740_v8  ;;  %20738 = vmatprep.subr.bf16.mxu1 %v26115_v55  ;;  %v5214_v34 = vrot.slane %v5212_v40, 5  ;;  %v5207_v10 = vsel %vm23429_vm2, %v5202_v50, %v5206_v19  ;;  %v28764_v40 = vld [vmem:[#allocation12_spill] sm:$0xff]  ;;  %v10803_v19 = vrot.slane %v10801_v58, 4 }
 0x330   : > { %21215 = vmatpush3.bf16.msra.mxu0 %v25933_v14  ;;  %21186 = vmatprep.mubr.msk.bf16.mxu0 %vm3657_vm7, %v28760_v54  ;;  %v5192_v14 = vrot.slane %v5190_v25, 5  ;;  %v5165_v53 = vsel %vm23429_vm2, %v5160_v63, %v5164_v37  ;;  %v18722_v63 = vld [vmem:[%s23872_s20 + $0x1c4] sm:$0x1]  ;;  %v10789_v37 = vrot.slane %v10787_v5, 4  ;;  %v18726_v50 = vld [vmem:[%s23872_s20 + $0x1d4] sm:$0x1] }
 0x331   : > { %21248 = vmatprep.subr.bf16.mxu0 %v26128_v56  ;;  %v5215_v4 = vor.u32 %v5214_v34, %v5211_v59  ;;  %v18015_v13 = vcombine.low %v5151_v18, %v5165_v53  ;;  %v10782_v59 = vshll.u32 %v18720_v11, 16  ;;  %v10796_v12 = vshll.u32 %v18722_v63, 16 }
 0x332   : > { %v5193_v6 = vsel %vm23429_vm2, %v5188_v26, %v5192_v14  ;;  %v18727_v26 = vld [vmem:[%s23872_s20 + $0x1d8] sm:$0xf]  ;;  %v18729_v14 = vld [vmem:[%s23872_s20 + $0x1e0] sm:$0xf]  ;;  %v10804_v18 = vshll.u32 %v18723_v38, 16  ;;  %v10818_v53 = vshll.u32 %v18725_v28, 16 }
 0x333   : > { %v18016_v21 = vcombine.low %v5179_v20, %v5193_v6  ;;  %v5216_v36 = vrot.slane %v5215_v4, 4  ;;  %v10829_v23 = vshrl.u32 %v18727_v26, 16  ;;  %v10843_v4 = vshrl.u32 %v18729_v14, 16 }
 0x334   : > { %v10846_v30 = vshll.u32 %v18729_v14, 16  ;;  %v10784_v6 = vrot.slane %v10782_v59, 5  ;;  %v10820_v57 = vrot.slane %v10818_v53, 5  ;;  %v10824_v5 = vshll.u32 %v18726_v50, 16 }
 0x335   : > { %20677 = vmatmul.mubr.msk.bf16.gmra.mrb[16].mxu1 %vm3657_vm7, %v28761_v45  ;;  %v5221_v61 = vsel %vm23429_vm2, %v5216_v36, %v5220_v22  ;;  %v10793_v45 = vor.u32 %v10792_v42, %v10789_v37  ;;  %v10806_v36 = vrot.slane %v10804_v18, 5  ;;  %v10817_v22 = vrot.slane %v10815_v43, 4 }
 0x336   : > { %20680 = vmatprep.mubr.msk.bf16.mxu1 %vm3657_vm7, %v18014_v49  ;;  %v18017_v25 = vcombine.low %v5207_v10, %v5221_v61  ;;  %v10775_v49 = vrot.slane %v10773_v17, 4  ;;  %v10845_v61 = vrot.slane %v10843_v4, 4  ;;  %v10848_v17 = vrot.slane %v10846_v30, 5 }
 0x337   : > { %21187 = vmatmul.mubr.msk.bf16.gmra.mrb[12].mxu0 %vm3657_vm7, %v28762_v35  ;;  %v10807_v11 = vor.u32 %v10806_v36, %v10803_v19  ;;  %v10860_v63 = vshll.u32 %v18731_v51, 16  ;;  %v10871_v37 = vshrl.u32 %v18733_v0, 16  ;;  %v10874_v42 = vshll.u32 %v18733_v0, 16 }
 0x338   : > { %21190 = vmatprep.mubr.msk.bf16.mxu0 %vm3657_vm7, %v28763_v7  ;;  %v10779_v34 = vor.u32 %v10778_v24, %v10775_v49  ;;  %v10798_v7 = vrot.slane %v10796_v12, 5  ;;  %v10821_v49 = vor.u32 %v10820_v57, %v10817_v22  ;;  %v28767_v24 = vld [vmem:[#allocation7_spill] sm:$0xff]  ;;  %v10838_v28 = vshll.u32 %v18728_v2, 16  ;;  %v28771_v2 = vld [vmem:[#allocation22_spill] sm:$0xff] }
 0x339   : > { %v10849_v59 = vor.u32 %v10848_v17, %v10845_v61  ;;  %v10808_v58 = vrot.slane %v10807_v11, 4  ;;  %v10826_v14 = vrot.slane %v10824_v5, 5  ;;  %v10862_v18 = vrot.slane %v10860_v63, 5  ;;  %v23046_v11 = vld [vmem:[%s23872_s20 + $0x120] ss:$8 sps:$4 sm:$0xff]  }
 0x33a   : > { %v10780_v20 = vrot.slane %v10779_v34, 4  ;;  %v10873_v43 = vrot.slane %v10871_v37, 4  ;;  %v10876_v53 = vrot.slane %v10874_v42, 5  ;;  %v10840_v4 = vrot.slane %v10838_v28, 5  ;;  %v23047_v63 = vld [vmem:[%s23872_s20 + $0x130] ss:$8 sps:$4 sm:$0xff]  }
 0x33b   : > { %v10850_v30 = vrot.slane %v10849_v59, 4  ;;  %v23048_v37 = vld [vmem:[%s23872_s20 + $0x140] ss:$8 sps:$4 sm:$0xff]   ;;  %v26239_v42 = vld [vmem:[%s28526_s6 + $0x38] sm:$0xff]  }
 0x33c   : > { %v10877_v22 = vor.u32 %v10876_v53, %v10873_v43  ;;  %v23256_v28 = vld [vmem:[%s23872_s20 + $0x18] ss:$8 sps:$4 sm:$0xff]   ;;  %v23257_v59 = vld [vmem:[%s23872_s20 + $0x28] ss:$8 sps:$4 sm:$0xff]  }
 0x33d   : > { %20681 = vmatmul.mubr.msk.bf16.gmra.mrb[20].mxu1 %vm3657_vm7, %v18015_v13  ;;  %v18724_v13 = vld [vmem:[%s23872_s20 + $0x1cc] sm:$0x1]  ;;  %v26299_v43 = vld [vmem:[%s23872_s20 + $0xc8] ss:$8 sps:$4 sm:$0xff]   ;;  %v23056_v53 = vld [vmem:[%s23872_s20 + $0x258] ss:$8 sps:$4 sm:$0xff]  }
 0x33e   : > { %20684 = vmatprep.mubr.msk.bf16.mxu1 %vm3657_vm7, %v18016_v21  ;;  %v10794_v21 = vrot.slane %v10793_v45, 4 }
 0x33f   : > { %21191 = vmatmul.mubr.msk.bf16.gmra.mrb[16].mxu0 %vm3657_vm7, %v28764_v40  ;;  %v10810_v40 = vshll.u32 %v18724_v13, 16  ;;  %v28770_v13 = vld [vmem:[#allocation8_spill] sm:$0xff] }
 0x340   : > { %21194 = vmatprep.mubr.msk.bf16.mxu0 %vm3657_vm7, %v28765_v9  ;;  %v18730_v9 = vld [vmem:[%s23872_s20 + $0x1e4] sm:$0x1] }
 0x341   : > { %v10812_v34 = vrot.slane %v10810_v40, 5  ;;  %v10878_v40 = vrot.slane %v10877_v22, 4  ;;  %v26348_v22 = vld [vmem:[%s23872_s20 + $0x308] ss:$8 sps:$4 sm:$0xff]  }
 0x343   : > { %v10813_v19 = vsel %vm23429_vm2, %v10808_v58, %v10812_v34  ;;  %v26258_v34 = vld [vmem:[%s23872_s20 + $0x1b0] ss:$8 sps:$4 sm:$0xff]  }
 0x344   : > { %v26274_v58 = vld [vmem:[%s23872_s20 + $0x1d0] ss:$8 sps:$4 sm:$0xff]  }
 0x345   : > { %20685 = vmatmul.mubr.msk.bf16.gmra.mrb[24].mxu1 %vm3657_vm7, %v18017_v25  ;;  %v10785_v25 = vsel %vm23429_vm2, %v10780_v20, %v10784_v6  ;;  %v18734_v6 = vld [vmem:[%s23872_s20 + $0x1f4] sm:$0x1] }
 0x346   : > { %20688 = vmatprep.mubr.msk.bf16.mxu1 %vm3657_vm7, %v28715_v29  ;;  %v10832_v29 = vshll.u32 %v18727_v26, 16  ;;  %v10822_v26 = vrot.slane %v10821_v49, 4  ;;  %v10880_v57 = vshll.u32 %v18734_v6, 16  ;;  %v23266_v6 = vld [vmem:[%s23872_s20 + $0x390] ss:$8 sps:$4 sm:$0xff]  }
 0x347   : > { %21195 = vmatmul.mubr.msk.bf16.gmra.mrb[20].mxu0 %vm3657_vm7, %v28766_v46  ;;  %v18732_v46 = vld [vmem:[%s23872_s20 + $0x1ec] sm:$0x1] }
 0x348   : > { %21198 = vmatprep.mubr.msk.bf16.mxu0 %vm3657_vm7, %v25806_v41  ;;  %v10831_v41 = vrot.slane %v10829_v23, 4  ;;  %v10834_v10 = vrot.slane %v10832_v29, 5  ;;  %v28768_v23 = vld [vmem:[#allocation24_spill] sm:$0xff]  ;;  %v10827_v50 = vsel %vm23429_vm2, %v10822_v26, %v10826_v14  ;;  %v10882_v5 = vrot.slane %v10880_v57, 5  ;;  %v26286_v14 = vld [vmem:[%s23872_s20 + $0xb8] ss:$8 sps:$4 sm:$0xff]  }
 0x349   : > { %v26281_v26 = vld [vmem:[%s23872_s20 + $0xa8] ss:$8 sps:$4 sm:$0xff]  }
 0x34a   : > { %v10835_v38 = vor.u32 %v10834_v10, %v10831_v41  ;;  %v18736_v10 = vcombine.low %v10813_v19, %v10827_v50  ;;  %v26330_v19 = vld [vmem:[%s23872_s20 + $0x2f8] ss:$8 sps:$4 sm:$0xff]  }
 0x34b   : > { %v26338_v50 = vld [vmem:[%s23872_s20 + $0x410] ss:$8 sps:$4 sm:$0xff]   ;;  %v26351_v57 = vld [vmem:[%s23872_s20 + $0x420] ss:$8 sps:$4 sm:$0xff]  }
 0x34c   : > { %v10836_v29 = vrot.slane %v10835_v38, 4  ;;  %v26245_v38 = vld [vmem:[%s28526_s6 + $0xb0] sm:$0xff]  }
 0x34d   : > { %20689 = vmatmul.mubr.msk.bf16.gmra.mrb[28].mxu1 %vm3657_vm7, %v28718_v44  ;;  %v10799_v44 = vsel %vm23429_vm2, %v10794_v21, %v10798_v7  ;;  %v28769_v7 = vld [vmem:[#allocation21_spill] sm:$0xff]  ;;  %v10866_v21 = vshll.u32 %v18732_v46, 16  ;;  %v26291_v46 = vld [vmem:[%s23872_s20 + $0x1e0] ss:$8 sps:$4 sm:$0xff]  }
 0x34e   : > { %20692 = vmatprep.mubr.msk.bf16.mxu1 %vm3657_vm7, %v28719_v31  ;;  %v10857_v31 = vshrl.u32 %v18731_v51, 16  ;;  %v18735_v12 = vcombine.low %v10785_v25, %v10799_v44  ;;  %v10841_v51 = vsel %vm23429_vm2, %v10836_v29, %v10840_v4  ;;  %v10883_v44 = vsel %vm23429_vm2, %v10878_v40, %v10882_v5  ;;  %v23264_v29 = vld [vmem:[%s23872_s20 + $0x370] ss:$8 sps:$4 sm:$0xff]   ;;  %v23265_v4 = vld [vmem:[%s23872_s20 + $0x380] ss:$8 sps:$4 sm:$0xff]  }
 0x34f   : > { %21199 = vmatmul.mubr.msk.bf16.gmra.mrb[24].mxu0 %vm3657_vm7, %v25829_v52  ;;  %v10852_v52 = vshll.u32 %v18730_v9, 16  ;;  %v10868_v61 = vrot.slane %v10866_v21, 5  ;;  %v28772_v9 = vld [vmem:[#allocation23_spill] sm:$0xff]  ;;  %v23273_v40 = vld [vmem:[%s23872_s20 + $0x70] ss:$8 sps:$4 sm:$0xff]  }
 0x350   : > { %21202 = vmatprep.mubr.msk.bf16.mxu0 %vm3657_vm7, %v28767_v24  ;;  %v10859_v45 = vrot.slane %v10857_v31, 4  ;;  %v28773_v24 = vld [vmem:[#allocation40_spill] sm:$0xff]  ;;  %v26333_v21 = vld [vmem:[%s23872_s20 + $0x400] ss:$8 sps:$4 sm:$0xff]  }
 0x351   : > { %v10854_v20 = vrot.slane %v10852_v52, 5  ;;  %v23255_v31 = vld [vmem:[%s23872_s20 + $0x8] ss:$8 sps:$4 sm:$0xff]   ;;  %v23067_v5 = vld [vmem:[%s23872_s20 + $0x198] ss:$8 sps:$4 sm:$0xff]  }
 0x352   : > { %v10863_v36 = vor.u32 %v10862_v18, %v10859_v45  ;;  %v23049_v52 = vld [vmem:[%s23872_s20 + $0x150] ss:$8 sps:$4 sm:$0xff]   ;;  %v23262_v18 = vld [vmem:[%s23872_s20 + $0x360] ss:$8 sps:$4 sm:$0xff]  }
 0x353   : > { %v10855_v41 = vsel %vm23429_vm2, %v10850_v30, %v10854_v20  ;;  %v23055_v45 = vld [vmem:[%s23872_s20 + $0x248] ss:$8 sps:$4 sm:$0xff]   ;;  %v23058_v30 = vld [vmem:[%s23872_s20 + $0x278] ss:$8 sps:$4 sm:$0xff]  }
 0x354   : > { %v18737_v17 = vcombine.low %v10841_v51, %v10855_v41  ;;  %v10864_v0 = vrot.slane %v10863_v36, 4  ;;  %v26314_v20 = vld [vmem:[%s23872_s20 + $0x2d8] ss:$8 sps:$4 sm:$0xff]   ;;  %v23062_v36 = vld [vmem:[%s23872_s20 + $0x168] ss:$8 sps:$4 sm:$0xff]  }
 0x355   : > { %20693 = vmatmul.mubr.msk.bf16.gmra.mrb[32].mxu1 %vm3657_vm7, %v28768_v23  ;;  %v23057_v23 = vld [vmem:[%s23872_s20 + $0x268] ss:$8 sps:$4 sm:$0xff]   ;;  %v23063_v41 = vld [vmem:[%s23872_s20 + $0x178] ss:$8 sps:$4 sm:$0xff]  }
 0x356   : > { %20696 = vmatprep.mubr.msk.bf16.mxu1 %vm3657_vm7, %v28769_v7  ;;  %v10869_v25 = vsel %vm23429_vm2, %v10864_v0, %v10868_v61  ;;  %v26319_v7 = vld [vmem:[%s23872_s20 + $0x3f0] ss:$8 sps:$4 sm:$0xff]   ;;  %v26365_v61 = vld [vmem:[%s28526_s6 + $0x40] sm:$0xff]  }
 0x357   : > { %21203 = vmatmul.mubr.msk.bf16.gmra.mrb[28].mxu0 %vm3657_vm7, %v28770_v13  ;;  %v18738_v49 = vcombine.low %v10869_v25, %v10883_v44  ;;  %v26327_v13 = vld [vmem:[%s23872_s20 + $0x2e8] ss:$8 sps:$4 sm:$0xff]  }
 0x358   : > { %21206 = vmatprep.mubr.msk.bf16.mxu0 %vm3657_vm7, %v18735_v12  ;;  %v26271_v12 = vld [vmem:[%s23872_s20 + $0x1c0] ss:$8 sps:$4 sm:$0xff]   ;;  %v23271_v51 = vld [vmem:[%s23872_s20 + $0x50] ss:$8 sps:$4 sm:$0xff]  }
 0x359   : > { %v23272_v0 = vld [vmem:[%s23872_s20 + $0x60] ss:$8 sps:$4 sm:$0xff]  }
 0x35a   : > { %v26392_v25 = vld [vmem:[%s23872_s20 + $0xe0] ss:$8 sps:$4 sm:$0xff]  }
 0x35b   : > { %v26397_v44 = vld [vmem:[%s23872_s20 + $0x208] ss:$8 sps:$4 sm:$0xff]  }
 0x35d   : > { %20697 = vmatmul.mubr.msk.bf16.gmra.mrb[36].mxu1 %vm3657_vm7, %v28771_v2  ;;  %v26384_v2 = vld [vmem:[%s23872_s20 + $0x1f8] ss:$8 sps:$4 sm:$0xff]  }
 0x35e   : > { %20700 = vmatprep.mubr.msk.bf16.mxu1 %vm3657_vm7, %v28772_v9  ;;  %v23274_v9 = vld [vmem:[%s23872_s20 + $0x80] ss:$8 sps:$4 sm:$0xff]  }
 0x35f   : > { %21207 = vmatmul.mubr.msk.bf16.gmra.mrb[32].mxu0 %vm3657_vm7, %v18736_v10  ;;  %v23066_v10 = vld [vmem:[%s23872_s20 + $0x188] ss:$8 sps:$4 sm:$0xff]  }
 0x360   : > { %21210 = vmatprep.mubr.msk.bf16.mxu0 %vm3657_vm7, %v18737_v17  ;;  %v26371_v17 = vld [vmem:[%s28526_s6 + $0xb8] sm:$0xff]  }
 0x365   : > { %20701 = vmatmul.mubr.msk.bf16.gmra.mrb[40].mxu1 %vm3657_vm7, %v28773_v24  ;;  %v26412_v24 = vld [vmem:[%s23872_s20 + $0x100] ss:$8 sps:$4 sm:$0xff]  }
 0x366   : > { %20706 = vmatprep.mubr.msk.bf16.mxu1 %vm3657_vm7, %v23046_v11  ;;  %v26400_v11 = vld [vmem:[%s23872_s20 + $0x218] ss:$8 sps:$4 sm:$0xff]  }
 0x367   : > { %21211 = vmatmul.mubr.msk.bf16.gmra.mrb[36].mxu0 %vm3657_vm7, %v18738_v49  ;;  %v26407_v49 = vld [vmem:[%s23872_s20 + $0xf0] ss:$8 sps:$4 sm:$0xff]  }
 0x368   : > { %21216 = vmatprep.mubr.msk.bf16.mxu0 %vm3657_vm7, %v23255_v31  ;;  %v26417_v31 = vld [vmem:[%s23872_s20 + $0x228] ss:$8 sps:$4 sm:$0xff]  }
 0x36d   : > { %20707 = vmatmul.mubr.msk.bf16.vlgmr.msra.gmra.mrb[12].mxu1 %vm3657_vm7, %v23047_v63  ;;  %v23073_v63 = vld [vmem:[%s23872_s20 + $0x290] ss:$8 sps:$4 sm:$0xff]  }
 0x36e   : > { %20710 = vmatprep.mubr.msk.bf16.mxu1 %vm3657_vm7, %v23048_v37  ;;  %20739 = vmatpush3.bf16.msra.mxu1 %v26115_v55  ;;  %v23258_v55 = vld [vmem:[%s23872_s20 + $0x38] ss:$8 sps:$4 sm:$0xff]   ;;  %v23278_v37 = vld [vmem:[%s23872_s20 + $0x3a8] ss:$8 sps:$4 sm:$0xff]  }
 0x36f   : > { %21217 = vmatmul.mubr.msk.bf16.vlgmr.msra.gmra.mrb[8].mxu0 %vm3657_vm7, %v23256_v28  ;;  %20772 = vmatprep.subr.bf16.mxu1 %v26239_v42  ;;  %v23075_v28 = vld [vmem:[%s23872_s20 + $0x2b0] ss:$8 sps:$4 sm:$0xff]  }
 0x370   : > { %21249 = vmatpush3.bf16.msra.mxu0 %v26128_v56  ;;  %21220 = vmatprep.mubr.msk.bf16.mxu0 %vm3657_vm7, %v23257_v59  ;;  %v26266_v56 = vld [vmem:[%s23872_s20 + $0x98] ss:$8 sps:$4 sm:$0xff]  }
 0x371   : > { %21282 = vmatprep.subr.bf16.mxu0 %v26245_v38  ;;  %v23280_v59 = vld [vmem:[%s23872_s20 + $0x3b8] ss:$8 sps:$4 sm:$0xff]  }
 0x375   : > { %20711 = vmatmul.mubr.msk.bf16.gmra.mrb[16].mxu1 %vm3657_vm7, %v23049_v52  ;;  %v23281_v52 = vld [vmem:[%s23872_s20 + $0x3c8] ss:$8 sps:$4 sm:$0xff]  }
 0x376   : > { %20714 = vmatprep.mubr.msk.bf16.mxu1 %vm3657_vm7, %v26258_v34 }
 0x377   : > { %21221 = vmatmul.mubr.msk.bf16.gmra.mrb[12].mxu0 %vm3657_vm7, %v23258_v55  ;;  %v23076_v55 = vld [vmem:[%s23872_s20 + $0x2c0] ss:$8 sps:$4 sm:$0xff]  }
 0x378   : > { %21224 = vmatprep.mubr.msk.bf16.mxu0 %vm3657_vm7, %v26266_v56 }
 0x37d   : > { %20715 = vmatmul.mubr.msk.bf16.gmra.mrb[20].mxu1 %vm3657_vm7, %v26271_v12 }
 0x37e   : > { %20718 = vmatprep.mubr.msk.bf16.mxu1 %vm3657_vm7, %v26274_v58 }
 0x37f   : > { %21225 = vmatmul.mubr.msk.bf16.gmra.mrb[16].mxu0 %vm3657_vm7, %v26281_v26 }
 0x380   : > { %21228 = vmatprep.mubr.msk.bf16.mxu0 %vm3657_vm7, %v26286_v14 }
 0x385   : > { %20719 = vmatmul.mubr.msk.bf16.gmra.mrb[24].mxu1 %vm3657_vm7, %v26291_v46 }
 0x386   : > { %20722 = vmatprep.mubr.msk.bf16.mxu1 %vm3657_vm7, %v23262_v18  ;;  %v23282_v18 = vld [vmem:[%s23872_s20 + $0x3d8] ss:$8 sps:$4 sm:$0xff]  }
 0x387   : > { %21229 = vmatmul.mubr.msk.bf16.gmra.mrb[20].mxu0 %vm3657_vm7, %v26299_v43 }
 0x388   : > { %21232 = vmatprep.mubr.msk.bf16.mxu0 %vm3657_vm7, %v23055_v45  ;;  %v26440_v45 = vld [vmem:[%s23872_s20 + $0x320] ss:$8 sps:$4 sm:$0xff]  }
 0x38d   : > { %20723 = vmatmul.mubr.msk.bf16.gmra.mrb[28].mxu1 %vm3657_vm7, %v23264_v29  ;;  %v26456_v29 = vld [vmem:[%s23872_s20 + $0x340] ss:$8 sps:$4 sm:$0xff]  }
 0x38e   : > { %20726 = vmatprep.mubr.msk.bf16.mxu1 %vm3657_vm7, %v23265_v4  ;;  %v26459_v4 = vld [vmem:[%s23872_s20 + $0x448] ss:$8 sps:$4 sm:$0xff]  }
 0x38f   : > { %21233 = vmatmul.mubr.msk.bf16.gmra.mrb[24].mxu0 %vm3657_vm7, %v23056_v53  ;;  %v26445_v53 = vld [vmem:[%s23872_s20 + $0x438] ss:$8 sps:$4 sm:$0xff]  }
 0x390   : > { %21236 = vmatprep.mubr.msk.bf16.mxu0 %vm3657_vm7, %v23057_v23  ;;  %v26453_v23 = vld [vmem:[%s23872_s20 + $0x330] ss:$8 sps:$4 sm:$0xff]  }
 0x395   : > { %20727 = vmatmul.mubr.msk.bf16.gmra.mrb[32].mxu1 %vm3657_vm7, %v23266_v6  ;;  %v26473_v6 = vld [vmem:[%s23872_s20 + $0x350] ss:$8 sps:$4 sm:$0xff]  }
 0x396   : > { %20730 = vmatprep.mubr.msk.bf16.mxu1 %vm3657_vm7, %v26319_v7 }
 0x397   : > { %21237 = vmatmul.mubr.msk.bf16.gmra.mrb[28].mxu0 %vm3657_vm7, %v23058_v30  ;;  %v26464_v30 = vld [vmem:[%s23872_s20 + $0x458] ss:$8 sps:$4 sm:$0xff]  }
 0x398   : > { %21240 = vmatprep.mubr.msk.bf16.mxu0 %vm3657_vm7, %v26314_v20 }
 0x39d   : > { %20731 = vmatmul.mubr.msk.bf16.gmra.mrb[36].mxu1 %vm3657_vm7, %v26333_v21 }
 0x39e   : > { %20734 = vmatprep.mubr.msk.bf16.mxu1 %vm3657_vm7, %v26338_v50 }
 0x39f   : > { %21241 = vmatmul.mubr.msk.bf16.gmra.mrb[32].mxu0 %vm3657_vm7, %v26327_v13 }
 0x3a0   : > { %21244 = vmatprep.mubr.msk.bf16.mxu0 %vm3657_vm7, %v26330_v19 }
 0x3a5   : > { %20735 = vmatmul.mubr.msk.bf16.gmra.mrb[40].mxu1 %vm3657_vm7, %v26351_v57 }
 0x3a6   : > { %20740 = vmatprep.mubr.msk.bf16.mxu1 %vm3657_vm7, %v23062_v36  ;;  %v26476_v36 = vld [vmem:[%s23872_s20 + $0x468] ss:$8 sps:$4 sm:$0xff]  }
 0x3a7   : > { %21245 = vmatmul.mubr.msk.bf16.gmra.mrb[36].mxu0 %vm3657_vm7, %v26348_v22 }
 0x3a8   : > { %21250 = vmatprep.mubr.msk.bf16.mxu0 %vm3657_vm7, %v23271_v51  ;;  %v26491_v51 = vld [vmem:[%s28526_s6 + $0xc0] sm:$0xff]  }
 0x3ad   : > { %20741 = vmatmul.mubr.msk.bf16.vlgmr.msra.gmra.mrb[12].mxu1 %vm3657_vm7, %v23063_v41 }
 0x3ae   : > { %20744 = vmatprep.mubr.msk.bf16.mxu1 %vm3657_vm7, %v23066_v10  ;;  %20773 = vmatpush3.bf16.msra.mxu1 %v26239_v42  ;;  %v26425_v42 = vld [vmem:[%s23872_s20 + $0x110] ss:$8 sps:$4 sm:$0xff]  }
 0x3af   : > { %21251 = vmatmul.mubr.msk.bf16.vlgmr.msra.gmra.mrb[8].mxu0 %vm3657_vm7, %v23272_v0  ;;  %20806 = vmatprep.subr.bf16.mxu1 %v26365_v61  ;;  %v28778_v10 = vld [vmem:[#allocation29_spill] sm:$0xff]  ;;  %v18845_v0 = vld [vmem:[%s23872_s20 + $0x24c] sm:$0x1] }
 0x3b0   : > { %21283 = vmatpush3.bf16.msra.mxu0 %v26245_v38  ;;  %21254 = vmatprep.mubr.msk.bf16.mxu0 %vm3657_vm7, %v23273_v40  ;;  %v23074_v38 = vld [vmem:[%s23872_s20 + $0x2a0] ss:$8 sps:$4 sm:$0xff]  }
 0x3b1   : > { %21316 = vmatprep.subr.bf16.mxu0 %v26371_v17 }
 0x3b5   : > { %20745 = vmatmul.mubr.msk.bf16.gmra.mrb[16].mxu1 %vm3657_vm7, %v23067_v5 }
 0x3b6   : > { %20748 = vmatprep.mubr.msk.bf16.mxu1 %vm3657_vm7, %v26384_v2 }
 0x3b7   : > { %21255 = vmatmul.mubr.msk.bf16.gmra.mrb[12].mxu0 %vm3657_vm7, %v23274_v9  ;;  %v18847_v9 = vld [vmem:[%s23872_s20 + $0x254] sm:$0x1] }
 0x3b8   : > { %21258 = vmatprep.mubr.msk.bf16.mxu0 %vm3657_vm7, %v26392_v25 }
 0x3bd   : > { %20749 = vmatmul.mubr.msk.bf16.gmra.mrb[20].mxu1 %vm3657_vm7, %v26397_v44 }
 0x3be   : > { %20752 = vmatprep.mubr.msk.bf16.mxu1 %vm3657_vm7, %v26400_v11 }
 0x3bf   : > { %21259 = vmatmul.mubr.msk.bf16.gmra.mrb[16].mxu0 %vm3657_vm7, %v26407_v49 }
 0x3c0   : > { %21262 = vmatprep.mubr.msk.bf16.mxu0 %vm3657_vm7, %v26412_v24 }
 0x3c5   : > { %20753 = vmatmul.mubr.msk.bf16.gmra.mrb[24].mxu1 %vm3657_vm7, %v26417_v31 }
 0x3c6   : > { %20756 = vmatprep.mubr.msk.bf16.mxu1 %vm3657_vm7, %v23278_v37 }
 0x3c7   : > { %21263 = vmatmul.mubr.msk.bf16.gmra.mrb[20].mxu0 %vm3657_vm7, %v26425_v42 }
 0x3c8   : > { %21266 = vmatprep.mubr.msk.bf16.mxu0 %vm3657_vm7, %v23073_v63 }
 0x3cd   : > { %20757 = vmatmul.mubr.msk.bf16.gmra.mrb[28].mxu1 %vm3657_vm7, %v23280_v59  ;;  %v28780_v59 = vld [vmem:[#allocation6_spill] sm:$0xff] }
 0x3ce   : > { %20760 = vmatprep.mubr.msk.bf16.mxu1 %vm3657_vm7, %v23281_v52  ;;  %v11704_v52 = vshll.u32 %v18845_v0, 16 }
 0x3cf   : > { %21267 = vmatmul.mubr.msk.bf16.gmra.mrb[24].mxu0 %vm3657_vm7, %v23074_v38  ;;  %v18848_v38 = vld [vmem:[%s23872_s20 + $0x258] sm:$0xf] }
 0x3d0   : > { %21270 = vmatprep.mubr.msk.bf16.mxu0 %vm3657_vm7, %v23075_v28  ;;  %v18850_v28 = vld [vmem:[%s23872_s20 + $0x260] sm:$0xf] }
 0x3d5   : > { %20761 = vmatmul.mubr.msk.bf16.gmra.mrb[32].mxu1 %vm3657_vm7, %v23282_v18  ;;  %v11718_v18 = vshll.u32 %v18847_v9, 16  ;;  %v11706_v9 = vrot.slane %v11704_v52, 5  ;;  %v11732_v52 = vshll.u32 %v18849_v16, 16  ;;  %v11779_v16 = vshrl.u32 %v18856_v15, 16 }
 0x3d6   : > { %20764 = vmatprep.mubr.msk.bf16.mxu1 %vm3657_vm7, %v26445_v53 }
 0x3d7   : > { %21271 = vmatmul.mubr.msk.bf16.gmra.mrb[28].mxu0 %vm3657_vm7, %v23076_v55  ;;  %v11734_v33 = vrot.slane %v11732_v52, 5 }
 0x3d8   : > { %21274 = vmatprep.mubr.msk.bf16.mxu0 %vm3657_vm7, %v26440_v45 }
 0x3dd   : > { %20765 = vmatmul.mubr.msk.bf16.gmra.mrb[36].mxu1 %vm3657_vm7, %v26459_v4 }
 0x3de   : > { %20768 = vmatprep.mubr.msk.bf16.mxu1 %vm3657_vm7, %v26464_v30 }
 0x3df   : > { %21275 = vmatmul.mubr.msk.bf16.gmra.mrb[32].mxu0 %vm3657_vm7, %v26453_v23 }
 0x3e0   : > { %21278 = vmatprep.mubr.msk.bf16.mxu0 %vm3657_vm7, %v26456_v29 }
 0x3e5   : > { %20769 = vmatmul.mubr.msk.bf16.gmra.mrb[40].mxu1 %vm3657_vm7, %v26476_v36 }
 0x3e6   : > { %20774 = vmatprep.mubr.msk.bf16.mxu1 %vm3657_vm7, %v26258_v34  ;;  %v28774_v34 = vld [vmem:[#allocation3_spill] sm:$0xff] }
 0x3e7   : > { %21279 = vmatmul.mubr.msk.bf16.gmra.mrb[36].mxu0 %vm3657_vm7, %v26473_v6 }
 0x3e8   : > { %21284 = vmatprep.mubr.msk.bf16.mxu0 %vm3657_vm7, %v26266_v56  ;;  %v28775_v56 = vld [vmem:[#allocation28_spill] sm:$0xff] }
 0x3ed   : > { %20775 = vmatmul.mubr.msk.bf16.vlgmr.msra.gmra.mrb[12].mxu1 %vm3657_vm7, %v26271_v12  ;;  %v18844_v12 = vld [vmem:[%s23872_s20 + $0x248] sm:$0xf] }
 0x3ee   : > { %20778 = vmatprep.mubr.msk.bf16.mxu1 %vm3657_vm7, %v26274_v58  ;;  %20807 = vmatpush3.bf16.msra.mxu1 %v26365_v61  ;;  %v18846_v58 = vld [vmem:[%s23872_s20 + $0x250] sm:$0xf]  ;;  %v11698_v41 = vshll.u32 %v18844_v12, 16 }
 0x3ef   : > { %21285 = vmatmul.mubr.msk.bf16.vlgmr.msra.gmra.mrb[8].mxu0 %vm3657_vm7, %v26281_v26  ;;  %v28776_v26 = vld [vmem:[#allocation4_spill] sm:$0xff]  ;;  %v11709_v61 = vshrl.u32 %v18846_v58, 16 }
 0x3f0   : > { %21317 = vmatpush3.bf16.msra.mxu0 %v26371_v17  ;;  %21288 = vmatprep.mubr.msk.bf16.mxu0 %vm3657_vm7, %v26286_v14  ;;  %v28777_v14 = vld [vmem:[#allocation5_spill] sm:$0xff]  ;;  %v28779_v17 = vld [vmem:[#allocation30_spill] sm:$0xff]  ;;  %v11700_v5 = vrot.slane %v11698_v41, 5  ;;  %v11737_v41 = vshrl.u32 %v18850_v28, 16 }
 0x3f1   : > { %21350 = vmatprep.subr.bf16.mxu0 %v26491_v51  ;;  %v11711_v63 = vrot.slane %v11709_v61, 4  ;;  %v11740_v61 = vshll.u32 %v18850_v28, 16 }
 0x3f3   : > { %v11742_v28 = vrot.slane %v11740_v61, 5 }
 0x3f5   : > { %20779 = vmatmul.mubr.msk.bf16.gmra.mrb[16].mxu1 %vm3657_vm7, %v26291_v46  ;;  %v11695_v46 = vshrl.u32 %v18844_v12, 16  ;;  %v18852_v12 = vld [vmem:[%s23872_s20 + $0x268] sm:$0xf] }
 0x3f6   : > { %20782 = vmatprep.mubr.msk.bf16.mxu1 %vm3657_vm7, %v28774_v34  ;;  %v11723_v34 = vshrl.u32 %v18848_v38, 16 }
 0x3f7   : > { %21289 = vmatmul.mubr.msk.bf16.gmra.mrb[12].mxu0 %vm3657_vm7, %v26299_v43  ;;  %v11712_v43 = vshll.u32 %v18846_v58, 16  ;;  %v11697_v40 = vrot.slane %v11695_v46, 4  ;;  %v18854_v58 = vld [vmem:[%s23872_s20 + $0x270] sm:$0xf]  ;;  %v11726_v46 = vshll.u32 %v18848_v38, 16  ;;  %v11739_v38 = vrot.slane %v11737_v41, 4 }
 0x3f8   : > { %21292 = vmatprep.mubr.msk.bf16.mxu0 %vm3657_vm7, %v28775_v56  ;;  %v11765_v0 = vshrl.u32 %v18854_v58, 16  ;;  %v11725_v48 = vrot.slane %v11723_v34, 4  ;;  %v18853_v34 = vld [vmem:[%s23872_s20 + $0x26c] sm:$0x1] }
 0x3f9   : > { %v11714_v37 = vrot.slane %v11712_v43, 5  ;;  %v11701_v55 = vor.u32 %v11700_v5, %v11697_v40  ;;  %v11751_v43 = vshrl.u32 %v18852_v12, 16  ;;  %v11768_v40 = vshll.u32 %v18854_v58, 16 }
 0x3fa   : > { %v11767_v58 = vrot.slane %v11765_v0, 4  ;;  %v11743_v61 = vor.u32 %v11742_v28, %v11739_v38  ;;  %v11781_v38 = vrot.slane %v11779_v16, 4 }
 0x3fb   : > { %v11702_v5 = vrot.slane %v11701_v55, 4  ;;  %v11770_v55 = vrot.slane %v11768_v40, 5  ;;  %v11760_v40 = vshll.u32 %v18853_v34, 16 }
 0x3fd   : > { %20783 = vmatmul.mubr.msk.bf16.gmra.mrb[20].mxu1 %vm3657_vm7, %v28776_v26  ;;  %v28781_v26 = vld [vmem:[#allocation31_spill] sm:$0xff] }
 0x3fe   : > { %20786 = vmatprep.mubr.msk.bf16.mxu1 %vm3657_vm7, %v28777_v14  ;;  %v11715_v14 = vor.u32 %v11714_v37, %v11711_v63  ;;  %v18851_v63 = vld [vmem:[%s23872_s20 + $0x264] sm:$0x1]  ;;  %v11728_v37 = vrot.slane %v11726_v46, 5  ;;  %v11707_v46 = vsel %vm23429_vm2, %v11702_v5, %v11706_v9 }
 0x3ff   : > { %21293 = vmatmul.mubr.msk.bf16.gmra.mrb[16].mxu0 %vm3657_vm7, %v28778_v10 }
 0x400   : > { %21296 = vmatprep.mubr.msk.bf16.mxu0 %vm3657_vm7, %v28779_v17  ;;  %v11716_v3 = vrot.slane %v11715_v14, 4  ;;  %v18855_v14 = vld [vmem:[%s23872_s20 + $0x274] sm:$0x1]  ;;  %v11729_v41 = vor.u32 %v11728_v37, %v11725_v48  ;;  %v18859_v37 = vld [vmem:[%s23872_s20 + $0x284] sm:$0x1] }
 0x402   : > { %v11730_v9 = vrot.slane %v11729_v41, 4 }
 0x404   : > { %v11735_v52 = vsel %vm23429_vm2, %v11730_v9, %v11734_v33 }
 0x405   : > { %20787 = vmatmul.mubr.msk.bf16.gmra.mrb[24].mxu1 %vm3657_vm7, %v28780_v59  ;;  %v11720_v59 = vrot.slane %v11718_v18, 5  ;;  %v11746_v18 = vshll.u32 %v18851_v63, 16  ;;  %v11774_v63 = vshll.u32 %v18855_v14, 16  ;;  %v18234_v14 = vld [vmem:[%s23872_s20 + $0x168] sm:$0xf] }
 0x406   : > { %20790 = vmatprep.mubr.msk.bf16.mxu1 %vm3657_vm7, %v26319_v7  ;;  %v11754_v7 = vshll.u32 %v18852_v12, 16  ;;  %v6855_v16 = vshrl.u32 %v18234_v14, 16 }
 0x407   : > { %21297 = vmatmul.mubr.msk.bf16.gmra.mrb[20].mxu0 %vm3657_vm7, %v28781_v26  ;;  %v11748_v48 = vrot.slane %v11746_v18, 5 }
 0x408   : > { %21300 = vmatprep.mubr.msk.bf16.mxu0 %vm3657_vm7, %v26314_v20  ;;  %v11753_v20 = vrot.slane %v11751_v43, 4  ;;  %v11756_v12 = vrot.slane %v11754_v7, 5  ;;  %v11793_v43 = vshrl.u32 %v18858_v32, 16  ;;  %v11796_v7 = vshll.u32 %v18858_v32, 16 }
 0x40a   : > { %v11757_v0 = vor.u32 %v11756_v12, %v11753_v20  ;;  %v11795_v26 = vrot.slane %v11793_v43, 4  ;;  %v11776_v12 = vrot.slane %v11774_v63, 5  ;;  %v6857_v63 = vrot.slane %v6855_v16, 4  ;;  %v18241_v16 = vld [vmem:[%s23872_s20 + $0x184] sm:$0x1] }
 0x40c   : > { %v11758_v32 = vrot.slane %v11757_v0, 4 }
 0x40d   : > { %20791 = vmatmul.mubr.msk.bf16.gmra.mrb[28].mxu1 %vm3657_vm7, %v26333_v21  ;;  %v11721_v21 = vsel %vm23429_vm2, %v11716_v3, %v11720_v59  ;;  %v11744_v3 = vrot.slane %v11743_v61, 4  ;;  %v18857_v59 = vld [vmem:[%s23872_s20 + $0x27c] sm:$0x1] }
 0x40e   : > { %20794 = vmatprep.mubr.msk.bf16.mxu1 %vm3657_vm7, %v26338_v50  ;;  %v11782_v50 = vshll.u32 %v18856_v15, 16  ;;  %v26552_v5 = vcombine.low %v11707_v46, %v11721_v21  ;;  %v11762_v15 = vrot.slane %v11760_v40, 5  ;;  %v18236_v46 = vld [vmem:[%s23872_s20 + $0x170] sm:$0xf] }
 0x40f   : > { %21301 = vmatmul.mubr.msk.bf16.gmra.mrb[24].mxu0 %vm3657_vm7, %v26327_v13  ;;  %v11771_v13 = vor.u32 %v11770_v55, %v11767_v58  ;;  %v11788_v58 = vshll.u32 %v18857_v59, 16  ;;  %v11802_v55 = vshll.u32 %v18859_v37, 16  ;;  %v6872_v0 = vshll.u32 %v18236_v46, 16  ;;  %v18238_v59 = vld [vmem:[%s23872_s20 + $0x178] sm:$0xf] }
 0x410   : > { %21304 = vmatprep.mubr.msk.bf16.mxu0 %vm3657_vm7, %v26330_v19  ;;  %v11784_v28 = vrot.slane %v11782_v50, 5  ;;  %v11798_v19 = vrot.slane %v11796_v7, 5  ;;  %v6869_v7 = vshrl.u32 %v18236_v46, 16  ;;  %v18240_v37 = vld [vmem:[%s23872_s20 + $0x180] sm:$0xf] }
 0x411   : > { %v11772_v20 = vrot.slane %v11771_v13, 4  ;;  %v11790_v41 = vrot.slane %v11788_v58, 5  ;;  %v11804_v61 = vrot.slane %v11802_v55, 5  ;;  %v6886_v55 = vshll.u32 %v18238_v59, 16 }
 0x412   : > { %v11785_v18 = vor.u32 %v11784_v28, %v11781_v38  ;;  %v11799_v34 = vor.u32 %v11798_v19, %v11795_v26  ;;  %v6858_v26 = vshll.u32 %v18234_v14, 16 }
 0x414   : > { %v11786_v50 = vrot.slane %v11785_v18, 4  ;;  %v11800_v43 = vrot.slane %v11799_v34, 4  ;;  %v6860_v9 = vrot.slane %v6858_v26, 5 }
 0x415   : > { %20795 = vmatmul.mubr.msk.bf16.gmra.mrb[32].mxu1 %vm3657_vm7, %v26351_v57  ;;  %v11749_v57 = vsel %vm23429_vm2, %v11744_v3, %v11748_v48  ;;  %v18237_v3 = vld [vmem:[%s23872_s20 + $0x174] sm:$0x1]  ;;  %v6871_v48 = vrot.slane %v6869_v7, 4  ;;  %v18246_v7 = vld [vmem:[%s23872_s20 + $0x198] sm:$0xf] }
 0x416   : > { %20798 = vmatprep.mubr.msk.bf16.mxu1 %vm3657_vm7, %v28739_v60  ;;  %v11763_v60 = vsel %vm23429_vm2, %v11758_v32, %v11762_v15  ;;  %v26574_v21 = vcombine.low %v11735_v52, %v11749_v57  ;;  %v11791_v40 = vsel %vm23429_vm2, %v11786_v50, %v11790_v41  ;;  %v11805_v13 = vsel %vm23429_vm2, %v11800_v43, %v11804_v61  ;;  %v18239_v41 = vld [vmem:[%s23872_s20 + $0x17c] sm:$0x1] }
 0x417   : > { %21305 = vmatmul.mubr.msk.bf16.gmra.mrb[28].mxu0 %vm3657_vm7, %v26348_v22  ;;  %v11777_v22 = vsel %vm23429_vm2, %v11772_v20, %v11776_v12  ;;  %v26594_v38 = vcombine.low %v11791_v40, %v11805_v13  ;;  %v6861_v19 = vor.u32 %v6860_v9, %v6857_v63  ;;  %v6878_v32 = vshll.u32 %v18237_v3, 16  ;;  %v18242_v20 = vld [vmem:[%s23872_s20 + $0x188] sm:$0xf]  ;;  %v18244_v12 = vld [vmem:[%s23872_s20 + $0x190] sm:$0xf] }
 0x418   : > { %21308 = vmatprep.mubr.msk.bf16.mxu0 %vm3657_vm7, %v26552_v5  ;;  %v26576_v33 = vcombine.low %v11763_v60, %v11777_v22  ;;  %v6883_v15 = vshrl.u32 %v18238_v59, 16  ;;  %v6897_v52 = vshrl.u32 %v18240_v37, 16  ;;  %v6900_v57 = vshll.u32 %v18240_v37, 16  ;;  %v18248_v63 = vld [vmem:[%s23872_s20 + $0x1a0] sm:$0xf] }
 0x419   : > { %v6911_v18 = vshrl.u32 %v18242_v20, 16  ;;  %v6914_v34 = vshll.u32 %v18242_v20, 16  ;;  %v6925_v14 = vshrl.u32 %v18244_v12, 16  ;;  %v6928_v60 = vshll.u32 %v18244_v12, 16  ;;  %v18243_v3 = vld [vmem:[%s23872_s20 + $0x18c] sm:$0x1] }
 0x41a   : > { %v6880_v46 = vrot.slane %v6878_v32, 5  ;;  %v6885_v61 = vrot.slane %v6883_v15, 4  ;;  %v6888_v50 = vrot.slane %v6886_v55, 5  ;;  %v6899_v43 = vrot.slane %v6897_v52, 4 }
 0x41b   : > { %v6902_v26 = vrot.slane %v6900_v57, 5  ;;  %v6916_v40 = vrot.slane %v6914_v34, 5  ;;  %v6927_v13 = vrot.slane %v6925_v14, 4  ;;  %v6906_v9 = vshll.u32 %v18241_v16, 16  ;;  %v18247_v14 = vld [vmem:[%s23872_s20 + $0x19c] sm:$0x1] }
 0x41c   : > { %v6889_v37 = vor.u32 %v6888_v50, %v6885_v61  ;;  %v6942_v32 = vshll.u32 %v18246_v7, 16  ;;  %v6953_v15 = vshrl.u32 %v18248_v63, 16  ;;  %v6956_v20 = vshll.u32 %v18248_v63, 16  ;;  %v18249_v16 = vld [vmem:[%s23872_s20 + $0x1a4] sm:$0x1] }
 0x41d   : > { %20799 = vmatmul.mubr.msk.bf16.gmra.mrb[36].mxu1 %vm3657_vm7, %v28740_v8  ;;  %v18235_v8 = vld [vmem:[%s23872_s20 + $0x16c] sm:$0x1]  ;;  %v6920_v12 = vshll.u32 %v18243_v3, 16  ;;  %v6908_v34 = vrot.slane %v6906_v9, 5 }
 0x41e   : > { %20802 = vmatprep.mubr.msk.bf16.mxu1 %vm3657_vm7, %v28760_v54  ;;  %v6874_v54 = vrot.slane %v6872_v0, 5  ;;  %v6864_v28 = vshll.u32 %v18235_v8, 16  ;;  %v6913_v0 = vrot.slane %v6911_v18, 4  ;;  %v6930_v8 = vrot.slane %v6928_v60, 5 }
 0x41f   : > { %21309 = vmatmul.mubr.msk.bf16.gmra.mrb[32].mxu0 %vm3657_vm7, %v26574_v21  ;;  %v6890_v57 = vrot.slane %v6889_v37, 4  ;;  %v28783_v37 = vld [vmem:[#allocation38_spill] sm:$0xff] }
 0x420   : > { %21312 = vmatprep.mubr.msk.bf16.mxu0 %vm3657_vm7, %v26576_v33  ;;  %v6875_v58 = vor.u32 %v6874_v54, %v6871_v48  ;;  %v6866_v22 = vrot.slane %v6864_v28, 5  ;;  %v18245_v48 = vld [vmem:[%s23872_s20 + $0x194] sm:$0x1]  ;;  %v6903_v28 = vor.u32 %v6902_v26, %v6899_v43 }
 0x421   : > { %v6934_v55 = vshll.u32 %v18245_v48, 16  ;;  %v18883_v48 = vld [vmem:[%s23872_s20 + $0x290] sm:$0xf] }
 0x422   : > { %v6904_v18 = vrot.slane %v6903_v28, 4  ;;  %v12049_v28 = vshrl.u32 %v18883_v48, 16 }
 0x424   : > { %v6909_v50 = vsel %vm23429_vm2, %v6904_v18, %v6908_v34  ;;  %v18887_v18 = vld [vmem:[%s23872_s20 + $0x2a0] sm:$0xf]  ;;  %v18889_v34 = vld [vmem:[%s23872_s20 + $0x2a8] sm:$0xf] }
 0x425   : > { %20803 = vmatmul.mubr.msk.bf16.gmra.mrb[40].mxu1 %vm3657_vm7, %v28762_v35  ;;  %v6862_v35 = vrot.slane %v6861_v19, 4  ;;  %v6939_v19 = vshrl.u32 %v18246_v7, 16  ;;  %v6962_v7 = vshll.u32 %v18249_v16, 16  ;;  %v12091_v16 = vshrl.u32 %v18889_v34, 16 }
 0x426   : > { %20808 = vmatprep.mubr.msk.bf16.mxu1 %vm3657_vm7, %v26384_v2  ;;  %v6876_v2 = vrot.slane %v6875_v58, 4  ;;  %v6931_v58 = vor.u32 %v6930_v8, %v6927_v13 }
 0x427   : > { %21313 = vmatmul.mubr.msk.bf16.gmra.mrb[36].mxu0 %vm3657_vm7, %v26594_v38  ;;  %v6867_v54 = vsel %vm23429_vm2, %v6862_v35, %v6866_v22  ;;  %v6941_v60 = vrot.slane %v6939_v19, 4  ;;  %v6944_v35 = vrot.slane %v6942_v32, 5  ;;  %v6955_v22 = vrot.slane %v6953_v15, 4 }
 0x428   : > { %21318 = vmatprep.mubr.msk.bf16.mxu0 %vm3657_vm7, %v26392_v25  ;;  %v6892_v25 = vshll.u32 %v18239_v41, 16  ;;  %v6881_v59 = vsel %vm23429_vm2, %v6876_v2, %v6880_v46  ;;  %v6922_v41 = vrot.slane %v6920_v12, 5  ;;  %v6932_v61 = vrot.slane %v6931_v58, 4  ;;  %v18884_v12 = vld [vmem:[%s23872_s20 + $0x294] sm:$0x1] }
 0x429   : > { %v6936_v2 = vrot.slane %v6934_v55, 5  ;;  %v6945_v43 = vor.u32 %v6944_v35, %v6941_v60  ;;  %v6964_v3 = vrot.slane %v6962_v7, 5  ;;  %v12052_v19 = vshll.u32 %v18883_v48, 16  ;;  %v18886_v58 = vld [vmem:[%s23872_s20 + $0x29c] sm:$0x1] }
 0x42a   : > { %v6894_v52 = vrot.slane %v6892_v25, 5  ;;  %v12051_v55 = vrot.slane %v12049_v28, 4  ;;  %v12072_v60 = vshll.u32 %v18886_v58, 16  ;;  %v12077_v35 = vshrl.u32 %v18887_v18, 16 }
 0x42b   : > { %v6946_v25 = vrot.slane %v6945_v43, 4 }
 0x42c   : > { %v12074_v7 = vrot.slane %v12072_v60, 5 }
 0x42d   : > { %20809 = vmatmul.mubr.msk.bf16.vlgmr.msra.gmra.mrb[12].mxu1 %vm3657_vm7, %v26397_v44  ;;  %v6917_v44 = vor.u32 %v6916_v40, %v6913_v0  ;;  %v6937_v0 = vsel %vm23429_vm2, %v6932_v61, %v6936_v2  ;;  %v28782_v40 = vld [vmem:[#allocation32_spill] sm:$0xff] }
 0x42e   : > { %20812 = vmatprep.mubr.msk.bf16.mxu1 %vm3657_vm7, %v26400_v11  ;;  %v18266_v11 = vcombine.low %v6867_v54, %v6881_v59  ;;  %v18885_v54 = vld [vmem:[%s23872_s20 + $0x298] sm:$0xf] }
 0x42f   : > { %21319 = vmatmul.mubr.msk.bf16.vlgmr.msra.gmra.mrb[8].mxu0 %vm3657_vm7, %v26407_v49  ;;  %v6958_v49 = vrot.slane %v6956_v20, 5  ;;  %v6918_v46 = vrot.slane %v6917_v44, 4  ;;  %v12063_v32 = vshrl.u32 %v18885_v54, 16  ;;  %v12066_v15 = vshll.u32 %v18885_v54, 16  ;;  %v28784_v20 = vld [vmem:[#allocation39_spill] sm:$0xff] }
 0x430   : > { %21351 = vmatpush3.bf16.msra.mxu0 %v26491_v51  ;;  %21322 = vmatprep.mubr.msk.bf16.mxu0 %vm3657_vm7, %v26412_v24  ;;  %v6895_v24 = vsel %vm23429_vm2, %v6890_v57, %v6894_v52  ;;  %v6948_v51 = vshll.u32 %v18247_v14, 16  ;;  %v12054_v52 = vrot.slane %v12052_v19, 5  ;;  %v12058_v14 = vshll.u32 %v18884_v12, 16  ;;  %v18892_v19 = vld [vmem:[%s23872_s20 + $0x2b4] sm:$0x1] }
 0x431   : > { %v6959_v26 = vor.u32 %v6958_v49, %v6955_v22  ;;  %v18267_v13 = vcombine.low %v6895_v24, %v6909_v50  ;;  %v12068_v57 = vrot.slane %v12066_v15, 5  ;;  %v12080_v22 = vshll.u32 %v18887_v18, 16  ;;  %v18891_v49 = vld [vmem:[%s23872_s20 + $0x2b0] sm:$0xf] }
 0x432   : > { %v6950_v8 = vrot.slane %v6948_v51, 5  ;;  %v12055_v61 = vor.u32 %v12054_v52, %v12051_v55  ;;  %v12094_v24 = vshll.u32 %v18889_v34, 16  ;;  %v12105_v51 = vshrl.u32 %v18891_v49, 16 }
 0x433   : > { %v6960_v9 = vrot.slane %v6959_v26, 4  ;;  %v12108_v50 = vshll.u32 %v18891_v49, 16  ;;  %v12060_v26 = vrot.slane %v12058_v14, 5 }
 0x435   : > { %20813 = vmatmul.mubr.msk.bf16.gmra.mrb[16].mxu1 %vm3657_vm7, %v26417_v31  ;;  %v6923_v31 = vsel %vm23429_vm2, %v6918_v46, %v6922_v41  ;;  %v6965_v59 = vsel %vm23429_vm2, %v6960_v9, %v6964_v3  ;;  %v18893_v46 = vld [vmem:[%s23872_s20 + $0x2b8] sm:$0xf]  ;;  %v12096_v9 = vrot.slane %v12094_v24, 5  ;;  %v18895_v3 = vld [vmem:[%s23872_s20 + $0x2c0] sm:$0xf]  ;;  %v12110_v48 = vrot.slane %v12108_v50, 5 }
 0x436   : > { %20816 = vmatprep.mubr.msk.bf16.mxu1 %vm3657_vm7, %v18266_v11  ;;  %v18268_v63 = vcombine.low %v6923_v31, %v6937_v0  ;;  %v12065_v11 = vrot.slane %v12063_v32, 4  ;;  %v28785_v41 = vld [vmem:[#allocation33_spill] sm:$0xff]  ;;  %v12122_v43 = vshll.u32 %v18893_v46, 16  ;;  %v18888_v31 = vld [vmem:[%s23872_s20 + $0x2a4] sm:$0x1]  ;;  %v12079_v0 = vrot.slane %v12077_v35, 4 }
 0x437   : > { %21323 = vmatmul.mubr.msk.bf16.gmra.mrb[12].mxu0 %vm3657_vm7, %v26425_v42  ;;  %v6951_v42 = vsel %vm23429_vm2, %v6946_v25, %v6950_v8  ;;  %v12093_v25 = vrot.slane %v12091_v16, 4  ;;  %v18894_v32 = vld [vmem:[%s23872_s20 + $0x2bc] sm:$0x1]  ;;  %v12136_v12 = vshll.u32 %v18895_v3, 16 }
 0x438   : > { %21326 = vmatprep.mubr.msk.bf16.mxu0 %vm3657_vm7, %v28782_v40  ;;  %v18269_v44 = vcombine.low %v6951_v42, %v6965_v59  ;;  %v12069_v2 = vor.u32 %v12068_v57, %v12065_v11  ;;  %v12082_v40 = vrot.slane %v12080_v22, 5  ;;  %v12124_v42 = vrot.slane %v12122_v43, 5  ;;  %v18897_v59 = vld [vmem:[%s23872_s20 + $0x2c8] sm:$0xf]  ;;  %v18896_v22 = vld [vmem:[%s23872_s20 + $0x2c4] sm:$0x1] }
 0x439   : > { %v12147_v58 = vshrl.u32 %v18897_v59, 16  ;;  %v12150_v55 = vshll.u32 %v18897_v59, 16  ;;  %v12114_v11 = vshll.u32 %v18892_v19, 16  ;;  %v18923_v59 = vld [vmem:[%s23872_s20 + $0x2dc] sm:$0x1] }
 0x43a   : > { %v12070_v8 = vrot.slane %v12069_v2, 4 }
 0x43b   : > { %v12116_v2 = vrot.slane %v12114_v11, 5  ;;  %v28790_v11 = vld [vmem:[#allocation35_spill] sm:$0xff] }
 0x43d   : > { %20817 = vmatmul.mubr.msk.bf16.gmra.mrb[20].mxu1 %vm3657_vm7, %v18267_v13  ;;  %v12056_v13 = vrot.slane %v12055_v61, 4  ;;  %v12152_v61 = vrot.slane %v12150_v55, 5  ;;  %v18930_v55 = vld [vmem:[%s23872_s20 + $0x2f8] sm:$0xf] }
 0x43e   : > { %20820 = vmatprep.mubr.msk.bf16.mxu1 %vm3657_vm7, %v18268_v63  ;;  %v18890_v63 = vld [vmem:[%s23872_s20 + $0x2ac] sm:$0x1] }
 0x43f   : > { %21327 = vmatmul.mubr.msk.bf16.gmra.mrb[16].mxu0 %vm3657_vm7, %v28783_v37  ;;  %v12086_v37 = vshll.u32 %v18888_v31, 16  ;;  %v12100_v28 = vshll.u32 %v18890_v63, 16  ;;  %v12061_v15 = vsel %vm23429_vm2, %v12056_v13, %v12060_v26 }
 0x440   : > { %21330 = vmatprep.mubr.msk.bf16.mxu0 %vm3657_vm7, %v28784_v20  ;;  %v12083_v20 = vor.u32 %v12082_v40, %v12079_v0 }
 0x441   : > { %v12088_v18 = vrot.slane %v12086_v37, 5  ;;  %v12102_v35 = vrot.slane %v12100_v28, 5  ;;  %v18925_v37 = vld [vmem:[%s23872_s20 + $0x2e4] sm:$0x1] }
 0x442   : > { %v12084_v14 = vrot.slane %v12083_v20, 4  ;;  %v18928_v20 = vld [vmem:[%s23872_s20 + $0x2f0] sm:$0xf] }
 0x444   : > { %v12089_v50 = vsel %vm23429_vm2, %v12084_v14, %v12088_v18  ;;  %v12445_v18 = vshrl.u32 %v18928_v20, 16  ;;  %v12459_v14 = vshrl.u32 %v18930_v55, 16 }
 0x445   : > { %20821 = vmatmul.mubr.msk.bf16.gmra.mrb[24].mxu1 %vm3657_vm7, %v18269_v44  ;;  %v12097_v44 = vor.u32 %v12096_v9, %v12093_v25 }
 0x446   : > { %20824 = vmatprep.mubr.msk.bf16.mxu1 %vm3657_vm7, %v26445_v53  ;;  %v12119_v53 = vshrl.u32 %v18893_v46, 16  ;;  %v12138_v46 = vrot.slane %v12136_v12, 5 }
 0x447   : > { %21331 = vmatmul.mubr.msk.bf16.gmra.mrb[20].mxu0 %vm3657_vm7, %v28785_v41  ;;  %v12098_v60 = vrot.slane %v12097_v44, 4  ;;  %v12149_v41 = vrot.slane %v12147_v58, 4  ;;  %v12412_v44 = vshll.u32 %v18923_v59, 16 }
 0x448   : > { %21334 = vmatprep.mubr.msk.bf16.mxu0 %vm3657_vm7, %v26440_v45  ;;  %v12107_v45 = vrot.slane %v12105_v51, 4  ;;  %v12121_v54 = vrot.slane %v12119_v53, 4  ;;  %v18898_v51 = vld [vmem:[%s23872_s20 + $0x2cc] sm:$0x1]  ;;  %v12142_v53 = vshll.u32 %v18896_v22, 16 }
 0x449   : > { %v12153_v26 = vor.u32 %v12152_v61, %v12149_v41  ;;  %v18927_v41 = vld [vmem:[%s23872_s20 + $0x2ec] sm:$0x1] }
 0x44a   : > { %v12111_v52 = vor.u32 %v12110_v48, %v12107_v45  ;;  %v12125_v57 = vor.u32 %v12124_v42, %v12121_v54  ;;  %v18924_v45 = vld [vmem:[%s23872_s20 + $0x2e0] sm:$0xf]  ;;  %v28788_v48 = vld [vmem:[#allocation41_spill] sm:$0xff] }
 0x44b   : > { %v12420_v42 = vshll.u32 %v18924_v45, 16 }
 0x44c   : > { %v12126_v16 = vrot.slane %v12125_v57, 4 }
 0x44d   : > { %20825 = vmatmul.mubr.msk.bf16.gmra.mrb[28].mxu1 %vm3657_vm7, %v26459_v4  ;;  %v12075_v4 = vsel %vm23429_vm2, %v12070_v8, %v12074_v7  ;;  %v12156_v7 = vshll.u32 %v18898_v51, 16  ;;  %v12154_v8 = vrot.slane %v12153_v26, 4  ;;  %v12447_v51 = vrot.slane %v12445_v18, 4 }
 0x44e   : > { %20828 = vmatprep.mubr.msk.bf16.mxu1 %vm3657_vm7, %v26464_v30  ;;  %v12133_v30 = vshrl.u32 %v18895_v3, 16  ;;  %v18899_v34 = vcombine.low %v12061_v15, %v12075_v4  ;;  %v12422_v15 = vrot.slane %v12420_v42, 5  ;;  %v18926_v4 = vld [vmem:[%s23872_s20 + $0x2e8] sm:$0xf] }
 0x44f   : > { %21335 = vmatmul.mubr.msk.bf16.gmra.mrb[24].mxu0 %vm3657_vm7, %v26453_v23  ;;  %v12128_v23 = vshll.u32 %v18894_v32, 16  ;;  %v12158_v63 = vrot.slane %v12156_v7, 5  ;;  %v12431_v12 = vshrl.u32 %v18926_v4, 16  ;;  %v12434_v58 = vshll.u32 %v18926_v4, 16  ;;  %v18936_v7 = vld [vmem:[%s23872_s20 + $0x310] sm:$0xf] }
 0x450   : > { %21338 = vmatprep.mubr.msk.bf16.mxu0 %vm3657_vm7, %v26456_v29  ;;  %v12135_v49 = vrot.slane %v12133_v30, 4  ;;  %v12112_v29 = vrot.slane %v12111_v52, 4  ;;  %v12426_v30 = vshll.u32 %v18925_v37, 16  ;;  %v18932_v52 = vld [vmem:[%s23872_s20 + $0x300] sm:$0xf] }
 0x451   : > { %v12130_v24 = vrot.slane %v12128_v23, 5  ;;  %v12159_v9 = vsel %vm23429_vm2, %v12154_v8, %v12158_v63  ;;  %v12476_v22 = vshll.u32 %v18932_v52, 16  ;;  %v12433_v61 = vrot.slane %v12431_v12, 4 }
 0x452   : > { %v12139_v43 = vor.u32 %v12138_v46, %v12135_v49  ;;  %v12117_v31 = vsel %vm23429_vm2, %v12112_v29, %v12116_v2  ;;  %v12414_v49 = vrot.slane %v12412_v44, 5  ;;  %v12428_v46 = vrot.slane %v12426_v30, 5 }
 0x453   : > { %v12436_v29 = vrot.slane %v12434_v58, 5  ;;  %v12478_v26 = vrot.slane %v12476_v22, 5 }
 0x454   : > { %v12140_v13 = vrot.slane %v12139_v43, 4 }
 0x455   : > { %20829 = vmatmul.mubr.msk.bf16.gmra.mrb[32].mxu1 %vm3657_vm7, %v26476_v36  ;;  %v12103_v36 = vsel %vm23429_vm2, %v12098_v60, %v12102_v35  ;;  %v12462_v60 = vshll.u32 %v18930_v55, 16  ;;  %v12473_v35 = vshrl.u32 %v18932_v52, 16  ;;  %v12437_v8 = vor.u32 %v12436_v29, %v12433_v61 }
 0x456   : > { %20832 = vmatprep.mubr.msk.bf16.mxu1 %vm3657_vm7, %v25963_v62  ;;  %v12131_v62 = vsel %vm23429_vm2, %v12126_v16, %v12130_v24  ;;  %v18900_v0 = vcombine.low %v12089_v50, %v12103_v36  ;;  %v18929_v24 = vld [vmem:[%s23872_s20 + $0x2f4] sm:$0x1]  ;;  %v12461_v36 = vrot.slane %v12459_v14, 4 }
 0x457   : > { %21339 = vmatmul.mubr.msk.bf16.gmra.mrb[28].mxu0 %vm3657_vm7, %v26473_v6  ;;  %v12144_v6 = vrot.slane %v12142_v53, 5  ;;  %v18901_v40 = vcombine.low %v12117_v31, %v12131_v62  ;;  %v18934_v53 = vld [vmem:[%s23872_s20 + $0x308] sm:$0xf]  ;;  %v12475_v43 = vrot.slane %v12473_v35, 4  ;;  %v12440_v31 = vshll.u32 %v18927_v41, 16  ;;  %v23086_v41 = vld [vmem:[%s28528_s8 + $0x18] sm:$0xff]  }
 0x458   : > { %21342 = vmatprep.mubr.msk.bf16.mxu0 %vm3657_vm7, %v18899_v34  ;;  %v12448_v34 = vshll.u32 %v18928_v20, 16  ;;  %v12454_v62 = vshll.u32 %v18929_v24, 16  ;;  %v18937_v20 = vld [vmem:[%s23872_s20 + $0x314] sm:$0x1] }
 0x459   : > { %v12145_v25 = vsel %vm23429_vm2, %v12140_v13, %v12144_v6  ;;  %v18933_v6 = vld [vmem:[%s23872_s20 + $0x304] sm:$0x1]  ;;  %v12510_v52 = vshll.u32 %v18937_v20, 16 }
 0x45a   : > { %v18902_v3 = vcombine.low %v12145_v25, %v12159_v9  ;;  %v12450_v50 = vrot.slane %v12448_v34, 5  ;;  %v12487_v25 = vshrl.u32 %v18934_v53, 16  ;;  %v12490_v9 = vshll.u32 %v18934_v53, 16 }
 0x45b   : > { %v12456_v42 = vrot.slane %v12454_v62, 5 }
 0x45c   : > { %v12451_v63 = vor.u32 %v12450_v50, %v12447_v51  ;;  %v12489_v59 = vrot.slane %v12487_v25, 4  ;;  %v12492_v37 = vrot.slane %v12490_v9, 5 }
 0x45d   : > { %20833 = vmatmul.mubr.msk.bf16.gmra.mrb[36].mxu1 %vm3657_vm7, %v26013_v1  ;;  %v28786_v1 = vld [vmem:[#allocation31_spill] sm:$0xff] }
 0x45e   : > { %20836 = vmatprep.mubr.msk.bf16.mxu1 %vm3657_vm7, %v26016_v47  ;;  %v28787_v47 = vld [vmem:[#allocation34_spill] sm:$0xff]  ;;  %v12493_v58 = vor.u32 %v12492_v37, %v12489_v59 }
 0x45f   : > { %21343 = vmatmul.mubr.msk.bf16.gmra.mrb[32].mxu0 %vm3657_vm7, %v18900_v0  ;;  %v18931_v0 = vld [vmem:[%s23872_s20 + $0x2fc] sm:$0x1] }
 0x460   : > { %21346 = vmatprep.mubr.msk.bf16.mxu0 %vm3657_vm7, %v18901_v40  ;;  %v12494_v34 = vrot.slane %v12493_v58, 4 }
 0x465   : > { %20837 = vmatmul.mubr.msk.bf16.gmra.mrb[40].mxu1 %vm3657_vm7, %v26034_v39  ;;  %v18922_v39 = vld [vmem:[%s23872_s20 + $0x2d8] sm:$0xf] }
 0x466   : > { %v12406_v54 = vshll.u32 %v18922_v39, 16 }
 0x467   : > { %21347 = vmatmul.mubr.msk.bf16.gmra.mrb[36].mxu0 %vm3657_vm7, %v18902_v3  ;;  %v12501_v3 = vshrl.u32 %v18936_v7, 16 }
 0x468   : > { %21352 = vmatprep.mubr.msk.bf16.mxu0 %vm3657_vm7, %v28775_v56  ;;  %v12403_v56 = vshrl.u32 %v18922_v39, 16  ;;  %v12408_v19 = vrot.slane %v12406_v54, 5  ;;  %v12468_v39 = vshll.u32 %v18931_v0, 16  ;;  %v12438_v54 = vrot.slane %v12437_v8, 4 }
 0x46a   : > { %v12405_v28 = vrot.slane %v12403_v56, 4 }
 0x46c   : > { %v12409_v57 = vor.u32 %v12408_v19, %v12405_v28  ;;  %v12503_v28 = vrot.slane %v12501_v3, 4 }
 0x46e   : > { %v12410_v2 = vrot.slane %v12409_v57, 4 }
 0x46f   : > { %21353 = vmatmul.mubr.msk.bf16.vlgmr.msra.gmra.mrb[8].mxu0 %vm3657_vm7, %v28778_v10  ;;  %v12417_v10 = vshrl.u32 %v18924_v45, 16  ;;  %v12479_v45 = vor.u32 %v12478_v26, %v12475_v43 }
 0x470   : > { %21356 = vmatprep.mubr.msk.bf16.mxu0 %vm3657_vm7, %v28779_v17  ;;  %v28789_v17 = vld [vmem:[#allocation42_spill] sm:$0xff]  ;;  %v12415_v40 = vsel %vm23429_vm2, %v12410_v2, %v12414_v49 }
 0x471   : > { %v12419_v32 = vrot.slane %v12417_v10, 4  ;;  %v12452_v10 = vrot.slane %v12451_v63, 4 }
 0x473   : > { %v12423_v23 = vor.u32 %v12422_v15, %v12419_v32  ;;  %v12470_v32 = vrot.slane %v12468_v39, 5  ;;  %v12480_v15 = vrot.slane %v12479_v45, 4  ;;  %v12457_v12 = vsel %vm23429_vm2, %v12452_v10, %v12456_v42 }
 0x475   : > { %v12424_v16 = vrot.slane %v12423_v23, 4 }
 0x477   : > { %21357 = vmatmul.mubr.msk.bf16.gmra.mrb[12].mxu0 %vm3657_vm7, %v28786_v1  ;;  %v12429_v13 = vsel %vm23429_vm2, %v12424_v16, %v12428_v46  ;;  %v12504_v1 = vshll.u32 %v18936_v7, 16  ;;  %v23085_v46 = vld [vmem:[%s28528_s8 + $0x10] sm:$0xff]  }
 0x478   : > { %21360 = vmatprep.mubr.msk.bf16.mxu0 %vm3657_vm7, %v28787_v47  ;;  %v18938_v56 = vcombine.low %v12415_v40, %v12429_v13  ;;  %21384 = vmatprep.subr.bf16.mxu1 %v23085_v46  ;;  %v26806_v40 = vld [vmem:[%s28528_s8] sm:$0xff]  }
 0x479   : > { %v12506_v19 = vrot.slane %v12504_v1, 5  ;;  %21385 = vmatpush3.bf16.msra.mxu1 %v23085_v46 }
 0x47a   : > { %21386 = vmatprep.subr.bf16.mxu1 %v23086_v41 }
 0x47b   : > { %v12507_v55 = vor.u32 %v12506_v19, %v12503_v28 }
 0x47d   : > { %v12508_v14 = vrot.slane %v12507_v55, 4  ;;  %21387 = vmatpush3.bf16.msra.mxu1 %v23086_v41 }
 0x47e   : > { %21396 = vmatprep.subr.bf16.mxu1 %v26806_v40 }
 0x47f   : > { %21361 = vmatmul.mubr.msk.bf16.gmra.mrb[16].mxu0 %vm3657_vm7, %v28788_v48  ;;  %v12442_v48 = vrot.slane %v12440_v31, 5 }
 0x480   : > { %21364 = vmatprep.mubr.msk.bf16.mxu0 %vm3657_vm7, %v28789_v17  ;;  %v18935_v17 = vld [vmem:[%s23872_s20 + $0x30c] sm:$0x1]  ;;  %s23298_s20 = smov 126  }
 0x481   : > { %v12443_v44 = vsel %vm23429_vm2, %v12438_v54, %v12442_v48  ;;  %v12496_v30 = vshll.u32 %v18935_v17, 16  ;;  %v26842_v17 = vld [vmem:[%s28527_s7] ss:$0 sm:$0xff] }
 0x482   : > { %v18939_v23 = vcombine.low %v12443_v44, %v12457_v12 }
 0x487   : > { %21365 = vmatmul.mubr.msk.bf16.gmra.mrb[20].mxu0 %vm3657_vm7, %v28790_v11 }
 0x488   : > { %21368 = vmatprep.mubr.msk.bf16.mxu0 %vm3657_vm7, %v26552_v5  ;;  %v12464_v5 = vrot.slane %v12462_v60, 5  ;;  %v12512_v60 = vrot.slane %v12510_v52, 5 }
 0x48a   : > { %v12465_v47 = vor.u32 %v12464_v5, %v12461_v36  ;;  %v12513_v22 = vsel %vm23429_vm2, %v12508_v14, %v12512_v60 }
 0x48f   : > { %21369 = vmatmul.mubr.msk.bf16.gmra.mrb[24].mxu0 %vm3657_vm7, %v26574_v21  ;;  %v12482_v21 = vshll.u32 %v18933_v6, 16 }
 0x490   : > { %21372 = vmatprep.mubr.msk.bf16.mxu0 %vm3657_vm7, %v26576_v33  ;;  %v12466_v33 = vrot.slane %v12465_v47, 4 }
 0x491   : > { %v12484_v4 = vrot.slane %v12482_v21, 5 }
 0x492   : > { %v12471_v11 = vsel %vm23429_vm2, %v12466_v33, %v12470_v32 }
 0x493   : > { %v12485_v57 = vsel %vm23429_vm2, %v12480_v15, %v12484_v4  ;;  %v28791_v4 = vld [vmem:[#allocation17_spill] sm:$0xff] }
 0x494   : > { %v18940_v18 = vcombine.low %v12471_v11, %v12485_v57  ;;  %v19018_v20 = vcombine.low %v28791_v4, %v28791_v4 }
 0x497   : > { %21373 = vmatmul.mubr.msk.bf16.gmra.mrb[28].mxu0 %vm3657_vm7, %v26594_v38  ;;  %v12498_v38 = vrot.slane %v12496_v30, 5 }
 0x498   : > { %21376 = vmatprep.mubr.msk.bf16.mxu0 %vm3657_vm7, %v18938_v56 }
 0x499   : > { %v12499_v35 = vsel %vm23429_vm2, %v12494_v34, %v12498_v38 }
 0x49a   : > { %v18941_v49 = vcombine.low %v12499_v35, %v12513_v22 }
 0x49f   : > { %21377 = vmatmul.mubr.msk.bf16.gmra.mrb[32].mxu0 %vm3657_vm7, %v18939_v23  ;;  %v13336_v23 = vshrl.u32 %v19018_v20, 16 }
 0x4a0   : > { %21380 = vmatprep.mubr.msk.bf16.mxu0 %vm3657_vm7, %v18940_v18 }
 0x4a7   : > { %21381 = vmatmul.mubr.msk.bf16.gmra.mrb[36].mxu0 %vm3657_vm7, %v18941_v49  ;;  %v13339_v49 = vshll.u32 %v19018_v20, 16 }
 0x500   : > { %v20810_v61 = vpop.f32.mrb[12].mxu1 }
 0x501   : > { %v7185_v29 = vpop.f32.mrb[13].mxu1 }
 0x502   : > { %v20811_v2 = vpop.f32.mrb[14].mxu1 }
 0x503   : > { %v7188_v16 = vpop.f32.mrb[15].mxu1 }
 0x508   : > { %v20814_v24 = vpop.f32.mrb[16].mxu1 }
 0x509   : > { %v7201_v51 = vpop.f32.mrb[17].mxu1 }
 0x50a   : > { %v26781_v50 = vpop.f32.mrb[18].mxu1 }
 0x50b   : > { %v26783_v53 = vpop.f32.mrb[19].mxu1 }
 0x510   : > { %v26785_v36 = vpop.f32.mrb[20].mxu1 }
 0x511   : > { %v26787_v5 = vpop.f32.mrb[21].mxu1 }
 0x512   : > { %v26789_v43 = vpop.f32.mrb[22].mxu1 }
 0x513   : > { %v26791_v26 = vpop.f32.mrb[23].mxu1 }
 0x518   : > { %v26793_v7 = vpop.f32.mrb[24].mxu1 }
 0x519   : > { %v26795_v31 = vpop.f32.mrb[25].mxu1 }
 0x51a   : > { %v26797_v62 = vpop.f32.mrb[26].mxu1 }
 0x51b   : > { %v26799_v0 = vpop.f32.mrb[27].mxu1 }
 0x520   : > { %v26801_v6 = vpop.f32.mrb[28].mxu1 }
 0x521   : > { %v26808_v13 = vpop.f32.mrb[29].mxu1 }
 0x522   : > { %v26810_v8 = vpop.f32.mrb[30].mxu1 }
 0x523   : > { %v26813_v63 = vpop.f32.mrb[31].mxu1 }
 0x528   : > { %v26815_v25 = vpop.f32.mrb[32].mxu1 }
 0x529   : > { %v26817_v9 = vpop.f32.mrb[33].mxu1 }
 0x52a   : > { %v26819_v3 = vpop.f32.mrb[34].mxu1 }
 0x52b   : > { %v26821_v1 = vpop.f32.mrb[35].mxu1 }
 0x530   : > { %v26823_v47 = vpop.f32.mrb[36].mxu1 }
 0x531   : > { %v26825_v39 = vpop.f32.mrb[37].mxu1 }
 0x532   : > { %v26827_v45 = vpop.f32.mrb[38].mxu1 }
 0x533   : > { %v26829_v21 = vpop.f32.mrb[39].mxu1 }
 0x538   : > { %v26831_v48 = vpop.f32.mrb[40].mxu1 }
 0x539   : > { %v26833_v56 = vpop.f32.mrb[41].mxu1 }
 0x53a   : > { %v26835_v54 = vpop.f32.mrb[42].mxu1 }
 0x53b   : > { %v26837_v10 = vpop.f32.mrb[43].mxu1 }
 0x542   : > { %v21354_v42 = vpop.f32.mrb[8].mxu0 }
 0x543   : > { %v21788_v59 = vadd.f32 %v21354_v42, %v20810_v61  ;;  %v12581_v37 = vpop.f32.mrb[9].mxu0 }
 0x544   : > { %v21789_v28 = vadd.f32 %v12581_v37, %v7185_v29  ;;  %v21355_v19 = vpop.f32.mrb[10].mxu0 }
 0x545   : > { %v12749_v33 = vadd.f32 %v21788_v59, %v26842_v17  ;;  %v21790_v32 = vadd.f32 %v21355_v19, %v20811_v2  ;;  %v12584_v15 = vpop.f32.mrb[11].mxu0  ;;  %v19019_v2 = vcombine.high %v28791_v4, %v28791_v4 }
 0x546   : > { %v12747_v44 = vadd.f32 %v21789_v28, %v26842_v17  ;;  %v21791_v30 = vadd.f32 %v12584_v15, %v7188_v16 }
 0x547   : > { %v12781_v12 = vmax.f32 %v12749_v33, 0.0  ;;  %v12750_v58 = vadd.f32 %v21790_v32, %v26842_v17 }
 0x548   : > { %v12779_v55 = vmax.f32 %v12747_v44, 0.0  ;;  %v12748_v52 = vadd.f32 %v21791_v30, %v26842_v17  ;;  %v13341_v44 = vrot.slane %v13339_v49, 5 }
 0x549   : > { %v19549_v11 = vpack.c.bf16 %v12781_v12, %v12781_v12  ;;  %v12782_v57 = vmax.f32 %v12750_v58, 0.0 }
 0x54a   : > { %v19547_v38 = vpack.c.bf16 %v12779_v55, %v12779_v55  ;;  %v12780_v18 = vmax.f32 %v12748_v52, 0.0  ;;  %v21358_v34 = vpop.f32.mrb[12].mxu0  ;;  %v13345_v55 = vshll.u32 %v19019_v2, 16 }
 0x54b   : > { %v26851_v14 = vsel %vm12847_vm14, %v19549_v11, 0  ;;  %v19550_v60 = vpack.c.bf16 %v12782_v57, %v12782_v57  ;;  %v21792_v35 = vadd.f32 %v21358_v34, %v20814_v24  ;;  %v12597_v22 = vpop.f32.mrb[13].mxu0  ;;  %v13338_v24 = vrot.slane %v13336_v23, 4 }
 0x54c   : > { %28792 = vst [vmem:[#allocation19_spill] sm:$0xff] %v26851_v14  ;;  %v26854_v46 = vsel %vm12847_vm14, %v19547_v38, 0  ;;  %v19548_v41 = vpack.c.bf16 %v12780_v18, %v12780_v18  ;;  %v21793_v61 = vadd.f32 %v12597_v22, %v7201_v51  ;;  %v21359_v29 = vpop.f32.mrb[14].mxu0 }
 0x54d   : > { %28793 = vst [vmem:[#allocation27_spill] sm:$0xff] %v26854_v46  ;;  %v26859_v16 = vsel %vm12847_vm14, %v19550_v60, 0  ;;  %v12753_v42 = vadd.f32 %v21792_v35, %v26842_v17  ;;  %v21794_v59 = vadd.f32 %v21359_v29, %v26781_v50  ;;  %v12600_v37 = vpop.f32.mrb[15].mxu0  ;;  %v13342_v34 = vor.u32 %v13341_v44, %v13338_v24 }
 0x54e   : > { %28794 = vst [vmem:[#allocation36_spill] sm:$0xff] %v26859_v16  ;;  %v26866_v19 = vsel %vm12847_vm14, %v19548_v41, 0  ;;  %v12751_v51 = vadd.f32 %v21793_v61, %v26842_v17  ;;  %v21795_v33 = vadd.f32 %v12600_v37, %v26783_v53 }
 0x54f   : > { %28795 = vst [vmem:[#allocation37_spill] sm:$0xff] %v26866_v19  ;;  %v12785_v15 = vmax.f32 %v12753_v42, 0.0  ;;  %v12754_v20 = vadd.f32 %v21794_v59, %v26842_v17  ;;  %v13347_v42 = vrot.slane %v13345_v55, 5 }
 0x550   : > { %v12783_v50 = vmax.f32 %v12751_v51, 0.0  ;;  %v12752_v30 = vadd.f32 %v21795_v33, %v26842_v17 }
 0x551   : > { %v19553_v12 = vpack.c.bf16 %v12785_v15, %v12785_v15  ;;  %v12786_v58 = vmax.f32 %v12754_v20, 0.0  ;;  %v13343_v15 = vrot.slane %v13342_v34, 4 }
 0x552   : > { %v19551_v52 = vpack.c.bf16 %v12783_v50, %v12783_v50  ;;  %v12784_v11 = vmax.f32 %v12752_v30, 0.0  ;;  %v21362_v57 = vpop.f32.mrb[16].mxu0 }
 0x553   : > { %v26875_v23 = vsel %vm12847_vm14, %v19553_v12, 0  ;;  %v19554_v53 = vpack.c.bf16 %v12786_v58, %v12786_v58  ;;  %v21796_v38 = vadd.f32 %v21362_v57, %v26785_v36  ;;  %v12613_v18 = vpop.f32.mrb[17].mxu0  ;;  %v26901_v57 = vsel %vm23429_vm2, %v13343_v15, %v13347_v42 }
 0x554   : > { %28796 = vst [vmem:[#allocation9_spill] sm:$0xff] %v26875_v23  ;;  %v26879_v60 = vsel %vm12847_vm14, %v19551_v52, 0  ;;  %v19552_v35 = vpack.c.bf16 %v12784_v11, %v12784_v11  ;;  %v21797_v22 = vadd.f32 %v12613_v18, %v26787_v5  ;;  %v21363_v49 = vpop.f32.mrb[18].mxu0 }
 0x555   : > { %28797 = vst [vmem:[#allocation26_spill] sm:$0xff] %v26879_v60  ;;  %v26883_v41 = vsel %vm12847_vm14, %v19554_v53, 0  ;;  %v12757_v61 = vadd.f32 %v21796_v38, %v26842_v17  ;;  %v21798_v29 = vadd.f32 %v21363_v49, %v26789_v43  ;;  %v12616_v2 = vpop.f32.mrb[19].mxu0 }
 0x556   : > { %28798 = vst [vmem:[#allocation10_spill] sm:$0xff] %v26883_v41  ;;  %v26890_v59 = vsel %vm12847_vm14, %v19552_v35, 0  ;;  %v12755_v37 = vadd.f32 %v21797_v22, %v26842_v17  ;;  %v21799_v5 = vadd.f32 %v12616_v2, %v26791_v26 }
 0x557   : > { %28799 = vst [vmem:[#allocation11_spill] sm:$0xff] %v26890_v59  ;;  %v12789_v51 = vmax.f32 %v12757_v61, 0.0  ;;  %v12758_v33 = vadd.f32 %v21798_v29, %v26842_v17 }
 0x558   : > { %v12787_v43 = vmax.f32 %v12755_v37, 0.0  ;;  %v12756_v20 = vadd.f32 %v21799_v5, %v26842_v17 }
 0x559   : > { %v19557_v44 = vpack.c.bf16 %v12789_v51, %v12789_v51  ;;  %v12790_v50 = vmax.f32 %v12758_v33, 0.0 }
 0x55a   : > { %v19555_v30 = vpack.c.bf16 %v12787_v43, %v12787_v43  ;;  %v12788_v12 = vmax.f32 %v12756_v20, 0.0  ;;  %v21366_v58 = vpop.f32.mrb[20].mxu0 }
 0x55b   : > { %v12899_v55 = vshrl.u32 %v19557_v44, 16  ;;  %v19558_v52 = vpack.c.bf16 %v12790_v50, %v12790_v50  ;;  %v21800_v11 = vadd.f32 %v21366_v58, %v26793_v7  ;;  %v12629_v26 = vpop.f32.mrb[21].mxu0  ;;  %v12902_v53 = vshll.u32 %v19557_v44, 16 }
 0x55c   : > { %v12885_v38 = vshrl.u32 %v19555_v30, 16  ;;  %v19556_v18 = vpack.c.bf16 %v12788_v12, %v12788_v12  ;;  %v21801_v34 = vadd.f32 %v12629_v26, %v26795_v31  ;;  %v21367_v35 = vpop.f32.mrb[22].mxu0  ;;  %v12888_v49 = vshll.u32 %v19555_v30, 16 }
 0x55d   : > { %v12901_v22 = vrot.slane %v12899_v55, 7  ;;  %v12906_v61 = vshrl.u32 %v19558_v52, 16  ;;  %v12761_v29 = vadd.f32 %v21800_v11, %v26842_v17  ;;  %v12632_v2 = vpop.f32.mrb[23].mxu0  ;;  %v12909_v5 = vshll.u32 %v19558_v52, 16 }
 0x55e   : > { %v12887_v37 = vrot.slane %v12885_v38, 7  ;;  %v12892_v7 = vshrl.u32 %v19556_v18, 16  ;;  %v12759_v51 = vadd.f32 %v21801_v34, %v26842_v17  ;;  %v21802_v43 = vadd.f32 %v21367_v35, %v26797_v62 }
 0x55f   : > { %v12904_v33 = vor.u32 %v12902_v53, %v12901_v22  ;;  %v12908_v42 = vrot.slane %v12906_v61, 7  ;;  %v12793_v15 = vmax.f32 %v12761_v29, 0.0  ;;  %v12895_v31 = vshll.u32 %v19556_v18, 16 }
 0x560   : > { %v12890_v20 = vor.u32 %v12888_v49, %v12887_v37  ;;  %v12894_v44 = vrot.slane %v12892_v7, 7  ;;  %v26908_v50 = vadd.f32 %v12632_v2, %v26799_v0  ;;  %v12791_v52 = vmax.f32 %v12759_v51, 0.0 }
 0x561   : > { %v26912_v12 = vsel %vm24407_vm11, 0, %v12904_v33  ;;  %v12911_v58 = vor.u32 %v12909_v5, %v12908_v42  ;;  %v19561_v55 = vpack.c.bf16 %v12793_v15, %v12793_v15  ;;  %v12762_v0 = vadd.f32 %v21802_v43, %v26842_v17 }
 0x562   : > { %28801 = vst [vmem:[#allocation12_spill] sm:$0xff] %v26912_v12  ;;  %v19080_v11 = vcombine.low %v26912_v12, %v26912_v12  ;;  %v19081_v26 = vcombine.high %v26912_v12, %v26912_v12  ;;  %v26920_v62 = vsel %vm24407_vm11, 0, %v12890_v20  ;;  %v26923_v53 = vpop.f32.mrb[24].mxu0  ;;  %v12897_v35 = vor.u32 %v12895_v31, %v12894_v44 }
 0x563   : > { %v19076_v38 = vcombine.low %v26920_v62, %v26920_v62  ;;  %v19077_v18 = vcombine.high %v26920_v62, %v26920_v62  ;;  %v26931_v34 = vsel %vm24407_vm11, 0, %v12911_v58  ;;  %v26933_v22 = vpop.f32.mrb[25].mxu0  ;;  %v12927_v33 = vshrl.u32 %v19561_v55, 16 }
 0x564   : > { %28802 = vst [vmem:[#allocation13_spill] sm:$0xff] %v26931_v34  ;;  %v13858_v49 = vshrl.u32 %v19080_v11, 16  ;;  %v13861_v61 = vshll.u32 %v19080_v11, 16  ;;  %v13867_v29 = vshll.u32 %v19081_v26, 16  ;;  %v26937_v37 = vpop.f32.mrb[26].mxu0  ;;  %v19082_v51 = vcombine.low %v26931_v34, %v26931_v34 }
 0x565   : > { %v13830_v5 = vshrl.u32 %v19076_v38, 16  ;;  %v13833_v7 = vshll.u32 %v19076_v38, 16  ;;  %v26941_v42 = vpop.f32.mrb[27].mxu0  ;;  %v26943_v20 = vshll.u32 %v19077_v18, 16  ;;  %v19083_v44 = vcombine.high %v26931_v34, %v26931_v34 }
 0x566   : > { %v13860_v15 = vrot.slane %v13858_v49, 4  ;;  %v13863_v43 = vrot.slane %v13861_v61, 5  ;;  %v13869_v31 = vrot.slane %v13867_v29, 5  ;;  %v13872_v26 = vshrl.u32 %v19082_v51, 16 }
 0x567   : > { %28803 = vst [vmem:[#allocation14_spill] sm:$0xff] %v26943_v20  ;;  %v26947_v58 = vrot.slane %v13830_v5, 4  ;;  %v26949_v11 = vrot.slane %v13833_v7, 5  ;;  %v13875_v36 = vshll.u32 %v19082_v51, 16  ;;  %v13881_v24 = vshll.u32 %v19083_v44, 16 }
 0x568   : > { %v13864_v38 = vor.u32 %v13863_v43, %v13860_v15  ;;  %v26953_v28 = vsel %vm24407_vm11, 0, %v12897_v35  ;;  %v13874_v49 = vrot.slane %v13872_v26, 4  ;;  %v12929_v29 = vrot.slane %v12927_v33, 7 }
 0x569   : > { %v19078_v18 = vcombine.low %v26953_v28, %v26953_v28  ;;  %v19079_v61 = vcombine.high %v26953_v28, %v26953_v28  ;;  %v13877_v32 = vrot.slane %v13875_v36, 5  ;;  %v12930_v2 = vshll.u32 %v19561_v55, 16 }
 0x56a   : > { %v13865_v5 = vrot.slane %v13864_v38, 4  ;;  %v26960_v15 = vpop.f32.mrb[28].mxu0  ;;  %v13883_v51 = vrot.slane %v13881_v24, 5  ;;  %v19559_v35 = vpack.c.bf16 %v12791_v52, %v12791_v52  ;;  %v12794_v60 = vmax.f32 %v12762_v0, 0.0 }
 0x56b   : > { %v13844_v43 = vshrl.u32 %v19078_v18, 16  ;;  %v13847_v44 = vshll.u32 %v19078_v18, 16  ;;  %v26962_v41 = vpop.f32.mrb[29].mxu0  ;;  %v13878_v26 = vor.u32 %v13877_v32, %v13874_v49  ;;  %v26964_v23 = vshll.u32 %v19079_v61, 16 }
 0x56c   : > { %v12932_v59 = vor.u32 %v12930_v2, %v12929_v29  ;;  %v26966_v16 = vpop.f32.mrb[30].mxu0  ;;  %v26970_v33 = vsel %vm23429_vm2, %v13865_v5, %v13869_v31  ;;  %v12913_v24 = vshrl.u32 %v19559_v35, 16  ;;  %v12916_v2 = vshll.u32 %v19559_v35, 16 }
 0x56d   : > { %28804 = vst [vmem:[#allocation7_spill] sm:$0xff] %v26964_v23  ;;  %v26972_v36 = vrot.slane %v13844_v43, 4  ;;  %v26974_v55 = vrot.slane %v13847_v44, 5  ;;  %v26976_v38 = vpop.f32.mrb[31].mxu0  ;;  %v13879_v52 = vrot.slane %v13878_v26, 4  ;;  %v19562_v0 = vpack.c.bf16 %v12794_v60, %v12794_v60 }
 0x56e   : > { %v26980_v32 = vsel %vm24407_vm11, 0, %v12932_v59  ;;  %v12915_v18 = vrot.slane %v12913_v24, 7  ;;  %v12760_v61 = vadd.f32 %v26908_v50, %v26842_v17  ;;  %v21804_v60 = vadd.f32 %v26923_v53, %v26801_v6 }
 0x56f   : > { %v19088_v49 = vcombine.low %v26980_v32, %v26980_v32  ;;  %v19089_v31 = vcombine.high %v26980_v32, %v26980_v32  ;;  %v26990_v29 = vsel %vm23429_vm2, %v13879_v52, %v13883_v51  ;;  %v12934_v59 = vshrl.u32 %v19562_v0, 16 }
 0x570   : > { %v12918_v35 = vor.u32 %v12916_v2, %v12915_v18  ;;  %v12937_v26 = vshll.u32 %v19562_v0, 16  ;;  %v12792_v14 = vmax.f32 %v12760_v61, 0.0  ;;  %v12765_v24 = vadd.f32 %v21804_v60, %v26842_v17 }
 0x571   : > { %v13914_v43 = vshrl.u32 %v19088_v49, 16  ;;  %v13917_v44 = vshll.u32 %v19088_v49, 16  ;;  %v12936_v7 = vrot.slane %v12934_v59, 7  ;;  %v21805_v50 = vadd.f32 %v26933_v22, %v26808_v13 }
 0x572   : > { %v26998_v19 = vpop.f32.mrb[32].mxu0  ;;  %v27004_v5 = vshll.u32 %v19089_v31, 16  ;;  %v27008_v6 = vsel %vm24407_vm11, 0, %v12918_v35  ;;  %v19560_v0 = vpack.c.bf16 %v12792_v14, %v12792_v14  ;;  %v12797_v18 = vmax.f32 %v12765_v24, 0.0 }
 0x573   : > { %v27000_v51 = vrot.slane %v13914_v43, 4  ;;  %v27002_v52 = vrot.slane %v13917_v44, 5  ;;  %v27010_v53 = vpop.f32.mrb[33].mxu0  ;;  %v19084_v2 = vcombine.low %v27008_v6, %v27008_v6  ;;  %v19085_v13 = vcombine.high %v27008_v6, %v27008_v6 }
 0x574   : > { %28805 = vst [vmem:[#allocation24_spill] sm:$0xff] %v27004_v5  ;;  %v12939_v22 = vor.u32 %v12937_v26, %v12936_v7  ;;  %v27016_v49 = vpop.f32.mrb[34].mxu0  ;;  %v12763_v31 = vadd.f32 %v21805_v50, %v26842_v17  ;;  %v21806_v61 = vadd.f32 %v26937_v37, %v26810_v8  ;;  %v21807_v59 = vadd.f32 %v26941_v42, %v26813_v63 }
 0x575   : > { %v27023_v60 = vpop.f32.mrb[35].mxu0  ;;  %v13886_v43 = vshrl.u32 %v19084_v2, 16  ;;  %v13889_v44 = vshll.u32 %v19084_v2, 16  ;;  %v27025_v35 = vshll.u32 %v19085_v13, 16  ;;  %v12920_v37 = vshrl.u32 %v19560_v0, 16 }
 0x576   : > { %v27029_v14 = vsel %vm24407_vm11, 0, %v12939_v22  ;;  %v12923_v24 = vshll.u32 %v19560_v0, 16  ;;  %v19565_v50 = vpack.c.bf16 %v12797_v18, %v12797_v18  ;;  %v12795_v7 = vmax.f32 %v12763_v31, 0.0 }
 0x577   : > { %v19090_v26 = vcombine.low %v27029_v14, %v27029_v14  ;;  %v19091_v8 = vcombine.high %v27029_v14, %v27029_v14  ;;  %v27036_v63 = vrot.slane %v13886_v43, 4  ;;  %v27038_v42 = vrot.slane %v13889_v44, 5 }
 0x578   : > { %v12922_v46 = vrot.slane %v12920_v37, 7  ;;  %v12766_v12 = vadd.f32 %v21806_v61, %v26842_v17  ;;  %v12764_v5 = vadd.f32 %v21807_v59, %v26842_v17  ;;  %v27050_v0 = vsel %vm12847_vm14, %v19565_v50, 0 }
 0x579   : > { %v13928_v13 = vshrl.u32 %v19090_v26, 16  ;;  %v13931_v22 = vshll.u32 %v19090_v26, 16  ;;  %v27041_v34 = vshll.u32 %v19091_v8, 16  ;;  %28806 = vst [vmem:[#allocation21_spill] sm:$0xff] %v27050_v0  ;;  %v19563_v2 = vpack.c.bf16 %v12795_v7, %v12795_v7 }
 0x57a   : > { %v21382_v23 = vpop.f32.mrb[36].mxu0  ;;  %v12925_v44 = vor.u32 %v12923_v24, %v12922_v46  ;;  %v12798_v26 = vmax.f32 %v12766_v12, 0.0  ;;  %v12796_v37 = vmax.f32 %v12764_v5, 0.0  ;;  %v21808_v31 = vadd.f32 %v26960_v15, %v26815_v25 }
 0x57b   : > { %v27045_v20 = vrot.slane %v13928_v13, 4  ;;  %v27047_v43 = vrot.slane %v13931_v22, 5  ;;  %v12693_v18 = vpop.f32.mrb[37].mxu0  ;;  %v21809_v59 = vadd.f32 %v26962_v41, %v26817_v9  ;;  %v21810_v46 = vadd.f32 %v26966_v16, %v26819_v3 }
 0x57c   : > { %v27054_v8 = vpop.f32.mrb[38].mxu0  ;;  %v27058_v61 = vsel %vm24407_vm11, 0, %v12925_v44  ;;  %v21811_v7 = vadd.f32 %v26976_v38, %v26821_v1  ;;  %v27073_v5 = vsel %vm12847_vm14, %v19563_v2, 0  ;;  %v19566_v24 = vpack.c.bf16 %v12798_v26, %v12798_v26 }
 0x57d   : > { %v27066_v12 = vpop.f32.mrb[39].mxu0  ;;  %v19086_v25 = vcombine.low %v27058_v61, %v27058_v61  ;;  %v19087_v15 = vcombine.high %v27058_v61, %v27058_v61  ;;  %v28807_v9 = vmov 0   ;;  %v19564_v50 = vpack.c.bf16 %v12796_v37, %v12796_v37 }
 0x57e   : > { %v18998_v41 = vcombine.low %v28807_v9, %v27073_v5  ;;  %v12769_v3 = vadd.f32 %v21808_v31, %v26842_v17  ;;  %v12767_v1 = vadd.f32 %v21809_v59, %v26842_v17  ;;  %v27081_v22 = vsel %vm12847_vm14, %v19566_v24, 0  ;;  %v23088_v24 = vld [vmem:[%s28528_s8 + $0x8] sm:$0xff]  }
 0x57f   : > { %v13900_v38 = vshrl.u32 %v19086_v25, 16  ;;  %v13903_v13 = vshll.u32 %v19086_v25, 16  ;;  %28808 = vst [vmem:[#allocation8_spill] sm:$0xff] %v27081_v22  ;;  %v27086_v44 = vsel %vm12847_vm14, %v19564_v50, 0  ;;  %v27093_v59 = vshll.u32 %v19087_v15, 16 }
 0x580   : > { %28809 = vst [vmem:[#allocation22_spill] sm:$0xff] %v27086_v44  ;;  %v12801_v26 = vmax.f32 %v12769_v3, 0.0  ;;  %v12799_v9 = vmax.f32 %v12767_v1, 0.0  ;;  %21388 = vmatprep.mubr.msk.bf16.mxu1 %vm693_vm3, %v18998_v41  ;;  %v18999_v25 = vcombine.low %v27086_v44, %v27050_v0  ;;  %v12770_v41 = vadd.f32 %v21810_v46, %v26842_v17 }
 0x581   : > { %v27089_v37 = vrot.slane %v13900_v38, 4  ;;  %v27091_v31 = vrot.slane %v13903_v13, 5  ;;  %v12768_v38 = vadd.f32 %v21811_v7, %v26842_v17  ;;  %v21812_v15 = vadd.f32 %v26998_v19, %v26823_v47 }
 0x582   : > { %v19569_v3 = vpack.c.bf16 %v12801_v26, %v12801_v26  ;;  %v19567_v1 = vpack.c.bf16 %v12799_v9, %v12799_v9  ;;  %21389 = vmatmul.mubr.msk.bf16.vlgmr.msra.gmra.mrb[44].mxu1 %vm693_vm3, %v18999_v25  ;;  %v21813_v13 = vadd.f32 %v27010_v53, %v26825_v39  ;;  %v21814_v2 = vadd.f32 %v27016_v49, %v26827_v45  ;;  %v27127_v53 = vld [vmem:[%s28528_s8 + $0x20] sm:$0xff]  }
 0x583   : > { %v12802_v46 = vmax.f32 %v12770_v41, 0.0  ;;  %v21815_v7 = vadd.f32 %v27023_v60, %v26829_v21  ;;  %21397 = vmatpush3.bf16.msra.mxu1 %v26806_v40  ;;  %v12800_v19 = vmax.f32 %v12768_v38, 0.0  ;;  %v12773_v39 = vadd.f32 %v21812_v15, %v26842_v17 }
 0x584   : > { %v27112_v16 = vsel %vm12847_vm14, %v19569_v3, 0  ;;  %v27115_v26 = vsel %vm12847_vm14, %v19567_v1, 0  ;;  %v12771_v45 = vadd.f32 %v21813_v13, %v26842_v17  ;;  %21398 = vmatprep.subr.bf16.mxu1 %v23088_v24  ;;  %v12774_v9 = vadd.f32 %v21814_v2, %v26842_v17 }
 0x585   : > { %28810 = vst [vmem:[#allocation23_spill] sm:$0xff] %v27112_v16  ;;  %28811 = vst [vmem:[#allocation40_spill] sm:$0xff] %v27115_v26  ;;  %v19000_v47 = vcombine.low %v27081_v22, %v27115_v26  ;;  %v19570_v49 = vpack.c.bf16 %v12802_v46, %v12802_v46  ;;  %v12772_v21 = vadd.f32 %v21815_v7, %v26842_v17  ;;  %v12805_v25 = vmax.f32 %v12773_v39, 0.0 }
 0x586   : > { %v21816_v40 = vadd.f32 %v21382_v23, %v26831_v48  ;;  %v19568_v60 = vpack.c.bf16 %v12800_v19, %v12800_v19  ;;  %v12803_v3 = vmax.f32 %v12771_v45, 0.0  ;;  %v21817_v1 = vadd.f32 %v12693_v18, %v26833_v56 }
 0x587   : > { %21392 = vmatprep.mubr.msk.bf16.mxu1 %vm693_vm3, %v19000_v47  ;;  %v27135_v41 = vsel %vm12847_vm14, %v19570_v49, 0  ;;  %v12806_v38 = vmax.f32 %v12774_v9, 0.0  ;;  %v12804_v15 = vmax.f32 %v12772_v21, 0.0  ;;  %21399 = vmatpush3.bf16.msra.mxu1 %v23088_v24  ;;  %v19573_v23 = vpack.c.bf16 %v12805_v25, %v12805_v25 }
 0x588   : > { %28812 = vst [vmem:[#allocation3_spill] sm:$0xff] %v27135_v41  ;;  %v12777_v13 = vadd.f32 %v21816_v40, %v26842_v17  ;;  %v27141_v48 = vsel %vm12847_vm14, %v19568_v60, 0  ;;  %v19571_v46 = vpack.c.bf16 %v12803_v3, %v12803_v3  ;;  %21408 = vmatprep.subr.bf16.mxu1 %v27127_v53  ;;  %v12775_v2 = vadd.f32 %v21817_v1, %v26842_v17 }
 0x589   : > { %28813 = vst [vmem:[#allocation28_spill] sm:$0xff] %v27141_v48  ;;  %v19001_v56 = vcombine.low %v27141_v48, %v27112_v16  ;;  %v19574_v7 = vpack.c.bf16 %v12806_v38, %v12806_v38  ;;  %v19572_v47 = vpack.c.bf16 %v12804_v15, %v12804_v15  ;;  %v13027_v19 = vshrl.u32 %v19573_v23, 16 }
 0x58a   : > { %v13030_v24 = vshll.u32 %v19573_v23, 16  ;;  %v13013_v39 = vshrl.u32 %v19571_v46, 16  ;;  %v13016_v45 = vshll.u32 %v19571_v46, 16  ;;  %v12809_v3 = vmax.f32 %v12777_v13, 0.0 }
 0x58b   : > { %v13034_v49 = vshrl.u32 %v19574_v7, 16  ;;  %v13037_v9 = vshll.u32 %v19574_v7, 16  ;;  %v13020_v21 = vshrl.u32 %v19572_v47, 16  ;;  %v13023_v40 = vshll.u32 %v19572_v47, 16  ;;  %21393 = vmatmul.mubr.msk.bf16.gmra.mrb[48].mxu1 %vm693_vm3, %v19001_v56 }
 0x58c   : > { %v13029_v60 = vrot.slane %v13027_v19, 7  ;;  %v13015_v25 = vrot.slane %v13013_v39, 7  ;;  %v21818_v38 = vadd.f32 %v27054_v8, %v26835_v54  ;;  %v21819_v15 = vadd.f32 %v27066_v12, %v26837_v10 }
 0x58d   : > { %v13036_v50 = vrot.slane %v13034_v49, 7  ;;  %v13022_v41 = vrot.slane %v13020_v21, 7  ;;  %v19577_v47 = vpack.c.bf16 %v12809_v3, %v12809_v3  ;;  %v12807_v19 = vmax.f32 %v12775_v2, 0.0 }
 0x58e   : > { %v13032_v46 = vor.u32 %v13030_v24, %v13029_v60  ;;  %v13018_v7 = vor.u32 %v13016_v45, %v13015_v25  ;;  %v12778_v13 = vadd.f32 %v21818_v38, %v26842_v17  ;;  %v12776_v10 = vadd.f32 %v21819_v15, %v26842_v17 }
 0x58f   : > { %v13039_v18 = vor.u32 %v13037_v9, %v13036_v50  ;;  %v13025_v56 = vor.u32 %v13023_v40, %v13022_v41  ;;  %v13055_v8 = vshrl.u32 %v19577_v47, 16  ;;  %v13058_v2 = vshll.u32 %v19577_v47, 16 }
 0x590   : > { %v27158_v1 = vsel %vm24407_vm11, 0, %v13032_v46  ;;  %v27162_v54 = vsel %vm24407_vm11, 0, %v13018_v7  ;;  %v19575_v40 = vpack.c.bf16 %v12807_v19, %v12807_v19  ;;  %v12810_v46 = vmax.f32 %v12778_v13, 0.0 }
 0x591   : > { %v19024_v12 = vcombine.low %v27158_v1, %v27158_v1  ;;  %v19025_v50 = vcombine.high %v27158_v1, %v27158_v1  ;;  %v27171_v41 = vcombine.low %v27162_v54, %v27162_v54  ;;  %v19021_v24 = vcombine.high %v27162_v54, %v27162_v54 }
 0x592   : > { %v27177_v39 = vsel %vm24407_vm11, 0, %v13039_v18  ;;  %v27181_v17 = vsel %vm24407_vm11, 0, %v13025_v56  ;;  %v13057_v45 = vrot.slane %v13055_v8, 7  ;;  %v13044_v48 = vshll.u32 %v19575_v40, 16 }
 0x593   : > { %v13378_v49 = vshrl.u32 %v19024_v12, 16  ;;  %v13381_v9 = vshll.u32 %v19024_v12, 16  ;;  %v27183_v21 = vshll.u32 %v19025_v50, 16  ;;  %v13350_v60 = vshrl.u32 %v27171_v41, 16 }
 0x594   : > { %v13353_v25 = vshll.u32 %v27171_v41, 16  ;;  %v27189_v3 = vcombine.low %v27177_v39, %v27177_v39  ;;  %v19009_v7 = vcombine.low %v27181_v17, %v27158_v1  ;;  %v19022_v19 = vcombine.low %v27181_v17, %v27181_v17 }
 0x595   : > { %v13380_v38 = vrot.slane %v13378_v49, 4  ;;  %v13383_v15 = vrot.slane %v13381_v9, 5  ;;  %v13389_v47 = vrot.slane %v27183_v21, 5  ;;  %v19023_v8 = vcombine.high %v27181_v17, %v27181_v17 }
 0x596   : > { %v13392_v56 = vshrl.u32 %v27189_v3, 16  ;;  %v13395_v50 = vshll.u32 %v27189_v3, 16  ;;  %v13060_v41 = vor.u32 %v13058_v2, %v13057_v45  ;;  %v13041_v49 = vshrl.u32 %v19575_v40, 16 }
 0x597   : > { %v13384_v12 = vor.u32 %v13383_v15, %v13380_v38  ;;  %v13364_v9 = vshrl.u32 %v19022_v19, 16  ;;  %v13367_v18 = vshll.u32 %v19022_v19, 16  ;;  %v13373_v23 = vshll.u32 %v19023_v8, 16 }
 0x598   : > { %v27206_v21 = vsel %vm24407_vm11, 0, %v13060_v41  ;;  %v13043_v16 = vrot.slane %v13041_v49, 7  ;;  %v12808_v26 = vmax.f32 %v12776_v10, 0.0  ;;  %v19578_v3 = vpack.c.bf16 %v12810_v46, %v12810_v46 }
 0x599   : > { %v13385_v22 = vrot.slane %v13384_v12, 4  ;;  %v13366_v0 = vrot.slane %v13364_v9, 4  ;;  %v13369_v44 = vrot.slane %v13367_v18, 5  ;;  %v27210_v38 = vcombine.low %v27206_v21, %v27206_v21 }
 0x59a   : > { %v13375_v2 = vrot.slane %v13373_v23, 5  ;;  %v13046_v45 = vor.u32 %v13044_v48, %v13043_v16  ;;  %v19576_v15 = vpack.c.bf16 %v12808_v26, %v12808_v26  ;;  %v19008_v10 = vcombine.low %v28791_v4, %v27162_v54 }
 0x59b   : > { %v13370_v19 = vor.u32 %v13369_v44, %v13366_v0  ;;  %v13062_v12 = vshrl.u32 %v19578_v3, 16  ;;  %v23090_v0 = vld [vmem:[%s28528_s8 + $0x28] sm:$0xff]   ;;  %v13065_v26 = vshll.u32 %v19578_v3, 16  ;;  %v13352_v49 = vrot.slane %v13350_v60, 4 }
 0x59c   : > { %v27220_v18 = vsel %vm24407_vm11, 0, %v13046_v45  ;;  %v13048_v23 = vshrl.u32 %v19576_v15, 16  ;;  %v13051_v48 = vshll.u32 %v19576_v15, 16  ;;  %21400 = vmatprep.mubr.msk.bf16.mxu1 %vm693_vm3, %v19008_v10  ;;  %v13359_v13 = vshll.u32 %v19021_v24, 16 }
 0x59d   : > { %v13371_v16 = vrot.slane %v13370_v19, 4  ;;  %v19028_v44 = vcombine.low %v27220_v18, %v27220_v18  ;;  %v13064_v4 = vrot.slane %v13062_v12, 7  ;;  %21401 = vmatmul.mubr.msk.bf16.vlgmr.msra.gmra.mrb[44].mxu1 %vm693_vm3, %v19009_v7  ;;  %v19010_v41 = vcombine.low %v27177_v39, %v27220_v18  ;;  %v27238_v7 = vld [vmem:[%s28528_s8 + $0x30] sm:$0xff]  }
 0x59e   : > { %v13050_v46 = vrot.slane %v13048_v23, 7  ;;  %v19029_v9 = vcombine.high %v27220_v18, %v27220_v18  ;;  %21409 = vmatpush3.bf16.msra.mxu1 %v27127_v53  ;;  %v13355_v19 = vrot.slane %v13353_v25, 5  ;;  %v13394_v10 = vrot.slane %v13392_v56, 4 }
 0x59f   : > { %v13406_v45 = vshrl.u32 %v19028_v44, 16  ;;  %v13067_v3 = vor.u32 %v13065_v26, %v13064_v4  ;;  %21404 = vmatprep.mubr.msk.bf16.mxu1 %vm693_vm3, %v19010_v41  ;;  %21410 = vmatprep.subr.bf16.mxu1 %v23090_v0  ;;  %v27242_v60 = vsel %vm23429_vm2, %v13371_v16, %v13375_v2  ;;  %v13409_v12 = vshll.u32 %v19028_v44, 16 }
 0x5a0   : > { %v13053_v15 = vor.u32 %v13051_v48, %v13050_v46  ;;  %v13356_v23 = vor.u32 %v13355_v19, %v13352_v49  ;;  %v27246_v53 = vsel %vm23429_vm2, %v13385_v22, %v13389_v47  ;;  %v13397_v24 = vrot.slane %v13395_v50, 5 }
 0x5a1   : > { %v27250_v25 = vsel %vm24407_vm11, 0, %v13067_v3  ;;  %v19039_v2 = vcombine.low %v27242_v60, %v27246_v53  ;;  %v28814_v56 = vcombine.high %v27177_v39, %v27177_v39  ;;  %v13361_v44 = vrot.slane %v13359_v13, 5 }
 0x5a2   : > { %v27254_v26 = vsel %vm24407_vm11, 0, %v13053_v15  ;;  %v19134_v22 = vcombine.low %v27250_v25, %v27250_v25  ;;  %v19135_v47 = vcombine.high %v27250_v25, %v27250_v25  ;;  %21411 = vmatpush3.bf16.msra.mxu1 %v23090_v0  ;;  %v13357_v46 = vrot.slane %v13356_v23, 4 }
 0x5a3   : > { %v13401_v16 = vshll.u32 %v28814_v56, 16  ;;  %v19030_v50 = vcombine.low %v27254_v26, %v27254_v26  ;;  %v19031_v48 = vcombine.high %v27254_v26, %v27254_v26  ;;  %v19011_v4 = vcombine.low %v27254_v26, %v27206_v21  ;;  %21420 = vmatprep.subr.bf16.mxu1 %v27238_v7 }
 0x5a4   : > { %v13398_v41 = vor.u32 %v13397_v24, %v13394_v10  ;;  %v14275_v49 = vshrl.u32 %v19134_v22, 16  ;;  %v14278_v19 = vshll.u32 %v19134_v22, 16  ;;  %v27275_v13 = vsel %vm23429_vm2, %v13357_v46, %v13361_v44 }
 0x5a5   : > { %v13420_v3 = vshrl.u32 %v19030_v50, 16  ;;  %v13403_v15 = vrot.slane %v13401_v16, 5  ;;  %v13423_v56 = vshll.u32 %v19030_v50, 16  ;;  %21405 = vmatmul.mubr.msk.bf16.gmra.mrb[48].mxu1 %vm693_vm3, %v19011_v4  ;;  %v13408_v40 = vrot.slane %v13406_v45, 4 }
 0x5a6   : > { %v13399_v0 = vrot.slane %v13398_v41, 4  ;;  %v27277_v8 = vrot.slane %v14275_v49, 4  ;;  %v27279_v30 = vrot.slane %v14278_v19, 5  ;;  %v27281_v23 = vshll.u32 %v19135_v47, 16 }
 0x5a7   : > { %v19038_v10 = vcombine.low %v26901_v57, %v27275_v13  ;;  %v13411_v16 = vrot.slane %v13409_v12, 5  ;;  %v13415_v22 = vshll.u32 %v19029_v9, 16  ;;  %v13422_v50 = vrot.slane %v13420_v3, 4 }
 0x5a8   : > { %v27287_v24 = vsel %vm23429_vm2, %v13399_v0, %v13403_v15  ;;  %v13425_v44 = vrot.slane %v13423_v56, 5  ;;  %v13429_v4 = vshll.u32 %v19031_v48, 16  ;;  %v28815_v47 = vshrl.u32 %v27210_v38, 16 }
 0x5a9   : > { %21412 = vmatprep.mubr.msk.bf16.mxu1 %vm693_vm3, %v19038_v10  ;;  %v19141_v45 = vcombine.low %v27246_v53, %v27287_v24  ;;  %v13412_v41 = vor.u32 %v13411_v16, %v13408_v40  ;;  %v13417_v49 = vrot.slane %v13415_v22, 5  ;;  %v28816_v57 = vshll.u32 %v27210_v38, 16  ;;  %v23092_v40 = vld [vmem:[%s28528_s8 + $0x38] sm:$0xff]  }
 0x5aa   : > { %v13436_v46 = vrot.slane %v28815_v47, 4  ;;  %v28817_v12 = vcombine.high %v27206_v21, %v27206_v21  ;;  %v13426_v3 = vor.u32 %v13425_v44, %v13422_v50  ;;  %v13431_v15 = vrot.slane %v13429_v4, 5  ;;  %v28818_v44 = vld [vmem:[#allocation14_spill] sm:$0xff] }
 0x5ab   : > { %v13439_v19 = vrot.slane %v28816_v57, 5  ;;  %v19052_v0 = vcombine.low %v26920_v62, %v26953_v28  ;;  %v19054_v48 = vcombine.low %v27008_v6, %v27058_v61  ;;  %v13413_v56 = vrot.slane %v13412_v41, 4 }
 0x5ac   : > { %v13443_v9 = vshll.u32 %v28817_v12, 16  ;;  %v19055_v16 = vcombine.low %v26980_v32, %v27029_v14  ;;  %v13427_v22 = vrot.slane %v13426_v3, 4  ;;  %v13836_v50 = vor.u32 %v26949_v11, %v26947_v58 }
 0x5ad   : > { %v13440_v10 = vor.u32 %v13439_v19, %v13436_v46  ;;  %v13850_v28 = vor.u32 %v26974_v55, %v26972_v36  ;;  %v19097_v62 = vcombine.low %v26970_v33, %v26990_v29  ;;  %21413 = vmatmul.mubr.msk.bf16.vlgmr.msra.gmra.mrb[44].mxu1 %vm693_vm3, %v19039_v2  ;;  %v27317_v6 = vsel %vm23429_vm2, %v13413_v56, %v13417_v49  ;;  %v28820_v46 = vld [vmem:[#allocation7_spill] sm:$0xff]  ;;  %v23100_v33 = vld [vmem:[%s28528_s8 + $0x78] sm:$0xff]  }
 0x5ae   : > { %v13445_v38 = vrot.slane %v13443_v9, 5  ;;  %v13892_v32 = vor.u32 %v27038_v42, %v27036_v63  ;;  %v13906_v14 = vor.u32 %v27091_v31, %v27089_v37  ;;  %21421 = vmatpush3.bf16.msra.mxu1 %v27238_v7  ;;  %v19040_v58 = vcombine.low %v27287_v24, %v27317_v6  ;;  %v23093_v63 = vld [vmem:[%s28528_s8 + $0x40] sm:$0xff]  }
 0x5af   : > { %v13441_v61 = vrot.slane %v13440_v10, 4  ;;  %v27328_v11 = vsel %vm23429_vm2, %v13427_v22, %v13431_v15  ;;  %v13837_v36 = vrot.slane %v13836_v50, 4  ;;  %v13851_v55 = vrot.slane %v13850_v28, 4  ;;  %21422 = vmatprep.subr.bf16.mxu1 %v23092_v40  ;;  %v28827_v50 = vld [vmem:[#allocation12_spill] sm:$0xff]  ;;  %v28828_v28 = vld [vmem:[#allocation13_spill] sm:$0xff] }
 0x5b0   : > { %v13893_v42 = vrot.slane %v13892_v32, 4  ;;  %v13907_v37 = vrot.slane %v13906_v14, 4  ;;  %v13920_v31 = vor.u32 %v27002_v52, %v27000_v51  ;;  %21416 = vmatprep.mubr.msk.bf16.mxu1 %vm693_vm3, %v19040_v58  ;;  %v28819_v4 = vrot.slane %v28818_v44, 5  ;;  %v28833_v32 = vld [vmem:[#allocation19_spill] sm:$0xff]  ;;  %v28836_v58 = vld [vmem:[#allocation26_spill] sm:$0xff]  ;;  %v28846_v44 = vld [vmem:[#allocation8_spill] sm:$0xff] }
 0x5b1   : > { %v27332_v2 = vsel %vm23429_vm2, %v13441_v61, %v13445_v38  ;;  %v28821_v41 = vrot.slane %v28820_v46, 5  ;;  %v13934_v57 = vor.u32 %v27047_v43, %v27045_v20  ;;  %v28822_v51 = vrot.slane %v27025_v35, 5  ;;  %v28824_v38 = vld [vmem:[#allocation24_spill] sm:$0xff]  ;;  %v23096_v61 = vld [vmem:[%s28528_s8 + $0x58] sm:$0xff]  }
 0x5b2   : > { %v19041_v7 = vcombine.low %v27328_v11, %v27332_v2  ;;  %v13842_v47 = vsel %vm23429_vm2, %v13837_v36, %v28819_v4  ;;  %v28823_v12 = vrot.slane %v27093_v59, 5  ;;  %v13921_v3 = vrot.slane %v13920_v31, 4  ;;  %21423 = vmatpush3.bf16.msra.mxu1 %v23092_v40  ;;  %v28843_v31 = vld [vmem:[#allocation22_spill] sm:$0xff]  ;;  %v28849_v46 = vld [vmem:[#allocation28_spill] sm:$0xff] }
 0x5b3   : > { %v13856_v49 = vsel %vm23429_vm2, %v13851_v55, %v28821_v41  ;;  %v13898_v52 = vsel %vm23429_vm2, %v13893_v42, %v28822_v51  ;;  %v13935_v56 = vrot.slane %v13934_v57, 4  ;;  %v19110_v10 = vcombine.low %v27162_v54, %v27181_v17  ;;  %21432 = vmatprep.subr.bf16.mxu1 %v23093_v63  ;;  %v28839_v55 = vld [vmem:[#allocation9_spill] sm:$0xff]  ;;  %v23098_v42 = vld [vmem:[%s28528_s8 + $0x68] sm:$0xff]  }
 0x5b4   : > { %v19096_v19 = vcombine.low %v13842_v47, %v13856_v49  ;;  %v13912_v9 = vsel %vm23429_vm2, %v13907_v37, %v28823_v12  ;;  %v19112_v20 = vcombine.low %v27220_v18, %v27254_v26  ;;  %v19113_v35 = vcombine.low %v27206_v21, %v27250_v25  ;;  %v23099_v37 = vld [vmem:[%s28528_s8 + $0x70] sm:$0xff]   ;;  %v28852_v49 = vld [vmem:[#allocation3_spill] sm:$0xff] }
 0x5b5   : > { %v19098_v15 = vcombine.low %v13898_v52, %v13912_v9  ;;  %v19140_v43 = vcombine.low %v27275_v13, %v27242_v60  ;;  %v19142_v59 = vcombine.low %v27317_v6, %v27328_v11  ;;  %v28825_v40 = vrot.slane %v28824_v38, 5  ;;  %21417 = vmatmul.mubr.msk.bf16.gmra.mrb[48].mxu1 %vm693_vm3, %v19041_v7  ;;  %v28837_v11 = vld [vmem:[#allocation11_spill] sm:$0xff]  ;;  %v28848_v47 = vld [vmem:[#allocation40_spill] sm:$0xff] }
 0x5b6   : > { %v28826_v54 = vrot.slane %v27041_v34, 5  ;;  %v14281_v18 = vor.u32 %v27279_v30, %v27277_v8  ;;  %v14286_v60 = vrot.slane %v27281_v23, 5  ;;  %21424 = vmatprep.mubr.msk.bf16.mxu1 %vm693_vm3, %v19052_v0  ;;  %v23094_v34 = vld [vmem:[%s28528_s8 + $0x48] sm:$0xff]   ;;  %v28829_v30 = vcombine.low %v28827_v50, %v28828_v28  ;;  %v23095_v8 = vld [vmem:[%s28528_s8 + $0x50] sm:$0xff]   ;;  %v28831_v0 = vld [vmem:[#allocation37_spill] sm:$0xff] }
 0x5b7   : > { %v13926_v22 = vsel %vm23429_vm2, %v13921_v3, %v28825_v40  ;;  %v28830_v23 = vld [vmem:[#allocation27_spill] sm:$0xff]  ;;  %v28838_v36 = vcombine.low %v28836_v58, %v28837_v11  ;;  %v28842_v29 = vcombine.low %v27158_v1, %v27177_v39  ;;  %v28844_v7 = vcombine.low %v27073_v5, %v28843_v31  ;;  %v28845_v39 = vld [vmem:[#allocation21_spill] sm:$0xff]  ;;  %v23103_v50 = vld [vmem:[%s28530_s10 + $0x20] sm:$0xff]  }
 0x5b8   : > { %v13940_v17 = vsel %vm23429_vm2, %v13935_v56, %v28826_v54  ;;  %v14282_v25 = vrot.slane %v14281_v18, 4  ;;  %v28832_v6 = vcombine.low %v28830_v23, %v28831_v0  ;;  %v23102_v1 = vld [vmem:[%s28528_s8 + $0x88] sm:$0xff]   ;;  %v28847_v4 = vcombine.low %v28845_v39, %v28846_v44  ;;  %v27490_v23 = vld [vmem:[%s28530_s10] sm:$0xff]   ;;  %v28857_v11 = vld [vmem:[#allocation45_spill] sm:$0xff] }
 0x5b9   : > { %v19099_v21 = vcombine.low %v13926_v22, %v13940_v17  ;;  %v28850_v41 = vcombine.low %v28848_v47, %v28849_v46  ;;  %v28851_v5 = vld [vmem:[#allocation23_spill] sm:$0xff]  ;;  %v23287_v0 = vld [vmem:[%s28525_s5] ss:$0 sm:$0xff] }
 0x5ba   : > { %v14287_v26 = vsel %vm23429_vm2, %v14282_v25, %v14286_v60  ;;  %v28853_v57 = vcombine.low %v28851_v5, %v28852_v49  ;;  %v23104_v28 = vld [vmem:[%s28530_s10 + $0x28] sm:$0xff]   ;;  %v28860_v46 = vld [vmem:[#allocation50_spill] sm:$0xff] }
 0x5bb   : > { %v19143_v13 = vcombine.low %v27332_v2, %v14287_v26  ;;  %v28840_v2 = vld [vmem:[#allocation10_spill] sm:$0xff] }
 0x5bd   : > { %21425 = vmatmul.mubr.msk.bf16.vlgmr.msra.gmra.mrb[44].mxu1 %vm693_vm3, %v28829_v30  ;;  %v23105_v30 = vld [vmem:[%s28530_s10 + $0x30] sm:$0xff]  }
 0x5be   : > { %21433 = vmatpush3.bf16.msra.mxu1 %v23093_v63  ;;  %21428 = vmatprep.mubr.msk.bf16.mxu1 %vm693_vm3, %v19054_v48  ;;  %v28834_v48 = vld [vmem:[#allocation36_spill] sm:$0xff]  ;;  %v28841_v63 = vcombine.low %v28839_v55, %v28840_v2 }
 0x5bf   : > { %21434 = vmatprep.subr.bf16.mxu1 %v23094_v34  ;;  %v28835_v14 = vcombine.low %v28833_v32, %v28834_v48  ;;  %v28855_v32 = vld [vmem:[#allocation46_spill] sm:$0xff] }
 0x5c0   : > { %v3400_v48 = vadd.f32 %v23287_v0, %v28855_v32 }
 0x5c2   : > { %21435 = vmatpush3.bf16.msra.mxu1 %v23094_v34  ;;  %v3408_v2 = vmax.f32 %v3400_v48, 0.0 }
 0x5c3   : > { %21444 = vmatprep.subr.bf16.mxu1 %v23095_v8 }
 0x5c5   : > { %21429 = vmatmul.mubr.msk.bf16.gmra.mrb[48].mxu1 %vm693_vm3, %v19055_v16  ;;  %v23097_v16 = vld [vmem:[%s28528_s8 + $0x60] sm:$0xff]  }
 0x5c6   : > { %21436 = vmatprep.mubr.msk.bf16.mxu1 %vm693_vm3, %v28832_v6  ;;  %v28854_v6 = vld [vmem:[#allocation44_spill] sm:$0xff] }
 0x5cd   : > { %21437 = vmatmul.mubr.msk.bf16.vlgmr.msra.gmra.mrb[44].mxu1 %vm693_vm3, %v28835_v14  ;;  %v28856_v14 = vld [vmem:[#allocation43_spill] sm:$0xff] }
 0x5ce   : > { %21445 = vmatpush3.bf16.msra.mxu1 %v23095_v8  ;;  %21440 = vmatprep.mubr.msk.bf16.mxu1 %vm693_vm3, %v28838_v36  ;;  %v23106_v8 = vld [vmem:[%s28530_s10 + $0x38] sm:$0xff]   ;;  %v3401_v58 = vadd.f32 %v23287_v0, %v28856_v14  ;;  %v3402_v36 = vadd.f32 %v23287_v0, %v28857_v11 }
 0x5cf   : > { %21446 = vmatprep.subr.bf16.mxu1 %v23096_v61 }
 0x5d0   : > { %v3409_v31 = vmax.f32 %v3401_v58, 0.0  ;;  %v3410_v47 = vmax.f32 %v3402_v36, 0.0 }
 0x5d2   : > { %21447 = vmatpush3.bf16.msra.mxu1 %v23096_v61  ;;  %v3399_v61 = vadd.f32 %v23287_v0, %v28854_v6 }
 0x5d3   : > { %21456 = vmatprep.subr.bf16.mxu1 %v23097_v16 }
 0x5d4   : > { %v3407_v55 = vmax.f32 %v3399_v61, 0.0 }
 0x5d5   : > { %21441 = vmatmul.mubr.msk.bf16.gmra.mrb[48].mxu1 %vm693_vm3, %v28841_v63 }
 0x5d6   : > { %21448 = vmatprep.mubr.msk.bf16.mxu1 %vm693_vm3, %v19096_v19  ;;  %v19150_v19 = vld [vmem:[%s28529_s9] ss:$0 sm:$0xff] }
 0x5dd   : > { %21449 = vmatmul.mubr.msk.bf16.vlgmr.msra.gmra.mrb[44].mxu1 %vm693_vm3, %v19097_v62  ;;  %v23101_v62 = vld [vmem:[%s28528_s8 + $0x80] sm:$0xff]  }
 0x5de   : > { %21457 = vmatpush3.bf16.msra.mxu1 %v23097_v16  ;;  %21452 = vmatprep.mubr.msk.bf16.mxu1 %vm693_vm3, %v19098_v15 }
 0x5df   : > { %21458 = vmatprep.subr.bf16.mxu1 %v23098_v42 }
 0x5e2   : > { %21459 = vmatpush3.bf16.msra.mxu1 %v23098_v42 }
 0x5e3   : > { %21468 = vmatprep.subr.bf16.mxu1 %v23099_v37 }
 0x5e5   : > { %21453 = vmatmul.mubr.msk.bf16.gmra.mrb[48].mxu1 %vm693_vm3, %v19099_v21 }
 0x5e6   : > { %21460 = vmatprep.mubr.msk.bf16.mxu1 %vm693_vm3, %v19110_v10 }
 0x5ed   : > { %21461 = vmatmul.mubr.msk.bf16.vlgmr.msra.gmra.mrb[44].mxu1 %vm693_vm3, %v28842_v29  ;;  %v28859_v29 = vld [vmem:[#allocation48_spill] sm:$0xff] }
 0x5ee   : > { %21469 = vmatpush3.bf16.msra.mxu1 %v23099_v37  ;;  %21464 = vmatprep.mubr.msk.bf16.mxu1 %vm693_vm3, %v19112_v20  ;;  %v28858_v37 = vld [vmem:[#allocation47_spill] sm:$0xff] }
 0x5ef   : > { %21470 = vmatprep.subr.bf16.mxu1 %v23100_v33 }
 0x5f2   : > { %21471 = vmatpush3.bf16.msra.mxu1 %v23100_v33  ;;  %v27501_v33 = vadd.f32 %v23287_v0, %v28858_v37 }
 0x5f3   : > { %21480 = vmatprep.subr.bf16.mxu1 %v23101_v62 }
 0x5f4   : > { %v3413_v49 = vmax.f32 %v27501_v33, 0.0 }
 0x5f5   : > { %21465 = vmatmul.mubr.msk.bf16.gmra.mrb[48].mxu1 %vm693_vm3, %v19113_v35 }
 0x5f6   : > { %21472 = vmatprep.mubr.msk.bf16.mxu1 %vm693_vm3, %v28844_v7 }
 0x5fd   : > { %21473 = vmatmul.mubr.msk.bf16.vlgmr.msra.gmra.mrb[44].mxu1 %vm693_vm3, %v28847_v4 }
 0x5fe   : > { %21481 = vmatpush3.bf16.msra.mxu1 %v23101_v62  ;;  %21476 = vmatprep.mubr.msk.bf16.mxu1 %vm693_vm3, %v28850_v41  ;;  %v3403_v62 = vadd.f32 %v23287_v0, %v28859_v29  ;;  %v27507_v41 = vadd.f32 %v23287_v0, %v28860_v46 }
 0x5ff   : > { %21482 = vmatprep.subr.bf16.mxu1 %v23102_v1 }
 0x602   : > { %21483 = vmatpush3.bf16.msra.mxu1 %v23102_v1 }
 0x603   : > { %21492 = vmatprep.subr.bf16.mxu1 %v23103_v50 }
 0x605   : > { %21477 = vmatmul.mubr.msk.bf16.gmra.mrb[48].mxu1 %vm693_vm3, %v28853_v57  ;;  %v3411_v57 = vmax.f32 %v3403_v62, 0.0 }
 0x606   : > { %21484 = vmatprep.mubr.msk.bf16.mxu1 %vm693_vm3, %v19140_v43 }
 0x60d   : > { %21485 = vmatmul.mubr.msk.bf16.vlgmr.msra.gmra.mrb[44].mxu1 %vm693_vm3, %v19141_v45 }
 0x60e   : > { %21488 = vmatprep.mubr.msk.bf16.mxu1 %vm693_vm3, %v19142_v59  ;;  %21493 = vmatpush3.bf16.msra.mxu1 %v23103_v50 }
 0x60f   : > { %21494 = vmatprep.subr.bf16.mxu1 %v23104_v28 }
 0x612   : > { %21495 = vmatpush3.bf16.msra.mxu1 %v23104_v28 }
 0x613   : > { %21496 = vmatprep.subr.bf16.mxu1 %v23105_v30 }
 0x615   : > { %21489 = vmatmul.mubr.msk.bf16.gmra.mrb[48].mxu1 %vm693_vm3, %v19143_v13 }
 0x616   : > { %21497 = vmatpush3.bf16.msra.mxu1 %v23105_v30 }
 0x617   : > { %21498 = vmatprep.subr.bf16.mxu1 %v23106_v8 }
 0x61a   : > { %21499 = vmatpush3.bf16.msra.mxu1 %v23106_v8  ;;  %v23144_v8 = vld [vmem:[%s28532_s12 + $0x8] sm:$0xff]  }
 0x61b   : > { %21508 = vmatprep.subr.bf16.mxu1 %v27490_v23 }
 0x6e0   : > { %v21486_v51 = vpop.f32.mrb[44].mxu1 }
 0x6e1   : > { %v14356_v52 = vpop.f32.mrb[45].mxu1  ;;  %v14404_v20 = vadd.f32 %v21486_v51, %v19150_v19 }
 0x6e2   : > { %v14402_v12 = vadd.f32 %v19150_v19, %v14356_v52  ;;  %v21487_v9 = vpop.f32.mrb[46].mxu1 }
 0x6e3   : > { %v14359_v3 = vpop.f32.mrb[47].mxu1  ;;  %v14405_v53 = vadd.f32 %v21487_v9, %v19150_v19  ;;  %v14412_v40 = vmax.f32 %v14404_v20, 0.0 }
 0x6e4   : > { %v14403_v15 = vadd.f32 %v19150_v19, %v14359_v3  ;;  %v14410_v56 = vmax.f32 %v14402_v12, 0.0  ;;  %v28861_v12 = vld [vmem:[#allocation49_spill] sm:$0xff] }
 0x6e5   : > { %v14413_v54 = vmax.f32 %v14405_v53, 0.0  ;;  %v3414_v9 = vmax.f32 %v28861_v12, 0.0 }
 0x6e6   : > { %v14411_v10 = vmax.f32 %v14403_v15, 0.0 }
 0x6e8   : > { %v21490_v24 = vpop.f32.mrb[48].mxu1  ;;  %v22885_v45 = vpack.i.bf16 %v14411_v10, %v14410_v56 }
 0x6e9   : > { %v14372_v35 = vpop.f32.mrb[49].mxu1  ;;  %v14408_v43 = vadd.f32 %v21490_v24, %v19150_v19 }
 0x6ea   : > { %v14406_v59 = vadd.f32 %v19150_v19, %v14372_v35  ;;  %22886 = vrot.lane.b32.xlu0 %v22885_v45, %s23297_s23  ;;  %v21491_v38 = vpop.f32.mrb[50].mxu1  ;;  %v3412_v35 = vmax.f32 %v27507_v41, 0.0 }
 0x6eb   : > { %v14375_v22 = vpop.f32.mrb[51].mxu1  ;;  %v14409_v18 = vadd.f32 %v21491_v38, %v19150_v19  ;;  %v14416_v60 = vmax.f32 %v14408_v43, 0.0 }
 0x6ec   : > { %v14414_v17 = vmax.f32 %v14406_v59, 0.0  ;;  %v14407_v21 = vadd.f32 %v19150_v19, %v14375_v22 }
 0x6ed   : > { %v14417_v13 = vmax.f32 %v14409_v18, 0.0 }
 0x6ee   : > { %v14415_v25 = vmax.f32 %v14407_v21, 0.0  ;;  %14430 = vrot.lane.b32.xlu0 %v14412_v40, %s23297_s23  ;;  %v22890_v26 = vpack.i.bf16 %v14414_v17, %v14413_v54 }
 0x6f0   : > { %v22895_v34 = vpack.i.bf16 %v14416_v60, %v14415_v25  ;;  %22891 = vrot.lane.b32.xlu1 %v22890_v26, %s23297_s23 }
 0x6f2   : > { %14440 = vrot.lane.b32.xlu0 %v14417_v13, %s23297_s23 }
 0x6f4   : > { %22896 = vrot.lane.b32.xlu1 %v22895_v34, %s23297_s23 }
 0x75c   : > { %v22887_v16 = vpop.permute.xlu0 %22886 }
 0x75d   : > { %v22889_v63 = vunpack.i.h.bf16 %v22887_v16  ;;  %v22888_v42 = vunpack.i.l.bf16 %v22887_v16 }
 0x75f   : > { %v14451_v7 = vsel %vm693_vm3, %v3408_v2, %v22889_v63  ;;  %v14450_v1 = vsel %vm693_vm3, %v3407_v55, %v22888_v42 }
 0x760   : > { %v19580_v39 = vpack.c.bf16 %v14451_v7, %v14451_v7  ;;  %v19579_v44 = vpack.c.bf16 %v14450_v1, %v14450_v1  ;;  %v14431_v4 = vpop.permute.xlu0 %14430 }
 0x761   : > { %v14452_v5 = vsel %vm693_vm3, %v3409_v31, %v14431_v4 }
 0x762   : > { %v14490_v19 = vshrl.u32 %v19580_v39, 16  ;;  %v14483_v51 = vshrl.u32 %v19579_v44, 16  ;;  %v22892_v52 = vpop.permute.xlu1 %22891  ;;  %v19581_v3 = vpack.c.bf16 %v14452_v5, %v14452_v5  ;;  %v14493_v20 = vshll.u32 %v19580_v39, 16 }
 0x763   : > { %v22894_v15 = vunpack.i.h.bf16 %v22892_v52  ;;  %v22893_v56 = vunpack.i.l.bf16 %v22892_v52  ;;  %v14486_v24 = vshll.u32 %v19579_v44, 16 }
 0x764   : > { %v14492_v10 = vrot.slane %v14490_v19, 7  ;;  %v14485_v53 = vrot.slane %v14483_v51, 7  ;;  %v14441_v45 = vpop.permute.xlu0 %14440  ;;  %v14497_v43 = vshrl.u32 %v19581_v3, 16  ;;  %v14500_v60 = vshll.u32 %v19581_v3, 16 }
 0x765   : > { %v14454_v59 = vsel %vm693_vm3, %v3411_v57, %v22894_v15  ;;  %v14453_v38 = vsel %vm693_vm3, %v3410_v47, %v22893_v56  ;;  %v14457_v25 = vsel %vm693_vm3, %v3414_v9, %v14441_v45 }
 0x766   : > { %v14495_v40 = vor.u32 %v14493_v20, %v14492_v10  ;;  %v14488_v22 = vor.u32 %v14486_v24, %v14485_v53  ;;  %v19583_v54 = vpack.c.bf16 %v14454_v59, %v14454_v59  ;;  %v19582_v17 = vpack.c.bf16 %v14453_v38, %v14453_v38  ;;  %v22897_v18 = vpop.permute.xlu1 %22896 }
 0x767   : > { %v14499_v21 = vrot.slane %v14497_v43, 7  ;;  %v22899_v26 = vunpack.i.h.bf16 %v22897_v18  ;;  %v22898_v30 = vunpack.i.l.bf16 %v22897_v18  ;;  %v19586_v29 = vpack.c.bf16 %v14457_v25, %v14457_v25 }
 0x768   : > { %v14547_v34 = vsel %vm24407_vm11, 0, %v14495_v40  ;;  %v14546_v50 = vsel %vm24407_vm11, 0, %v14488_v22  ;;  %v14511_v28 = vshrl.u32 %v19583_v54, 16  ;;  %v14504_v32 = vshrl.u32 %v19582_v17, 16 }
 0x769   : > { %v27522_v0 = vsel %vm24427_vm13, %v14547_v34, 0  ;;  %v27526_v6 = vsel %vm24427_vm13, %v14546_v50, 0  ;;  %v14502_v61 = vor.u32 %v14500_v60, %v14499_v21  ;;  %v14514_v11 = vshll.u32 %v19583_v54, 16 }
 0x76a   : > { %v27530_v48 = vcombine.low %v27522_v0, %v27522_v0  ;;  %v27534_v14 = vcombine.high %v27522_v0, %v27522_v0  ;;  %v14513_v58 = vrot.slane %v14511_v28, 7  ;;  %v27538_v36 = vcombine.low %v27526_v6, %v27526_v6 }
 0x76b   : > { %v14548_v16 = vsel %vm24407_vm11, 0, %v14502_v61  ;;  %v14506_v55 = vrot.slane %v14504_v32, 7  ;;  %v14507_v2 = vshll.u32 %v19582_v17, 16  ;;  %v14532_v24 = vshrl.u32 %v19586_v29, 16 }
 0x76c   : > { %v14620_v63 = vshrl.u32 %v27530_v48, 16  ;;  %v14623_v42 = vshll.u32 %v27530_v48, 16  ;;  %v14629_v37 = vshll.u32 %v27534_v14, 16  ;;  %v19206_v62 = vrot.slane %v27530_v48, 9 }
 0x76d   : > { %v27548_v31 = vsel %vm24427_vm13, %v14548_v16, 0  ;;  %v14516_v7 = vor.u32 %v14514_v11, %v14513_v58  ;;  %v14509_v1 = vor.u32 %v14507_v2, %v14506_v55  ;;  %v14936_v4 = vrot.slane %v27534_v14, 5 }
 0x76e   : > { %v14622_v39 = vrot.slane %v14620_v63, 4  ;;  %v14625_v44 = vrot.slane %v14623_v42, 5  ;;  %v27553_v47 = vcombine.low %v27548_v31, %v27548_v31  ;;  %v27557_v46 = vcombine.high %v27548_v31, %v27548_v31 }
 0x76f   : > { %v27561_v41 = vcombine.low %v27522_v0, %v27548_v31  ;;  %v14550_v5 = vsel %vm24407_vm11, 0, %v14516_v7  ;;  %v14549_v57 = vsel %vm24407_vm11, 0, %v14509_v1  ;;  %v14631_v19 = vrot.slane %v14629_v37, 5 }
 0x770   : > { %v14634_v51 = vshrl.u32 %v27553_v47, 16  ;;  %v14637_v52 = vshll.u32 %v27553_v47, 16  ;;  %v19207_v12 = vrot.slane %v27553_v47, 9  ;;  %v14643_v9 = vshll.u32 %v27557_v46, 16 }
 0x771   : > { %v14940_v3 = vrot.slane %v27557_v46, 5  ;;  %v27574_v15 = vsel %vm24427_vm13, %v14550_v5, 0  ;;  %v27578_v56 = vsel %vm24427_vm13, %v14549_v57, 0  ;;  %v14535_v43 = vshll.u32 %v19586_v29, 16 }
 0x772   : > { %v14636_v10 = vrot.slane %v14634_v51, 4  ;;  %v14639_v20 = vrot.slane %v14637_v52, 5  ;;  %v27582_v53 = vcombine.low %v27578_v56, %v27578_v56  ;;  %v14645_v45 = vrot.slane %v14643_v9, 5 }
 0x773   : > { %v14456_v59 = vsel %vm693_vm3, %v3413_v49, %v22899_v26  ;;  %v14455_v38 = vsel %vm693_vm3, %v3412_v35, %v22898_v30  ;;  %v14534_v22 = vrot.slane %v14532_v24, 7  ;;  %v27590_v18 = vcombine.high %v27526_v6, %v27526_v6 }
 0x774   : > { %v14640_v40 = vor.u32 %v14639_v20, %v14636_v10  ;;  %v19585_v54 = vpack.c.bf16 %v14456_v59, %v14456_v59  ;;  %v19584_v17 = vpack.c.bf16 %v14455_v38, %v14455_v38  ;;  %v14606_v21 = vshrl.u32 %v27538_v36, 16  ;;  %v28864_v59 = vld [vmem:[#allocation25_spill] sm:$0xff] }
 0x775   : > { %v14609_v60 = vshll.u32 %v27538_v36, 16  ;;  %v14626_v25 = vor.u32 %v14625_v44, %v14622_v39  ;;  %v14537_v33 = vor.u32 %v14535_v43, %v14534_v22  ;;  %v14615_v58 = vshll.u32 %v27590_v18, 16 }
 0x776   : > { %v14641_v34 = vrot.slane %v14640_v40, 4  ;;  %v14525_v50 = vshrl.u32 %v19585_v54, 16  ;;  %v14528_v49 = vshll.u32 %v19585_v54, 16  ;;  %v14518_v26 = vshrl.u32 %v19584_v17, 16  ;;  %v23108_v54 = vld [vmem:[%s28530_s10 + $0x8] sm:$0xff]  }
 0x777   : > { %v14521_v35 = vshll.u32 %v19584_v17, 16  ;;  %v14608_v28 = vrot.slane %v14606_v21, 4  ;;  %v14611_v30 = vrot.slane %v14609_v60, 5  ;;  %v14553_v61 = vsel %vm24407_vm11, 0, %v14537_v33 }
 0x778   : > { %v14527_v32 = vrot.slane %v14525_v50, 7  ;;  %v14627_v11 = vrot.slane %v14626_v25, 4  ;;  %v27599_v16 = vsel %vm24427_vm13, %v14553_v61, 0  ;;  %v14520_v55 = vrot.slane %v14518_v26, 7 }
 0x779   : > { %v14612_v2 = vor.u32 %v14611_v30, %v14608_v28  ;;  %v27603_v63 = vsel %vm23429_vm2, %v14641_v34, %v14645_v45  ;;  %v27607_v42 = vcombine.low %v27574_v15, %v27574_v15  ;;  %v27611_v37 = vcombine.low %v27599_v16, %v27599_v16 }
 0x77a   : > { %v14530_v29 = vor.u32 %v14528_v49, %v14527_v32  ;;  %v14617_v7 = vrot.slane %v14615_v58, 5  ;;  %v14523_v1 = vor.u32 %v14521_v35, %v14520_v55  ;;  %v27615_v44 = vsel %vm23429_vm2, %v14627_v11, %v14631_v19  ;;  %v23109_v55 = vld [vmem:[%s28530_s10 + $0x10] sm:$0xff]  }
 0x77b   : > { %v14613_v39 = vrot.slane %v14612_v2, 4  ;;  %v27619_v5 = vcombine.high %v27578_v56, %v27578_v56  ;;  %v27625_v51 = vcombine.low %v27615_v44, %v27603_v63  ;;  %v27629_v52 = vcombine.high %v27574_v15, %v27574_v15 }
 0x77c   : > { %v14552_v57 = vsel %vm24407_vm11, 0, %v14530_v29  ;;  %v14648_v9 = vshrl.u32 %v27582_v53, 16  ;;  %v14551_v10 = vsel %vm24407_vm11, 0, %v14523_v1  ;;  %v14651_v24 = vshll.u32 %v27582_v53, 16 }
 0x77d   : > { %v27634_v19 = vsel %vm24427_vm13, %v14552_v57, 0  ;;  %v27640_v20 = vsel %vm23429_vm2, %v14613_v39, %v14617_v7  ;;  %v27649_v43 = vsel %vm24427_vm13, %v14551_v10, 0  ;;  %v14657_v21 = vshll.u32 %v27619_v5, 16 }
 0x77e   : > { %v27645_v45 = vcombine.low %v27634_v19, %v27634_v19  ;;  %v19181_v38 = vcombine.low %v28864_v59, %v27640_v20  ;;  %v14650_v40 = vrot.slane %v14648_v9, 4  ;;  %v27655_v22 = vcombine.low %v27649_v43, %v27649_v43 }
 0x77f   : > { %v14653_v17 = vrot.slane %v14651_v24, 5  ;;  %v14662_v60 = vshrl.u32 %v27607_v42, 16  ;;  %v14665_v25 = vshll.u32 %v27607_v42, 16  ;;  %v14671_v34 = vshll.u32 %v27629_v52, 16 }
 0x780   : > { %21500 = vmatprep.mubr.msk.bf16.mxu1 %vm14747_vm15, %v19181_v38  ;;  %v27667_v33 = vcombine.high %v27649_v43, %v27649_v43  ;;  %v27671_v50 = vcombine.high %v27634_v19, %v27634_v19  ;;  %v27675_v49 = vcombine.high %v27599_v16, %v27599_v16  ;;  %v14676_v28 = vshrl.u32 %v27655_v22, 16 }
 0x781   : > { %21501 = vmatmul.mubr.msk.bf16.vlgmr.msra.gmra.mrb[52].mxu1 %vm14747_vm15, %v27625_v51  ;;  %v14654_v26 = vor.u32 %v14653_v17, %v14650_v40  ;;  %v14664_v35 = vrot.slane %v14662_v60, 4  ;;  %v14659_v30 = vrot.slane %v14657_v21, 5  ;;  %v14667_v61 = vrot.slane %v14665_v25, 5 }
 0x782   : > { %21509 = vmatpush3.bf16.msra.mxu1 %v27490_v23  ;;  %v14679_v32 = vshll.u32 %v27655_v22, 16  ;;  %v14685_v58 = vshll.u32 %v27667_v33, 16  ;;  %v14678_v2 = vrot.slane %v14676_v28, 4  ;;  %v14690_v29 = vshrl.u32 %v27645_v45, 16 }
 0x783   : > { %21510 = vmatprep.subr.bf16.mxu1 %v23108_v54  ;;  %v14655_v11 = vrot.slane %v14654_v26, 4  ;;  %v14693_v7 = vshll.u32 %v27645_v45, 16  ;;  %v14668_v1 = vor.u32 %v14667_v61, %v14664_v35  ;;  %v14673_v39 = vrot.slane %v14671_v34, 5  ;;  %v23110_v34 = vld [vmem:[%s28530_s10 + $0x18] sm:$0xff]  }
 0x784   : > { %v14681_v23 = vrot.slane %v14679_v32, 5  ;;  %v14699_v57 = vshll.u32 %v27671_v50, 16  ;;  %v14687_v10 = vrot.slane %v14685_v58, 5  ;;  %v14692_v24 = vrot.slane %v14690_v29, 4  ;;  %v23149_v32 = vld [vmem:[%s28532_s12 + $0x50] sm:$0xff]  }
 0x785   : > { %v27691_v9 = vsel %vm23429_vm2, %v14655_v11, %v14659_v30  ;;  %v14695_v38 = vrot.slane %v14693_v7, 5  ;;  %v14669_v40 = vrot.slane %v14668_v1, 4  ;;  %v27700_v26 = vcombine.low %v27578_v56, %v27574_v15 }
 0x786   : > { %v19263_v17 = vcombine.low %v27603_v63, %v27691_v9  ;;  %21511 = vmatpush3.bf16.msra.mxu1 %v23108_v54  ;;  %v14682_v21 = vor.u32 %v14681_v23, %v14678_v2  ;;  %v14701_v60 = vrot.slane %v14699_v57, 5  ;;  %v27704_v35 = vcombine.low %v27649_v43, %v27634_v19  ;;  %v23127_v63 = vld [vmem:[%s28530_s10 + $0xc0] sm:$0xff]  }
 0x787   : > { %21512 = vmatprep.subr.bf16.mxu1 %v23109_v55  ;;  %v14696_v25 = vor.u32 %v14695_v38, %v14692_v24  ;;  %v19205_v28 = vrot.slane %v27538_v36, 9  ;;  %v27709_v54 = vsel %vm23429_vm2, %v14669_v40, %v14673_v39  ;;  %v14932_v61 = vrot.slane %v27590_v18, 5 }
 0x788   : > { %v14683_v30 = vrot.slane %v14682_v21, 4  ;;  %v27718_v58 = vsel %vm23467_vm6, %v19206_v62, %v14936_v4  ;;  %v27722_v11 = vcombine.low %v27691_v9, %v27709_v54  ;;  %v27730_v18 = vsel %vm23467_vm6, %v19207_v12, %v14940_v3  ;;  %v28866_v62 = vld [vmem:[#allocation18_spill] sm:$0xff]  ;;  %v23128_v9 = vld [vmem:[%s28530_s10 + $0xc8] sm:$0xff]  }
 0x789   : > { %v14697_v36 = vrot.slane %v14696_v25, 4  ;;  %v19208_v14 = vrot.slane %v27582_v53, 9  ;;  %v19193_v4 = vcombine.low %v28866_v62, %v27526_v6  ;;  %v27741_v2 = vcombine.low %v27718_v58, %v27730_v18 }
 0x78a   : > { %v27735_v48 = vsel %vm23429_vm2, %v14683_v30, %v14687_v10  ;;  %21513 = vmatpush3.bf16.msra.mxu1 %v23109_v55  ;;  %v14944_v47 = vrot.slane %v27619_v5, 5  ;;  %21504 = vmatprep.mubr.msk.bf16.mxu1 %vm14747_vm15, %v27722_v11  ;;  %v27752_v12 = vsel %vm23467_vm6, %v19205_v28, %v14932_v61  ;;  %v19209_v3 = vrot.slane %v27607_v42, 9  ;;  %v23111_v5 = vld [vmem:[%s28530_s10 + $0x40] sm:$0xff]  }
 0x78b   : > { %v27748_v46 = vsel %vm23429_vm2, %v14697_v36, %v14701_v60  ;;  %21514 = vmatprep.subr.bf16.mxu1 %v23110_v34  ;;  %v14948_v53 = vrot.slane %v27629_v52, 5  ;;  %v19210_v7 = vrot.slane %v27655_v22, 9  ;;  %v14952_v1 = vrot.slane %v27667_v33, 5 }
 0x78c   : > { %v27758_v55 = vcombine.low %v27735_v48, %v27748_v46  ;;  %v27765_v29 = vsel %vm23467_vm6, %v19208_v14, %v14944_v47  ;;  %v19211_v39 = vrot.slane %v27645_v45, 9  ;;  %v14956_v23 = vrot.slane %v27671_v50, 5  ;;  %v28867_v47 = vld [vmem:[#allocation20_spill] sm:$0xff] }
 0x78d   : > { %v27771_v42 = vsel %vm23467_vm6, %v19209_v3, %v14948_v53  ;;  %v19284_v52 = vcombine.low %v27730_v18, %v27765_v29  ;;  %v27785_v22 = vsel %vm23467_vm6, %v19210_v7, %v14952_v1  ;;  %v19240_v33 = vcombine.low %v27526_v6, %v27522_v0  ;;  %v23116_v53 = vld [vmem:[%s28530_s10 + $0x68] sm:$0xff]   ;;  %v23118_v7 = vld [vmem:[%s28530_s10 + $0x78] sm:$0xff]   ;;  %v23119_v1 = vld [vmem:[%s28530_s10 + $0x80] sm:$0xff]  }
 0x78e   : > { %21505 = vmatmul.mubr.msk.bf16.gmra.mrb[56].mxu1 %vm14747_vm15, %v27758_v55  ;;  %v27781_v57 = vcombine.low %v27765_v29, %v27771_v42  ;;  %v19241_v10 = vcombine.low %v27548_v31, %v27578_v56  ;;  %v27794_v45 = vsel %vm23467_vm6, %v19211_v39, %v14956_v23  ;;  %v19242_v50 = vcombine.low %v27574_v15, %v27649_v43  ;;  %v23120_v39 = vld [vmem:[%s28530_s10 + $0x88] sm:$0xff]   ;;  %v23121_v23 = vld [vmem:[%s28530_s10 + $0x90] sm:$0xff]   ;;  %v23138_v29 = vld [vmem:[%s28530_s10 + $0x118] sm:$0xff]  }
 0x78f   : > { %21516 = vmatprep.mubr.msk.bf16.mxu1 %vm14747_vm15, %v19193_v4  ;;  %21515 = vmatpush3.bf16.msra.mxu1 %v23110_v34  ;;  %v19243_v24 = vcombine.low %v27634_v19, %v27599_v16  ;;  %v15215_v38 = vshrl.u32 %v27611_v37, 16  ;;  %v27803_v0 = vcombine.low %v27785_v22, %v27794_v45  ;;  %v19262_v6 = vcombine.low %v27640_v20, %v27615_v44  ;;  %v23112_v44 = vld [vmem:[%s28530_s10 + $0x48] sm:$0xff]   ;;  %v23114_v4 = vld [vmem:[%s28530_s10 + $0x58] sm:$0xff]   ;;  %v23125_v19 = vld [vmem:[%s28530_s10 + $0xb0] sm:$0xff]  }
 0x790   : > { %21524 = vmatprep.subr.bf16.mxu1 %v23111_v5  ;;  %v19264_v31 = vcombine.low %v27709_v54, %v27735_v48  ;;  %v15218_v56 = vshll.u32 %v27611_v37, 16  ;;  %v19283_v15 = vcombine.low %v27752_v12, %v27718_v58  ;;  %v19285_v43 = vcombine.low %v27771_v42, %v27785_v22  ;;  %v23130_v54 = vld [vmem:[%s28530_s10 + $0xd8] sm:$0xff]   ;;  %v23131_v58 = vld [vmem:[%s28530_s10 + $0xe0] sm:$0xff]   ;;  %v23132_v18 = vld [vmem:[%s28530_s10 + $0xe8] sm:$0xff]  }
 0x791   : > { %v15217_v40 = vrot.slane %v15215_v38, 4  ;;  %v15224_v60 = vshll.u32 %v27675_v49, 16  ;;  %v19274_v25 = vrot.slane %v27611_v37, 9  ;;  %v15353_v34 = vrot.slane %v27675_v49, 5  ;;  %v23113_v37 = vld [vmem:[%s28530_s10 + $0x50] sm:$0xff]  }
 0x792   : > { %v15220_v21 = vrot.slane %v15218_v56, 5  ;;  %v19220_v3 = vcombine.low %v28867_v47, %v27752_v12  ;;  %v19303_v48 = vcombine.low %v27599_v16, %v28866_v62  ;;  %v23134_v12 = vld [vmem:[%s28530_s10 + $0xf8] sm:$0xff]   ;;  %v23136_v16 = vld [vmem:[%s28530_s10 + $0x108] sm:$0xff]   ;;  %v23141_v42 = vld [vmem:[%s28532_s12 + $0x30] sm:$0xff]  }
 0x793   : > { %v27822_v28 = vsel %vm23467_vm6, %v19274_v25, %v15353_v34  ;;  %v15226_v36 = vrot.slane %v15224_v60, 5  ;;  %v19346_v22 = vld [vmem:[%s28531_s11] ss:$0 sm:$0xff] }
 0x794   : > { %v15221_v20 = vor.u32 %v15220_v21, %v15217_v40  ;;  %v19286_v30 = vcombine.low %v27794_v45, %v27822_v28 }
 0x796   : > { %21517 = vmatmul.mubr.msk.bf16.vlgmr.msra.gmra.mrb[52].mxu1 %vm14747_vm15, %v27561_v41  ;;  %v15222_v61 = vrot.slane %v15221_v20, 4 }
 0x797   : > { %21525 = vmatpush3.bf16.msra.mxu1 %v23111_v5  ;;  %21520 = vmatprep.mubr.msk.bf16.mxu1 %vm14747_vm15, %v27700_v26  ;;  %v23117_v5 = vld [vmem:[%s28530_s10 + $0x70] sm:$0xff]  }
 0x798   : > { %21526 = vmatprep.subr.bf16.mxu1 %v23112_v44  ;;  %v27835_v49 = vsel %vm23429_vm2, %v15222_v61, %v15226_v36 }
 0x799   : > { %v19265_v14 = vcombine.low %v27748_v46, %v27835_v49  ;;  %v23115_v46 = vld [vmem:[%s28530_s10 + $0x60] sm:$0xff]  }
 0x79b   : > { %21527 = vmatpush3.bf16.msra.mxu1 %v23112_v44 }
 0x79c   : > { %21528 = vmatprep.subr.bf16.mxu1 %v23113_v37 }
 0x79e   : > { %21521 = vmatmul.mubr.msk.bf16.gmra.mrb[56].mxu1 %vm14747_vm15, %v27704_v35 }
 0x79f   : > { %21529 = vmatpush3.bf16.msra.mxu1 %v23113_v37  ;;  %21532 = vmatprep.mubr.msk.bf16.mxu1 %vm14747_vm15, %v19220_v3 }
 0x7a0   : > { %21530 = vmatprep.subr.bf16.mxu1 %v23114_v4 }
 0x7a3   : > { %21531 = vmatpush3.bf16.msra.mxu1 %v23114_v4 }
 0x7a4   : > { %21540 = vmatprep.subr.bf16.mxu1 %v23115_v46 }
 0x7a6   : > { %21533 = vmatmul.mubr.msk.bf16.vlgmr.msra.gmra.mrb[52].mxu1 %vm14747_vm15, %v27741_v2 }
 0x7a7   : > { %21541 = vmatpush3.bf16.msra.mxu1 %v23115_v46  ;;  %21536 = vmatprep.mubr.msk.bf16.mxu1 %vm14747_vm15, %v27781_v57 }
 0x7a8   : > { %21542 = vmatprep.subr.bf16.mxu1 %v23116_v53 }
 0x7ab   : > { %21543 = vmatpush3.bf16.msra.mxu1 %v23116_v53 }
 0x7ac   : > { %21544 = vmatprep.subr.bf16.mxu1 %v23117_v5 }
 0x7ae   : > { %21537 = vmatmul.mubr.msk.bf16.gmra.mrb[56].mxu1 %vm14747_vm15, %v27803_v0 }
 0x7af   : > { %21545 = vmatpush3.bf16.msra.mxu1 %v23117_v5  ;;  %21548 = vmatprep.mubr.msk.bf16.mxu1 %vm14747_vm15, %v19240_v33  ;;  %v23122_v33 = vld [vmem:[%s28530_s10 + $0x98] sm:$0xff]  }
 0x7b0   : > { %21546 = vmatprep.subr.bf16.mxu1 %v23118_v7 }
 0x7b3   : > { %21547 = vmatpush3.bf16.msra.mxu1 %v23118_v7 }
 0x7b4   : > { %21556 = vmatprep.subr.bf16.mxu1 %v23119_v1 }
 0x7b6   : > { %21549 = vmatmul.mubr.msk.bf16.vlgmr.msra.gmra.mrb[52].mxu1 %vm14747_vm15, %v19241_v10  ;;  %v23123_v10 = vld [vmem:[%s28530_s10 + $0xa0] sm:$0xff]  }
 0x7b7   : > { %21557 = vmatpush3.bf16.msra.mxu1 %v23119_v1  ;;  %21552 = vmatprep.mubr.msk.bf16.mxu1 %vm14747_vm15, %v19242_v50  ;;  %v23124_v50 = vld [vmem:[%s28530_s10 + $0xa8] sm:$0xff]  }
 0x7b8   : > { %21558 = vmatprep.subr.bf16.mxu1 %v23120_v39 }
 0x7bb   : > { %21559 = vmatpush3.bf16.msra.mxu1 %v23120_v39 }
 0x7bc   : > { %21560 = vmatprep.subr.bf16.mxu1 %v23121_v23 }
 0x7be   : > { %21553 = vmatmul.mubr.msk.bf16.gmra.mrb[56].mxu1 %vm14747_vm15, %v19243_v24  ;;  %v23126_v24 = vld [vmem:[%s28530_s10 + $0xb8] sm:$0xff]  }
 0x7bf   : > { %21561 = vmatpush3.bf16.msra.mxu1 %v23121_v23  ;;  %21564 = vmatprep.mubr.msk.bf16.mxu1 %vm14747_vm15, %v19262_v6 }
 0x7c0   : > { %21562 = vmatprep.subr.bf16.mxu1 %v23122_v33 }
 0x7c3   : > { %21563 = vmatpush3.bf16.msra.mxu1 %v23122_v33 }
 0x7c4   : > { %21572 = vmatprep.subr.bf16.mxu1 %v23123_v10 }
 0x7c6   : > { %21565 = vmatmul.mubr.msk.bf16.vlgmr.msra.gmra.mrb[52].mxu1 %vm14747_vm15, %v19263_v17  ;;  %v23129_v17 = vld [vmem:[%s28530_s10 + $0xd0] sm:$0xff]  }
 0x7c7   : > { %21573 = vmatpush3.bf16.msra.mxu1 %v23123_v10  ;;  %21568 = vmatprep.mubr.msk.bf16.mxu1 %vm14747_vm15, %v19264_v31 }
 0x7c8   : > { %21574 = vmatprep.subr.bf16.mxu1 %v23124_v50 }
 0x7cb   : > { %21575 = vmatpush3.bf16.msra.mxu1 %v23124_v50 }
 0x7cc   : > { %21576 = vmatprep.subr.bf16.mxu1 %v23125_v19 }
 0x7ce   : > { %21569 = vmatmul.mubr.msk.bf16.gmra.mrb[56].mxu1 %vm14747_vm15, %v19265_v14 }
 0x7cf   : > { %21577 = vmatpush3.bf16.msra.mxu1 %v23125_v19  ;;  %21580 = vmatprep.mubr.msk.bf16.mxu1 %vm14747_vm15, %v19283_v15 }
 0x7d0   : > { %21578 = vmatprep.subr.bf16.mxu1 %v23126_v24 }
 0x7d3   : > { %21579 = vmatpush3.bf16.msra.mxu1 %v23126_v24 }
 0x7d4   : > { %21588 = vmatprep.subr.bf16.mxu1 %v23127_v63 }
 0x7d6   : > { %21581 = vmatmul.mubr.msk.bf16.vlgmr.msra.gmra.mrb[52].mxu1 %vm14747_vm15, %v19284_v52  ;;  %v23142_v52 = vld [vmem:[%s28532_s12 + $0x38] sm:$0xff]  }
 0x7d7   : > { %21589 = vmatpush3.bf16.msra.mxu1 %v23127_v63  ;;  %21584 = vmatprep.mubr.msk.bf16.mxu1 %vm14747_vm15, %v19285_v43 }
 0x7d8   : > { %21590 = vmatprep.subr.bf16.mxu1 %v23128_v9 }
 0x7db   : > { %21591 = vmatpush3.bf16.msra.mxu1 %v23128_v9 }
 0x7dc   : > { %21592 = vmatprep.subr.bf16.mxu1 %v23129_v17 }
 0x7de   : > { %21585 = vmatmul.mubr.msk.bf16.gmra.mrb[56].mxu1 %vm14747_vm15, %v19286_v30 }
 0x7df   : > { %21593 = vmatpush3.bf16.msra.mxu1 %v23129_v17  ;;  %21596 = vmatprep.mubr.msk.bf16.mxu1 %vm14747_vm15, %v27561_v41  ;;  %v23133_v41 = vld [vmem:[%s28530_s10 + $0xf0] sm:$0xff]  }
 0x7e0   : > { %21594 = vmatprep.subr.bf16.mxu1 %v23130_v54 }
 0x7e3   : > { %21595 = vmatpush3.bf16.msra.mxu1 %v23130_v54 }
 0x7e4   : > { %21604 = vmatprep.subr.bf16.mxu1 %v23131_v58 }
 0x7e6   : > { %21597 = vmatmul.mubr.msk.bf16.vlgmr.msra.gmra.mrb[52].mxu1 %vm14747_vm15, %v27700_v26  ;;  %v23135_v26 = vld [vmem:[%s28530_s10 + $0x100] sm:$0xff]  }
 0x7e7   : > { %21605 = vmatpush3.bf16.msra.mxu1 %v23131_v58  ;;  %21600 = vmatprep.mubr.msk.bf16.mxu1 %vm14747_vm15, %v27704_v35  ;;  %v19320_v35 = vcombine.low %v27835_v49, %v28864_v59 }
 0x7e8   : > { %21606 = vmatprep.subr.bf16.mxu1 %v23132_v18 }
 0x7eb   : > { %21607 = vmatpush3.bf16.msra.mxu1 %v23132_v18 }
 0x7ec   : > { %21608 = vmatprep.subr.bf16.mxu1 %v23133_v41 }
 0x7ee   : > { %21601 = vmatmul.mubr.msk.bf16.gmra.mrb[56].mxu1 %vm14747_vm15, %v19303_v48 }
 0x7ef   : > { %21609 = vmatpush3.bf16.msra.mxu1 %v23133_v41  ;;  %21612 = vmatprep.mubr.msk.bf16.mxu1 %vm14747_vm15, %v27625_v51  ;;  %v23137_v51 = vld [vmem:[%s28530_s10 + $0x110] sm:$0xff]  }
 0x7f0   : > { %21610 = vmatprep.subr.bf16.mxu1 %v23134_v12 }
 0x7f3   : > { %21611 = vmatpush3.bf16.msra.mxu1 %v23134_v12 }
 0x7f4   : > { %21620 = vmatprep.subr.bf16.mxu1 %v23135_v26 }
 0x7f6   : > { %21613 = vmatmul.mubr.msk.bf16.vlgmr.msra.gmra.mrb[52].mxu1 %vm14747_vm15, %v27722_v11  ;;  %v19337_v11 = vcombine.low %v27822_v28, %v28867_v47 }
 0x7f7   : > { %21621 = vmatpush3.bf16.msra.mxu1 %v23135_v26  ;;  %21616 = vmatprep.mubr.msk.bf16.mxu1 %vm14747_vm15, %v27758_v55  ;;  %v23139_v55 = vld [vmem:[%s28532_s12 + $0x20] sm:$0xff]  }
 0x7f8   : > { %21622 = vmatprep.subr.bf16.mxu1 %v23136_v16 }
 0x7fb   : > { %21623 = vmatpush3.bf16.msra.mxu1 %v23136_v16 }
 0x7fc   : > { %21624 = vmatprep.subr.bf16.mxu1 %v23137_v51 }
 0x7fe   : > { %21617 = vmatmul.mubr.msk.bf16.gmra.mrb[56].mxu1 %vm14747_vm15, %v19320_v35 }
 0x7ff   : > { %21625 = vmatpush3.bf16.msra.mxu1 %v23137_v51  ;;  %21628 = vmatprep.mubr.msk.bf16.mxu1 %vm14747_vm15, %v27741_v2  ;;  %v23140_v2 = vld [vmem:[%s28532_s12 + $0x28] sm:$0xff]  }
 0x800   : > { %21626 = vmatprep.subr.bf16.mxu1 %v23138_v29 }
 0x803   : > { %21627 = vmatpush3.bf16.msra.mxu1 %v23138_v29 }
 0x804   : > { %21636 = vmatprep.subr.bf16.mxu1 %v23139_v55 }
 0x806   : > { %21629 = vmatmul.mubr.msk.bf16.vlgmr.msra.gmra.mrb[52].mxu1 %vm14747_vm15, %v27781_v57  ;;  %v28000_v57 = vld [vmem:[%s28532_s12] sm:$0xff]  }
 0x807   : > { %21632 = vmatprep.mubr.msk.bf16.mxu1 %vm14747_vm15, %v27803_v0  ;;  %21637 = vmatpush3.bf16.msra.mxu1 %v23139_v55 }
 0x808   : > { %21638 = vmatprep.subr.bf16.mxu1 %v23140_v2 }
 0x80b   : > { %21639 = vmatpush3.bf16.msra.mxu1 %v23140_v2 }
 0x80c   : > { %21640 = vmatprep.subr.bf16.mxu1 %v23141_v42 }
 0x80e   : > { %21633 = vmatmul.mubr.msk.bf16.gmra.mrb[56].mxu1 %vm14747_vm15, %v19337_v11 }
 0x80f   : > { %21641 = vmatpush3.bf16.msra.mxu1 %v23141_v42 }
 0x810   : > { %21642 = vmatprep.subr.bf16.mxu1 %v23142_v52 }
 0x813   : > { %21643 = vmatpush3.bf16.msra.mxu1 %v23142_v52 }
 0x814   : > { %21652 = vmatprep.subr.bf16.mxu1 %v28000_v57 }
 0x8d9   : > { %v21630_v45 = vpop.f32.mrb[52].mxu1 }
 0x8da   : > { %v15817_v38 = vadd.f32 %v21630_v45, %v19346_v22  ;;  %v15769_v0 = vpop.f32.mrb[53].mxu1 }
 0x8db   : > { %v15815_v6 = vadd.f32 %v19346_v22, %v15769_v0  ;;  %v21631_v31 = vpop.f32.mrb[54].mxu1 }
 0x8dc   : > { %v15825_v56 = vmax.f32 %v15817_v38, 0.0  ;;  %v15818_v40 = vadd.f32 %v21631_v31, %v19346_v22  ;;  %v15772_v15 = vpop.f32.mrb[55].mxu1 }
 0x8dd   : > { %v15823_v43 = vmax.f32 %v15815_v6, 0.0  ;;  %v15816_v21 = vadd.f32 %v19346_v22, %v15772_v15 }
 0x8de   : > { %v15833_v60 = vpack.c.bf16 %v15825_v56, %v15825_v56  ;;  %v15826_v25 = vmax.f32 %v15818_v40, 0.0 }
 0x8df   : > { %v15831_v34 = vpack.c.bf16 %v15823_v43, %v15823_v43  ;;  %v15824_v44 = vmax.f32 %v15816_v21, 0.0 }
 0x8e0   : > { %v15854_v20 = vshrl.u32 %v15833_v60, 16  ;;  %v15834_v28 = vpack.c.bf16 %v15826_v25, %v15826_v25  ;;  %v15857_v30 = vshll.u32 %v15833_v60, 16 }
 0x8e1   : > { %v15840_v61 = vshrl.u32 %v15831_v34, 16  ;;  %v15832_v36 = vpack.c.bf16 %v15824_v44, %v15824_v44  ;;  %v21634_v37 = vpop.f32.mrb[56].mxu1  ;;  %v15843_v14 = vshll.u32 %v15831_v34, 16 }
 0x8e2   : > { %v15856_v49 = vrot.slane %v15854_v20, 7  ;;  %v15861_v4 = vshrl.u32 %v15834_v28, 16  ;;  %v15821_v3 = vadd.f32 %v21634_v37, %v19346_v22  ;;  %v15785_v46 = vpop.f32.mrb[57].mxu1  ;;  %v15864_v5 = vshll.u32 %v15834_v28, 16 }
 0x8e3   : > { %v15842_v53 = vrot.slane %v15840_v61, 7  ;;  %v15847_v7 = vshrl.u32 %v15832_v36, 16  ;;  %v15819_v1 = vadd.f32 %v19346_v22, %v15785_v46  ;;  %v21635_v39 = vpop.f32.mrb[58].mxu1  ;;  %v15850_v9 = vshll.u32 %v15832_v36, 16 }
 0x8e4   : > { %v15859_v23 = vor.u32 %v15857_v30, %v15856_v49  ;;  %v15863_v33 = vrot.slane %v15861_v4, 7  ;;  %v15829_v10 = vmax.f32 %v15821_v3, 0.0  ;;  %v15822_v50 = vadd.f32 %v21635_v39, %v19346_v22  ;;  %v15788_v19 = vpop.f32.mrb[59].mxu1 }
 0x8e5   : > { %v15845_v24 = vor.u32 %v15843_v14, %v15842_v53  ;;  %v15849_v63 = vrot.slane %v15847_v7, 7  ;;  %v15827_v17 = vmax.f32 %v15819_v1, 0.0  ;;  %v15820_v41 = vadd.f32 %v19346_v22, %v15788_v19 }
 0x8e6   : > { %v15905_v54 = vsel %vm24407_vm11, 0, %v15859_v23  ;;  %v15866_v58 = vor.u32 %v15864_v5, %v15863_v33  ;;  %v15837_v18 = vpack.c.bf16 %v15829_v10, %v15829_v10  ;;  %v15830_v16 = vmax.f32 %v15822_v50, 0.0 }
 0x8e7   : > { %v28010_v48 = vsel %vm24427_vm13, %v15905_v54, 0  ;;  %v15903_v12 = vsel %vm24407_vm11, 0, %v15845_v24  ;;  %v15852_v26 = vor.u32 %v15850_v9, %v15849_v63  ;;  %v15835_v52 = vpack.c.bf16 %v15827_v17, %v15827_v17 }
 0x8e8   : > { %v28016_v51 = vcombine.low %v28010_v48, %v28010_v48  ;;  %v28020_v35 = vcombine.high %v28010_v48, %v28010_v48  ;;  %v28024_v29 = vsel %vm24427_vm13, %v15903_v12, 0  ;;  %v15906_v11 = vsel %vm24407_vm11, 0, %v15866_v58 }
 0x8e9   : > { %v28030_v55 = vcombine.low %v28024_v29, %v28024_v29  ;;  %v28034_v2 = vsel %vm24427_vm13, %v15906_v11, 0  ;;  %v15904_v42 = vsel %vm24407_vm11, 0, %v15852_v26  ;;  %v28043_v0 = vcombine.high %v28024_v29, %v28024_v29 }
 0x8ea   : > { %v15991_v22 = vshrl.u32 %v28016_v51, 16  ;;  %v15994_v45 = vshll.u32 %v28016_v51, 16  ;;  %v16000_v38 = vshll.u32 %v28020_v35, 16  ;;  %v19395_v6 = vrot.slane %v28016_v51, 9 }
 0x8eb   : > { %v16296_v31 = vrot.slane %v28020_v35, 5  ;;  %v28049_v56 = vcombine.low %v28034_v2, %v28034_v2  ;;  %v19429_v40 = vcombine.low %v28010_v48, %v28034_v2  ;;  %v28055_v21 = vcombine.high %v28034_v2, %v28034_v2 }
 0x8ec   : > { %v15993_v15 = vrot.slane %v15991_v22, 4  ;;  %v15996_v43 = vrot.slane %v15994_v45, 5  ;;  %v28059_v60 = vsel %vm24427_vm13, %v15904_v42, 0  ;;  %v15882_v20 = vshrl.u32 %v15837_v18, 16 }
 0x8ed   : > { %v28063_v25 = vcombine.low %v28059_v60, %v28059_v60  ;;  %v28067_v34 = vcombine.high %v28059_v60, %v28059_v60  ;;  %v28071_v44 = vcombine.low %v28059_v60, %v28010_v48  ;;  %v16002_v30 = vrot.slane %v16000_v38, 5  ;;  %v23159_v48 = vld [vmem:[%s28532_s12 + $0xa0] sm:$0xff]  }
 0x8ee   : > { %v15997_v28 = vor.u32 %v15996_v43, %v15993_v15  ;;  %v15885_v61 = vshll.u32 %v15837_v18, 16  ;;  %v15868_v36 = vshrl.u32 %v15835_v52, 16  ;;  %v15871_v4 = vshll.u32 %v15835_v52, 16 }
 0x8ef   : > { %v15977_v37 = vshrl.u32 %v28063_v25, 16  ;;  %v15980_v49 = vshll.u32 %v28063_v25, 16  ;;  %v15986_v14 = vshll.u32 %v28067_v34, 16  ;;  %v19394_v46 = vrot.slane %v28063_v25, 9 }
 0x8f0   : > { %v15998_v3 = vrot.slane %v15997_v28, 4  ;;  %v15884_v53 = vrot.slane %v15882_v20, 7  ;;  %v15870_v5 = vrot.slane %v15868_v36, 7  ;;  %v16292_v39 = vrot.slane %v28067_v34, 5 }
 0x8f1   : > { %v15979_v7 = vrot.slane %v15977_v37, 4  ;;  %v15982_v1 = vrot.slane %v15980_v49, 5  ;;  %v15838_v23 = vpack.c.bf16 %v15830_v16, %v15830_v16  ;;  %v15828_v50 = vmax.f32 %v15820_v41, 0.0 }
 0x8f2   : > { %v15887_v33 = vor.u32 %v15885_v61, %v15884_v53  ;;  %v15873_v10 = vor.u32 %v15871_v4, %v15870_v5  ;;  %v15963_v19 = vshrl.u32 %v28030_v55, 16  ;;  %v15966_v17 = vshll.u32 %v28030_v55, 16 }
 0x8f3   : > { %v15983_v24 = vor.u32 %v15982_v1, %v15979_v7  ;;  %v15889_v63 = vshrl.u32 %v15838_v23, 16  ;;  %v15892_v9 = vshll.u32 %v15838_v23, 16  ;;  %v15836_v18 = vpack.c.bf16 %v15828_v50, %v15828_v50 }
 0x8f4   : > { %v15909_v54 = vsel %vm24407_vm11, 0, %v15887_v33  ;;  %v15907_v58 = vsel %vm24407_vm11, 0, %v15873_v10  ;;  %v15965_v12 = vrot.slane %v15963_v19, 4  ;;  %v15988_v42 = vrot.slane %v15986_v14, 5 }
 0x8f5   : > { %v15984_v26 = vrot.slane %v15983_v24, 4  ;;  %v28086_v16 = vsel %vm24427_vm13, %v15909_v54, 0  ;;  %v28090_v41 = vsel %vm24427_vm13, %v15907_v58, 0  ;;  %v15891_v11 = vrot.slane %v15889_v63, 7 }
 0x8f6   : > { %v28094_v52 = vcombine.low %v28086_v16, %v28086_v16  ;;  %v28098_v22 = vcombine.high %v28086_v16, %v28086_v16  ;;  %v28102_v45 = vcombine.low %v28090_v41, %v28090_v41  ;;  %v15875_v15 = vshrl.u32 %v15836_v18, 16 }
 0x8f7   : > { %v15894_v38 = vor.u32 %v15892_v9, %v15891_v11  ;;  %v15878_v43 = vshll.u32 %v15836_v18, 16  ;;  %v15968_v20 = vrot.slane %v15966_v17, 5  ;;  %v15972_v28 = vshll.u32 %v28043_v0, 16 }
 0x8f8   : > { %v28107_v61 = vsel %vm23429_vm2, %v15984_v26, %v15988_v42  ;;  %v28111_v36 = vsel %vm23429_vm2, %v15998_v3, %v16002_v30  ;;  %v16005_v37 = vshrl.u32 %v28049_v56, 16  ;;  %v15877_v14 = vrot.slane %v15875_v15, 7 }
 0x8f9   : > { %v15910_v49 = vsel %vm24407_vm11, 0, %v15894_v38  ;;  %v15969_v4 = vor.u32 %v15968_v20, %v15965_v12  ;;  %v28118_v53 = vcombine.low %v28107_v61, %v28111_v36  ;;  %v28122_v5 = vcombine.high %v28090_v41, %v28090_v41 }
 0x8fa   : > { %v28126_v7 = vsel %vm24427_vm13, %v15910_v49, 0  ;;  %v16007_v30 = vrot.slane %v16005_v37, 4  ;;  %v16008_v3 = vshll.u32 %v28049_v56, 16  ;;  %v15880_v23 = vor.u32 %v15878_v43, %v15877_v14 }
 0x8fb   : > { %v28131_v1 = vcombine.low %v28126_v7, %v28126_v7  ;;  %v15970_v33 = vrot.slane %v15969_v4, 4  ;;  %v15974_v10 = vrot.slane %v15972_v28, 5  ;;  %v16014_v19 = vshll.u32 %v28055_v21, 16 }
 0x8fc   : > { %v16010_v50 = vrot.slane %v16008_v3, 5  ;;  %v16019_v24 = vshrl.u32 %v28102_v45, 16  ;;  %v16022_v63 = vshll.u32 %v28102_v45, 16  ;;  %v28138_v9 = vcombine.high %v28126_v7, %v28126_v7 }
 0x8fd   : > { %v15908_v17 = vsel %vm24407_vm11, 0, %v15880_v23  ;;  %v28144_v54 = vsel %vm23429_vm2, %v15970_v33, %v15974_v10  ;;  %v16047_v58 = vshrl.u32 %v28094_v52, 16  ;;  %v16028_v11 = vshll.u32 %v28122_v5, 16 }
 0x8fe   : > { %v28149_v18 = vsel %vm24427_vm13, %v15908_v17, 0  ;;  %v19369_v12 = vcombine.low %v28864_v59, %v28144_v54  ;;  %v16011_v26 = vor.u32 %v16010_v50, %v16007_v30  ;;  %v16021_v38 = vrot.slane %v16019_v24, 4  ;;  %v23145_v24 = vld [vmem:[%s28532_s12 + $0x10] sm:$0xff]  }
 0x8ff   : > { %v28156_v13 = vcombine.low %v28149_v18, %v28149_v18  ;;  %v28160_v42 = vcombine.high %v28149_v18, %v28149_v18  ;;  %v16024_v15 = vrot.slane %v16022_v63, 5  ;;  %v16016_v20 = vrot.slane %v16014_v19, 5 }
 0x900   : > { %21644 = vmatprep.mubr.msk.bf16.mxu1 %vm14747_vm15, %v19369_v12  ;;  %v16012_v43 = vrot.slane %v16011_v26, 4  ;;  %v16049_v28 = vrot.slane %v16047_v58, 4  ;;  %v16050_v37 = vshll.u32 %v28094_v52, 16  ;;  %v16030_v23 = vrot.slane %v16028_v11, 5 }
 0x901   : > { %21645 = vmatmul.mubr.msk.bf16.vlgmr.msra.gmra.mrb[60].mxu1 %vm14747_vm15, %v28118_v53  ;;  %v16025_v49 = vor.u32 %v16024_v15, %v16021_v38  ;;  %v16033_v14 = vshrl.u32 %v28156_v13, 16  ;;  %v16036_v4 = vshll.u32 %v28156_v13, 16  ;;  %v16042_v30 = vshll.u32 %v28160_v42, 16 }
 0x902   : > { %21653 = vmatpush3.bf16.msra.mxu1 %v28000_v57  ;;  %v28175_v3 = vsel %vm23429_vm2, %v16012_v43, %v16016_v20  ;;  %v16052_v33 = vrot.slane %v16050_v37, 5  ;;  %v16056_v10 = vshll.u32 %v28098_v22, 16  ;;  %v28185_v26 = vcombine.low %v28034_v2, %v28090_v41  ;;  %v23160_v2 = vld [vmem:[%s28532_s12 + $0xa8] sm:$0xff]  }
 0x903   : > { %21654 = vmatprep.subr.bf16.mxu1 %v23144_v8  ;;  %v16026_v50 = vrot.slane %v16025_v49, 4  ;;  %v19451_v19 = vcombine.low %v28111_v36, %v28175_v3  ;;  %v16035_v63 = vrot.slane %v16033_v14, 4  ;;  %v16038_v17 = vrot.slane %v16036_v4, 5  ;;  %v23164_v36 = vld [vmem:[%s28532_s12 + $0xc8] sm:$0xff]  }
 0x904   : > { %v16044_v57 = vrot.slane %v16042_v30, 5  ;;  %v16053_v58 = vor.u32 %v16052_v33, %v16049_v28  ;;  %v16058_v12 = vrot.slane %v16056_v10, 5  ;;  %v28193_v15 = vcombine.low %v28149_v18, %v28086_v16 }
 0x905   : > { %v28189_v11 = vsel %vm23429_vm2, %v16026_v50, %v16030_v23  ;;  %v16039_v38 = vor.u32 %v16038_v17, %v16035_v63  ;;  %v19393_v43 = vrot.slane %v28030_v55, 9  ;;  %v16288_v37 = vrot.slane %v28043_v0, 5  ;;  %v23146_v55 = vld [vmem:[%s28532_s12 + $0x18] sm:$0xff]   ;;  %v23147_v23 = vld [vmem:[%s28532_s12 + $0x40] sm:$0xff]  }
 0x906   : > { %21655 = vmatpush3.bf16.msra.mxu1 %v23144_v8  ;;  %v28198_v20 = vcombine.low %v28175_v3, %v28189_v11  ;;  %v16054_v28 = vrot.slane %v16053_v58, 4  ;;  %v28207_v49 = vsel %vm23467_vm6, %v19394_v46, %v16292_v39  ;;  %v28218_v0 = vsel %vm23467_vm6, %v19395_v6, %v16296_v31  ;;  %v23166_v3 = vld [vmem:[%s28532_s12 + $0xd8] sm:$0xff]  }
 0x907   : > { %21656 = vmatprep.subr.bf16.mxu1 %v23145_v24  ;;  %v16040_v14 = vrot.slane %v16039_v38, 4  ;;  %v19396_v25 = vrot.slane %v28049_v56, 9  ;;  %v16300_v34 = vrot.slane %v28055_v21, 5  ;;  %v19381_v35 = vcombine.low %v28866_v62, %v28024_v29 }
 0x908   : > { %21648 = vmatprep.mubr.msk.bf16.mxu1 %vm14747_vm15, %v28198_v20  ;;  %v28226_v46 = vsel %vm23429_vm2, %v16054_v28, %v16058_v12  ;;  %v28232_v51 = vcombine.low %v28207_v49, %v28218_v0  ;;  %v19397_v6 = vrot.slane %v28102_v45, 9  ;;  %v28241_v56 = vsel %vm23467_vm6, %v19393_v43, %v16288_v37 }
 0x909   : > { %v28237_v31 = vsel %vm23429_vm2, %v16040_v14, %v16044_v57  ;;  %v28245_v21 = vsel %vm23467_vm6, %v19396_v25, %v16300_v34  ;;  %v16304_v39 = vrot.slane %v28122_v5, 5  ;;  %v19398_v4 = vrot.slane %v28156_v13, 9  ;;  %v23148_v14 = vld [vmem:[%s28532_s12 + $0x48] sm:$0xff]  }
 0x90a   : > { %v28250_v8 = vcombine.low %v28237_v31, %v28226_v46  ;;  %21657 = vmatpush3.bf16.msra.mxu1 %v23145_v24  ;;  %v19472_v45 = vcombine.low %v28218_v0, %v28245_v21  ;;  %v16308_v30 = vrot.slane %v28160_v42, 5  ;;  %v19399_v33 = vrot.slane %v28094_v52, 9  ;;  %v23170_v0 = vld [vmem:[%s28532_s12 + $0xf8] sm:$0xff]  }
 0x90b   : > { %21658 = vmatprep.subr.bf16.mxu1 %v23146_v55  ;;  %v28261_v5 = vsel %vm23467_vm6, %v19397_v6, %v16304_v39  ;;  %v16312_v10 = vrot.slane %v28098_v22, 5  ;;  %v19428_v50 = vcombine.low %v28024_v29, %v28059_v60  ;;  %v19430_v24 = vcombine.low %v28090_v41, %v28149_v18  ;;  %v23150_v6 = vld [vmem:[%s28532_s12 + $0x58] sm:$0xff]  }
 0x90c   : > { %21649 = vmatmul.mubr.msk.bf16.gmra.mrb[64].mxu1 %vm14747_vm15, %v28250_v8  ;;  %v28271_v13 = vcombine.low %v28245_v21, %v28261_v5  ;;  %v28275_v42 = vsel %vm23467_vm6, %v19398_v4, %v16308_v30  ;;  %v19431_v52 = vcombine.low %v28086_v16, %v28126_v7  ;;  %v19450_v60 = vcombine.low %v28144_v54, %v28107_v61  ;;  %v23153_v4 = vld [vmem:[%s28532_s12 + $0x70] sm:$0xff]   ;;  %v23154_v30 = vld [vmem:[%s28532_s12 + $0x78] sm:$0xff]   ;;  %v23163_v61 = vld [vmem:[%s28532_s12 + $0xc0] sm:$0xff]  }
 0x90d   : > { %21660 = vmatprep.mubr.msk.bf16.mxu1 %vm14747_vm15, %v19381_v35  ;;  %v28284_v29 = vsel %vm23467_vm6, %v19399_v33, %v16312_v10  ;;  %v19452_v22 = vcombine.low %v28189_v11, %v28237_v31  ;;  %v16571_v63 = vshrl.u32 %v28131_v1, 16  ;;  %v16574_v18 = vshll.u32 %v28131_v1, 16  ;;  %v23156_v33 = vld [vmem:[%s28532_s12 + $0x88] sm:$0xff]   ;;  %v23157_v10 = vld [vmem:[%s28532_s12 + $0x90] sm:$0xff]   ;;  %v23162_v16 = vld [vmem:[%s28532_s12 + $0xb8] sm:$0xff]  }
 0x90e   : > { %21659 = vmatpush3.bf16.msra.mxu1 %v23146_v55  ;;  %v28293_v41 = vcombine.low %v28275_v42, %v28284_v29  ;;  %v19471_v17 = vcombine.low %v28241_v56, %v28207_v49  ;;  %v19473_v58 = vcombine.low %v28261_v5, %v28275_v42  ;;  %v19462_v12 = vrot.slane %v28131_v1, 9  ;;  %v23165_v54 = vld [vmem:[%s28532_s12 + $0xd0] sm:$0xff]   ;;  %v23168_v11 = vld [vmem:[%s28532_s12 + $0xe8] sm:$0xff]  }
 0x90f   : > { %21668 = vmatprep.subr.bf16.mxu1 %v23147_v23  ;;  %v16573_v57 = vrot.slane %v16571_v63, 4  ;;  %v16709_v38 = vrot.slane %v28138_v9, 5  ;;  %v16576_v43 = vrot.slane %v16574_v18, 5  ;;  %v16580_v28 = vshll.u32 %v28138_v9, 16 }
 0x910   : > { %v19408_v39 = vcombine.low %v28867_v47, %v28241_v56  ;;  %v19491_v49 = vcombine.low %v28126_v7, %v28866_v62  ;;  %v23172_v62 = vld [vmem:[%s28532_s12 + $0x108] sm:$0xff]  }
 0x911   : > { %v28305_v37 = vsel %vm23467_vm6, %v19462_v12, %v16709_v38  ;;  %v16577_v55 = vor.u32 %v16576_v43, %v16573_v57  ;;  %v16582_v34 = vrot.slane %v16580_v28, 5 }
 0x912   : > { %v19474_v25 = vcombine.low %v28284_v29, %v28305_v37 }
 0x913   : > { %v16578_v1 = vrot.slane %v16577_v55, 4 }
 0x914   : > { %21661 = vmatmul.mubr.msk.bf16.vlgmr.msra.gmra.mrb[60].mxu1 %vm14747_vm15, %v28071_v44 }
 0x915   : > { %21669 = vmatpush3.bf16.msra.mxu1 %v23147_v23  ;;  %21664 = vmatprep.mubr.msk.bf16.mxu1 %vm14747_vm15, %v28185_v26  ;;  %v28321_v9 = vsel %vm23429_vm2, %v16578_v1, %v16582_v34  ;;  %v23155_v23 = vld [vmem:[%s28532_s12 + $0x80] sm:$0xff]  }
 0x916   : > { %21670 = vmatprep.subr.bf16.mxu1 %v23148_v14  ;;  %v19453_v35 = vcombine.low %v28226_v46, %v28321_v9  ;;  %v23152_v46 = vld [vmem:[%s28532_s12 + $0x68] sm:$0xff]   ;;  %v19508_v7 = vcombine.low %v28321_v9, %v28864_v59  ;;  %v19525_v59 = vcombine.low %v28305_v37, %v28867_v47 }
 0x919   : > { %21671 = vmatpush3.bf16.msra.mxu1 %v23148_v14 }
 0x91a   : > { %21672 = vmatprep.subr.bf16.mxu1 %v23149_v32 }
 0x91c   : > { %21665 = vmatmul.mubr.msk.bf16.gmra.mrb[64].mxu1 %vm14747_vm15, %v28193_v15 }
 0x91d   : > { %21673 = vmatpush3.bf16.msra.mxu1 %v23149_v32  ;;  %21676 = vmatprep.mubr.msk.bf16.mxu1 %vm14747_vm15, %v19408_v39 }
 0x91e   : > { %21674 = vmatprep.subr.bf16.mxu1 %v23150_v6 }
 0x921   : > { %21675 = vmatpush3.bf16.msra.mxu1 %v23150_v6 }
 0x922   : > { %21684 = vmatprep.subr.bf16.mxu1 %v23151_v27 }
 0x924   : > { %21677 = vmatmul.mubr.msk.bf16.vlgmr.msra.gmra.mrb[60].mxu1 %vm14747_vm15, %v28232_v51 }
 0x925   : > { %21685 = vmatpush3.bf16.msra.mxu1 %v23151_v27  ;;  %21680 = vmatprep.mubr.msk.bf16.mxu1 %vm14747_vm15, %v28271_v13 }
 0x926   : > { %21686 = vmatprep.subr.bf16.mxu1 %v23152_v46 }
 0x929   : > { %21687 = vmatpush3.bf16.msra.mxu1 %v23152_v46 }
 0x92a   : > { %21688 = vmatprep.subr.bf16.mxu1 %v23153_v4 }
 0x92c   : > { %21681 = vmatmul.mubr.msk.bf16.gmra.mrb[64].mxu1 %vm14747_vm15, %v28293_v41 }
 0x92d   : > { %21689 = vmatpush3.bf16.msra.mxu1 %v23153_v4  ;;  %21692 = vmatprep.mubr.msk.bf16.mxu1 %vm14747_vm15, %v19428_v50  ;;  %v23158_v50 = vld [vmem:[%s28532_s12 + $0x98] sm:$0xff]  }
 0x92e   : > { %21690 = vmatprep.subr.bf16.mxu1 %v23154_v30 }
 0x931   : > { %21691 = vmatpush3.bf16.msra.mxu1 %v23154_v30 }
 0x932   : > { %21700 = vmatprep.subr.bf16.mxu1 %v23155_v23 }
 0x934   : > { %21693 = vmatmul.mubr.msk.bf16.vlgmr.msra.gmra.mrb[60].mxu1 %vm14747_vm15, %v19429_v40  ;;  %v23161_v40 = vld [vmem:[%s28532_s12 + $0xb0] sm:$0xff]  }
 0x935   : > { %21701 = vmatpush3.bf16.msra.mxu1 %v23155_v23  ;;  %21696 = vmatprep.mubr.msk.bf16.mxu1 %vm14747_vm15, %v19430_v24 }
 0x936   : > { %21702 = vmatprep.subr.bf16.mxu1 %v23156_v33 }
 0x939   : > { %21703 = vmatpush3.bf16.msra.mxu1 %v23156_v33 }
 0x93a   : > { %21704 = vmatprep.subr.bf16.mxu1 %v23157_v10 }
 0x93c   : > { %21697 = vmatmul.mubr.msk.bf16.gmra.mrb[64].mxu1 %vm14747_vm15, %v19431_v52 }
 0x93d   : > { %21705 = vmatpush3.bf16.msra.mxu1 %v23157_v10  ;;  %21708 = vmatprep.mubr.msk.bf16.mxu1 %vm14747_vm15, %v19450_v60 }
 0x93e   : > { %21706 = vmatprep.subr.bf16.mxu1 %v23158_v50 }
 0x941   : > { %21707 = vmatpush3.bf16.msra.mxu1 %v23158_v50 }
 0x942   : > { %21716 = vmatprep.subr.bf16.mxu1 %v23159_v48 }
 0x944   : > { %21709 = vmatmul.mubr.msk.bf16.vlgmr.msra.gmra.mrb[60].mxu1 %vm14747_vm15, %v19451_v19  ;;  %v23167_v19 = vld [vmem:[%s28532_s12 + $0xe0] sm:$0xff]  }
 0x945   : > { %21717 = vmatpush3.bf16.msra.mxu1 %v23159_v48  ;;  %21712 = vmatprep.mubr.msk.bf16.mxu1 %vm14747_vm15, %v19452_v22 }
 0x946   : > { %21718 = vmatprep.subr.bf16.mxu1 %v23160_v2 }
 0x949   : > { %21719 = vmatpush3.bf16.msra.mxu1 %v23160_v2 }
 0x94a   : > { %21720 = vmatprep.subr.bf16.mxu1 %v23161_v40 }
 0x94c   : > { %21713 = vmatmul.mubr.msk.bf16.gmra.mrb[64].mxu1 %vm14747_vm15, %v19453_v35 }
 0x94d   : > { %21721 = vmatpush3.bf16.msra.mxu1 %v23161_v40  ;;  %21724 = vmatprep.mubr.msk.bf16.mxu1 %vm14747_vm15, %v19471_v17 }
 0x94e   : > { %21722 = vmatprep.subr.bf16.mxu1 %v23162_v16 }
 0x951   : > { %21723 = vmatpush3.bf16.msra.mxu1 %v23162_v16 }
 0x952   : > { %21732 = vmatprep.subr.bf16.mxu1 %v23163_v61 }
 0x954   : > { %21725 = vmatmul.mubr.msk.bf16.vlgmr.msra.gmra.mrb[60].mxu1 %vm14747_vm15, %v19472_v45 }
 0x955   : > { %21733 = vmatpush3.bf16.msra.mxu1 %v23163_v61  ;;  %21728 = vmatprep.mubr.msk.bf16.mxu1 %vm14747_vm15, %v19473_v58 }
 0x956   : > { %21734 = vmatprep.subr.bf16.mxu1 %v23164_v36 }
 0x959   : > { %21735 = vmatpush3.bf16.msra.mxu1 %v23164_v36 }
 0x95a   : > { %21736 = vmatprep.subr.bf16.mxu1 %v23165_v54 }
 0x95c   : > { %21729 = vmatmul.mubr.msk.bf16.gmra.mrb[64].mxu1 %vm14747_vm15, %v19474_v25 }
 0x95d   : > { %21737 = vmatpush3.bf16.msra.mxu1 %v23165_v54  ;;  %21740 = vmatprep.mubr.msk.bf16.mxu1 %vm14747_vm15, %v28071_v44  ;;  %v23169_v44 = vld [vmem:[%s28532_s12 + $0xf0] sm:$0xff]  }
 0x95e   : > { %21738 = vmatprep.subr.bf16.mxu1 %v23166_v3 }
 0x961   : > { %21739 = vmatpush3.bf16.msra.mxu1 %v23166_v3 }
 0x962   : > { %21748 = vmatprep.subr.bf16.mxu1 %v23167_v19 }
 0x964   : > { %21741 = vmatmul.mubr.msk.bf16.vlgmr.msra.gmra.mrb[60].mxu1 %vm14747_vm15, %v28185_v26  ;;  %v23171_v26 = vld [vmem:[%s28532_s12 + $0x100] sm:$0xff]  }
 0x965   : > { %21749 = vmatpush3.bf16.msra.mxu1 %v23167_v19  ;;  %21744 = vmatprep.mubr.msk.bf16.mxu1 %vm14747_vm15, %v28193_v15  ;;  %v23174_v15 = vld [vmem:[%s28532_s12 + $0x118] sm:$0xff]  }
 0x966   : > { %21750 = vmatprep.subr.bf16.mxu1 %v23168_v11 }
 0x969   : > { %21751 = vmatpush3.bf16.msra.mxu1 %v23168_v11 }
 0x96a   : > { %21752 = vmatprep.subr.bf16.mxu1 %v23169_v44 }
 0x96c   : > { %21745 = vmatmul.mubr.msk.bf16.gmra.mrb[64].mxu1 %vm14747_vm15, %v19491_v49 }
 0x96d   : > { %21753 = vmatpush3.bf16.msra.mxu1 %v23169_v44  ;;  %21756 = vmatprep.mubr.msk.bf16.mxu1 %vm14747_vm15, %v28118_v53  ;;  %v23173_v53 = vld [vmem:[%s28532_s12 + $0x110] sm:$0xff]  }
 0x96e   : > { %21754 = vmatprep.subr.bf16.mxu1 %v23170_v0 }
 0x971   : > { %21755 = vmatpush3.bf16.msra.mxu1 %v23170_v0 }
 0x972   : > { %21764 = vmatprep.subr.bf16.mxu1 %v23171_v26 }
 0x974   : > { %21757 = vmatmul.mubr.msk.bf16.vlgmr.msra.gmra.mrb[60].mxu1 %vm14747_vm15, %v28198_v20  ;;  %v19534_v20 = vld [vmem:[%s28533_s13] ss:$0 sm:$0xff] }
 0x975   : > { %21765 = vmatpush3.bf16.msra.mxu1 %v23171_v26  ;;  %21760 = vmatprep.mubr.msk.bf16.mxu1 %vm14747_vm15, %v28250_v8 }
 0x976   : > { %21766 = vmatprep.subr.bf16.mxu1 %v23172_v62 }
 0x979   : > { %21767 = vmatpush3.bf16.msra.mxu1 %v23172_v62 }
 0x97a   : > { %21768 = vmatprep.subr.bf16.mxu1 %v23173_v53 }
 0x97c   : > { %21761 = vmatmul.mubr.msk.bf16.gmra.mrb[64].mxu1 %vm14747_vm15, %v19508_v7 }
 0x97d   : > { %21769 = vmatpush3.bf16.msra.mxu1 %v23173_v53  ;;  %21772 = vmatprep.mubr.msk.bf16.mxu1 %vm14747_vm15, %v28232_v51 }
 0x97e   : > { %21770 = vmatprep.subr.bf16.mxu1 %v23174_v15 }
 0x981   : > { %21771 = vmatpush3.bf16.msra.mxu1 %v23174_v15 }
 0x984   : > { %21773 = vmatmul.mubr.msk.bf16.vlgmr.msra.gmra.mrb[60].mxu1 %vm14747_vm15, %v28271_v13 }
 0x985   : > { %21776 = vmatprep.mubr.msk.bf16.mxu1 %vm14747_vm15, %v28293_v41 }
 0x98c   : > { %21777 = vmatmul.mubr.msk.bf16.gmra.mrb[64].mxu1 %vm14747_vm15, %v19525_v59 }
 0xa57   : > { %v21774_v31 = vpop.f32.mrb[60].mxu1 }
 0xa58   : > { %v17173_v56 = vadd.f32 %v21774_v31, %v19534_v20  ;;  %v17125_v51 = vpop.f32.mrb[61].mxu1 }
 0xa59   : > { %v17171_v21 = vadd.f32 %v19534_v20, %v17125_v51  ;;  %v21775_v8 = vpop.f32.mrb[62].mxu1 }
 0xa5a   : > { %23175 = vtanh.f32 %v17173_v56  ;;  %v19537_v45 = vmul.f32 -1.442695, %v17173_v56  ;;  %v17174_v5 = vadd.f32 %v21775_v8, %v19534_v20  ;;  %v17128_v13 = vpop.f32.mrb[63].mxu1 }
 0xa5b   : > { %23177 = vtanh.f32 %v17171_v21  ;;  %v19535_v42 = vmul.f32 -1.442695, %v17171_v21  ;;  %v17172_v24 = vadd.f32 %v19534_v20, %v17128_v13 }
 0xa5c   : > { %23179 = vpow2.f32 %v19537_v45  ;;  %v19538_v47 = vmul.f32 -1.442695, %v17174_v5 }
 0xa5d   : > { %23181 = vpow2.f32 %v19535_v42  ;;  %v19536_v52 = vmul.f32 -1.442695, %v17172_v24 }
 0xa5e   : > { %23183 = vtanh.f32 %v17174_v5 }
 0xa5f   : > { %23185 = vpow2.f32 %v19538_v47  ;;  %v21778_v29 = vpop.f32.mrb[64].mxu1 }
 0xa60   : > { %23187 = vtanh.f32 %v17172_v24  ;;  %v17177_v60 = vadd.f32 %v21778_v29, %v19534_v20  ;;  %v17141_v22 = vpop.f32.mrb[65].mxu1 }
 0xa61   : > { %23189 = vpow2.f32 %v19536_v52  ;;  %v17175_v63 = vadd.f32 %v19534_v20, %v17141_v22  ;;  %v21779_v41 = vpop.f32.mrb[66].mxu1 }
 0xa62   : > { %23191 = vtanh.f32 %v17177_v60  ;;  %v19541_v18 = vmul.f32 -1.442695, %v17177_v60  ;;  %v17178_v17 = vadd.f32 %v21779_v41, %v19534_v20  ;;  %v17144_v57 = vpop.f32.mrb[67].mxu1 }
 0xa63   : > { %23193 = vtanh.f32 %v17175_v63  ;;  %v19539_v58 = vmul.f32 -1.442695, %v17175_v63  ;;  %v17176_v12 = vadd.f32 %v19534_v20, %v17144_v57 }
 0xa64   : > { %v23176_v38 = vpop.eup %23175  ;;  %23195 = vpow2.f32 %v19541_v18  ;;  %v19542_v55 = vmul.f32 -1.442695, %v17178_v17 }
 0xa65   : > { %v23178_v43 = vpop.eup %23177  ;;  %v17189_v28 = vmul.f32 1.2, %v23176_v38  ;;  %23197 = vpow2.f32 %v19539_v58  ;;  %v19540_v34 = vmul.f32 -1.442695, %v17176_v12 }
 0xa66   : > { %v23180_v37 = vpop.eup %23179  ;;  %v17187_v14 = vmul.f32 1.2, %v23178_v43  ;;  %23199 = vtanh.f32 %v17178_v17 }
 0xa67   : > { %v23182_v25 = vpop.eup %23181  ;;  %v17221_v1 = vadd.f32 1.0, %v23180_v37  ;;  %17246 = vst.msk [vmem:[%s28486_s22 + $0x10] sm:$0xff] %vm17243_vm0, %v17189_v28  ;;  %23201 = vtanh.f32 %v17176_v12 }
 0xa68   : > { %v23184_v32 = vpop.eup %23183  ;;  %17244 = vst.msk [vmem:[%s28486_s22] sm:$0xff] %vm17243_vm0, %v17187_v14  ;;  %v17219_v35 = vadd.f32 1.0, %v23182_v25 }
 0xa69   : > { %v23186_v9 = vpop.eup %23185  ;;  %23203 = vrcp.f32 %v17221_v1  ;;  %v17190_v6 = vmul.f32 1.2, %v23184_v32 }
 0xa6a   : > { %v23188_v39 = vpop.eup %23187  ;;  %v17222_v27 = vadd.f32 1.0, %v23186_v9  ;;  %23205 = vpow2.f32 %v19542_v55 }
 0xa6b   : > { %v23190_v46 = vpop.eup %23189  ;;  %17247 = vst.msk [vmem:[%s28486_s22 + $0x18] sm:$0xff] %vm17243_vm0, %v17190_v6  ;;  %v17188_v4 = vmul.f32 1.2, %v23188_v39  ;;  %23207 = vpow2.f32 %v19540_v34 }
 0xa6c   : > { %v23192_v30 = vpop.eup %23191  ;;  %23209 = vrcp.f32 %v17222_v27  ;;  %v17220_v23 = vadd.f32 1.0, %v23190_v46 }
 0xa6d   : > { %v23194_v33 = vpop.eup %23193  ;;  %23211 = vrcp.f32 %v17219_v35  ;;  %17245 = vst.msk [vmem:[%s28486_s22 + $0x8] sm:$0xff] %vm17243_vm0, %v17188_v4  ;;  %v17193_v10 = vmul.f32 1.2, %v23192_v30 }
 0xa6e   : > { %v23196_v50 = vpop.eup %23195  ;;  %v17191_v48 = vmul.f32 1.2, %v23194_v33  ;;  %23213 = vrcp.f32 %v17220_v23 }
 0xa6f   : > { %v23198_v2 = vpop.eup %23197  ;;  %17250 = vst.msk [vmem:[%s28486_s22 + $0x30] sm:$0xff] %vm17243_vm0, %v17193_v10  ;;  %v17225_v54 = vadd.f32 1.0, %v23196_v50 }
 0xa70   : > { %v23200_v40 = vpop.eup %23199  ;;  %v17223_v16 = vadd.f32 1.0, %v23198_v2  ;;  %17248 = vst.msk [vmem:[%s28486_s22 + $0x20] sm:$0xff] %vm17243_vm0, %v17191_v48 }
 0xa71   : > { %v17194_v61 = vmul.f32 1.2, %v23200_v40  ;;  %v23202_v36 = vpop.eup %23201 }
 0xa72   : > { %23215 = vrcp.f32 %v17223_v16  ;;  %v17192_v19 = vmul.f32 1.2, %v23202_v36 }
 0xa73   : > { %v23204_v3 = vpop.eup %23203  ;;  %17251 = vst.msk [vmem:[%s28486_s22 + $0x38] sm:$0xff] %vm17243_vm0, %v17194_v61  ;;  %23217 = vrcp.f32 %v17225_v54 }
 0xa74   : > { %v23206_v11 = vpop.eup %23205  ;;  %17264 = vrot.lane.b32.xlu1 %v23204_v3, %s23298_s20  ;;  %17249 = vst.msk [vmem:[%s28486_s22 + $0x28] sm:$0xff] %vm17243_vm0, %v17192_v19 }
 0xa75   : > { %v23208_v44 = vpop.eup %23207  ;;  %v17226_v62 = vadd.f32 1.0, %v23206_v11 }
 0xa76   : > { %v23210_v49 = vpop.eup %23209  ;;  %v17224_v0 = vadd.f32 1.0, %v23208_v44 }
 0xa77   : > { %v23212_v26 = vpop.eup %23211  ;;  %17266 = vrot.lane.b32.xlu0 %v23210_v49, %s23298_s20 }
 0xa78   : > { %23219 = vrcp.f32 %v17224_v0  ;;  %17260 = vrot.lane.b32.xlu1 %v23212_v26, %s23298_s20  ;;  %v23214_v53 = vpop.eup %23213 }
 0xa79   : > { %23221 = vrcp.f32 %v17226_v62 }
 0xa7b   : > { %17262 = vrot.lane.b32.xlu0 %v23214_v53, %s23298_s20 }
 0xa7c   : > { %v23216_v7 = vpop.eup %23215 }
 0xa7d   : > { %17268 = vrot.lane.b32.xlu1 %v23216_v7, %s23298_s20  ;;  %v23218_v15 = vpop.eup %23217 }
 0xa81   : > { %17272 = vrot.lane.b32.xlu1 %v23218_v15, %s23298_s20 }
 0xa82   : > { %v23220_v59 = vpop.eup %23219 }
 0xa83   : > { %17270 = vrot.lane.b32.xlu0 %v23220_v59, %s23298_s20  ;;  %v23222_v20 = vpop.eup %23221 }
 0xa87   : > { %17274 = vrot.lane.b32.xlu0 %v23222_v20, %s23298_s20 }
 0xae6   : > { %v17265_v31 = vpop.permute.xlu1 %17264 }
 0xae7   : > { %17287 = vst.msk [vmem:[%s527_s29 + $0x10] sm:$0xff] %vm17284_vm1, %v17265_v31 }
 0xae9   : > { %v17267_v56 = vpop.permute.xlu0 %17266 }
 0xaea   : > { %17288 = vst.msk [vmem:[%s527_s29 + $0x18] sm:$0xff] %vm17284_vm1, %v17267_v56  ;;  %v17261_v51 = vpop.permute.xlu1 %17260 }
 0xaeb   : > { %17285 = vst.msk [vmem:[%s527_s29] sm:$0xff] %vm17284_vm1, %v17261_v51 }
 0xaed   : > { %v17263_v21 = vpop.permute.xlu0 %17262 }
 0xaee   : > { %17286 = vst.msk [vmem:[%s527_s29 + $0x8] sm:$0xff] %vm17284_vm1, %v17263_v21 }
 0xaef   : > { %v17269_v8 = vpop.permute.xlu1 %17268 }
 0xaf0   : > { %17289 = vst.msk [vmem:[%s527_s29 + $0x20] sm:$0xff] %vm17284_vm1, %v17269_v8 }
 0xaf3   : > { %v17273_v45 = vpop.permute.xlu1 %17272 }
 0xaf4   : > { %17291 = vst.msk [vmem:[%s527_s29 + $0x30] sm:$0xff] %vm17284_vm1, %v17273_v45 }
 0xaf5   : > { %v17271_v5 = vpop.permute.xlu0 %17270 }
 0xaf6   : > { %17290 = vst.msk [vmem:[%s527_s29 + $0x28] sm:$0xff] %vm17284_vm1, %v17271_v5 }
 0xaf9   : > { %v17275_v13 = vpop.permute.xlu0 %17274 }
 0xafa   : > { %17292 = vst.msk [vmem:[%s527_s29 + $0x38] sm:$0xff] %vm17284_vm1, %v17275_v13 }
 0xafb PF: > { %s26_s18 = sadd.s32 1, %s23294_s18  }
 0xafc   : > { %p23_p4 = scmp.ge.s32.totalorder %s26_s18, 4  }
 0xafe   :  { %25 = sbr.rel (!%p23_p4) target bundleno = 1 (0x1), region = 214 }

</bundles_post_ra>
